<compile_context>
chip_gen: v7x
topology: tpu7x:2x2x1
jax: 0.10.0
libtpu: 0.0.40
codegen_flags: <defaults>
</compile_context>

<pallas_src>
import functools

import jax
import jax.numpy as jnp
import numpy as np
from jax.experimental import pallas as pl
from jax.experimental.pallas import tpu as pltpu


# ----------------------------- Pallas kernel --------------------------------


def aspp_kernel(
    x_ref,      # (1, HW + 2P, Cin)  flat-padded spatial rows, compute dtype
    col_ref,    # (HW, 1) int32      output column index (x % W)
    w0_ref, b0_ref,           # (Cin, Cout), (1, Cout)
    w1_ref, b1_ref,           # (9, Cin, Cout), (1, Cout)   dilation d0
    w2_ref, b2_ref,           # (9, Cin, Cout), (1, Cout)   dilation d1
    w3_ref, b3_ref,           # (9, Cin, Cout), (1, Cout)   dilation d2
    wp4_ref,                  # (4*Cout, Cout)  projection weight for branches 0..3
    beff_ref,                 # (1, 1, Cout)    pool-branch contribution + bp (per batch)
    o_ref,                    # (1, HW, Cout)
    cat_ref,                  # VMEM scratch (HW, 4*Cout)
    *, height, width, dilations, pad,
):
    f32 = jnp.float32
    hw = height * width
    cout = w0_ref.shape[-1]
    col = col_ref[...]                                   # (HW, 1) int32

    # ---- Branch 0: 1x1 conv + ReLU (center slice of the padded input) ----
    x0 = x_ref[0, pad:pad + hw, :]                       # (HW, Cin)
    y0 = jnp.maximum(
        jnp.dot(x0, w0_ref[...], preferred_element_type=f32) + b0_ref[...], 0.0)
    cat_ref[:, 0:cout] = y0.astype(cat_ref.dtype)

    # ---- Branches 1..3: dilated 3x3 convs as 9 shifted-slice matmuls each ----
    w_refs = (w1_ref, w2_ref, w3_ref)
    b_refs = (b1_ref, b2_ref, b3_ref)
    for bi, d in enumerate(dilations):
        acc = None
        for ky in range(3):
            for kx in range(3):
                # output (y, x) reads input (y + (ky-1)*d, x + (kx-1)*d)
                s = (ky - 1) * d * width + (kx - 1) * d
                xs = x_ref[0, pad + s:pad + s + hw, :]   # (HW, Cin) shifted view
                if kx == 0:      # reads column x - d : invalid where x <  d
                    xs = jnp.where(col >= d, xs, 0.0)
                elif kx == 2:    # reads column x + d : invalid where x >= W - d
                    xs = jnp.where(col < width - d, xs, 0.0)
                c = jnp.dot(xs, w_refs[bi][ky * 3 + kx],
                            preferred_element_type=f32)
                acc = c if acc is None else acc + c
        yb = jnp.maximum(acc + b_refs[bi][...], 0.0)     # bias + ReLU
        cat_ref[:, (bi + 1) * cout:(bi + 2) * cout] = yb.astype(cat_ref.dtype)

    # ---- Concat(4 branches) + 1x1 projection as a single K=4*Cout matmul. ----
    # The image-pooling branch (branch 4) is folded into beff (precomputed).
    proj = jnp.dot(cat_ref[...], wp4_ref[...], preferred_element_type=f32)
    o_ref[0] = jnp.maximum(proj + beff_ref[0], 0.0).astype(o_ref.dtype)
    # dropout = 0.0 -> no-op


# ----------------------------- JAX glue --------------------------------------


@functools.partial(jax.jit, static_argnames=("dilations", "compute_dtype"))
def aspp_forward(x_nchw, params, dilations, compute_dtype=jnp.float32):
    n, cin, h, w = x_nchw.shape
    hw = h * w
    cout = params["w0"].shape[-1]
    dmax = max(dilations)
    pad = dmax * (w + 1)                      # max |flat shift| for any tap

    x_nhwc = jnp.transpose(x_nchw, (0, 2, 3, 1))                 # NCHW -> NHWC
    x_flat = x_nhwc.reshape(n, hw, cin)
    x_pad = jnp.pad(x_flat, ((0, 0), (pad, pad), (0, 0))).astype(compute_dtype)

    col_ids = (jnp.arange(hw, dtype=jnp.int32) % w).reshape(hw, 1)

    # Weights: 3x3 HWIO -> (9, Cin, Cout) tap-major; cast matmul operands.
    w0 = params["w0"].astype(compute_dtype)
    w3x3 = [params[f"w{i + 1}"].reshape(9, cin, cout).astype(compute_dtype)
            for i in range(3)]
    wp = params["wp"]                                            # (5*Cout, Cout)
    wp4 = wp[:4 * cout].astype(compute_dtype)
    wp_pool = wp[4 * cout:]

    # Global-average-pool branch folded into an effective projection bias
    # (bilinear upsample of a 1x1 map, align_corners=False, is a pure broadcast).
    pooled = jnp.mean(x_nhwc.astype(jnp.float32), axis=(1, 2))   # (N, Cin)
    y4 = jax.nn.relu(pooled @ params["w4"] + params["b4"])       # (N, Cout)
    bias_eff = (y4 @ wp_pool + params["bp"]).reshape(n, 1, cout).astype(jnp.float32)

    kern = functools.partial(aspp_kernel, height=h, width=w,
                             dilations=dilations, pad=pad)

    def full(shape):
        return pl.BlockSpec(shape, lambda b, _nd=len(shape): (0,) * _nd)

    out_flat = pl.pallas_call(
        kern,
        out_shape=jax.ShapeDtypeStruct((n, hw, cout), x_nchw.dtype),
        grid=(n,),
        in_specs=[
            pl.BlockSpec((1, hw + 2 * pad, cin), lambda b: (b, 0, 0)),  # x (padded)
            full((hw, 1)),                                              # col ids
            full((cin, cout)), full((1, cout)),                         # w0, b0
            full((9, cin, cout)), full((1, cout)),                      # w1, b1
            full((9, cin, cout)), full((1, cout)),                      # w2, b2
            full((9, cin, cout)), full((1, cout)),                      # w3, b3
            full((4 * cout, cout)),                                     # wp[:4C]
            pl.BlockSpec((1, 1, cout), lambda b: (b, 0, 0)),            # bias_eff
        ],
        out_specs=pl.BlockSpec((1, hw, cout), lambda b: (b, 0, 0)),
        scratch_shapes=[pltpu.VMEM((hw, 4 * cout), compute_dtype)],
        compiler_params=pltpu.CompilerParams(
            dimension_semantics=("parallel",),
            vmem_limit_bytes=48 * 1024 * 1024),
    )(
        x_pad, col_ids,
        w0, params["b0"],
        w3x3[0], params["b1"],
        w3x3[1], params["b2"],
        w3x3[2], params["b3"],
        wp4, bias_eff,
    )

    out_nhwc = out_flat.reshape(n, h, w, cout)
    # Layout change back to PyTorch's NCHW done in the wrapper (keeps kernel
    # output stores channel-lane-dense); emitting NCHW directly is a follow-up.
    return jnp.transpose(out_nhwc, (0, 3, 1, 2))


# ----------------------------- pure-JAX reference ----------------------------


def aspp_reference(x, params, dilations):
    """Pure-JAX reference matching the PyTorch ASPP forward (NCHW)."""
    def conv1x1(inp, w, b):  # w: (Cin, Cout)
        y = jnp.einsum("nchw,cd->ndhw", inp, w) + b.reshape(1, -1, 1, 1)
        return jax.nn.relu(y)

    def conv3x3(inp, w_hwio, b, d):
        y = jax.lax.conv_general_dilated(
            inp, w_hwio, window_strides=(1, 1),
            padding=((d, d), (d, d)), rhs_dilation=(d, d),
            dimension_numbers=("NCHW", "HWIO", "NCHW"))
        return jax.nn.relu(y + b.reshape(1, -1, 1, 1))

    branches = [conv1x1(x, params["w0"], params["b0"][0])]
    for i, d in enumerate(dilations):
        branches.append(conv3x3(x, params[f"w{i+1}"], params[f"b{i+1}"][0], d))
    pooled = jnp.mean(x, axis=(2, 3), keepdims=True)
    y4 = conv1x1(pooled, params["w4"], params["b4"][0])
    y4 = jnp.broadcast_to(y4, (x.shape[0], y4.shape[1], x.shape[2], x.shape[3]))
    branches.append(y4)
    cat = jnp.concatenate(branches, axis=1)
    return conv1x1(cat, params["wp"], params["bp"][0])


# ----------------------------- main ------------------------------------------


if __name__ == "__main__":
    N, Cin, H, W = 2, 8, 16, 16
    Cout = 16
    dilations = (1, 2, 3)

    key = jax.random.PRNGKey(0)
    keys = jax.random.split(key, 16)

    def xavier(k, shape, fan_in):
        return jax.random.normal(k, shape, jnp.float32) * (1.0 / np.sqrt(fan_in))

    params = {
        "w0": xavier(keys[0], (Cin, Cout), Cin),
        "b0": jnp.zeros((1, Cout), jnp.float32) + 0.01,
        "w1": xavier(keys[1], (3, 3, Cin, Cout), 9 * Cin),
        "b1": jnp.zeros((1, Cout), jnp.float32) + 0.02,
        "w2": xavier(keys[2], (3, 3, Cin, Cout), 9 * Cin),
        "b2": jnp.zeros((1, Cout), jnp.float32) + 0.03,
        "w3": xavier(keys[3], (3, 3, Cin, Cout), 9 * Cin),
        "b3": jnp.zeros((1, Cout), jnp.float32) + 0.04,
        "w4": xavier(keys[4], (Cin, Cout), Cin),
        "b4": jnp.zeros((1, Cout), jnp.float32) + 0.05,
        "wp": xavier(keys[5], (5 * Cout, Cout), 5 * Cout),
        "bp": jnp.zeros((1, Cout), jnp.float32) + 0.06,
    }

    x = jax.random.normal(keys[6], (N, Cin, H, W), jnp.float32)

    out = aspp_forward(x, params, dilations)
    out = jax.block_until_ready(out)

    ref = jax.block_until_ready(aspp_reference(x, params, dilations))
    np.testing.assert_allclose(np.asarray(out), np.asarray(ref),
                               rtol=2e-3, atol=2e-3)

    assert out.shape == (N, Cout, H, W)
    print("KERNEL_OK")
</pallas_src>

<mosaic_0001>
module attributes {stable_mosaic.version = 11 : i64} {
  func.func @aspp_kernel(%arg0: i32, %arg1: memref<1x358x8xf32, #tpu.memory_space<vmem>>, %arg2: memref<256x1xi32, #tpu.memory_space<vmem>>, %arg3: memref<8x16xf32, #tpu.memory_space<vmem>>, %arg4: memref<1x16xf32, #tpu.memory_space<vmem>>, %arg5: memref<9x8x16xf32, #tpu.memory_space<vmem>>, %arg6: memref<1x16xf32, #tpu.memory_space<vmem>>, %arg7: memref<9x8x16xf32, #tpu.memory_space<vmem>>, %arg8: memref<1x16xf32, #tpu.memory_space<vmem>>, %arg9: memref<9x8x16xf32, #tpu.memory_space<vmem>>, %arg10: memref<1x16xf32, #tpu.memory_space<vmem>>, %arg11: memref<64x16xf32, #tpu.memory_space<vmem>>, %arg12: memref<1x1x16xf32, #tpu.memory_space<vmem>>, %arg13: memref<1x256x16xf32, #tpu.memory_space<vmem>>, %arg14: memref<256x64xf32, #tpu.memory_space<vmem>>) attributes {dimension_semantics = [#tpu.dimension_semantics<parallel>], iteration_bounds = array<i64: 2>, scalar_prefetch = 0 : i64, scratch_operands = 1 : i64, tpu.core_type = #tpu.core_type<tc>, window_params = [{transform_indices = @transform_0, window_bounds = array<i64: 1, 358, 8>}, {pipeline_mode = #tpu.pipeline_mode<synchronous>, transform_indices = @transform_1, window_bounds = array<i64: 256, 1>}, {pipeline_mode = #tpu.pipeline_mode<synchronous>, transform_indices = @transform_2, window_bounds = array<i64: 8, 16>}, {pipeline_mode = #tpu.pipeline_mode<synchronous>, transform_indices = @transform_3, window_bounds = array<i64: 1, 16>}, {pipeline_mode = #tpu.pipeline_mode<synchronous>, transform_indices = @transform_4, window_bounds = array<i64: 9, 8, 16>}, {pipeline_mode = #tpu.pipeline_mode<synchronous>, transform_indices = @transform_5, window_bounds = array<i64: 1, 16>}, {pipeline_mode = #tpu.pipeline_mode<synchronous>, transform_indices = @transform_6, window_bounds = array<i64: 9, 8, 16>}, {pipeline_mode = #tpu.pipeline_mode<synchronous>, transform_indices = @transform_7, window_bounds = array<i64: 1, 16>}, {pipeline_mode = #tpu.pipeline_mode<synchronous>, transform_indices = @transform_8, window_bounds = array<i64: 9, 8, 16>}, {pipeline_mode = #tpu.pipeline_mode<synchronous>, transform_indices = @transform_9, window_bounds = array<i64: 1, 16>}, {pipeline_mode = #tpu.pipeline_mode<synchronous>, transform_indices = @transform_10, window_bounds = array<i64: 64, 16>}, {transform_indices = @transform_11, window_bounds = array<i64: 1, 1, 16>}, {transform_indices = @transform_12, window_bounds = array<i64: 1, 256, 16>}]} {
    %c0 = arith.constant 0 : index
    %c0_0 = arith.constant 0 : index
    %0 = vector.load %arg2[%c0, %c0_0] : memref<256x1xi32, #tpu.memory_space<vmem>>, vector<256x1xi32>
    %c0_1 = arith.constant 0 : index
    %c51 = arith.constant 51 : index
    %c0_2 = arith.constant 0 : index
    %1 = vector.load %arg1[%c0_1, %c51, %c0_2] : memref<1x358x8xf32, #tpu.memory_space<vmem>>, vector<1x256x8xf32>
    %2 = vector.shape_cast %1 : vector<1x256x8xf32> to vector<256x8xf32>
    %c0_3 = arith.constant 0 : index
    %c0_4 = arith.constant 0 : index
    %3 = vector.load %arg3[%c0_3, %c0_4] : memref<8x16xf32, #tpu.memory_space<vmem>>, vector<8x16xf32>
    %cst = arith.constant dense<0.000000e+00> : vector<256x16xf32>
    %4 = tpu.matmul %2, %3, %cst {dimension_numbers = #tpu.dot_dimension_numbers<[1], [0], [0], [1], [0, 0, 1, 1], [], []>} : vector<256x8xf32>, vector<8x16xf32>, vector<256x16xf32> -> vector<256x16xf32>
    %c0_5 = arith.constant 0 : index
    %c0_6 = arith.constant 0 : index
    %5 = vector.load %arg4[%c0_5, %c0_6] : memref<1x16xf32, #tpu.memory_space<vmem>>, vector<1x16xf32>
    %6 = vector.broadcast %5 : vector<1x16xf32> to vector<256x16xf32>
    %7 = arith.addf %4, %6 : vector<256x16xf32>
    %cst_7 = arith.constant 0.000000e+00 : f32
    %8 = vector.broadcast %cst_7 : f32 to vector<256x16xf32>
    %9 = arith.maximumf %7, %8 : vector<256x16xf32>
    %c0_8 = arith.constant 0 : index
    %c0_9 = arith.constant 0 : index
    %10 = vector.load %arg14[%c0_8, %c0_9] : memref<256x64xf32, #tpu.memory_space<vmem>>, vector<256x16xf32>
    tpu.vector_store %arg14[%c0_8, %c0_9], %9 {strides = array<i32>} : memref<256x64xf32, #tpu.memory_space<vmem>>, vector<256x16xf32>,
    %c0_10 = arith.constant 0 : index
    %c34 = arith.constant 34 : index
    %c0_11 = arith.constant 0 : index
    %11 = vector.load %arg1[%c0_10, %c34, %c0_11] : memref<1x358x8xf32, #tpu.memory_space<vmem>>, vector<1x256x8xf32>
    %12 = vector.shape_cast %11 : vector<1x256x8xf32> to vector<256x8xf32>
    %c1_i32 = arith.constant 1 : i32
    %13 = vector.broadcast %c1_i32 : i32 to vector<256x1xi32>
    %14 = arith.cmpi sge, %0, %13 : vector<256x1xi32>
    %cst_12 = arith.constant 0.000000e+00 : f32
    %15 = vector.shape_cast %14 : vector<256x1xi1> to vector<256x1xi1>
    %16 = vector.broadcast %15 : vector<256x1xi1> to vector<256x8xi1>
    %17 = vector.broadcast %cst_12 : f32 to vector<256x8xf32>
    %18 = arith.select %16, %12, %17 : vector<256x8xi1>, vector<256x8xf32>
    %c0_13 = arith.constant 0 : index
    %c0_14 = arith.constant 0 : index
    %c0_15 = arith.constant 0 : index
    %19 = vector.load %arg5[%c0_13, %c0_14, %c0_15] : memref<9x8x16xf32, #tpu.memory_space<vmem>>, vector<1x8x16xf32>
    %20 = vector.shape_cast %19 : vector<1x8x16xf32> to vector<8x16xf32>
    %cst_16 = arith.constant dense<0.000000e+00> : vector<256x16xf32>
    %21 = tpu.matmul %18, %20, %cst_16 {dimension_numbers = #tpu.dot_dimension_numbers<[1], [0], [0], [1], [0, 0, 1, 1], [], []>} : vector<256x8xf32>, vector<8x16xf32>, vector<256x16xf32> -> vector<256x16xf32>
    %c0_17 = arith.constant 0 : index
    %c35 = arith.constant 35 : index
    %c0_18 = arith.constant 0 : index
    %22 = vector.load %arg1[%c0_17, %c35, %c0_18] : memref<1x358x8xf32, #tpu.memory_space<vmem>>, vector<1x256x8xf32>
    %23 = vector.shape_cast %22 : vector<1x256x8xf32> to vector<256x8xf32>
    %c1 = arith.constant 1 : index
    %c0_19 = arith.constant 0 : index
    %c0_20 = arith.constant 0 : index
    %24 = vector.load %arg5[%c1, %c0_19, %c0_20] : memref<9x8x16xf32, #tpu.memory_space<vmem>>, vector<1x8x16xf32>
    %25 = vector.shape_cast %24 : vector<1x8x16xf32> to vector<8x16xf32>
    %cst_21 = arith.constant dense<0.000000e+00> : vector<256x16xf32>
    %26 = tpu.matmul %23, %25, %cst_21 {dimension_numbers = #tpu.dot_dimension_numbers<[1], [0], [0], [1], [0, 0, 1, 1], [], []>} : vector<256x8xf32>, vector<8x16xf32>, vector<256x16xf32> -> vector<256x16xf32>
    %27 = arith.addf %21, %26 : vector<256x16xf32>
    %c0_22 = arith.constant 0 : index
    %c36 = arith.constant 36 : index
    %c0_23 = arith.constant 0 : index
    %28 = vector.load %arg1[%c0_22, %c36, %c0_23] : memref<1x358x8xf32, #tpu.memory_space<vmem>>, vector<1x256x8xf32>
    %29 = vector.shape_cast %28 : vector<1x256x8xf32> to vector<256x8xf32>
    %c15_i32 = arith.constant 15 : i32
    %30 = vector.broadcast %c15_i32 : i32 to vector<256x1xi32>
    %31 = arith.cmpi slt, %0, %30 : vector<256x1xi32>
    %cst_24 = arith.constant 0.000000e+00 : f32
    %32 = vector.shape_cast %31 : vector<256x1xi1> to vector<256x1xi1>
    %33 = vector.broadcast %32 : vector<256x1xi1> to vector<256x8xi1>
    %34 = vector.broadcast %cst_24 : f32 to vector<256x8xf32>
    %35 = arith.select %33, %29, %34 : vector<256x8xi1>, vector<256x8xf32>
    %c2 = arith.constant 2 : index
    %c0_25 = arith.constant 0 : index
    %c0_26 = arith.constant 0 : index
    %36 = vector.load %arg5[%c2, %c0_25, %c0_26] : memref<9x8x16xf32, #tpu.memory_space<vmem>>, vector<1x8x16xf32>
    %37 = vector.shape_cast %36 : vector<1x8x16xf32> to vector<8x16xf32>
    %cst_27 = arith.constant dense<0.000000e+00> : vector<256x16xf32>
    %38 = tpu.matmul %35, %37, %cst_27 {dimension_numbers = #tpu.dot_dimension_numbers<[1], [0], [0], [1], [0, 0, 1, 1], [], []>} : vector<256x8xf32>, vector<8x16xf32>, vector<256x16xf32> -> vector<256x16xf32>
    %39 = arith.addf %27, %38 : vector<256x16xf32>
    %c0_28 = arith.constant 0 : index
    %c50 = arith.constant 50 : index
    %c0_29 = arith.constant 0 : index
    %40 = vector.load %arg1[%c0_28, %c50, %c0_29] : memref<1x358x8xf32, #tpu.memory_space<vmem>>, vector<1x256x8xf32>
    %41 = vector.shape_cast %40 : vector<1x256x8xf32> to vector<256x8xf32>
    %c1_i32_30 = arith.constant 1 : i32
    %42 = vector.broadcast %c1_i32_30 : i32 to vector<256x1xi32>
    %43 = arith.cmpi sge, %0, %42 : vector<256x1xi32>
    %cst_31 = arith.constant 0.000000e+00 : f32
    %44 = vector.shape_cast %43 : vector<256x1xi1> to vector<256x1xi1>
    %45 = vector.broadcast %44 : vector<256x1xi1> to vector<256x8xi1>
    %46 = vector.broadcast %cst_31 : f32 to vector<256x8xf32>
    %47 = arith.select %45, %41, %46 : vector<256x8xi1>, vector<256x8xf32>
    %c3 = arith.constant 3 : index
    %c0_32 = arith.constant 0 : index
    %c0_33 = arith.constant 0 : index
    %48 = vector.load %arg5[%c3, %c0_32, %c0_33] : memref<9x8x16xf32, #tpu.memory_space<vmem>>, vector<1x8x16xf32>
    %49 = vector.shape_cast %48 : vector<1x8x16xf32> to vector<8x16xf32>
    %cst_34 = arith.constant dense<0.000000e+00> : vector<256x16xf32>
    %50 = tpu.matmul %47, %49, %cst_34 {dimension_numbers = #tpu.dot_dimension_numbers<[1], [0], [0], [1], [0, 0, 1, 1], [], []>} : vector<256x8xf32>, vector<8x16xf32>, vector<256x16xf32> -> vector<256x16xf32>
    %51 = arith.addf %39, %50 : vector<256x16xf32>
    %c0_35 = arith.constant 0 : index
    %c51_36 = arith.constant 51 : index
    %c0_37 = arith.constant 0 : index
    %52 = vector.load %arg1[%c0_35, %c51_36, %c0_37] : memref<1x358x8xf32, #tpu.memory_space<vmem>>, vector<1x256x8xf32>
    %53 = vector.shape_cast %52 : vector<1x256x8xf32> to vector<256x8xf32>
    %c4 = arith.constant 4 : index
    %c0_38 = arith.constant 0 : index
    %c0_39 = arith.constant 0 : index
    %54 = vector.load %arg5[%c4, %c0_38, %c0_39] : memref<9x8x16xf32, #tpu.memory_space<vmem>>, vector<1x8x16xf32>
    %55 = vector.shape_cast %54 : vector<1x8x16xf32> to vector<8x16xf32>
    %cst_40 = arith.constant dense<0.000000e+00> : vector<256x16xf32>
    %56 = tpu.matmul %53, %55, %cst_40 {dimension_numbers = #tpu.dot_dimension_numbers<[1], [0], [0], [1], [0, 0, 1, 1], [], []>} : vector<256x8xf32>, vector<8x16xf32>, vector<256x16xf32> -> vector<256x16xf32>
    %57 = arith.addf %51, %56 : vector<256x16xf32>
    %c0_41 = arith.constant 0 : index
    %c52 = arith.constant 52 : index
    %c0_42 = arith.constant 0 : index
    %58 = vector.load %arg1[%c0_41, %c52, %c0_42] : memref<1x358x8xf32, #tpu.memory_space<vmem>>, vector<1x256x8xf32>
    %59 = vector.shape_cast %58 : vector<1x256x8xf32> to vector<256x8xf32>
    %c15_i32_43 = arith.constant 15 : i32
    %60 = vector.broadcast %c15_i32_43 : i32 to vector<256x1xi32>
    %61 = arith.cmpi slt, %0, %60 : vector<256x1xi32>
    %cst_44 = arith.constant 0.000000e+00 : f32
    %62 = vector.shape_cast %61 : vector<256x1xi1> to vector<256x1xi1>
    %63 = vector.broadcast %62 : vector<256x1xi1> to vector<256x8xi1>
    %64 = vector.broadcast %cst_44 : f32 to vector<256x8xf32>
    %65 = arith.select %63, %59, %64 : vector<256x8xi1>, vector<256x8xf32>
    %c5 = arith.constant 5 : index
    %c0_45 = arith.constant 0 : index
    %c0_46 = arith.constant 0 : index
    %66 = vector.load %arg5[%c5, %c0_45, %c0_46] : memref<9x8x16xf32, #tpu.memory_space<vmem>>, vector<1x8x16xf32>
    %67 = vector.shape_cast %66 : vector<1x8x16xf32> to vector<8x16xf32>
    %cst_47 = arith.constant dense<0.000000e+00> : vector<256x16xf32>
    %68 = tpu.matmul %65, %67, %cst_47 {dimension_numbers = #tpu.dot_dimension_numbers<[1], [0], [0], [1], [0, 0, 1, 1], [], []>} : vector<256x8xf32>, vector<8x16xf32>, vector<256x16xf32> -> vector<256x16xf32>
    %69 = arith.addf %57, %68 : vector<256x16xf32>
    %c0_48 = arith.constant 0 : index
    %c66 = arith.constant 66 : index
    %c0_49 = arith.constant 0 : index
    %70 = vector.load %arg1[%c0_48, %c66, %c0_49] : memref<1x358x8xf32, #tpu.memory_space<vmem>>, vector<1x256x8xf32>
    %71 = vector.shape_cast %70 : vector<1x256x8xf32> to vector<256x8xf32>
    %c1_i32_50 = arith.constant 1 : i32
    %72 = vector.broadcast %c1_i32_50 : i32 to vector<256x1xi32>
    %73 = arith.cmpi sge, %0, %72 : vector<256x1xi32>
    %cst_51 = arith.constant 0.000000e+00 : f32
    %74 = vector.shape_cast %73 : vector<256x1xi1> to vector<256x1xi1>
    %75 = vector.broadcast %74 : vector<256x1xi1> to vector<256x8xi1>
    %76 = vector.broadcast %cst_51 : f32 to vector<256x8xf32>
    %77 = arith.select %75, %71, %76 : vector<256x8xi1>, vector<256x8xf32>
    %c6 = arith.constant 6 : index
    %c0_52 = arith.constant 0 : index
    %c0_53 = arith.constant 0 : index
    %78 = vector.load %arg5[%c6, %c0_52, %c0_53] : memref<9x8x16xf32, #tpu.memory_space<vmem>>, vector<1x8x16xf32>
    %79 = vector.shape_cast %78 : vector<1x8x16xf32> to vector<8x16xf32>
    %cst_54 = arith.constant dense<0.000000e+00> : vector<256x16xf32>
    %80 = tpu.matmul %77, %79, %cst_54 {dimension_numbers = #tpu.dot_dimension_numbers<[1], [0], [0], [1], [0, 0, 1, 1], [], []>} : vector<256x8xf32>, vector<8x16xf32>, vector<256x16xf32> -> vector<256x16xf32>
    %81 = arith.addf %69, %80 : vector<256x16xf32>
    %c0_55 = arith.constant 0 : index
    %c67 = arith.constant 67 : index
    %c0_56 = arith.constant 0 : index
    %82 = vector.load %arg1[%c0_55, %c67, %c0_56] : memref<1x358x8xf32, #tpu.memory_space<vmem>>, vector<1x256x8xf32>
    %83 = vector.shape_cast %82 : vector<1x256x8xf32> to vector<256x8xf32>
    %c7 = arith.constant 7 : index
    %c0_57 = arith.constant 0 : index
    %c0_58 = arith.constant 0 : index
    %84 = vector.load %arg5[%c7, %c0_57, %c0_58] : memref<9x8x16xf32, #tpu.memory_space<vmem>>, vector<1x8x16xf32>
    %85 = vector.shape_cast %84 : vector<1x8x16xf32> to vector<8x16xf32>
    %cst_59 = arith.constant dense<0.000000e+00> : vector<256x16xf32>
    %86 = tpu.matmul %83, %85, %cst_59 {dimension_numbers = #tpu.dot_dimension_numbers<[1], [0], [0], [1], [0, 0, 1, 1], [], []>} : vector<256x8xf32>, vector<8x16xf32>, vector<256x16xf32> -> vector<256x16xf32>
    %87 = arith.addf %81, %86 : vector<256x16xf32>
    %c0_60 = arith.constant 0 : index
    %c68 = arith.constant 68 : index
    %c0_61 = arith.constant 0 : index
    %88 = vector.load %arg1[%c0_60, %c68, %c0_61] : memref<1x358x8xf32, #tpu.memory_space<vmem>>, vector<1x256x8xf32>
    %89 = vector.shape_cast %88 : vector<1x256x8xf32> to vector<256x8xf32>
    %c15_i32_62 = arith.constant 15 : i32
    %90 = vector.broadcast %c15_i32_62 : i32 to vector<256x1xi32>
    %91 = arith.cmpi slt, %0, %90 : vector<256x1xi32>
    %cst_63 = arith.constant 0.000000e+00 : f32
    %92 = vector.shape_cast %91 : vector<256x1xi1> to vector<256x1xi1>
    %93 = vector.broadcast %92 : vector<256x1xi1> to vector<256x8xi1>
    %94 = vector.broadcast %cst_63 : f32 to vector<256x8xf32>
    %95 = arith.select %93, %89, %94 : vector<256x8xi1>, vector<256x8xf32>
    %c8 = arith.constant 8 : index
    %c0_64 = arith.constant 0 : index
    %c0_65 = arith.constant 0 : index
    %96 = vector.load %arg5[%c8, %c0_64, %c0_65] : memref<9x8x16xf32, #tpu.memory_space<vmem>>, vector<1x8x16xf32>
    %97 = vector.shape_cast %96 : vector<1x8x16xf32> to vector<8x16xf32>
    %cst_66 = arith.constant dense<0.000000e+00> : vector<256x16xf32>
    %98 = tpu.matmul %95, %97, %cst_66 {dimension_numbers = #tpu.dot_dimension_numbers<[1], [0], [0], [1], [0, 0, 1, 1], [], []>} : vector<256x8xf32>, vector<8x16xf32>, vector<256x16xf32> -> vector<256x16xf32>
    %99 = arith.addf %87, %98 : vector<256x16xf32>
    %c0_67 = arith.constant 0 : index
    %c0_68 = arith.constant 0 : index
    %100 = vector.load %arg6[%c0_67, %c0_68] : memref<1x16xf32, #tpu.memory_space<vmem>>, vector<1x16xf32>
    %101 = vector.broadcast %100 : vector<1x16xf32> to vector<256x16xf32>
    %102 = arith.addf %99, %101 : vector<256x16xf32>
    %cst_69 = arith.constant 0.000000e+00 : f32
    %103 = vector.broadcast %cst_69 : f32 to vector<256x16xf32>
    %104 = arith.maximumf %102, %103 : vector<256x16xf32>
    %c0_70 = arith.constant 0 : index
    %c16 = arith.constant 16 : index
    %105 = vector.load %arg14[%c0_70, %c16] : memref<256x64xf32, #tpu.memory_space<vmem>>, vector<256x16xf32>
    tpu.vector_store %arg14[%c0_70, %c16], %104 {strides = array<i32>} : memref<256x64xf32, #tpu.memory_space<vmem>>, vector<256x16xf32>,
    %c0_71 = arith.constant 0 : index
    %c17 = arith.constant 17 : index
    %c0_72 = arith.constant 0 : index
    %106 = vector.load %arg1[%c0_71, %c17, %c0_72] : memref<1x358x8xf32, #tpu.memory_space<vmem>>, vector<1x256x8xf32>
    %107 = vector.shape_cast %106 : vector<1x256x8xf32> to vector<256x8xf32>
    %c2_i32 = arith.constant 2 : i32
    %108 = vector.broadcast %c2_i32 : i32 to vector<256x1xi32>
    %109 = arith.cmpi sge, %0, %108 : vector<256x1xi32>
    %cst_73 = arith.constant 0.000000e+00 : f32
    %110 = vector.shape_cast %109 : vector<256x1xi1> to vector<256x1xi1>
    %111 = vector.broadcast %110 : vector<256x1xi1> to vector<256x8xi1>
    %112 = vector.broadcast %cst_73 : f32 to vector<256x8xf32>
    %113 = arith.select %111, %107, %112 : vector<256x8xi1>, vector<256x8xf32>
    %c0_74 = arith.constant 0 : index
    %c0_75 = arith.constant 0 : index
    %c0_76 = arith.constant 0 : index
    %114 = vector.load %arg7[%c0_74, %c0_75, %c0_76] : memref<9x8x16xf32, #tpu.memory_space<vmem>>, vector<1x8x16xf32>
    %115 = vector.shape_cast %114 : vector<1x8x16xf32> to vector<8x16xf32>
    %cst_77 = arith.constant dense<0.000000e+00> : vector<256x16xf32>
    %116 = tpu.matmul %113, %115, %cst_77 {dimension_numbers = #tpu.dot_dimension_numbers<[1], [0], [0], [1], [0, 0, 1, 1], [], []>} : vector<256x8xf32>, vector<8x16xf32>, vector<256x16xf32> -> vector<256x16xf32>
    %c0_78 = arith.constant 0 : index
    %c19 = arith.constant 19 : index
    %c0_79 = arith.constant 0 : index
    %117 = vector.load %arg1[%c0_78, %c19, %c0_79] : memref<1x358x8xf32, #tpu.memory_space<vmem>>, vector<1x256x8xf32>
    %118 = vector.shape_cast %117 : vector<1x256x8xf32> to vector<256x8xf32>
    %c1_80 = arith.constant 1 : index
    %c0_81 = arith.constant 0 : index
    %c0_82 = arith.constant 0 : index
    %119 = vector.load %arg7[%c1_80, %c0_81, %c0_82] : memref<9x8x16xf32, #tpu.memory_space<vmem>>, vector<1x8x16xf32>
    %120 = vector.shape_cast %119 : vector<1x8x16xf32> to vector<8x16xf32>
    %cst_83 = arith.constant dense<0.000000e+00> : vector<256x16xf32>
    %121 = tpu.matmul %118, %120, %cst_83 {dimension_numbers = #tpu.dot_dimension_numbers<[1], [0], [0], [1], [0, 0, 1, 1], [], []>} : vector<256x8xf32>, vector<8x16xf32>, vector<256x16xf32> -> vector<256x16xf32>
    %122 = arith.addf %116, %121 : vector<256x16xf32>
    %c0_84 = arith.constant 0 : index
    %c21 = arith.constant 21 : index
    %c0_85 = arith.constant 0 : index
    %123 = vector.load %arg1[%c0_84, %c21, %c0_85] : memref<1x358x8xf32, #tpu.memory_space<vmem>>, vector<1x256x8xf32>
    %124 = vector.shape_cast %123 : vector<1x256x8xf32> to vector<256x8xf32>
    %c14_i32 = arith.constant 14 : i32
    %125 = vector.broadcast %c14_i32 : i32 to vector<256x1xi32>
    %126 = arith.cmpi slt, %0, %125 : vector<256x1xi32>
    %cst_86 = arith.constant 0.000000e+00 : f32
    %127 = vector.shape_cast %126 : vector<256x1xi1> to vector<256x1xi1>
    %128 = vector.broadcast %127 : vector<256x1xi1> to vector<256x8xi1>
    %129 = vector.broadcast %cst_86 : f32 to vector<256x8xf32>
    %130 = arith.select %128, %124, %129 : vector<256x8xi1>, vector<256x8xf32>
    %c2_87 = arith.constant 2 : index
    %c0_88 = arith.constant 0 : index
    %c0_89 = arith.constant 0 : index
    %131 = vector.load %arg7[%c2_87, %c0_88, %c0_89] : memref<9x8x16xf32, #tpu.memory_space<vmem>>, vector<1x8x16xf32>
    %132 = vector.shape_cast %131 : vector<1x8x16xf32> to vector<8x16xf32>
    %cst_90 = arith.constant dense<0.000000e+00> : vector<256x16xf32>
    %133 = tpu.matmul %130, %132, %cst_90 {dimension_numbers = #tpu.dot_dimension_numbers<[1], [0], [0], [1], [0, 0, 1, 1], [], []>} : vector<256x8xf32>, vector<8x16xf32>, vector<256x16xf32> -> vector<256x16xf32>
    %134 = arith.addf %122, %133 : vector<256x16xf32>
    %c0_91 = arith.constant 0 : index
    %c49 = arith.constant 49 : index
    %c0_92 = arith.constant 0 : index
    %135 = vector.load %arg1[%c0_91, %c49, %c0_92] : memref<1x358x8xf32, #tpu.memory_space<vmem>>, vector<1x256x8xf32>
    %136 = vector.shape_cast %135 : vector<1x256x8xf32> to vector<256x8xf32>
    %c2_i32_93 = arith.constant 2 : i32
    %137 = vector.broadcast %c2_i32_93 : i32 to vector<256x1xi32>
    %138 = arith.cmpi sge, %0, %137 : vector<256x1xi32>
    %cst_94 = arith.constant 0.000000e+00 : f32
    %139 = vector.shape_cast %138 : vector<256x1xi1> to vector<256x1xi1>
    %140 = vector.broadcast %139 : vector<256x1xi1> to vector<256x8xi1>
    %141 = vector.broadcast %cst_94 : f32 to vector<256x8xf32>
    %142 = arith.select %140, %136, %141 : vector<256x8xi1>, vector<256x8xf32>
    %c3_95 = arith.constant 3 : index
    %c0_96 = arith.constant 0 : index
    %c0_97 = arith.constant 0 : index
    %143 = vector.load %arg7[%c3_95, %c0_96, %c0_97] : memref<9x8x16xf32, #tpu.memory_space<vmem>>, vector<1x8x16xf32>
    %144 = vector.shape_cast %143 : vector<1x8x16xf32> to vector<8x16xf32>
    %cst_98 = arith.constant dense<0.000000e+00> : vector<256x16xf32>
    %145 = tpu.matmul %142, %144, %cst_98 {dimension_numbers = #tpu.dot_dimension_numbers<[1], [0], [0], [1], [0, 0, 1, 1], [], []>} : vector<256x8xf32>, vector<8x16xf32>, vector<256x16xf32> -> vector<256x16xf32>
    %146 = arith.addf %134, %145 : vector<256x16xf32>
    %c0_99 = arith.constant 0 : index
    %c51_100 = arith.constant 51 : index
    %c0_101 = arith.constant 0 : index
    %147 = vector.load %arg1[%c0_99, %c51_100, %c0_101] : memref<1x358x8xf32, #tpu.memory_space<vmem>>, vector<1x256x8xf32>
    %148 = vector.shape_cast %147 : vector<1x256x8xf32> to vector<256x8xf32>
    %c4_102 = arith.constant 4 : index
    %c0_103 = arith.constant 0 : index
    %c0_104 = arith.constant 0 : index
    %149 = vector.load %arg7[%c4_102, %c0_103, %c0_104] : memref<9x8x16xf32, #tpu.memory_space<vmem>>, vector<1x8x16xf32>
    %150 = vector.shape_cast %149 : vector<1x8x16xf32> to vector<8x16xf32>
    %cst_105 = arith.constant dense<0.000000e+00> : vector<256x16xf32>
    %151 = tpu.matmul %148, %150, %cst_105 {dimension_numbers = #tpu.dot_dimension_numbers<[1], [0], [0], [1], [0, 0, 1, 1], [], []>} : vector<256x8xf32>, vector<8x16xf32>, vector<256x16xf32> -> vector<256x16xf32>
    %152 = arith.addf %146, %151 : vector<256x16xf32>
    %c0_106 = arith.constant 0 : index
    %c53 = arith.constant 53 : index
    %c0_107 = arith.constant 0 : index
    %153 = vector.load %arg1[%c0_106, %c53, %c0_107] : memref<1x358x8xf32, #tpu.memory_space<vmem>>, vector<1x256x8xf32>
    %154 = vector.shape_cast %153 : vector<1x256x8xf32> to vector<256x8xf32>
    %c14_i32_108 = arith.constant 14 : i32
    %155 = vector.broadcast %c14_i32_108 : i32 to vector<256x1xi32>
    %156 = arith.cmpi slt, %0, %155 : vector<256x1xi32>
    %cst_109 = arith.constant 0.000000e+00 : f32
    %157 = vector.shape_cast %156 : vector<256x1xi1> to vector<256x1xi1>
    %158 = vector.broadcast %157 : vector<256x1xi1> to vector<256x8xi1>
    %159 = vector.broadcast %cst_109 : f32 to vector<256x8xf32>
    %160 = arith.select %158, %154, %159 : vector<256x8xi1>, vector<256x8xf32>
    %c5_110 = arith.constant 5 : index
    %c0_111 = arith.constant 0 : index
    %c0_112 = arith.constant 0 : index
    %161 = vector.load %arg7[%c5_110, %c0_111, %c0_112] : memref<9x8x16xf32, #tpu.memory_space<vmem>>, vector<1x8x16xf32>
    %162 = vector.shape_cast %161 : vector<1x8x16xf32> to vector<8x16xf32>
    %cst_113 = arith.constant dense<0.000000e+00> : vector<256x16xf32>
    %163 = tpu.matmul %160, %162, %cst_113 {dimension_numbers = #tpu.dot_dimension_numbers<[1], [0], [0], [1], [0, 0, 1, 1], [], []>} : vector<256x8xf32>, vector<8x16xf32>, vector<256x16xf32> -> vector<256x16xf32>
    %164 = arith.addf %152, %163 : vector<256x16xf32>
    %c0_114 = arith.constant 0 : index
    %c81 = arith.constant 81 : index
    %c0_115 = arith.constant 0 : index
    %165 = vector.load %arg1[%c0_114, %c81, %c0_115] : memref<1x358x8xf32, #tpu.memory_space<vmem>>, vector<1x256x8xf32>
    %166 = vector.shape_cast %165 : vector<1x256x8xf32> to vector<256x8xf32>
    %c2_i32_116 = arith.constant 2 : i32
    %167 = vector.broadcast %c2_i32_116 : i32 to vector<256x1xi32>
    %168 = arith.cmpi sge, %0, %167 : vector<256x1xi32>
    %cst_117 = arith.constant 0.000000e+00 : f32
    %169 = vector.shape_cast %168 : vector<256x1xi1> to vector<256x1xi1>
    %170 = vector.broadcast %169 : vector<256x1xi1> to vector<256x8xi1>
    %171 = vector.broadcast %cst_117 : f32 to vector<256x8xf32>
    %172 = arith.select %170, %166, %171 : vector<256x8xi1>, vector<256x8xf32>
    %c6_118 = arith.constant 6 : index
    %c0_119 = arith.constant 0 : index
    %c0_120 = arith.constant 0 : index
    %173 = vector.load %arg7[%c6_118, %c0_119, %c0_120] : memref<9x8x16xf32, #tpu.memory_space<vmem>>, vector<1x8x16xf32>
    %174 = vector.shape_cast %173 : vector<1x8x16xf32> to vector<8x16xf32>
    %cst_121 = arith.constant dense<0.000000e+00> : vector<256x16xf32>
    %175 = tpu.matmul %172, %174, %cst_121 {dimension_numbers = #tpu.dot_dimension_numbers<[1], [0], [0], [1], [0, 0, 1, 1], [], []>} : vector<256x8xf32>, vector<8x16xf32>, vector<256x16xf32> -> vector<256x16xf32>
    %176 = arith.addf %164, %175 : vector<256x16xf32>
    %c0_122 = arith.constant 0 : index
    %c83 = arith.constant 83 : index
    %c0_123 = arith.constant 0 : index
    %177 = vector.load %arg1[%c0_122, %c83, %c0_123] : memref<1x358x8xf32, #tpu.memory_space<vmem>>, vector<1x256x8xf32>
    %178 = vector.shape_cast %177 : vector<1x256x8xf32> to vector<256x8xf32>
    %c7_124 = arith.constant 7 : index
    %c0_125 = arith.constant 0 : index
    %c0_126 = arith.constant 0 : index
    %179 = vector.load %arg7[%c7_124, %c0_125, %c0_126] : memref<9x8x16xf32, #tpu.memory_space<vmem>>, vector<1x8x16xf32>
    %180 = vector.shape_cast %179 : vector<1x8x16xf32> to vector<8x16xf32>
    %cst_127 = arith.constant dense<0.000000e+00> : vector<256x16xf32>
    %181 = tpu.matmul %178, %180, %cst_127 {dimension_numbers = #tpu.dot_dimension_numbers<[1], [0], [0], [1], [0, 0, 1, 1], [], []>} : vector<256x8xf32>, vector<8x16xf32>, vector<256x16xf32> -> vector<256x16xf32>
    %182 = arith.addf %176, %181 : vector<256x16xf32>
    %c0_128 = arith.constant 0 : index
    %c85 = arith.constant 85 : index
    %c0_129 = arith.constant 0 : index
    %183 = vector.load %arg1[%c0_128, %c85, %c0_129] : memref<1x358x8xf32, #tpu.memory_space<vmem>>, vector<1x256x8xf32>
    %184 = vector.shape_cast %183 : vector<1x256x8xf32> to vector<256x8xf32>
    %c14_i32_130 = arith.constant 14 : i32
    %185 = vector.broadcast %c14_i32_130 : i32 to vector<256x1xi32>
    %186 = arith.cmpi slt, %0, %185 : vector<256x1xi32>
    %cst_131 = arith.constant 0.000000e+00 : f32
    %187 = vector.shape_cast %186 : vector<256x1xi1> to vector<256x1xi1>
    %188 = vector.broadcast %187 : vector<256x1xi1> to vector<256x8xi1>
    %189 = vector.broadcast %cst_131 : f32 to vector<256x8xf32>
    %190 = arith.select %188, %184, %189 : vector<256x8xi1>, vector<256x8xf32>
    %c8_132 = arith.constant 8 : index
    %c0_133 = arith.constant 0 : index
    %c0_134 = arith.constant 0 : index
    %191 = vector.load %arg7[%c8_132, %c0_133, %c0_134] : memref<9x8x16xf32, #tpu.memory_space<vmem>>, vector<1x8x16xf32>
    %192 = vector.shape_cast %191 : vector<1x8x16xf32> to vector<8x16xf32>
    %cst_135 = arith.constant dense<0.000000e+00> : vector<256x16xf32>
    %193 = tpu.matmul %190, %192, %cst_135 {dimension_numbers = #tpu.dot_dimension_numbers<[1], [0], [0], [1], [0, 0, 1, 1], [], []>} : vector<256x8xf32>, vector<8x16xf32>, vector<256x16xf32> -> vector<256x16xf32>
    %194 = arith.addf %182, %193 : vector<256x16xf32>
    %c0_136 = arith.constant 0 : index
    %c0_137 = arith.constant 0 : index
    %195 = vector.load %arg8[%c0_136, %c0_137] : memref<1x16xf32, #tpu.memory_space<vmem>>, vector<1x16xf32>
    %196 = vector.broadcast %195 : vector<1x16xf32> to vector<256x16xf32>
    %197 = arith.addf %194, %196 : vector<256x16xf32>
    %cst_138 = arith.constant 0.000000e+00 : f32
    %198 = vector.broadcast %cst_138 : f32 to vector<256x16xf32>
    %199 = arith.maximumf %197, %198 : vector<256x16xf32>
    %c0_139 = arith.constant 0 : index
    %c32 = arith.constant 32 : index
    %200 = vector.load %arg14[%c0_139, %c32] : memref<256x64xf32, #tpu.memory_space<vmem>>, vector<256x16xf32>
    tpu.vector_store %arg14[%c0_139, %c32], %199 {strides = array<i32>} : memref<256x64xf32, #tpu.memory_space<vmem>>, vector<256x16xf32>,
    %c0_140 = arith.constant 0 : index
    %c0_141 = arith.constant 0 : index
    %c0_142 = arith.constant 0 : index
    %201 = vector.load %arg1[%c0_140, %c0_141, %c0_142] : memref<1x358x8xf32, #tpu.memory_space<vmem>>, vector<1x256x8xf32>
    %202 = vector.shape_cast %201 : vector<1x256x8xf32> to vector<256x8xf32>
    %c3_i32 = arith.constant 3 : i32
    %203 = vector.broadcast %c3_i32 : i32 to vector<256x1xi32>
    %204 = arith.cmpi sge, %0, %203 : vector<256x1xi32>
    %cst_143 = arith.constant 0.000000e+00 : f32
    %205 = vector.shape_cast %204 : vector<256x1xi1> to vector<256x1xi1>
    %206 = vector.broadcast %205 : vector<256x1xi1> to vector<256x8xi1>
    %207 = vector.broadcast %cst_143 : f32 to vector<256x8xf32>
    %208 = arith.select %206, %202, %207 : vector<256x8xi1>, vector<256x8xf32>
    %c0_144 = arith.constant 0 : index
    %c0_145 = arith.constant 0 : index
    %c0_146 = arith.constant 0 : index
    %209 = vector.load %arg9[%c0_144, %c0_145, %c0_146] : memref<9x8x16xf32, #tpu.memory_space<vmem>>, vector<1x8x16xf32>
    %210 = vector.shape_cast %209 : vector<1x8x16xf32> to vector<8x16xf32>
    %cst_147 = arith.constant dense<0.000000e+00> : vector<256x16xf32>
    %211 = tpu.matmul %208, %210, %cst_147 {dimension_numbers = #tpu.dot_dimension_numbers<[1], [0], [0], [1], [0, 0, 1, 1], [], []>} : vector<256x8xf32>, vector<8x16xf32>, vector<256x16xf32> -> vector<256x16xf32>
    %c0_148 = arith.constant 0 : index
    %c3_149 = arith.constant 3 : index
    %c0_150 = arith.constant 0 : index
    %212 = vector.load %arg1[%c0_148, %c3_149, %c0_150] : memref<1x358x8xf32, #tpu.memory_space<vmem>>, vector<1x256x8xf32>
    %213 = vector.shape_cast %212 : vector<1x256x8xf32> to vector<256x8xf32>
    %c1_151 = arith.constant 1 : index
    %c0_152 = arith.constant 0 : index
    %c0_153 = arith.constant 0 : index
    %214 = vector.load %arg9[%c1_151, %c0_152, %c0_153] : memref<9x8x16xf32, #tpu.memory_space<vmem>>, vector<1x8x16xf32>
    %215 = vector.shape_cast %214 : vector<1x8x16xf32> to vector<8x16xf32>
    %cst_154 = arith.constant dense<0.000000e+00> : vector<256x16xf32>
    %216 = tpu.matmul %213, %215, %cst_154 {dimension_numbers = #tpu.dot_dimension_numbers<[1], [0], [0], [1], [0, 0, 1, 1], [], []>} : vector<256x8xf32>, vector<8x16xf32>, vector<256x16xf32> -> vector<256x16xf32>
    %217 = arith.addf %211, %216 : vector<256x16xf32>
    %c0_155 = arith.constant 0 : index
    %c6_156 = arith.constant 6 : index
    %c0_157 = arith.constant 0 : index
    %218 = vector.load %arg1[%c0_155, %c6_156, %c0_157] : memref<1x358x8xf32, #tpu.memory_space<vmem>>, vector<1x256x8xf32>
    %219 = vector.shape_cast %218 : vector<1x256x8xf32> to vector<256x8xf32>
    %c13_i32 = arith.constant 13 : i32
    %220 = vector.broadcast %c13_i32 : i32 to vector<256x1xi32>
    %221 = arith.cmpi slt, %0, %220 : vector<256x1xi32>
    %cst_158 = arith.constant 0.000000e+00 : f32
    %222 = vector.shape_cast %221 : vector<256x1xi1> to vector<256x1xi1>
    %223 = vector.broadcast %222 : vector<256x1xi1> to vector<256x8xi1>
    %224 = vector.broadcast %cst_158 : f32 to vector<256x8xf32>
    %225 = arith.select %223, %219, %224 : vector<256x8xi1>, vector<256x8xf32>
    %c2_159 = arith.constant 2 : index
    %c0_160 = arith.constant 0 : index
    %c0_161 = arith.constant 0 : index
    %226 = vector.load %arg9[%c2_159, %c0_160, %c0_161] : memref<9x8x16xf32, #tpu.memory_space<vmem>>, vector<1x8x16xf32>
    %227 = vector.shape_cast %226 : vector<1x8x16xf32> to vector<8x16xf32>
    %cst_162 = arith.constant dense<0.000000e+00> : vector<256x16xf32>
    %228 = tpu.matmul %225, %227, %cst_162 {dimension_numbers = #tpu.dot_dimension_numbers<[1], [0], [0], [1], [0, 0, 1, 1], [], []>} : vector<256x8xf32>, vector<8x16xf32>, vector<256x16xf32> -> vector<256x16xf32>
    %229 = arith.addf %217, %228 : vector<256x16xf32>
    %c0_163 = arith.constant 0 : index
    %c48 = arith.constant 48 : index
    %c0_164 = arith.constant 0 : index
    %230 = vector.load %arg1[%c0_163, %c48, %c0_164] : memref<1x358x8xf32, #tpu.memory_space<vmem>>, vector<1x256x8xf32>
    %231 = vector.shape_cast %230 : vector<1x256x8xf32> to vector<256x8xf32>
    %c3_i32_165 = arith.constant 3 : i32
    %232 = vector.broadcast %c3_i32_165 : i32 to vector<256x1xi32>
    %233 = arith.cmpi sge, %0, %232 : vector<256x1xi32>
    %cst_166 = arith.constant 0.000000e+00 : f32
    %234 = vector.shape_cast %233 : vector<256x1xi1> to vector<256x1xi1>
    %235 = vector.broadcast %234 : vector<256x1xi1> to vector<256x8xi1>
    %236 = vector.broadcast %cst_166 : f32 to vector<256x8xf32>
    %237 = arith.select %235, %231, %236 : vector<256x8xi1>, vector<256x8xf32>
    %c3_167 = arith.constant 3 : index
    %c0_168 = arith.constant 0 : index
    %c0_169 = arith.constant 0 : index
    %238 = vector.load %arg9[%c3_167, %c0_168, %c0_169] : memref<9x8x16xf32, #tpu.memory_space<vmem>>, vector<1x8x16xf32>
    %239 = vector.shape_cast %238 : vector<1x8x16xf32> to vector<8x16xf32>
    %cst_170 = arith.constant dense<0.000000e+00> : vector<256x16xf32>
    %240 = tpu.matmul %237, %239, %cst_170 {dimension_numbers = #tpu.dot_dimension_numbers<[1], [0], [0], [1], [0, 0, 1, 1], [], []>} : vector<256x8xf32>, vector<8x16xf32>, vector<256x16xf32> -> vector<256x16xf32>
    %241 = arith.addf %229, %240 : vector<256x16xf32>
    %c0_171 = arith.constant 0 : index
    %c51_172 = arith.constant 51 : index
    %c0_173 = arith.constant 0 : index
    %242 = vector.load %arg1[%c0_171, %c51_172, %c0_173] : memref<1x358x8xf32, #tpu.memory_space<vmem>>, vector<1x256x8xf32>
    %243 = vector.shape_cast %242 : vector<1x256x8xf32> to vector<256x8xf32>
    %c4_174 = arith.constant 4 : index
    %c0_175 = arith.constant 0 : index
    %c0_176 = arith.constant 0 : index
    %244 = vector.load %arg9[%c4_174, %c0_175, %c0_176] : memref<9x8x16xf32, #tpu.memory_space<vmem>>, vector<1x8x16xf32>
    %245 = vector.shape_cast %244 : vector<1x8x16xf32> to vector<8x16xf32>
    %cst_177 = arith.constant dense<0.000000e+00> : vector<256x16xf32>
    %246 = tpu.matmul %243, %245, %cst_177 {dimension_numbers = #tpu.dot_dimension_numbers<[1], [0], [0], [1], [0, 0, 1, 1], [], []>} : vector<256x8xf32>, vector<8x16xf32>, vector<256x16xf32> -> vector<256x16xf32>
    %247 = arith.addf %241, %246 : vector<256x16xf32>
    %c0_178 = arith.constant 0 : index
    %c54 = arith.constant 54 : index
    %c0_179 = arith.constant 0 : index
    %248 = vector.load %arg1[%c0_178, %c54, %c0_179] : memref<1x358x8xf32, #tpu.memory_space<vmem>>, vector<1x256x8xf32>
    %249 = vector.shape_cast %248 : vector<1x256x8xf32> to vector<256x8xf32>
    %c13_i32_180 = arith.constant 13 : i32
    %250 = vector.broadcast %c13_i32_180 : i32 to vector<256x1xi32>
    %251 = arith.cmpi slt, %0, %250 : vector<256x1xi32>
    %cst_181 = arith.constant 0.000000e+00 : f32
    %252 = vector.shape_cast %251 : vector<256x1xi1> to vector<256x1xi1>
    %253 = vector.broadcast %252 : vector<256x1xi1> to vector<256x8xi1>
    %254 = vector.broadcast %cst_181 : f32 to vector<256x8xf32>
    %255 = arith.select %253, %249, %254 : vector<256x8xi1>, vector<256x8xf32>
    %c5_182 = arith.constant 5 : index
    %c0_183 = arith.constant 0 : index
    %c0_184 = arith.constant 0 : index
    %256 = vector.load %arg9[%c5_182, %c0_183, %c0_184] : memref<9x8x16xf32, #tpu.memory_space<vmem>>, vector<1x8x16xf32>
    %257 = vector.shape_cast %256 : vector<1x8x16xf32> to vector<8x16xf32>
    %cst_185 = arith.constant dense<0.000000e+00> : vector<256x16xf32>
    %258 = tpu.matmul %255, %257, %cst_185 {dimension_numbers = #tpu.dot_dimension_numbers<[1], [0], [0], [1], [0, 0, 1, 1], [], []>} : vector<256x8xf32>, vector<8x16xf32>, vector<256x16xf32> -> vector<256x16xf32>
    %259 = arith.addf %247, %258 : vector<256x16xf32>
    %c0_186 = arith.constant 0 : index
    %c96 = arith.constant 96 : index
    %c0_187 = arith.constant 0 : index
    %260 = vector.load %arg1[%c0_186, %c96, %c0_187] : memref<1x358x8xf32, #tpu.memory_space<vmem>>, vector<1x256x8xf32>
    %261 = vector.shape_cast %260 : vector<1x256x8xf32> to vector<256x8xf32>
    %c3_i32_188 = arith.constant 3 : i32
    %262 = vector.broadcast %c3_i32_188 : i32 to vector<256x1xi32>
    %263 = arith.cmpi sge, %0, %262 : vector<256x1xi32>
    %cst_189 = arith.constant 0.000000e+00 : f32
    %264 = vector.shape_cast %263 : vector<256x1xi1> to vector<256x1xi1>
    %265 = vector.broadcast %264 : vector<256x1xi1> to vector<256x8xi1>
    %266 = vector.broadcast %cst_189 : f32 to vector<256x8xf32>
    %267 = arith.select %265, %261, %266 : vector<256x8xi1>, vector<256x8xf32>
    %c6_190 = arith.constant 6 : index
    %c0_191 = arith.constant 0 : index
    %c0_192 = arith.constant 0 : index
    %268 = vector.load %arg9[%c6_190, %c0_191, %c0_192] : memref<9x8x16xf32, #tpu.memory_space<vmem>>, vector<1x8x16xf32>
    %269 = vector.shape_cast %268 : vector<1x8x16xf32> to vector<8x16xf32>
    %cst_193 = arith.constant dense<0.000000e+00> : vector<256x16xf32>
    %270 = tpu.matmul %267, %269, %cst_193 {dimension_numbers = #tpu.dot_dimension_numbers<[1], [0], [0], [1], [0, 0, 1, 1], [], []>} : vector<256x8xf32>, vector<8x16xf32>, vector<256x16xf32> -> vector<256x16xf32>
    %271 = arith.addf %259, %270 : vector<256x16xf32>
    %c0_194 = arith.constant 0 : index
    %c99 = arith.constant 99 : index
    %c0_195 = arith.constant 0 : index
    %272 = vector.load %arg1[%c0_194, %c99, %c0_195] : memref<1x358x8xf32, #tpu.memory_space<vmem>>, vector<1x256x8xf32>
    %273 = vector.shape_cast %272 : vector<1x256x8xf32> to vector<256x8xf32>
    %c7_196 = arith.constant 7 : index
    %c0_197 = arith.constant 0 : index
    %c0_198 = arith.constant 0 : index
    %274 = vector.load %arg9[%c7_196, %c0_197, %c0_198] : memref<9x8x16xf32, #tpu.memory_space<vmem>>, vector<1x8x16xf32>
    %275 = vector.shape_cast %274 : vector<1x8x16xf32> to vector<8x16xf32>
    %cst_199 = arith.constant dense<0.000000e+00> : vector<256x16xf32>
    %276 = tpu.matmul %273, %275, %cst_199 {dimension_numbers = #tpu.dot_dimension_numbers<[1], [0], [0], [1], [0, 0, 1, 1], [], []>} : vector<256x8xf32>, vector<8x16xf32>, vector<256x16xf32> -> vector<256x16xf32>
    %277 = arith.addf %271, %276 : vector<256x16xf32>
    %c0_200 = arith.constant 0 : index
    %c102 = arith.constant 102 : index
    %c0_201 = arith.constant 0 : index
    %278 = vector.load %arg1[%c0_200, %c102, %c0_201] : memref<1x358x8xf32, #tpu.memory_space<vmem>>, vector<1x256x8xf32>
    %279 = vector.shape_cast %278 : vector<1x256x8xf32> to vector<256x8xf32>
    %c13_i32_202 = arith.constant 13 : i32
    %280 = vector.broadcast %c13_i32_202 : i32 to vector<256x1xi32>
    %281 = arith.cmpi slt, %0, %280 : vector<256x1xi32>
    %cst_203 = arith.constant 0.000000e+00 : f32
    %282 = vector.shape_cast %281 : vector<256x1xi1> to vector<256x1xi1>
    %283 = vector.broadcast %282 : vector<256x1xi1> to vector<256x8xi1>
    %284 = vector.broadcast %cst_203 : f32 to vector<256x8xf32>
    %285 = arith.select %283, %279, %284 : vector<256x8xi1>, vector<256x8xf32>
    %c8_204 = arith.constant 8 : index
    %c0_205 = arith.constant 0 : index
    %c0_206 = arith.constant 0 : index
    %286 = vector.load %arg9[%c8_204, %c0_205, %c0_206] : memref<9x8x16xf32, #tpu.memory_space<vmem>>, vector<1x8x16xf32>
    %287 = vector.shape_cast %286 : vector<1x8x16xf32> to vector<8x16xf32>
    %cst_207 = arith.constant dense<0.000000e+00> : vector<256x16xf32>
    %288 = tpu.matmul %285, %287, %cst_207 {dimension_numbers = #tpu.dot_dimension_numbers<[1], [0], [0], [1], [0, 0, 1, 1], [], []>} : vector<256x8xf32>, vector<8x16xf32>, vector<256x16xf32> -> vector<256x16xf32>
    %289 = arith.addf %277, %288 : vector<256x16xf32>
    %c0_208 = arith.constant 0 : index
    %c0_209 = arith.constant 0 : index
    %290 = vector.load %arg10[%c0_208, %c0_209] : memref<1x16xf32, #tpu.memory_space<vmem>>, vector<1x16xf32>
    %291 = vector.broadcast %290 : vector<1x16xf32> to vector<256x16xf32>
    %292 = arith.addf %289, %291 : vector<256x16xf32>
    %cst_210 = arith.constant 0.000000e+00 : f32
    %293 = vector.broadcast %cst_210 : f32 to vector<256x16xf32>
    %294 = arith.maximumf %292, %293 : vector<256x16xf32>
    %c0_211 = arith.constant 0 : index
    %c48_212 = arith.constant 48 : index
    %295 = vector.load %arg14[%c0_211, %c48_212] : memref<256x64xf32, #tpu.memory_space<vmem>>, vector<256x16xf32>
    tpu.vector_store %arg14[%c0_211, %c48_212], %294 {strides = array<i32>} : memref<256x64xf32, #tpu.memory_space<vmem>>, vector<256x16xf32>,
    %c0_213 = arith.constant 0 : index
    %c0_214 = arith.constant 0 : index
    %296 = vector.load %arg14[%c0_213, %c0_214] : memref<256x64xf32, #tpu.memory_space<vmem>>, vector<256x64xf32>
    %c0_215 = arith.constant 0 : index
    %c0_216 = arith.constant 0 : index
    %297 = vector.load %arg11[%c0_215, %c0_216] : memref<64x16xf32, #tpu.memory_space<vmem>>, vector<64x16xf32>
    %cst_217 = arith.constant dense<0.000000e+00> : vector<256x16xf32>
    %298 = tpu.matmul %296, %297, %cst_217 {dimension_numbers = #tpu.dot_dimension_numbers<[1], [0], [0], [1], [0, 0, 1, 1], [], []>} : vector<256x64xf32>, vector<64x16xf32>, vector<256x16xf32> -> vector<256x16xf32>
    %c0_218 = arith.constant 0 : index
    %c0_219 = arith.constant 0 : index
    %c0_220 = arith.constant 0 : index
    %299 = vector.load %arg12[%c0_218, %c0_219, %c0_220] : memref<1x1x16xf32, #tpu.memory_space<vmem>>, vector<1x1x16xf32>
    %300 = vector.shape_cast %299 : vector<1x1x16xf32> to vector<1x16xf32>
    %301 = vector.broadcast %300 : vector<1x16xf32> to vector<256x16xf32>
    %302 = arith.addf %298, %301 : vector<256x16xf32>
    %cst_221 = arith.constant 0.000000e+00 : f32
    %303 = vector.broadcast %cst_221 : f32 to vector<256x16xf32>
    %304 = arith.maximumf %302, %303 : vector<256x16xf32>
    %c0_222 = arith.constant 0 : index
    %c0_223 = arith.constant 0 : index
    %c0_224 = arith.constant 0 : index
    %305 = vector.load %arg13[%c0_222, %c0_223, %c0_224] : memref<1x256x16xf32, #tpu.memory_space<vmem>>, vector<1x256x16xf32>
    %306 = vector.shape_cast %305 : vector<1x256x16xf32> to vector<256x16xf32>
    %307 = vector.shape_cast %304 : vector<256x16xf32> to vector<1x256x16xf32>
    tpu.vector_store %arg13[%c0_222, %c0_223, %c0_224], %307 {strides = array<i32>} : memref<1x256x16xf32, #tpu.memory_space<vmem>>, vector<1x256x16xf32>,
    return
  }
  func.func @transform_0(%arg0: i32) -> (i32, i32, i32) {
    %c0_i32 = arith.constant 0 : i32
    %c0_i32_0 = arith.constant 0 : i32
    %c0_i32_1 = arith.constant 0 : i32
    return %arg0, %c0_i32, %c0_i32_0 : i32, i32, i32
  }
  func.func @transform_1(%arg0: i32) -> (i32, i32) {
    %c0_i32 = arith.constant 0 : i32
    %c0_i32_0 = arith.constant 0 : i32
    %c0_i32_1 = arith.constant 0 : i32
    return %c0_i32, %c0_i32_0 : i32, i32
  }
  func.func @transform_2(%arg0: i32) -> (i32, i32) {
    %c0_i32 = arith.constant 0 : i32
    %c0_i32_0 = arith.constant 0 : i32
    %c0_i32_1 = arith.constant 0 : i32
    return %c0_i32, %c0_i32_0 : i32, i32
  }
  func.func @transform_3(%arg0: i32) -> (i32, i32) {
    %c0_i32 = arith.constant 0 : i32
    %c0_i32_0 = arith.constant 0 : i32
    %c0_i32_1 = arith.constant 0 : i32
    return %c0_i32, %c0_i32_0 : i32, i32
  }
  func.func @transform_4(%arg0: i32) -> (i32, i32, i32) {
    %c0_i32 = arith.constant 0 : i32
    %c0_i32_0 = arith.constant 0 : i32
    %c0_i32_1 = arith.constant 0 : i32
    %c0_i32_2 = arith.constant 0 : i32
    return %c0_i32, %c0_i32_0, %c0_i32_1 : i32, i32, i32
  }
  func.func @transform_5(%arg0: i32) -> (i32, i32) {
    %c0_i32 = arith.constant 0 : i32
    %c0_i32_0 = arith.constant 0 : i32
    %c0_i32_1 = arith.constant 0 : i32
    return %c0_i32, %c0_i32_0 : i32, i32
  }
  func.func @transform_6(%arg0: i32) -> (i32, i32, i32) {
    %c0_i32 = arith.constant 0 : i32
    %c0_i32_0 = arith.constant 0 : i32
    %c0_i32_1 = arith.constant 0 : i32
    %c0_i32_2 = arith.constant 0 : i32
    return %c0_i32, %c0_i32_0, %c0_i32_1 : i32, i32, i32
  }
  func.func @transform_7(%arg0: i32) -> (i32, i32) {
    %c0_i32 = arith.constant 0 : i32
    %c0_i32_0 = arith.constant 0 : i32
    %c0_i32_1 = arith.constant 0 : i32
    return %c0_i32, %c0_i32_0 : i32, i32
  }
  func.func @transform_8(%arg0: i32) -> (i32, i32, i32) {
    %c0_i32 = arith.constant 0 : i32
    %c0_i32_0 = arith.constant 0 : i32
    %c0_i32_1 = arith.constant 0 : i32
    %c0_i32_2 = arith.constant 0 : i32
    return %c0_i32, %c0_i32_0, %c0_i32_1 : i32, i32, i32
  }
  func.func @transform_9(%arg0: i32) -> (i32, i32) {
    %c0_i32 = arith.constant 0 : i32
    %c0_i32_0 = arith.constant 0 : i32
    %c0_i32_1 = arith.constant 0 : i32
    return %c0_i32, %c0_i32_0 : i32, i32
  }
  func.func @transform_10(%arg0: i32) -> (i32, i32) {
    %c0_i32 = arith.constant 0 : i32
    %c0_i32_0 = arith.constant 0 : i32
    %c0_i32_1 = arith.constant 0 : i32
    return %c0_i32, %c0_i32_0 : i32, i32
  }
  func.func @transform_11(%arg0: i32) -> (i32, i32, i32) {
    %c0_i32 = arith.constant 0 : i32
    %c0_i32_0 = arith.constant 0 : i32
    %c0_i32_1 = arith.constant 0 : i32
    return %arg0, %c0_i32, %c0_i32_0 : i32, i32, i32
  }
  func.func @transform_12(%arg0: i32) -> (i32, i32, i32) {
    %c0_i32 = arith.constant 0 : i32
    %c0_i32_0 = arith.constant 0 : i32
    %c0_i32_1 = arith.constant 0 : i32
    return %arg0, %c0_i32, %c0_i32_0 : i32, i32, i32
  }
}

</mosaic_0001>

<bundles_post_ra>
// kernel: aspp_forward.1
= control target key start
LH: loop header
LB: loop body
LE: loop exit
PB: predicated region body
PF: predicated region fallthrough
CT: control target
= control target key end

     0   :  { %s18466_s21 = smov 0   ;;  %s24362_s0 = inlined_call_operand.vmem [shape: f32[2,358,8], index: 0, kind: input, shape index: {}]   ;;  %s24363_s1 = inlined_call_operand.vmem [shape: s32[256,1], index: 1, kind: input, shape index: {}]   ;;  %s24364_s2 = inlined_call_operand.vmem [shape: f32[8,16], index: 2, kind: input, shape index: {}]   ;;  %s24365_s3 = inlined_call_operand.vmem [shape: f32[1,16], index: 3, kind: input, shape index: {}]   ;;  %s24366_s4 = inlined_call_operand.vmem [shape: f32[9,8,16], index: 4, kind: input, shape index: {}]   ;;  %s24367_s5 = inlined_call_operand.vmem [shape: f32[1,16], index: 5, kind: input, shape index: {}]   ;;  %s24368_s6 = inlined_call_operand.vmem [shape: f32[9,8,16], index: 6, kind: input, shape index: {}]   ;;  %s24369_s7 = inlined_call_operand.vmem [shape: f32[1,16], index: 7, kind: input, shape index: {}]   ;;  %s24370_s8 = inlined_call_operand.vmem [shape: f32[9,8,16], index: 8, kind: input, shape index: {}]   ;;  %s24371_s9 = inlined_call_operand.vmem [shape: f32[1,16], index: 9, kind: input, shape index: {}]   ;;  %s24372_s10 = inlined_call_operand.vmem [shape: f32[64,16], index: 10, kind: input, shape index: {}]   ;;  %s24373_s11 = inlined_call_operand.vmem [shape: f32[2,1,16], index: 11, kind: input, shape index: {}]   ;;  %s24374_s12 = inlined_call_operand.vmem [shape: f32[2,256,16], index: 12, kind: output, shape index: {}]  }
   0x1 LB: > { %s14062_s22 = sadd.s32 4294967295, %s18395_s21   ;;  %p14066_p0 = scmp.ge.s32.totalorder %s18395_s21, 1  ;;  %s18395_s21 = sphi %s18466_s21, %s22_s21  }
   0x2   : > { %p370_p1 = scmp.lt.s32.totalorder %s18395_s21, 3 }
   0x4   : > { %p371_p2 = pnand %p14066_p0, %p370_p1 }
   0x6   : > { %374 = sbr.rel (%p371_p2) target bundleno = 1657 (0x679), region = 68 }
   0xd   : > { %v18477_v0 = vld [vmem:[%s24363_s1 + $0x90] sm:$0xff]  ;;  %v18482_v1 = vld [vmem:[%s24363_s1 + $0x80] sm:$0xff]  ;;  %v18487_v2 = vld [vmem:[%s24363_s1 + $0x98] sm:$0xff]  ;;  %v24394_v3 = vmov 0   ;;  %p415_p3 = scmp.lt.s32.totalorder %s14062_s22, 1  ;;  %vm500_vm12 = vcmask 64512  }
   0xe   : > { %18258 = vset.pattern.permute.xlu1 %v24394_v3  ;;  %18257 = vset.pattern.permute.xlu0 %v24394_v3  ;;  %vm937_vm0 = vcmp.ge.s32.totalorder %v18477_v0, 1  ;;  %vm935_vm1 = vcmp.ge.s32.totalorder %v18482_v1, 1  ;;  %vm938_vm2 = vcmp.ge.s32.totalorder %v18487_v2, 1  ;;  %v18497_v4 = vld [vmem:[%s24363_s1 + $0x88] sm:$0xff]  ;;  %v18510_v8 = vld [vmem:[%s24363_s1 + $0xa0] sm:$0xff]  ;;  %v18519_v11 = vld [vmem:[%s24363_s1 + $0xb8] sm:$0xff] }
   0xf   : > { %v969_v5 = vsel %vm937_vm0, 1, %v24394_v3  ;;  %v967_v6 = vsel %vm935_vm1, 1, %v24394_v3  ;;  %vm936_vm3 = vcmp.ge.s32.totalorder %v18497_v4, 1  ;;  %v18505_v7 = vld [vmem:[%s24363_s1 + $0xa8] sm:$0xff]  ;;  %v970_v9 = vsel %vm938_vm2, 1, %v24394_v3  ;;  %v18524_v12 = vld [vmem:[%s24363_s1 + $0xb0] sm:$0xff] }
  0x10   : > { %1038 = vperm.xlu1 %18258, %v969_v5   ;;  %1032 = vperm.xlu0 %18257, %v967_v6   ;;  %v968_v10 = vsel %vm936_vm3, 1, %v24394_v3  ;;  %vm940_vm4 = vcmp.ge.s32.totalorder %v18505_v7, 1  ;;  %vm939_vm5 = vcmp.ge.s32.totalorder %v18510_v8, 1  ;;  %vm942_vm6 = vcmp.ge.s32.totalorder %v18519_v11, 1  ;;  %v18533_v15 = vld [vmem:[%s24363_s1 + $0xc8] sm:$0xff]  ;;  %v18538_v16 = vld [vmem:[%s24363_s1 + $0xc0] sm:$0xff] }
  0x11   : > { %v972_v13 = vsel %vm940_vm4, 1, %v24394_v3  ;;  %v971_v14 = vsel %vm939_vm5, 1, %v24394_v3  ;;  %vm941_vm7 = vcmp.ge.s32.totalorder %v18524_v12, 1  ;;  %v974_v17 = vsel %vm942_vm6, 1, %v24394_v3  ;;  %v18549_v19 = vld [vmem:[%s24363_s1 + $0xd8] sm:$0xff]  ;;  %v18554_v20 = vld [vmem:[%s24363_s1 + $0xd0] sm:$0xff] }
  0x12   : > { %v973_v18 = vsel %vm941_vm7, 1, %v24394_v3  ;;  %vm944_vm8 = vcmp.ge.s32.totalorder %v18533_v15, 1  ;;  %vm943_vm9 = vcmp.ge.s32.totalorder %v18538_v16, 1  ;;  %v492_v21 = vld [vmem:[%s24364_s2] sm:$0xff]  ;;  %s25902_s22 = smov (!%p415_p3, %s14062_s22), 1  ;;  %v14201_v24 = vld [vmem:[%s24366_s4 + $0x18] sm:$0xff] }
  0x13   : > { %v976_v22 = vsel %vm944_vm8, 1, %v24394_v3  ;;  %v975_v23 = vsel %vm943_vm9, 1, %v24394_v3  ;;  %15994 = vmatprep.subr.mxu0 %v492_v21  ;;  %v14103_v25 = vld [vmem:[%s24366_s4 + $0x8] sm:$0xff]  ;;  %vm946_vm10 = vcmp.ge.s32.totalorder %v18549_v19, 1  ;;  %vm945_vm11 = vcmp.ge.s32.totalorder %v18554_v20, 1  ;;  %s18244_s19 = smul.u32 360, %s25902_s22  ;;  %17474 = vmatprep.subr.mxu1 %v14201_v24  ;;  %s422_s16 = scalar_lea.vmem %s24373_s11, %s25902_s22 }
  0x14   : > { %1041 = vperm.xlu1 %18258, %v970_v9   ;;  %1035 = vperm.xlu0 %18257, %v968_v10   ;;  %v18577_v26 = vld [vmem:[%s24366_s4 + $0x20] sm:$0xff]  ;;  %v18582_v27 = vld [vmem:[%s24363_s1 + $0xe8] sm:$0xff]  ;;  %v978_v29 = vsel %vm946_vm10, 1, %v24394_v3  ;;  %v977_v30 = vsel %vm945_vm11, 1, %v24394_v3  ;;  %v18613_v34 = vld [vmem:[%s24363_s1 + $0xf8] sm:$0xff]  ;;  %s18398_s26 = smov 16  }
  0x15   : > { %15995 = vmatpush3.msra.mxu0 %v492_v21  ;;  %v18587_v28 = vld [vmem:[%s24363_s1 + $0xe0] sm:$0xff]  ;;  %17475 = vmatpush3.msra.mxu1 %v14201_v24  ;;  %s18592_s30 = scalar_lea.vmem %s24362_s0, %s18244_s19  ;;  %vm948_vm13 = vcmp.ge.s32.totalorder %v18582_v27, 1  ;;  %v18618_v35 = vld [vmem:[%s24363_s1 + $0xf0] sm:$0xff]  ;;  %vm950_vm15 = vcmp.ge.s32.totalorder %v18613_v34, 1  ;;  %v18637_v40 = vld [vmem:[%s24363_s1 + $0x8] sm:$0xff]  ;;  %s18400_s14 = smov 48  }
  0x16   : > { %16044 = vmatprep.subr.mxu0 %v14103_v25  ;;  %v18597_v31 = vld [vmem:[%s18592_s30 + $0x33] sm:$0xff]  ;;  %v18600_v32 = vld [vmem:[%s18592_s30 + $0x3b] sm:$0xff]  ;;  %16244 = vmatprep.subr.mxu1 %v18577_v26  ;;  %vm947_vm14 = vcmp.ge.s32.totalorder %v18587_v28, 1  ;;  %v18608_v33 = vld [vmem:[%s18592_s30 + $0x43] sm:$0xff]  ;;  %v980_v37 = vsel %vm948_vm13, 1, %v24394_v3  ;;  %vm949_vm0 = vcmp.ge.s32.totalorder %v18618_v35, 1 }
  0x17   : > { %15996 = vmatprep.mubr.msk.f32.mxu0 %vm500_vm12, %v18597_v31  ;;  %v18623_v36 = vld [vmem:[%s18592_s30 + $0x4b] sm:$0xff]  ;;  %v979_v38 = vsel %vm947_vm14, 1, %v24394_v3  ;;  %v18632_v39 = vld [vmem:[%s18592_s30 + $0x53] sm:$0xff]  ;;  %v18642_v41 = vld [vmem:[%s24363_s1] sm:$0xff]  ;;  %v982_v43 = vsel %vm950_vm15, 1, %v24394_v3  ;;  %v981_v44 = vsel %vm949_vm0, 1, %v24394_v3 }
  0x18   : > { %1047 = vperm.xlu1 %18258, %v972_v13   ;;  %1044 = vperm.xlu0 %18257, %v971_v14   ;;  %v18647_v42 = vld [vmem:[%s18592_s30 + $0x5b] sm:$0xff]  ;;  %vm1853_vm1 = vcmp.lt.s32.totalorder %v18637_v40, 15  ;;  %vm1852_vm2 = vcmp.lt.s32.totalorder %v18642_v41, 15  ;;  %v18656_v45 = vld [vmem:[%s18592_s30 + $0x63] sm:$0xff]  ;;  %v18666_v47 = vld [vmem:[%s24363_s1 + $0x10] sm:$0xff]  ;;  %s15029_s17 = sshll.u32 %s25902_s22, 8 }
  0x19   : > { %15997 = vmatmul.mubr.msk.f32.vlgmr.msra.gmra.mrb[0].mxu0 %vm500_vm12, %v18600_v32  ;;  %v18661_v46 = vld [vmem:[%s24363_s1 + $0x18] sm:$0xff]  ;;  %v18671_v48 = vld [vmem:[%s18592_s30 + $0x6b] sm:$0xff]  ;;  %v1885_v49 = vsel %vm1853_vm1, 1, %v24394_v3  ;;  %v1884_v50 = vsel %vm1852_vm2, 1, %v24394_v3  ;;  %vm1854_vm4 = vcmp.lt.s32.totalorder %v18666_v47, 15  ;;  %v18690_v53 = vld [vmem:[%s24363_s1 + $0x20] sm:$0xff]  ;;  %s24262_s20 = scalar_lea.vmem %s24374_s12, %s15029_s17 }
  0x1a   : > { %15999 = vmatprep.mubr.msk.f32.mxu0 %vm500_vm12, %v18608_v33  ;;  %16045 = vmatpush3.msra.mxu0 %v14103_v25  ;;  %vm1855_vm3 = vcmp.lt.s32.totalorder %v18661_v46, 15  ;;  %v18680_v51 = vld [vmem:[%s18592_s30 + $0x73] sm:$0xff]  ;;  %v18685_v52 = vld [vmem:[%s24363_s1 + $0x28] sm:$0xff]  ;;  %v18695_v54 = vld [vmem:[%s18592_s30 + $0x7b] sm:$0xff]  ;;  %v1886_v56 = vsel %vm1854_vm4, 1, %v24394_v3  ;;  %vm1856_vm6 = vcmp.lt.s32.totalorder %v18690_v53, 15 }
  0x1b   : > { %v1887_v55 = vsel %vm1855_vm3, 1, %v24394_v3  ;;  %vm1857_vm5 = vcmp.lt.s32.totalorder %v18685_v52, 15  ;;  %v18704_v57 = vld [vmem:[%s18592_s30 + $0x83] sm:$0xff]  ;;  %v18709_v58 = vld [vmem:[%s24363_s1 + $0x38] sm:$0xff]  ;;  %v18714_v59 = vld [vmem:[%s24363_s1 + $0x30] sm:$0xff]  ;;  %v1888_v62 = vsel %vm1856_vm6, 1, %v24394_v3 }
  0x1c   : > { %1053 = vperm.xlu1 %18258, %v974_v17   ;;  %1050 = vperm.xlu0 %18257, %v973_v18   ;;  %v18719_v60 = vld [vmem:[%s18592_s30 + $0x8b] sm:$0xff]  ;;  %v1889_v61 = vsel %vm1857_vm5, 1, %v24394_v3  ;;  %vm1859_vm7 = vcmp.lt.s32.totalorder %v18709_v58, 15  ;;  %vm1858_vm8 = vcmp.lt.s32.totalorder %v18714_v59, 15  ;;  %v18728_v63 = vld [vmem:[%s18592_s30 + $0x93] sm:$0xff]  ;;  %v18738_v6 = vld [vmem:[%s24363_s1 + $0x40] sm:$0xff] }
  0x1d   : > { %16000 = vmatmul.mubr.msk.f32.gmra.mrb[2].mxu0 %vm500_vm12, %v18623_v36  ;;  %v18733_v5 = vld [vmem:[%s24363_s1 + $0x48] sm:$0xff]  ;;  %v18743_v9 = vld [vmem:[%s18592_s30 + $0x9b] sm:$0xff]  ;;  %v1891_v10 = vsel %vm1859_vm7, 1, %v24394_v3  ;;  %v1890_v13 = vsel %vm1858_vm8, 1, %v24394_v3  ;;  %vm1860_vm10 = vcmp.lt.s32.totalorder %v18738_v6, 15  ;;  %v18762_v18 = vld [vmem:[%s24363_s1 + $0x50] sm:$0xff] }
  0x1e   : > { %16002 = vmatprep.mubr.msk.f32.mxu0 %vm500_vm12, %v18632_v39  ;;  %vm1861_vm9 = vcmp.lt.s32.totalorder %v18733_v5, 15  ;;  %v18752_v14 = vld [vmem:[%s18592_s30 + $0xa3] sm:$0xff]  ;;  %v18757_v17 = vld [vmem:[%s24363_s1 + $0x58] sm:$0xff]  ;;  %v18767_v21 = vld [vmem:[%s18592_s30 + $0xab] sm:$0xff]  ;;  %vm1862_vm13 = vcmp.lt.s32.totalorder %v18762_v18, 15  ;;  %vm1869_vm2 = vcmp.lt.s32.totalorder %v18497_v4, 15 }
  0x1f   : > { %vm1863_vm11 = vcmp.lt.s32.totalorder %v18757_v17, 15  ;;  %v18776_v24 = vld [vmem:[%s18592_s30 + $0xb3] sm:$0xff]  ;;  %v18781_v25 = vld [vmem:[%s24363_s1 + $0x68] sm:$0xff]  ;;  %vm1868_vm3 = vcmp.lt.s32.totalorder %v18482_v1, 15  ;;  %vm1871_vm4 = vcmp.lt.s32.totalorder %v18487_v2, 15  ;;  %vm1870_vm5 = vcmp.lt.s32.totalorder %v18477_v0, 15 }
  0x20   : > { %1059 = vperm.xlu1 %18258, %v976_v22   ;;  %1056 = vperm.xlu0 %18257, %v975_v23   ;;  %v1893_v22 = vsel %vm1861_vm9, 1, %v24394_v3  ;;  %v1892_v23 = vsel %vm1860_vm10, 1, %v24394_v3  ;;  %vm1865_vm14 = vcmp.lt.s32.totalorder %v18781_v25, 15  ;;  %v18852_v1 = vld [vmem:[%s18592_s30 + $0xf3] sm:$0xff]  ;;  %v18857_v4 = vld [vmem:[%s18592_s30 + $0xfb] sm:$0xff]  ;;  %vm1873_vm6 = vcmp.lt.s32.totalorder %v18505_v7, 15 }
  0x21   : > { %16003 = vmatmul.mubr.msk.f32.gmra.mrb[4].mxu0 %vm500_vm12, %v18647_v42  ;;  %vm1872_vm7 = vcmp.lt.s32.totalorder %v18510_v8, 15  ;;  %v18866_v0 = vld [vmem:[%s18592_s30 + $0x103] sm:$0xff]  ;;  %v18871_v2 = vld [vmem:[%s18592_s30 + $0x10b] sm:$0xff]  ;;  %vm1875_vm8 = vcmp.lt.s32.totalorder %v18519_v11, 15  ;;  %vm1874_vm9 = vcmp.lt.s32.totalorder %v18524_v12, 15  ;;  %v18883_v8 = vld [vmem:[%s18592_s30 + $0x113] sm:$0xff] }
  0x22   : > { %16005 = vmatprep.mubr.msk.f32.mxu0 %vm500_vm12, %v18656_v45  ;;  %v1904_v7 = vsel %vm1872_vm7, 1, %v24394_v3  ;;  %vm1877_vm10 = vcmp.lt.s32.totalorder %v18533_v15, 15  ;;  %v18897_v11 = vld [vmem:[%s18592_s30 + $0x123] sm:$0xff]  ;;  %v18902_v12 = vld [vmem:[%s18592_s30 + $0x12b] sm:$0xff]  ;;  %vm924_vm7 = vcmp.ge.s32.totalorder %v18685_v52, 1 }
  0x23   : > { %v1144_v15 = vld [vmem:[%s18592_s30 + $0x23] sm:$0xff] }
  0x24   : > { %1065 = vperm.xlu1 %18258, %v978_v29   ;;  %1062 = vperm.xlu0 %18257, %v977_v30   ;;  %v18786_v29 = vld [vmem:[%s24363_s1 + $0x60] sm:$0xff] }
  0x25   : > { %16006 = vmatmul.mubr.msk.f32.gmra.mrb[6].mxu0 %vm500_vm12, %v18671_v48  ;;  %v18791_v30 = vld [vmem:[%s18592_s30 + $0xbb] sm:$0xff]  ;;  %vm1864_vm15 = vcmp.lt.s32.totalorder %v18786_v29, 15 }
  0x26   : > { %16008 = vmatprep.mubr.msk.f32.mxu0 %vm500_vm12, %v18680_v51 }
  0x28   : > { %1071 = vperm.xlu1 %18258, %v980_v37   ;;  %1068 = vperm.xlu0 %18257, %v979_v38   ;;  %v1895_v37 = vsel %vm1863_vm11, 1, %v24394_v3  ;;  %v1894_v38 = vsel %vm1862_vm13, 1, %v24394_v3  ;;  %vm1876_vm11 = vcmp.lt.s32.totalorder %v18538_v16, 15  ;;  %vm1879_vm13 = vcmp.lt.s32.totalorder %v18549_v19, 15  ;;  %v1145_v16 = vld [vmem:[%s18592_s30 + $0x2b] sm:$0xff] }
  0x29   : > { %16009 = vmatmul.mubr.msk.f32.gmra.mrb[8].mxu0 %vm500_vm12, %v18695_v54 }
  0x2a   : > { %16011 = vmatprep.mubr.msk.f32.mxu0 %vm500_vm12, %v18704_v57 }
  0x2c   : > { %1077 = vperm.xlu1 %18258, %v982_v43   ;;  %1074 = vperm.xlu0 %18257, %v981_v44   ;;  %v18800_v43 = vld [vmem:[%s18592_s30 + $0xc3] sm:$0xff]  ;;  %v18805_v44 = vld [vmem:[%s24363_s1 + $0x78] sm:$0xff] }
  0x2d   : > { %16012 = vmatmul.mubr.msk.f32.gmra.mrb[10].mxu0 %vm500_vm12, %v18719_v60  ;;  %vm1867_vm0 = vcmp.lt.s32.totalorder %v18805_v44, 15 }
  0x2e   : > { %16014 = vmatprep.mubr.msk.f32.mxu0 %vm500_vm12, %v18728_v63 }
  0x30   : > { %1920 = vperm.xlu1 %18258, %v1885_v49   ;;  %1917 = vperm.xlu0 %18257, %v1884_v50   ;;  %v18810_v49 = vld [vmem:[%s24363_s1 + $0x70] sm:$0xff] }
  0x31   : > { %16015 = vmatmul.mubr.msk.f32.gmra.mrb[12].mxu0 %vm500_vm12, %v18743_v9  ;;  %v18815_v50 = vld [vmem:[%s18592_s30 + $0xcb] sm:$0xff]  ;;  %vm1866_vm1 = vcmp.lt.s32.totalorder %v18810_v49, 15 }
  0x32   : > { %16017 = vmatprep.mubr.msk.f32.mxu0 %vm500_vm12, %v18752_v14 }
  0x34   : > { %1926 = vperm.xlu1 %18258, %v1887_v55   ;;  %1923 = vperm.xlu0 %18257, %v1886_v56   ;;  %v1897_v55 = vsel %vm1865_vm14, 1, %v24394_v3  ;;  %v1896_v56 = vsel %vm1864_vm15, 1, %v24394_v3  ;;  %vm1878_vm14 = vcmp.lt.s32.totalorder %v18554_v20, 15  ;;  %vm1881_vm15 = vcmp.lt.s32.totalorder %v18582_v27, 15 }
  0x35   : > { %16018 = vmatmul.mubr.msk.f32.gmra.mrb[14].mxu0 %vm500_vm12, %v18767_v21  ;;  %v1913_v19 = vsel %vm1881_vm15, 1, %v24394_v3  ;;  %vm929_vm15 = vcmp.ge.s32.totalorder %v18762_v18, 1 }
  0x36   : > { %16020 = vmatprep.mubr.msk.f32.mxu0 %vm500_vm12, %v18776_v24 }
  0x38   : > { %1932 = vperm.xlu1 %18258, %v1889_v61   ;;  %1929 = vperm.xlu0 %18257, %v1888_v62   ;;  %v18824_v61 = vld [vmem:[%s18592_s30 + $0xd3] sm:$0xff]  ;;  %v18829_v62 = vld [vmem:[%s18592_s30 + $0xdb] sm:$0xff] }
  0x39   : > { %16021 = vmatmul.mubr.msk.f32.gmra.mrb[16].mxu0 %vm500_vm12, %v18791_v30 }
  0x3a   : > { %16023 = vmatprep.mubr.msk.f32.mxu0 %vm500_vm12, %v18800_v43 }
  0x3c   : > { %1938 = vperm.xlu1 %18258, %v1891_v10   ;;  %1935 = vperm.xlu0 %18257, %v1890_v13   ;;  %v1899_v10 = vsel %vm1867_vm0, 1, %v24394_v3  ;;  %v1898_v13 = vsel %vm1866_vm1, 1, %v24394_v3  ;;  %vm1880_vm0 = vcmp.lt.s32.totalorder %v18587_v28, 15  ;;  %vm1883_vm1 = vcmp.lt.s32.totalorder %v18613_v34, 15 }
  0x3d   : > { %16024 = vmatmul.mubr.msk.f32.gmra.mrb[18].mxu0 %vm500_vm12, %v18815_v50  ;;  %v1912_v20 = vsel %vm1880_vm0, 1, %v24394_v3  ;;  %v1915_v27 = vsel %vm1883_vm1, 1, %v24394_v3  ;;  %vm932_vm0 = vcmp.ge.s32.totalorder %v18781_v25, 1  ;;  %vm931_vm1 = vcmp.ge.s32.totalorder %v18786_v29, 1 }
  0x3e   : > { %16026 = vmatprep.mubr.msk.f32.mxu0 %vm500_vm12, %v18824_v61 }
  0x40   : > { %1944 = vperm.xlu1 %18258, %v1893_v22   ;;  %1941 = vperm.xlu0 %18257, %v1892_v23   ;;  %v18838_v22 = vld [vmem:[%s18592_s30 + $0xe3] sm:$0xff]  ;;  %v18843_v23 = vld [vmem:[%s18592_s30 + $0xeb] sm:$0xff] }
  0x41   : > { %16027 = vmatmul.mubr.msk.f32.gmra.mrb[20].mxu0 %vm500_vm12, %v18829_v62 }
  0x42   : > { %16029 = vmatprep.mubr.msk.f32.mxu0 %vm500_vm12, %v18838_v22 }
  0x44   : > { %1950 = vperm.xlu1 %18258, %v1895_v37   ;;  %1947 = vperm.xlu0 %18257, %v1894_v38   ;;  %v1901_v37 = vsel %vm1869_vm2, 1, %v24394_v3  ;;  %v1900_v38 = vsel %vm1868_vm3, 1, %v24394_v3  ;;  %vm1882_vm2 = vcmp.lt.s32.totalorder %v18618_v35, 15  ;;  %vm920_vm3 = vcmp.ge.s32.totalorder %v18637_v40, 1 }
  0x45   : > { %16030 = vmatmul.mubr.msk.f32.gmra.mrb[22].mxu0 %vm500_vm12, %v18843_v23  ;;  %v1914_v28 = vsel %vm1882_vm2, 1, %v24394_v3  ;;  %v952_v34 = vsel %vm920_vm3, 1, %v24394_v3  ;;  %vm934_vm2 = vcmp.ge.s32.totalorder %v18805_v44, 1  ;;  %vm933_vm3 = vcmp.ge.s32.totalorder %v18810_v49, 1 }
  0x46   : > { %16032 = vmatprep.mubr.msk.f32.mxu0 %vm500_vm12, %v18852_v1 }
  0x48   : > { %1956 = vperm.xlu1 %18258, %v1897_v55   ;;  %1953 = vperm.xlu0 %18257, %v1896_v56   ;;  %v1903_v55 = vsel %vm1871_vm4, 1, %v24394_v3  ;;  %v1902_v56 = vsel %vm1870_vm5, 1, %v24394_v3  ;;  %vm919_vm4 = vcmp.ge.s32.totalorder %v18642_v41, 1  ;;  %vm922_vm5 = vcmp.ge.s32.totalorder %v18661_v46, 1 }
  0x49   : > { %16033 = vmatmul.mubr.msk.f32.gmra.mrb[24].mxu0 %vm500_vm12, %v18857_v4  ;;  %v951_v35 = vsel %vm919_vm4, 1, %v24394_v3  ;;  %vm5146_vm4 = vcmp.ge.s32.totalorder %v18637_v40, 2 }
  0x4a   : > { %16035 = vmatprep.mubr.msk.f32.mxu0 %vm500_vm12, %v18866_v0 }
  0x4c   : > { %1962 = vperm.xlu1 %18258, %v1899_v10   ;;  %1959 = vperm.xlu0 %18257, %v1898_v13   ;;  %v1143_v10 = vld [vmem:[%s24366_s4] sm:$0xff]  ;;  %v1905_v13 = vsel %vm1873_vm6, 1, %v24394_v3  ;;  %vm921_vm6 = vcmp.ge.s32.totalorder %v18666_v47, 1 }
  0x4d   : > { %16094 = vmatprep.subr.mxu0 %v1143_v10  ;;  %16036 = vmatmul.mubr.msk.f32.gmra.mrb[26].mxu0 %vm500_vm12, %v18871_v2 }
  0x4e   : > { %16038 = vmatprep.mubr.msk.f32.mxu0 %vm500_vm12, %v18883_v8 }
  0x50   : > { %1968 = vperm.xlu1 %18258, %v1901_v37   ;;  %1965 = vperm.xlu0 %18257, %v1900_v38   ;;  %v18888_v37 = vld [vmem:[%s18592_s30 + $0x11b] sm:$0xff]  ;;  %v1907_v38 = vsel %vm1875_vm8, 1, %v24394_v3  ;;  %vm923_vm8 = vcmp.ge.s32.totalorder %v18690_v53, 1 }
  0x51   : > { %16039 = vmatmul.mubr.msk.f32.gmra.mrb[28].mxu0 %vm500_vm12, %v18888_v37 }
  0x52   : > { %16041 = vmatprep.mubr.msk.f32.mxu0 %vm500_vm12, %v18897_v11 }
  0x54   : > { %1974 = vperm.xlu1 %18258, %v1903_v55   ;;  %1971 = vperm.xlu0 %18257, %v1902_v56   ;;  %v1906_v55 = vsel %vm1874_vm9, 1, %v24394_v3  ;;  %v1909_v56 = vsel %vm1877_vm10, 1, %v24394_v3  ;;  %vm926_vm9 = vcmp.ge.s32.totalorder %v18709_v58, 1  ;;  %vm925_vm10 = vcmp.ge.s32.totalorder %v18714_v59, 1 }
  0x55   : > { %16042 = vmatmul.mubr.msk.f32.gmra.mrb[30].mxu0 %vm500_vm12, %v18902_v12 }
  0x56   : > { %16046 = vmatprep.mubr.msk.f32.mxu0 %vm500_vm12, %v1144_v15  ;;  %v958_v15 = vsel %vm926_vm9, 1, %v24394_v3 }
  0x58   : > { %1980 = vperm.xlu1 %18258, %v1905_v13   ;;  %1977 = vperm.xlu0 %18257, %v1904_v7   ;;  %v1908_v13 = vsel %vm1876_vm11, 1, %v24394_v3  ;;  %v1911_v7 = vsel %vm1879_vm13, 1, %v24394_v3  ;;  %vm928_vm11 = vcmp.ge.s32.totalorder %v18733_v5, 1  ;;  %vm927_vm13 = vcmp.ge.s32.totalorder %v18738_v6, 1 }
  0x59   : > { %16047 = vmatmul.mubr.msk.f32.vlgmr.msra.gmra.mrb[32].mxu0 %vm500_vm12, %v1145_v16  ;;  %v957_v16 = vsel %vm925_vm10, 1, %v24394_v3  ;;  %vm5148_vm10 = vcmp.ge.s32.totalorder %v18661_v46, 2 }
  0x5a   : > { %16049 = vmatprep.mubr.msk.f32.mxu0 %vm500_vm12, %v18597_v31  ;;  %16095 = vmatpush3.msra.mxu0 %v1143_v10  ;;  %v954_v10 = vsel %vm922_vm5, 1, %v24394_v3  ;;  %vm5145_vm5 = vcmp.ge.s32.totalorder %v18642_v41, 2 }
  0x5c   : > { %1986 = vperm.xlu1 %18258, %v1907_v38   ;;  %1983 = vperm.xlu0 %18257, %v1906_v55   ;;  %v1910_v38 = vsel %vm1878_vm14, 1, %v24394_v3  ;;  %v953_v55 = vsel %vm921_vm6, 1, %v24394_v3  ;;  %vm930_vm14 = vcmp.ge.s32.totalorder %v18757_v17, 1  ;;  %vm9372_vm6 = vcmp.ge.s32.totalorder %v18637_v40, 3 }
  0x5d   : > { %16050 = vmatmul.mubr.msk.f32.gmra.mrb[34].mxu0 %vm500_vm12, %v18600_v32  ;;  %v9404_v40 = vsel %vm9372_vm6, 1, %v24394_v3 }
  0x5e   : > { %16052 = vmatprep.mubr.msk.f32.mxu0 %vm500_vm12, %v18608_v33 }
  0x60   : > { %1992 = vperm.xlu1 %18258, %v1909_v56   ;;  %1989 = vperm.xlu0 %18257, %v1908_v13   ;;  %v956_v56 = vsel %vm924_vm7, 1, %v24394_v3  ;;  %v955_v13 = vsel %vm923_vm8, 1, %v24394_v3  ;;  %vm9371_vm7 = vcmp.ge.s32.totalorder %v18642_v41, 3 }
  0x61   : > { %16053 = vmatmul.mubr.msk.f32.gmra.mrb[36].mxu0 %vm500_vm12, %v18623_v36  ;;  %v9403_v41 = vsel %vm9371_vm7, 1, %v24394_v3  ;;  %vm9376_vm7 = vcmp.ge.s32.totalorder %v18685_v52, 3 }
  0x62   : > { %16055 = vmatprep.mubr.msk.f32.mxu0 %vm500_vm12, %v18632_v39 }
  0x64   : > { %1998 = vperm.xlu1 %18258, %v1911_v7   ;;  %1995 = vperm.xlu0 %18257, %v1910_v38   ;;  %v960_v7 = vsel %vm928_vm11, 1, %v24394_v3  ;;  %v959_v38 = vsel %vm927_vm13, 1, %v24394_v3  ;;  %vm5147_vm11 = vcmp.ge.s32.totalorder %v18666_v47, 2 }
  0x65   : > { %16056 = vmatmul.mubr.msk.f32.gmra.mrb[38].mxu0 %vm500_vm12, %v18647_v42 }
  0x66   : > { %16058 = vmatprep.mubr.msk.f32.mxu0 %vm500_vm12, %v18656_v45 }
  0x68   : > { %2004 = vperm.xlu1 %18258, %v1913_v19   ;;  %2001 = vperm.xlu0 %18257, %v1912_v20   ;;  %v962_v19 = vsel %vm930_vm14, 1, %v24394_v3  ;;  %v961_v20 = vsel %vm929_vm15, 1, %v24394_v3  ;;  %vm9374_vm15 = vcmp.ge.s32.totalorder %v18661_v46, 3 }
  0x69   : > { %16059 = vmatmul.mubr.msk.f32.gmra.mrb[40].mxu0 %vm500_vm12, %v18671_v48 }
  0x6a   : > { %16061 = vmatprep.mubr.msk.f32.mxu0 %vm500_vm12, %v18680_v51 }
  0x6c   : > { %2010 = vperm.xlu1 %18258, %v1915_v27   ;;  %2007 = vperm.xlu0 %18257, %v1914_v28   ;;  %v964_v27 = vsel %vm932_vm0, 1, %v24394_v3  ;;  %v963_v28 = vsel %vm931_vm1, 1, %v24394_v3  ;;  %vm9373_vm0 = vcmp.ge.s32.totalorder %v18666_v47, 3 }
  0x6d   : > { %16062 = vmatmul.mubr.msk.f32.gmra.mrb[42].mxu0 %vm500_vm12, %v18695_v54 }
  0x6e   : > { %16064 = vmatprep.mubr.msk.f32.mxu0 %vm500_vm12, %v18704_v57 }
  0x70   : > { %987 = vperm.xlu1 %18258, %v952_v34   ;;  %984 = vperm.xlu0 %18257, %v951_v35   ;;  %v966_v34 = vsel %vm934_vm2, 1, %v24394_v3  ;;  %v965_v35 = vsel %vm933_vm3, 1, %v24394_v3  ;;  %vm5150_vm3 = vcmp.ge.s32.totalorder %v18685_v52, 2 }
  0x71   : > { %16065 = vmatmul.mubr.msk.f32.gmra.mrb[44].mxu0 %vm500_vm12, %v18719_v60 }
  0x72   : > { %16067 = vmatprep.mubr.msk.f32.mxu0 %vm500_vm12, %v18728_v63 }
  0x74   : > { %993 = vperm.xlu1 %18258, %v954_v10   ;;  %990 = vperm.xlu0 %18257, %v953_v55   ;;  %v5178_v10 = vsel %vm5146_vm4, 1, %v24394_v3  ;;  %v5177_v55 = vsel %vm5145_vm5, 1, %v24394_v3  ;;  %vm5149_vm4 = vcmp.ge.s32.totalorder %v18690_v53, 2 }
  0x75   : > { %16068 = vmatmul.mubr.msk.f32.gmra.mrb[46].mxu0 %vm500_vm12, %v18743_v9 }
  0x76   : > { %16070 = vmatprep.mubr.msk.f32.mxu0 %vm500_vm12, %v18752_v14 }
  0x78   : > { %999 = vperm.xlu1 %18258, %v956_v56   ;;  %996 = vperm.xlu0 %18257, %v955_v13   ;;  %v2447_v56 = vld [vmem:[%s18592_s30 + $0xb2] sm:$0xff] }
  0x79   : > { %16071 = vmatmul.mubr.msk.f32.gmra.mrb[48].mxu0 %vm500_vm12, %v18767_v21 }
  0x7a   : > { %16073 = vmatprep.mubr.msk.f32.mxu0 %vm500_vm12, %v18776_v24 }
  0x7c   : > { %1005 = vperm.xlu1 %18258, %v958_v15   ;;  %1002 = vperm.xlu0 %18257, %v957_v16  }
  0x7d   : > { %16074 = vmatmul.mubr.msk.f32.gmra.mrb[50].mxu0 %vm500_vm12, %v18791_v30 }
  0x7e   : > { %16076 = vmatprep.mubr.msk.f32.mxu0 %vm500_vm12, %v18800_v43 }
  0x80   : > { %1011 = vperm.xlu1 %18258, %v960_v7   ;;  %1008 = vperm.xlu0 %18257, %v959_v38   ;;  %v2449_v7 = vld [vmem:[%s18592_s30 + $0xc2] sm:$0xff]  ;;  %v2448_v38 = vld [vmem:[%s18592_s30 + $0xba] sm:$0xff] }
  0x81   : > { %16077 = vmatmul.mubr.msk.f32.gmra.mrb[52].mxu0 %vm500_vm12, %v18815_v50 }
  0x82   : > { %16079 = vmatprep.mubr.msk.f32.mxu0 %vm500_vm12, %v18824_v61 }
  0x84   : > { %1017 = vperm.xlu1 %18258, %v962_v19   ;;  %1014 = vperm.xlu0 %18257, %v961_v20  }
  0x85   : > { %16080 = vmatmul.mubr.msk.f32.gmra.mrb[54].mxu0 %vm500_vm12, %v18829_v62 }
  0x86   : > { %16082 = vmatprep.mubr.msk.f32.mxu0 %vm500_vm12, %v18838_v22 }
  0x88   : > { %1023 = vperm.xlu1 %18258, %v964_v27   ;;  %1020 = vperm.xlu0 %18257, %v963_v28  }
  0x89   : > { %16083 = vmatmul.mubr.msk.f32.gmra.mrb[56].mxu0 %vm500_vm12, %v18843_v23 }
  0x8a   : > { %16085 = vmatprep.mubr.msk.f32.mxu0 %vm500_vm12, %v18852_v1 }
  0x8c   : > { %1029 = vperm.xlu1 %18258, %v966_v34   ;;  %1026 = vperm.xlu0 %18257, %v965_v35   ;;  %v5180_v34 = vsel %vm5148_vm10, 1, %v24394_v3  ;;  %v5179_v35 = vsel %vm5147_vm11, 1, %v24394_v3  ;;  %vm9375_vm10 = vcmp.ge.s32.totalorder %v18690_v53, 3 }
  0x8d   : > { %16086 = vmatmul.mubr.msk.f32.gmra.mrb[58].mxu0 %vm500_vm12, %v18857_v4 }
  0x8e   : > { %16088 = vmatprep.mubr.msk.f32.mxu0 %vm500_vm12, %v18866_v0 }
  0x8f   : > { %v19007_v13 = vpop.permute.xlu1 %1038  ;;  %v19009_v15 = vpop.permute.xlu0 %1032 }
  0x90   : > { %24858 = vst [vmem:[#allocation3_spill] sm:$0xff] %v19007_v13  ;;  %24859 = vst [vmem:[#allocation4_spill] sm:$0xff] %v19009_v15  ;;  %vm24503_vm8 = vcmp.eq.s32.totalorder %v19009_v15, 1  ;;  %5213 = vperm.xlu1 %18258, %v5178_v10   ;;  %5210 = vperm.xlu0 %18257, %v5177_v55   ;;  %vm24499_vm9 = vcmp.eq.s32.totalorder %v19007_v13, 1  ;;  %v19044_v10 = vld [vmem:[%s24366_s4 + $0x10] sm:$0xff] }
  0x91   : > { %v2479_v16 = vsel %vm24503_vm8, %v2447_v56, 0.0  ;;  %v2481_v27 = vsel %vm24499_vm9, %v2449_v7, 0.0  ;;  %v2450_v55 = vld [vmem:[%s18592_s30 + $0xca] sm:$0xff]  ;;  %v2451_v56 = vld [vmem:[%s18592_s30 + $0xd2] sm:$0xff]  ;;  %16144 = vmatprep.subr.mxu0 %v19044_v10  ;;  %v9406_v7 = vsel %vm9374_vm15, 1, %v24394_v3  ;;  %16089 = vmatmul.mubr.msk.f32.gmra.mrb[60].mxu0 %vm500_vm12, %v18871_v2 }
  0x92   : > { %16220 = vmatprep.mubr.msk.f32.mxu1 %vm500_vm12, %v2479_v16  ;;  %v19055_v16 = vld [vmem:[%s24366_s4 + $0x28] sm:$0xff]  ;;  %16091 = vmatprep.mubr.msk.f32.mxu0 %vm500_vm12, %v18883_v8 }
  0x93   : > { %v19026_v19 = vpop.permute.xlu1 %1041  ;;  %v19028_v20 = vpop.permute.xlu0 %1035 }
  0x94   : > { %24860 = vst [vmem:[#allocation5_spill] sm:$0xff] %v19026_v19  ;;  %24861 = vst [vmem:[#allocation6_spill] sm:$0xff] %v19028_v20  ;;  %vm24432_vm13 = vcmp.eq.s32.totalorder %v19028_v20, 1  ;;  %9439 = vperm.xlu1 %18258, %v9404_v40   ;;  %9436 = vperm.xlu0 %18257, %v9403_v41   ;;  %vm24431_vm14 = vcmp.eq.s32.totalorder %v19026_v19, 1 }
  0x95   : > { %v2480_v28 = vsel %vm24432_vm13, %v2448_v38, 0.0  ;;  %v2482_v46 = vsel %vm24431_vm14, %v2450_v55, 0.0  ;;  %v2452_v38 = vld [vmem:[%s18592_s30 + $0xda] sm:$0xff]  ;;  %16092 = vmatmul.mubr.msk.f32.gmra.mrb[62].mxu0 %vm500_vm12, %v18888_v37 }
  0x96   : > { %16221 = vmatmul.mubr.msk.f32.vlgmr.msra.gmra.mrb[0].mxu1 %vm500_vm12, %v2480_v28 }
  0x97   : > { %16245 = vmatpush3.msra.mxu1 %v18577_v26  ;;  %v19059_v40 = vpop.permute.xlu1 %1047  ;;  %v19061_v41 = vpop.permute.xlu0 %1044  ;;  %16223 = vmatprep.mubr.msk.f32.mxu1 %vm500_vm12, %v2481_v27  ;;  %v9405_v26 = vsel %vm9373_vm0, 1, %v24394_v3  ;;  %v2453_v27 = vld [vmem:[%s18592_s30 + $0xe2] sm:$0xff]  ;;  %vm5152_vm0 = vcmp.ge.s32.totalorder %v18709_v58, 2 }
  0x98   : > { %24862 = vst [vmem:[#allocation7_spill] sm:$0xff] %v19059_v40  ;;  %24863 = vst [vmem:[#allocation8_spill] sm:$0xff] %v19061_v41  ;;  %vm24401_vm1 = vcmp.eq.s32.totalorder %v19061_v41, 1  ;;  %5219 = vperm.xlu1 %18258, %v5180_v34   ;;  %5216 = vperm.xlu0 %18257, %v5179_v35   ;;  %vm24397_vm2 = vcmp.eq.s32.totalorder %v19059_v40, 1 }
  0x99   : > { %v2483_v47 = vsel %vm24401_vm1, %v2451_v56, 0.0  ;;  %16294 = vmatprep.subr.mxu1 %v19055_v16  ;;  %v2484_v35 = vsel %vm24397_vm2, %v2452_v38, 0.0  ;;  %v5182_v56 = vsel %vm5150_vm3, 1, %v24394_v3  ;;  %vm5151_vm3 = vcmp.ge.s32.totalorder %v18714_v59, 2 }
  0x9a   : > { %16224 = vmatmul.mubr.msk.f32.gmra.mrb[2].mxu1 %vm500_vm12, %v2482_v46  ;;  %v5181_v46 = vsel %vm5149_vm4, 1, %v24394_v3 }
  0x9b   : > { %v19082_v28 = vpop.permute.xlu1 %1053  ;;  %v19084_v34 = vpop.permute.xlu0 %1050  ;;  %16226 = vmatprep.mubr.msk.f32.mxu1 %vm500_vm12, %v2483_v47  ;;  %v2454_v47 = vld [vmem:[%s18592_s30 + $0xea] sm:$0xff] }
  0x9c   : > { %24864 = vst [vmem:[#allocation9_spill] sm:$0xff] %v19082_v28  ;;  %24865 = vst [vmem:[#allocation10_spill] sm:$0xff] %v19084_v34  ;;  %vm24396_vm5 = vcmp.eq.s32.totalorder %v19084_v34, 1  ;;  %9445 = vperm.xlu1 %18258, %v9406_v7   ;;  %9442 = vperm.xlu0 %18257, %v9405_v26   ;;  %vm24393_vm6 = vcmp.eq.s32.totalorder %v19082_v28, 1  ;;  %v2455_v7 = vld [vmem:[%s18592_s30 + $0xf2] sm:$0xff]  ;;  %v5183_v28 = vsel %vm5151_vm3, 1, %v24394_v3 }
  0x9d   : > { %v2485_v55 = vsel %vm24396_vm5, %v2453_v27, 0.0  ;;  %v2486_v52 = vsel %vm24393_vm6, %v2454_v47, 0.0  ;;  %v9408_v27 = vsel %vm9376_vm7, 1, %v24394_v3  ;;  %v2458_v34 = vld [vmem:[%s18592_s30 + $0x10a] sm:$0xff]  ;;  %vm9385_vm6 = vcmp.ge.s32.totalorder %v18810_v49, 3 }
  0x9e   : > { %16227 = vmatmul.mubr.msk.f32.gmra.mrb[4].mxu1 %vm500_vm12, %v2484_v35  ;;  %v9407_v35 = vsel %vm9375_vm10, 1, %v24394_v3  ;;  %vm9378_vm10 = vcmp.ge.s32.totalorder %v18709_v58, 3 }
  0x9f   : > { %v19104_v26 = vpop.permute.xlu1 %1059  ;;  %v19106_v38 = vpop.permute.xlu0 %1056  ;;  %16229 = vmatprep.mubr.msk.f32.mxu1 %vm500_vm12, %v2485_v55  ;;  %v2456_v55 = vld [vmem:[%s18592_s30 + $0xfa] sm:$0xff]  ;;  %v9410_v58 = vsel %vm9378_vm10, 1, %v24394_v3 }
  0xa0   : > { %24866 = vst [vmem:[#allocation11_spill] sm:$0xff] %v19104_v26  ;;  %24867 = vst [vmem:[#allocation12_spill] sm:$0xff] %v19106_v38  ;;  %vm24381_vm11 = vcmp.eq.s32.totalorder %v19106_v38, 1  ;;  %5225 = vperm.xlu1 %18258, %v5182_v56   ;;  %5222 = vperm.xlu0 %18257, %v5181_v46   ;;  %vm24383_vm15 = vcmp.eq.s32.totalorder %v19104_v26, 1  ;;  %v2457_v56 = vld [vmem:[%s18592_s30 + $0x102] sm:$0xff]  ;;  %v5184_v38 = vsel %vm5152_vm0, 1, %v24394_v3 }
  0xa1   : > { %v2487_v53 = vsel %vm24381_vm11, %v2455_v7, 0.0  ;;  %v2488_v7 = vsel %vm24383_vm15, %v2456_v55, 0.0  ;;  %vm9377_vm11 = vcmp.ge.s32.totalorder %v18714_v59, 3  ;;  %vm5153_vm15 = vcmp.ge.s32.totalorder %v18738_v6, 2 }
  0xa2   : > { %16230 = vmatmul.mubr.msk.f32.gmra.mrb[6].mxu1 %vm500_vm12, %v2486_v52  ;;  %v9409_v59 = vsel %vm9377_vm11, 1, %v24394_v3 }
  0xa3   : > { %v19124_v46 = vpop.permute.xlu1 %1065  ;;  %v19126_v47 = vpop.permute.xlu0 %1062  ;;  %16232 = vmatprep.mubr.msk.f32.mxu1 %vm500_vm12, %v2487_v53  ;;  %v2459_v53 = vld [vmem:[%s18592_s30 + $0x112] sm:$0xff] }
  0xa4   : > { %24868 = vst [vmem:[#allocation13_spill] sm:$0xff] %v19124_v46  ;;  %24869 = vst [vmem:[#allocation14_spill] sm:$0xff] %v19126_v47  ;;  %vm24382_vm4 = vcmp.eq.s32.totalorder %v19126_v47, 1  ;;  %9451 = vperm.xlu1 %18258, %v9408_v27   ;;  %9448 = vperm.xlu0 %18257, %v9407_v35   ;;  %vm24389_vm7 = vcmp.eq.s32.totalorder %v19124_v46, 1  ;;  %v19175_v46 = vld [vmem:[%s18592_s30 + $0x4c] sm:$0xff] }
  0xa5   : > { %v2489_v52 = vsel %vm24382_vm4, %v2457_v56, 0.0  ;;  %v2490_v55 = vsel %vm24389_vm7, %v2458_v34, 0.0  ;;  %vm5154_vm4 = vcmp.ge.s32.totalorder %v18733_v5, 2  ;;  %vm9379_vm7 = vcmp.ge.s32.totalorder %v18738_v6, 3 }
  0xa6   : > { %16233 = vmatmul.mubr.msk.f32.gmra.mrb[8].mxu1 %vm500_vm12, %v2488_v7  ;;  %v2460_v7 = vld [vmem:[%s18592_s30 + $0x11a] sm:$0xff] }
  0xa7   : > { %v19142_v27 = vpop.permute.xlu1 %1071  ;;  %v19144_v35 = vpop.permute.xlu0 %1068  ;;  %16235 = vmatprep.mubr.msk.f32.mxu1 %vm500_vm12, %v2489_v52  ;;  %v2461_v52 = vld [vmem:[%s18592_s30 + $0x122] sm:$0xff] }
  0xa8   : > { %24870 = vst [vmem:[#allocation15_spill] sm:$0xff] %v19142_v27  ;;  %24871 = vst [vmem:[#allocation16_spill] sm:$0xff] %v19144_v35  ;;  %vm24388_vm0 = vcmp.eq.s32.totalorder %v19144_v35, 1  ;;  %5231 = vperm.xlu1 %18258, %v5184_v38   ;;  %5228 = vperm.xlu0 %18257, %v5183_v28   ;;  %vm24392_vm3 = vcmp.eq.s32.totalorder %v19142_v27, 1  ;;  %v5185_v35 = vsel %vm5153_vm15, 1, %v24394_v3  ;;  %vm5156_vm15 = vcmp.ge.s32.totalorder %v18757_v17, 2 }
  0xa9   : > { %v2491_v56 = vsel %vm24388_vm0, %v2459_v53, 0.0  ;;  %v2492_v38 = vsel %vm24392_vm3, %v2460_v7, 0.0  ;;  %vm9380_vm0 = vcmp.ge.s32.totalorder %v18733_v5, 3  ;;  %vm5159_vm3 = vcmp.ge.s32.totalorder %v18810_v49, 2 }
  0xaa   : > { %16236 = vmatmul.mubr.msk.f32.gmra.mrb[10].mxu1 %vm500_vm12, %v2490_v55  ;;  %v5186_v55 = vsel %vm5154_vm4, 1, %v24394_v3  ;;  %v9412_v6 = vsel %vm9380_vm0, 1, %v24394_v3  ;;  %vm9381_vm0 = vcmp.ge.s32.totalorder %v18762_v18, 3 }
  0xab   : > { %v19160_v28 = vpop.permute.xlu1 %1077  ;;  %v19162_v34 = vpop.permute.xlu0 %1074  ;;  %16238 = vmatprep.mubr.msk.f32.mxu1 %vm500_vm12, %v2491_v56  ;;  %v2462_v56 = vld [vmem:[%s18592_s30 + $0x12a] sm:$0xff] }
  0xac   : > { %24872 = vst [vmem:[#allocation17_spill] sm:$0xff] %v19160_v28  ;;  %24873 = vst [vmem:[#allocation18_spill] sm:$0xff] %v19162_v34  ;;  %vm24390_vm11 = vcmp.eq.s32.totalorder %v19162_v34, 1  ;;  %9457 = vperm.xlu1 %18258, %v9410_v58   ;;  %9454 = vperm.xlu0 %18257, %v9409_v59   ;;  %vm24391_vm10 = vcmp.eq.s32.totalorder %v19160_v28, 1 }
  0xad   : > { %v2493_v53 = vsel %vm24390_vm11, %v2461_v52, 0.0  ;;  %v2494_v5 = vsel %vm24391_vm10, %v2462_v56, 0.0  ;;  %v9411_v52 = vsel %vm9379_vm7, 1, %v24394_v3  ;;  %vm5155_vm11 = vcmp.ge.s32.totalorder %v18762_v18, 2  ;;  %v19213_v56 = vld [vmem:[%s24366_s4 + $0x30] sm:$0xff] }
  0xae   : > { %16239 = vmatmul.mubr.msk.f32.gmra.mrb[12].mxu1 %vm500_vm12, %v2492_v38  ;;  %vm9382_vm7 = vcmp.ge.s32.totalorder %v18757_v17, 3  ;;  %v9413_v17 = vsel %vm9381_vm0, 1, %v24394_v3  ;;  %vm9384_vm0 = vcmp.ge.s32.totalorder %v18781_v25, 3  ;;  %vm9383_vm10 = vcmp.ge.s32.totalorder %v18786_v29, 3 }
  0xaf   : > { %v19180_v58 = vpop.permute.xlu1 %1920  ;;  %v19182_v59 = vpop.permute.xlu0 %1917  ;;  %16241 = vmatprep.mubr.msk.f32.mxu1 %vm500_vm12, %v2493_v53  ;;  %v5188_v53 = vsel %vm5156_vm15, 1, %v24394_v3  ;;  %vm5157_vm15 = vcmp.ge.s32.totalorder %v18786_v29, 2 }
  0xb0   : > { %vm2013_vm4 = vcmp.eq.s32.totalorder %v19180_v58, 1  ;;  %5237 = vperm.xlu1 %18258, %v5186_v55   ;;  %5234 = vperm.xlu0 %18257, %v5185_v35   ;;  %v5187_v55 = vsel %vm5155_vm11, 1, %v24394_v3  ;;  %vm5158_vm11 = vcmp.ge.s32.totalorder %v18781_v25, 2  ;;  %v9415_v25 = vsel %vm9383_vm10, 1, %v24394_v3 }
  0xb1   : > { %v19189_v7 = vsel %vm2013_vm4, %v19175_v46, 0.0 }
  0xb2   : > { %24874 = vst [vmem:[#allocation19_spill] sm:$0xff] %v19189_v7  ;;  %16242 = vmatmul.mubr.msk.f32.gmra.mrb[14].mxu1 %vm500_vm12, %v2494_v5  ;;  %v24890_v7 = vmov 0  }
  0xb3   : > { %v19198_v38 = vpop.permute.xlu1 %1926  ;;  %v19200_v35 = vpop.permute.xlu0 %1923  ;;  %16246 = vmatprep.mubr.msk.f32.mxu1 %vm500_vm12, %v18597_v31 }
  0xb4   : > { %24875 = vst [vmem:[#allocation20_spill] sm:$0xff] %v19198_v38  ;;  %9463 = vperm.xlu1 %18258, %v9412_v6   ;;  %9460 = vperm.xlu0 %18257, %v9411_v52   ;;  %v5189_v6 = vsel %vm5157_vm15, 1, %v24394_v3  ;;  %vm5160_vm15 = vcmp.ge.s32.totalorder %v18805_v44, 2  ;;  %vm24450_vm13 = vcmp.eq.s32.totalorder %v19198_v38, 1 }
  0xb6   : > { %16247 = vmatmul.mubr.msk.f32.vlgmr.msra.gmra.mrb[16].mxu1 %vm500_vm12, %v18600_v32  ;;  %v9414_v32 = vsel %vm9382_vm7, 1, %v24394_v3 }
  0xb7   : > { %16295 = vmatpush3.msra.mxu1 %v19055_v16  ;;  %v19216_v31 = vpop.permute.xlu1 %1932  ;;  %v19218_v5 = vpop.permute.xlu0 %1929  ;;  %16249 = vmatprep.mubr.msk.f32.mxu1 %vm500_vm12, %v18608_v33  ;;  %v19237_v33 = vld [vmem:[%s18592_s30 + $0x5c] sm:$0xff] }
  0xb8   : > { %24876 = vst [vmem:[#allocation21_spill] sm:$0xff] %v19216_v31  ;;  %24877 = vst [vmem:[#allocation22_spill] sm:$0xff] %v19218_v5  ;;  %5243 = vperm.xlu1 %18258, %v5188_v53   ;;  %5240 = vperm.xlu0 %18257, %v5187_v55   ;;  %v19258_v55 = vld [vmem:[%s18592_s30 + $0x6c] sm:$0xff] }
  0xb9   : > { %16344 = vmatprep.subr.mxu1 %v19213_v56 }
  0xba   : > { %16250 = vmatmul.mubr.msk.f32.gmra.mrb[18].mxu1 %vm500_vm12, %v18623_v36  ;;  %v5190_v36 = vsel %vm5158_vm11, 1, %v24394_v3 }
  0xbb   : > { %v19229_v18 = vpop.permute.xlu1 %1938  ;;  %v19231_v16 = vpop.permute.xlu0 %1935  ;;  %16252 = vmatprep.mubr.msk.f32.mxu1 %vm500_vm12, %v18632_v39 }
  0xbc   : > { %24878 = vst [vmem:[#allocation23_spill] sm:$0xff] %v19229_v18  ;;  %24879 = vst [vmem:[#allocation24_spill] sm:$0xff] %v19231_v16  ;;  %vm24468_vm7 = vcmp.eq.s32.totalorder %v19229_v18, 1  ;;  %9469 = vperm.xlu1 %18258, %v9414_v32   ;;  %9466 = vperm.xlu0 %18257, %v9413_v17   ;;  %v19279_v17 = vld [vmem:[%s18592_s30 + $0x7c] sm:$0xff] }
  0xbd   : > { %v19244_v52 = vsel %vm24468_vm7, %v19237_v33, 0.0 }
  0xbe   : > { %24880 = vst [vmem:[#allocation25_spill] sm:$0xff] %v19244_v52  ;;  %16253 = vmatmul.mubr.msk.f32.gmra.mrb[20].mxu1 %vm500_vm12, %v18647_v42  ;;  %v9416_v42 = vsel %vm9384_vm0, 1, %v24394_v3  ;;  %vm9386_vm0 = vcmp.ge.s32.totalorder %v18805_v44, 3  ;;  %v9417_v44 = vsel %vm9385_vm6, 1, %v24394_v3 }
  0xbf   : > { %v19250_v39 = vpop.permute.xlu1 %1944  ;;  %v19252_v53 = vpop.permute.xlu0 %1941  ;;  %16255 = vmatprep.mubr.msk.f32.mxu1 %vm500_vm12, %v18656_v45 }
  0xc0   : > { %24881 = vst [vmem:[#allocation26_spill] sm:$0xff] %v19250_v39  ;;  %24882 = vst [vmem:[#allocation27_spill] sm:$0xff] %v19252_v53  ;;  %vm24475_vm11 = vcmp.eq.s32.totalorder %v19250_v39, 1  ;;  %5249 = vperm.xlu1 %18258, %v5190_v36   ;;  %5246 = vperm.xlu0 %18257, %v5189_v6   ;;  %v5191_v36 = vsel %vm5159_vm3, 1, %v24394_v3 }
  0xc1   : > { %v19265_v29 = vsel %vm24475_vm11, %v19258_v55, 0.0 }
  0xc2   : > { %24883 = vst [vmem:[#allocation28_spill] sm:$0xff] %v19265_v29  ;;  %16256 = vmatmul.mubr.msk.f32.gmra.mrb[22].mxu1 %vm500_vm12, %v18671_v48  ;;  %v5192_v48 = vsel %vm5160_vm15, 1, %v24394_v3 }
  0xc3   : > { %v19271_v45 = vpop.permute.xlu1 %1950  ;;  %v19273_v32 = vpop.permute.xlu0 %1947  ;;  %16258 = vmatprep.mubr.msk.f32.mxu1 %vm500_vm12, %v18680_v51 }
  0xc4   : > { %24884 = vst [vmem:[#allocation29_spill] sm:$0xff] %v19271_v45  ;;  %24885 = vst [vmem:[#allocation30_spill] sm:$0xff] %v19273_v32  ;;  %vm24491_vm10 = vcmp.eq.s32.totalorder %v19271_v45, 1  ;;  %9475 = vperm.xlu1 %18258, %v9416_v42   ;;  %9472 = vperm.xlu0 %18257, %v9415_v25   ;;  %v19300_v25 = vld [vmem:[%s18592_s30 + $0x8c] sm:$0xff] }
  0xc5   : > { %v19286_v6 = vsel %vm24491_vm10, %v19279_v17, 0.0 }
  0xc6   : > { %24886 = vst [vmem:[#allocation31_spill] sm:$0xff] %v19286_v6  ;;  %16259 = vmatmul.mubr.msk.f32.gmra.mrb[24].mxu1 %vm500_vm12, %v18695_v54  ;;  %v9418_v54 = vsel %vm9386_vm0, 1, %v24394_v3 }
  0xc7   : > { %v19292_v51 = vpop.permute.xlu1 %1956  ;;  %v19294_v42 = vpop.permute.xlu0 %1953  ;;  %16261 = vmatprep.mubr.msk.f32.mxu1 %vm500_vm12, %v18704_v57  ;;  %v18259_v57 = vld [vmem:[%s24363_s1 + $0x88] sm:$0xff] }
  0xc8   : > { %24887 = vst [vmem:[#allocation32_spill] sm:$0xff] %v19292_v51  ;;  %vm24497_vm3 = vcmp.eq.s32.totalorder %v19292_v51, 1  ;;  %5255 = vperm.xlu1 %18258, %v5192_v48   ;;  %5252 = vperm.xlu0 %18257, %v5191_v36   ;;  %vm5162_vm15 = vcmp.ge.s32.totalorder %v18259_v57, 2  ;;  %v18260_v48 = vld [vmem:[%s24363_s1 + $0x80] sm:$0xff]  ;;  %vm9388_vm5 = vcmp.ge.s32.totalorder %v18259_v57, 3 }
  0xc9   : > { %v19307_v49 = vsel %vm24497_vm3, %v19300_v25, 0.0  ;;  %vm5161_vm0 = vcmp.ge.s32.totalorder %v18260_v48, 2  ;;  %vm9387_vm2 = vcmp.ge.s32.totalorder %v18260_v48, 3 }
  0xca   : > { %24888 = vst [vmem:[#allocation33_spill] sm:$0xff] %v19307_v49  ;;  %16262 = vmatmul.mubr.msk.f32.gmra.mrb[26].mxu1 %vm500_vm12, %v18719_v60  ;;  %v19325_v60 = vld [vmem:[%s18592_s30 + $0x9c] sm:$0xff]  ;;  %v5194_v49 = vsel %vm5162_vm15, 1, %v24890_v7  ;;  %v5193_v6 = vsel %vm5161_vm0, 1, %v24890_v7 }
  0xcb   : > { %v19317_v36 = vpop.permute.xlu1 %1962  ;;  %v19319_v3 = vpop.permute.xlu0 %1959  ;;  %16264 = vmatprep.mubr.msk.f32.mxu1 %vm500_vm12, %v18728_v63 }
  0xcc   : > { %24889 = vst [vmem:[#allocation34_spill] sm:$0xff] %v19317_v36  ;;  %vm24421_vm6 = vcmp.eq.s32.totalorder %v19317_v36, 1  ;;  %9481 = vperm.xlu1 %18258, %v9418_v54   ;;  %9478 = vperm.xlu0 %18257, %v9417_v44   ;;  %v19344_v44 = vld [vmem:[%s18592_s30 + $0xac] sm:$0xff] }
  0xcd   : > { %v19332_v29 = vsel %vm24421_vm6, %v19325_v60, 0.0  ;;  %vm24430_vm6 = vcmp.eq.s32.totalorder %v19182_v59, 1 }
  0xce   : > { %24891 = vst [vmem:[#allocation35_spill] sm:$0xff] %v19332_v29  ;;  %16265 = vmatmul.mubr.msk.f32.gmra.mrb[28].mxu1 %vm500_vm12, %v18743_v9  ;;  %v9420_v29 = vsel %vm9388_vm5, 1, %v24890_v7  ;;  %v9419_v9 = vsel %vm9387_vm2, 1, %v24890_v7 }
  0xcf   : > { %v19336_v63 = vpop.permute.xlu1 %1968  ;;  %v19338_v54 = vpop.permute.xlu0 %1965  ;;  %16267 = vmatprep.mubr.msk.f32.mxu1 %vm500_vm12, %v18752_v14  ;;  %v18261_v14 = vld [vmem:[%s24363_s1 + $0x98] sm:$0xff] }
  0xd0   : > { %24892 = vst [vmem:[#allocation36_spill] sm:$0xff] %v19336_v63  ;;  %vm24400_vm15 = vcmp.eq.s32.totalorder %v19336_v63, 1  ;;  %5261 = vperm.xlu1 %18258, %v5194_v49   ;;  %5258 = vperm.xlu0 %18257, %v5193_v6   ;;  %vm5164_vm0 = vcmp.ge.s32.totalorder %v18261_v14, 2  ;;  %v18262_v6 = vld [vmem:[%s24363_s1 + $0x90] sm:$0xff] }
  0xd1   : > { %v19351_v57 = vsel %vm24400_vm15, %v19344_v44, 0.0  ;;  %vm5163_vm5 = vcmp.ge.s32.totalorder %v18262_v6, 2  ;;  %vm9390_vm15 = vcmp.ge.s32.totalorder %v18261_v14, 3  ;;  %vm9389_vm1 = vcmp.ge.s32.totalorder %v18262_v6, 3 }
  0xd2   : > { %24893 = vst [vmem:[#allocation37_spill] sm:$0xff] %v19351_v57  ;;  %16268 = vmatmul.mubr.msk.f32.gmra.mrb[30].mxu1 %vm500_vm12, %v18767_v21  ;;  %v19369_v21 = vld [vmem:[%s18592_s30 + $0xbc] sm:$0xff]  ;;  %v5196_v57 = vsel %vm5164_vm0, 1, %v24890_v7  ;;  %v5195_v52 = vsel %vm5163_vm5, 1, %v24890_v7 }
  0xd3   : > { %v19361_v49 = vpop.permute.xlu1 %1974  ;;  %v19363_v48 = vpop.permute.xlu0 %1971  ;;  %16270 = vmatprep.mubr.msk.f32.mxu1 %vm500_vm12, %v18776_v24 }
  0xd4   : > { %24894 = vst [vmem:[#allocation38_spill] sm:$0xff] %v19361_v49  ;;  %vm24407_vm2 = vcmp.eq.s32.totalorder %v19361_v49, 1  ;;  %9487 = vperm.xlu1 %18258, %v9420_v29   ;;  %9484 = vperm.xlu0 %18257, %v9419_v9   ;;  %v19388_v9 = vld [vmem:[%s18592_s30 + $0xcc] sm:$0xff] }
  0xd5   : > { %v19376_v28 = vsel %vm24407_vm2, %v19369_v21, 0.0 }
  0xd6   : > { %24895 = vst [vmem:[#allocation39_spill] sm:$0xff] %v19376_v28  ;;  %16271 = vmatmul.mubr.msk.f32.gmra.mrb[0].mxu1 %vm500_vm12, %v18791_v30  ;;  %v9422_v28 = vsel %vm9390_vm15, 1, %v24890_v7  ;;  %v9421_v30 = vsel %vm9389_vm1, 1, %v24890_v7 }
  0xd7   : > { %v19380_v24 = vpop.permute.xlu1 %1980  ;;  %v19382_v29 = vpop.permute.xlu0 %1977  ;;  %16273 = vmatprep.mubr.msk.f32.mxu1 %vm500_vm12, %v18800_v43  ;;  %v18263_v43 = vld [vmem:[%s24363_s1 + $0xa8] sm:$0xff] }
  0xd8   : > { %24896 = vst [vmem:[#allocation40_spill] sm:$0xff] %v19380_v24  ;;  %vm24406_vm0 = vcmp.eq.s32.totalorder %v19380_v24, 1  ;;  %5267 = vperm.xlu1 %18258, %v5196_v57   ;;  %5264 = vperm.xlu0 %18257, %v5195_v52   ;;  %vm5166_vm5 = vcmp.ge.s32.totalorder %v18263_v43, 2  ;;  %v18264_v52 = vld [vmem:[%s24363_s1 + $0xa0] sm:$0xff] }
  0xd9   : > { %v19395_v14 = vsel %vm24406_vm0, %v19388_v9, 0.0  ;;  %vm5165_vm15 = vcmp.ge.s32.totalorder %v18264_v52, 2  ;;  %vm9392_vm0 = vcmp.ge.s32.totalorder %v18263_v43, 3  ;;  %vm9391_vm2 = vcmp.ge.s32.totalorder %v18264_v52, 3 }
  0xda   : > { %24897 = vst [vmem:[#allocation41_spill] sm:$0xff] %v19395_v14  ;;  %16274 = vmatmul.mubr.msk.f32.gmra.mrb[2].mxu1 %vm500_vm12, %v18815_v50  ;;  %v19413_v50 = vld [vmem:[%s18592_s30 + $0xdc] sm:$0xff]  ;;  %v5198_v14 = vsel %vm5166_vm5, 1, %v24890_v7  ;;  %v5197_v34 = vsel %vm5165_vm15, 1, %v24890_v7 }
  0xdb   : > { %v19405_v57 = vpop.permute.xlu1 %1986  ;;  %v19407_v6 = vpop.permute.xlu0 %1983  ;;  %16276 = vmatprep.mubr.msk.f32.mxu1 %vm500_vm12, %v18824_v61 }
  0xdc   : > { %24898 = vst [vmem:[#allocation42_spill] sm:$0xff] %v19405_v57  ;;  %vm24413_vm1 = vcmp.eq.s32.totalorder %v19405_v57, 1  ;;  %9493 = vperm.xlu1 %18258, %v9422_v28   ;;  %9490 = vperm.xlu0 %18257, %v9421_v30   ;;  %v19432_v30 = vld [vmem:[%s18592_s30 + $0xec] sm:$0xff] }
  0xdd   : > { %v19420_v27 = vsel %vm24413_vm1, %v19413_v50, 0.0 }
  0xde   : > { %24899 = vst [vmem:[#allocation43_spill] sm:$0xff] %v19420_v27  ;;  %16277 = vmatmul.mubr.msk.f32.gmra.mrb[4].mxu1 %vm500_vm12, %v18829_v62  ;;  %v9424_v27 = vsel %vm9392_vm0, 1, %v24890_v7  ;;  %v9423_v62 = vsel %vm9391_vm2, 1, %v24890_v7 }
  0xdf   : > { %v19424_v61 = vpop.permute.xlu1 %1992  ;;  %v19426_v28 = vpop.permute.xlu0 %1989  ;;  %16279 = vmatprep.mubr.msk.f32.mxu1 %vm500_vm12, %v18838_v22  ;;  %v18265_v22 = vld [vmem:[%s24363_s1 + $0xb8] sm:$0xff] }
  0xe0   : > { %24900 = vst [vmem:[#allocation44_spill] sm:$0xff] %v19424_v61  ;;  %vm24412_vm5 = vcmp.eq.s32.totalorder %v19424_v61, 1  ;;  %5273 = vperm.xlu1 %18258, %v5198_v14   ;;  %5270 = vperm.xlu0 %18257, %v5197_v34   ;;  %vm5168_vm15 = vcmp.ge.s32.totalorder %v18265_v22, 2  ;;  %v18266_v34 = vld [vmem:[%s24363_s1 + $0xb0] sm:$0xff] }
  0xe1   : > { %v19439_v43 = vsel %vm24412_vm5, %v19432_v30, 0.0  ;;  %vm5167_vm0 = vcmp.ge.s32.totalorder %v18266_v34, 2  ;;  %vm9394_vm5 = vcmp.ge.s32.totalorder %v18265_v22, 3  ;;  %vm9393_vm1 = vcmp.ge.s32.totalorder %v18266_v34, 3  ;;  %v19501_v22 = vld [vmem:[%s18592_s30 + $0x11c] sm:$0xff] }
  0xe2   : > { %24901 = vst [vmem:[#allocation45_spill] sm:$0xff] %v19439_v43  ;;  %16280 = vmatmul.mubr.msk.f32.gmra.mrb[6].mxu1 %vm500_vm12, %v18843_v23  ;;  %v19457_v23 = vld [vmem:[%s18592_s30 + $0xfc] sm:$0xff]  ;;  %v5200_v43 = vsel %vm5168_vm15, 1, %v24890_v7  ;;  %v5199_v61 = vsel %vm5167_vm0, 1, %v24890_v7  ;;  %24911 = vst [vmem:[#allocation55_spill] sm:$0xff] %v19501_v22 }
  0xe3   : > { %v19449_v14 = vpop.permute.xlu1 %1998  ;;  %v19451_v52 = vpop.permute.xlu0 %1995  ;;  %16282 = vmatprep.mubr.msk.f32.mxu1 %vm500_vm12, %v18852_v1 }
  0xe4   : > { %24902 = vst [vmem:[#allocation46_spill] sm:$0xff] %v19449_v14  ;;  %24903 = vst [vmem:[#allocation47_spill] sm:$0xff] %v19451_v52  ;;  %vm24416_vm2 = vcmp.eq.s32.totalorder %v19449_v14, 1  ;;  %9499 = vperm.xlu1 %18258, %v9424_v27   ;;  %9496 = vperm.xlu0 %18257, %v9423_v62   ;;  %v9426_v62 = vsel %vm9394_vm5, 1, %v24890_v7  ;;  %v19478_v14 = vld [vmem:[%s18592_s30 + $0x10c] sm:$0xff] }
  0xe5   : > { %v19464_v57 = vsel %vm24416_vm2, %v19457_v23, 0.0  ;;  %24907 = vst [vmem:[#allocation51_spill] sm:$0xff] %v19478_v14 }
  0xe6   : > { %24904 = vst [vmem:[#allocation48_spill] sm:$0xff] %v19464_v57  ;;  %16283 = vmatmul.mubr.msk.f32.gmra.mrb[8].mxu1 %vm500_vm12, %v18857_v4  ;;  %v9425_v57 = vsel %vm9393_vm1, 1, %v24890_v7  ;;  %v18267_v4 = vld [vmem:[%s24363_s1 + $0xc8] sm:$0xff] }
  0xe7   : > { %v19468_v1 = vpop.permute.xlu1 %2004  ;;  %v19470_v27 = vpop.permute.xlu0 %2001  ;;  %16285 = vmatprep.mubr.msk.f32.mxu1 %vm500_vm12, %v18866_v0  ;;  %vm5170_vm0 = vcmp.ge.s32.totalorder %v18267_v4, 2  ;;  %v18268_v0 = vld [vmem:[%s24363_s1 + $0xc0] sm:$0xff]  ;;  %vm9396_vm5 = vcmp.ge.s32.totalorder %v18267_v4, 3  ;;  %v889_v4 = vld [vmem:[%s18592_s30 + $0x32] sm:$0xff] }
  0xe8   : > { %24905 = vst [vmem:[#allocation49_spill] sm:$0xff] %v19468_v1  ;;  %24906 = vst [vmem:[#allocation50_spill] sm:$0xff] %v19470_v27  ;;  %vm24420_vm15 = vcmp.eq.s32.totalorder %v19468_v1, 1  ;;  %5279 = vperm.xlu1 %18258, %v5200_v43   ;;  %5276 = vperm.xlu0 %18257, %v5199_v61   ;;  %vm5169_vm2 = vcmp.ge.s32.totalorder %v18268_v0, 2  ;;  %v5202_v34 = vsel %vm5170_vm0, 1, %v24890_v7  ;;  %v3238_v27 = vld [vmem:[%s18592_s30 + $0x3c] sm:$0xff] }
  0xe9   : > { %v19491_v61 = vsel %vm24420_vm15, %v19478_v14, 0.0  ;;  %v5201_v1 = vsel %vm5169_vm2, 1, %v24890_v7  ;;  %vm9395_vm15 = vcmp.ge.s32.totalorder %v18268_v0, 3 }
  0xea   : > { %16286 = vmatmul.mubr.msk.f32.gmra.mrb[10].mxu1 %vm500_vm12, %v18871_v2  ;;  %24908 = vst [vmem:[#allocation52_spill] sm:$0xff] %v19491_v61 }
  0xeb   : > { %v19493_v43 = vpop.permute.xlu1 %2010  ;;  %v19495_v2 = vpop.permute.xlu0 %2007  ;;  %16288 = vmatprep.mubr.msk.f32.mxu1 %vm500_vm12, %v18883_v8  ;;  %v888_v8 = vld [vmem:[%s18592_s30 + $0x2a] sm:$0xff] }
  0xec   : > { %24909 = vst [vmem:[#allocation53_spill] sm:$0xff] %v19493_v43  ;;  %24910 = vst [vmem:[#allocation54_spill] sm:$0xff] %v19495_v2  ;;  %vm24429_vm1 = vcmp.eq.s32.totalorder %v19493_v43, 1  ;;  %9505 = vperm.xlu1 %18258, %v9426_v62   ;;  %9502 = vperm.xlu0 %18257, %v9425_v57   ;;  %v2432_v2 = vld [vmem:[%s18592_s30 + $0x3a] sm:$0xff]  ;;  %v887_v62 = vld [vmem:[%s18592_s30 + $0x22] sm:$0xff] }
  0xed   : > { %v19508_v61 = vsel %vm24429_vm1, %v19501_v22, 0.0  ;;  %v3237_v43 = vld [vmem:[%s18592_s30 + $0x34] sm:$0xff]  ;;  %v9427_v22 = vsel %vm9395_vm15, 1, %v24890_v7 }
  0xee   : > { %24912 = vst [vmem:[#allocation56_spill] sm:$0xff] %v19508_v61  ;;  %16289 = vmatmul.mubr.msk.f32.gmra.mrb[12].mxu1 %vm500_vm12, %v18888_v37  ;;  %v9428_v37 = vsel %vm9396_vm5, 1, %v24890_v7 }
  0xef   : > { %v19516_v57 = vpop.permute.xlu1 %987  ;;  %v19518_v14 = vpop.permute.xlu0 %984  ;;  %16291 = vmatprep.mubr.msk.f32.mxu1 %vm500_vm12, %v18897_v11 }
  0xf0   : > { %24913 = vst [vmem:[#allocation57_spill] sm:$0xff] %v19516_v57  ;;  %vm24427_vm2 = vcmp.eq.s32.totalorder %v19516_v57, 1  ;;  %vm24428_vm0 = vcmp.eq.s32.totalorder %v19518_v14, 1  ;;  %5285 = vperm.xlu1 %18258, %v5202_v34   ;;  %5282 = vperm.xlu0 %18257, %v5201_v1   ;;  %v3269_v1 = vsel %vm24430_vm6, %v3237_v43, 0.0  ;;  %v18269_v34 = vld [vmem:[%s24363_s1 + $0xd8] sm:$0xff] }
  0xf1   : > { %v1112_v0 = vsel %vm24427_vm2, %v888_v8, 0.0  ;;  %v19531_v61 = vsel %vm24427_vm2, %v2432_v2, 0.0  ;;  %v1111_v11 = vsel %vm24428_vm0, %v887_v62, 0.0  ;;  %vm5172_vm5 = vcmp.ge.s32.totalorder %v18269_v34, 2  ;;  %v19562_v43 = vld [vmem:[%s24365_s3] ss:$0 sm:$0xff] }
  0xf2   : > { %24914 = vst [vmem:[#allocation58_spill] sm:$0xff] %v19531_v61  ;;  %16096 = vmatprep.mubr.msk.f32.mxu0 %vm500_vm12, %v1111_v11  ;;  %16292 = vmatmul.mubr.msk.f32.gmra.mrb[14].mxu1 %vm500_vm12, %v18902_v12  ;;  %v3239_v11 = vld [vmem:[%s18592_s30 + $0x44] sm:$0xff]  ;;  %v18270_v12 = vld [vmem:[%s24363_s1 + $0xd0] sm:$0xff]  ;;  %vm9398_vm2 = vcmp.ge.s32.totalorder %v18269_v34, 3  ;;  %vm24440_vm0 = vcmp.eq.s32.totalorder %v19200_v35, 1 }
  0xf3   : > { %v19546_v8 = vpop.permute.xlu1 %993  ;;  %v19548_v62 = vpop.permute.xlu0 %990  ;;  %16097 = vmatmul.mubr.msk.f32.vlgmr.msra.gmra.mrb[32].mxu0 %vm500_vm12, %v1112_v0  ;;  %16296 = vmatprep.mubr.msk.f32.mxu1 %vm500_vm12, %v3269_v1  ;;  %vm5171_vm15 = vcmp.ge.s32.totalorder %v18270_v12, 2  ;;  %vm9397_vm14 = vcmp.ge.s32.totalorder %v18270_v12, 3  ;;  %v3270_v0 = vsel %vm2013_vm4, %v3238_v27, 0.0  ;;  %v3271_v34 = vsel %vm24440_vm0, %v3239_v11, 0.0  ;;  %v19611_v11 = vld [vmem:[%s24363_s1 + $0xe0] sm:$0xff] }
  0xf4   : > { %24915 = vst [vmem:[#allocation59_spill] sm:$0xff] %v19546_v8  ;;  %24916 = vst [vmem:[#allocation60_spill] sm:$0xff] %v19548_v62  ;;  %vm24438_vm1 = vcmp.eq.s32.totalorder %v19546_v8, 1  ;;  %vm24439_vm6 = vcmp.eq.s32.totalorder %v19548_v62, 1  ;;  %9511 = vperm.xlu1 %18258, %v9428_v37   ;;  %9508 = vperm.xlu0 %18257, %v9427_v22   ;;  %v5204_v37 = vsel %vm5172_vm5, 1, %v24890_v7  ;;  %v5203_v27 = vsel %vm5171_vm15, 1, %v24890_v7 }
  0xf5   : > { %v1113_v1 = vsel %vm24439_vm6, %v889_v4, 0.0  ;;  %v1114_v61 = vsel %vm24438_vm1, %v2432_v2, 0.0  ;;  %16145 = vmatpush3.msra.mxu0 %v19044_v10  ;;  %v9430_v22 = vsel %vm9398_vm2, 1, %v24890_v7  ;;  %v14333_v2 = vld [vmem:[%s24366_s4 + $0x38] sm:$0xff]  ;;  %v15998_v4 = vpop.f32.mrb[0].mxu0  ;;  %vm24449_vm5 = vcmp.eq.s32.totalorder %v19218_v5, 1 }
  0xf6   : > { %16099 = vmatprep.mubr.msk.f32.mxu0 %vm500_vm12, %v1113_v1  ;;  %16297 = vmatmul.mubr.msk.f32.vlgmr.msra.gmra.mrb[16].mxu1 %vm500_vm12, %v3270_v0  ;;  %v19585_v10 = vld [vmem:[%s18592_s30 + $0x4a] sm:$0xff]  ;;  %v3241_v8 = vld [vmem:[%s18592_s30 + $0x54] sm:$0xff]  ;;  %v9429_v62 = vsel %vm9397_vm14, 1, %v24890_v7  ;;  %v669_v57 = vadd.f32 %v15998_v4, %v19562_v43  ;;  %vm5173_vm14 = vcmp.ge.s32.totalorder %v19611_v11, 2  ;;  %v663_v12 = vpop.f32.mrb[1].mxu0  ;;  %v3272_v4 = vsel %vm24450_vm13, %v19175_v46, 0.0 }
  0xf7   : > { %24917 = vst [vmem:[#allocation61_spill] sm:$0xff] %v19585_v10  ;;  %16345 = vmatpush3.msra.mxu1 %v19213_v56  ;;  %v19588_v1 = vpop.permute.xlu1 %999  ;;  %v19590_v0 = vpop.permute.xlu0 %996  ;;  %16100 = vmatmul.mubr.msk.f32.gmra.mrb[34].mxu0 %vm500_vm12, %v1114_v61  ;;  %v19603_v56 = vld [vmem:[%s18592_s30 + $0x42] sm:$0xff]  ;;  %vm24579_vm6 = vcmask 130048   ;;  %vm2017_vm0 = vcmp.eq.s32.totalorder %v19216_v31, 1  ;;  %v664_v46 = vadd.f32 %v19562_v43, %v663_v12  ;;  %v19646_v12 = vld [vmem:[%s18592_s30 + $0x5a] sm:$0xff] }
  0xf8   : > { %24918 = vst [vmem:[#allocation62_spill] sm:$0xff] %v19588_v1  ;;  %24919 = vst [vmem:[#allocation63_spill] sm:$0xff] %v19590_v0  ;;  %vm24448_vm2 = vcmp.eq.s32.totalorder %v19588_v1, 1  ;;  %vm24445_vm15 = vcmp.eq.s32.totalorder %v19590_v0, 1  ;;  %16299 = vmatprep.mubr.msk.f32.mxu1 %vm500_vm12, %v3271_v34  ;;  %5291 = vperm.xlu1 %18258, %v5204_v37   ;;  %v18271_v61 = vld [vmem:[%s24363_s1 + $0xe8] sm:$0xff]  ;;  %v823_v0 = vmax.f32 %v669_v57, 0.0 }
  0xf9   : > { %vm5174_vm1 = vcmp.ge.s32.totalorder %v18271_v61, 2  ;;  %5288 = vperm.xlu0 %18257, %v5203_v27   ;;  %v1115_v37 = vsel %vm24445_vm15, %v19603_v56, 0.0  ;;  %v1116_v34 = vsel %vm24448_vm2, %v19585_v10, 0.0  ;;  %16394 = vmatprep.subr.mxu1 %v14333_v2  ;;  %v3273_v27 = vsel %vm24449_vm5, %v3241_v8, 0.0  ;;  %v16001_v38 = vpop.f32.mrb[2].mxu0 }
  0xfa   : > { %16102 = vmatprep.mubr.msk.f32.mxu0 %vm500_vm12, %v1115_v37  ;;  %16300 = vmatmul.mubr.msk.f32.gmra.mrb[18].mxu1 %vm500_vm12, %v3272_v4  ;;  %vm24462_vm15 = vcmp.eq.s32.totalorder %v19231_v16, 1  ;;  %v19637_v37 = vld [vmem:[%s18592_s30 + $0x52] sm:$0xff]  ;;  %v3243_v4 = vld [vmem:[%s18592_s30 + $0x64] sm:$0xff]  ;;  %v5206_v8 = vsel %vm5174_vm1, 1, %v24890_v7  ;;  %v679_v57 = vadd.f32 %v16001_v38, %v19562_v43  ;;  %vm9400_vm13 = vcmp.ge.s32.totalorder %v18271_v61, 3  ;;  %856 = vst.msk [vmem:[#allocation2 + $0x8] sm:$0xff] %vm24579_vm6, %v823_v0 }
  0xfb   : > { %v19630_v1 = vpop.permute.xlu1 %1005  ;;  %v19632_v2 = vpop.permute.xlu0 %1002  ;;  %16103 = vmatmul.mubr.msk.f32.gmra.mrb[36].mxu0 %vm500_vm12, %v1116_v34  ;;  %16302 = vmatprep.mubr.msk.f32.mxu1 %vm500_vm12, %v3273_v27  ;;  %v19651_v34 = vld [vmem:[%s24366_s4 + $0x18] sm:$0xff]  ;;  %v822_v27 = vmax.f32 %v664_v46, 0.0  ;;  %v5205_v0 = vsel %vm5173_vm14, 1, %v24890_v7  ;;  %vm9399_vm1 = vcmp.ge.s32.totalorder %v19611_v11, 3  ;;  %v18275_v61 = vld [vmem:[%s24363_s1 + $0xf0] sm:$0xff] }
  0xfc   : > { %24920 = vst [vmem:[#allocation64_spill] sm:$0xff] %v19630_v1  ;;  %24921 = vst [vmem:[#allocation65_spill] sm:$0xff] %v19632_v2  ;;  %vm24456_vm2 = vcmp.eq.s32.totalorder %v19630_v1, 1  ;;  %vm24461_vm5 = vcmp.eq.s32.totalorder %v19632_v2, 1  ;;  %9517 = vperm.xlu1 %18258, %v9430_v22   ;;  %16194 = vmatprep.subr.mxu0 %v19651_v34  ;;  %v673_v5 = vpop.f32.mrb[3].mxu0  ;;  %v3274_v22 = vsel %vm2017_vm0, %v19237_v33, 0.0 }
  0xfd   : > { %9514 = vperm.xlu0 %18257, %v9429_v62   ;;  %v1117_v38 = vsel %vm24461_vm5, %v19637_v37, 0.0  ;;  %v1118_v10 = vsel %vm24456_vm2, %v19646_v12, 0.0  ;;  %v3275_v62 = vsel %vm24462_vm15, %v3243_v4, 0.0  ;;  %855 = vst.msk [vmem:[#allocation2] sm:$0xff] %vm24579_vm6, %v822_v27  ;;  %v825_v33 = vmax.f32 %v679_v57, 0.0  ;;  %v16004_v1 = vpop.f32.mrb[4].mxu0 }
  0xfe   : > { %16105 = vmatprep.mubr.msk.f32.mxu0 %vm500_vm12, %v1117_v38  ;;  %16303 = vmatmul.mubr.msk.f32.gmra.mrb[20].mxu1 %vm500_vm12, %v3274_v22  ;;  %v674_v46 = vadd.f32 %v19562_v43, %v673_v5  ;;  %vm2020_vm2 = vcmp.eq.s32.totalorder %v19252_v53, 1  ;;  %v19682_v4 = vld [vmem:[%s18592_s30 + $0x62] sm:$0xff]  ;;  %v3245_v38 = vld [vmem:[%s18592_s30 + $0x74] sm:$0xff]  ;;  %v9432_v57 = vsel %vm9400_vm13, 1, %v24890_v7  ;;  %v689_v27 = vadd.f32 %v16004_v1, %v19562_v43 }
  0xff   : > { %v19675_v2 = vpop.permute.xlu1 %1011  ;;  %v19677_v31 = vpop.permute.xlu0 %1008  ;;  %16106 = vmatmul.mubr.msk.f32.gmra.mrb[38].mxu0 %vm500_vm12, %v1118_v10  ;;  %16305 = vmatprep.mubr.msk.f32.mxu1 %vm500_vm12, %v3275_v62  ;;  %v19690_v5 = vld [vmem:[%s24363_s1 + $0xf8] sm:$0xff]  ;;  %v19697_v10 = vld [vmem:[%s18592_s30 + $0x6a] sm:$0xff]  ;;  %vm5175_vm13 = vcmp.ge.s32.totalorder %v18275_v61, 2  ;;  %858 = vst.msk [vmem:[#allocation2 + $0x18] sm:$0xff] %vm24579_vm6, %v825_v33  ;;  %v9431_v33 = vsel %vm9399_vm1, 1, %v24890_v7  ;;  %vm24485_vm1 = vcmp.eq.s32.totalorder %v19273_v32, 1 }
 0x100   : > { %24922 = vst [vmem:[#allocation66_spill] sm:$0xff] %v19675_v2  ;;  %24923 = vst [vmem:[#allocation67_spill] sm:$0xff] %v19677_v31  ;;  %vm5176_vm14 = vcmp.ge.s32.totalorder %v19690_v5, 2  ;;  %vm24469_vm5 = vcmp.eq.s32.totalorder %v19675_v2, 1  ;;  %vm24470_vm15 = vcmp.eq.s32.totalorder %v19677_v31, 1  ;;  %5297 = vperm.xlu1 %18258, %v5206_v8   ;;  %v824_v22 = vmax.f32 %v674_v46, 0.0 }
 0x101   : > { %v683_v62 = vpop.f32.mrb[5].mxu0  ;;  %5294 = vperm.xlu0 %18257, %v5205_v0   ;;  %v1119_v1 = vsel %vm24470_vm15, %v19682_v4, 0.0  ;;  %v3276_v8 = vsel %vm24468_vm7, %v19258_v55, 0.0  ;;  %v1120_v16 = vsel %vm24469_vm5, %v19697_v10, 0.0  ;;  %v3277_v0 = vsel %vm2020_vm2, %v3245_v38, 0.0  ;;  %v19732_v38 = vld [vmem:[%s18592_s30 + $0x72] sm:$0xff] }
 0x102   : > { %16108 = vmatprep.mubr.msk.f32.mxu0 %vm500_vm12, %v1119_v1  ;;  %16306 = vmatmul.mubr.msk.f32.gmra.mrb[22].mxu1 %vm500_vm12, %v3276_v8  ;;  %v5208_v55 = vsel %vm5176_vm14, 1, %v24890_v7  ;;  %857 = vst.msk [vmem:[#allocation2 + $0x10] sm:$0xff] %vm24579_vm6, %v824_v22  ;;  %v827_v46 = vmax.f32 %v689_v27, 0.0  ;;  %v684_v18 = vadd.f32 %v19562_v43, %v683_v62  ;;  %v16007_v11 = vpop.f32.mrb[6].mxu0  ;;  %v3247_v8 = vld [vmem:[%s18592_s30 + $0x84] sm:$0xff]  ;;  %v5207_v27 = vsel %vm5175_vm13, 1, %v24890_v7 }
 0x103   : > { %v19725_v2 = vpop.permute.xlu1 %1017  ;;  %v19727_v1 = vpop.permute.xlu0 %1014  ;;  %16109 = vmatmul.mubr.msk.f32.gmra.mrb[40].mxu0 %vm500_vm12, %v1120_v16  ;;  %16308 = vmatprep.mubr.msk.f32.mxu1 %vm500_vm12, %v3277_v0  ;;  %vm9402_vm14 = vcmp.ge.s32.totalorder %v19690_v5, 3  ;;  %v699_v22 = vadd.f32 %v16007_v11, %v19562_v43  ;;  %v19742_v62 = vld [vmem:[%s18592_s30 + $0x7a] sm:$0xff]  ;;  %vm9401_vm15 = vcmp.ge.s32.totalorder %v18275_v61, 3  ;;  %v3278_v11 = vsel %vm24475_vm11, %v19279_v17, 0.0  ;;  %v19757_v53 = vld [vmem:[%s24363_s1 + $0x8] sm:$0xff] }
 0x104   : > { %24924 = vst [vmem:[#allocation68_spill] sm:$0xff] %v19725_v2  ;;  %24925 = vst [vmem:[#allocation69_spill] sm:$0xff] %v19727_v1  ;;  %vm24476_vm7 = vcmp.eq.s32.totalorder %v19725_v2, 1  ;;  %vm24484_vm5 = vcmp.eq.s32.totalorder %v19727_v1, 1  ;;  %9523 = vperm.xlu1 %18258, %v9432_v57   ;;  %v826_v16 = vmax.f32 %v684_v18, 0.0  ;;  %v693_v0 = vpop.f32.mrb[7].mxu0 }
 0x105   : > { %24926 = vst [vmem:[#allocation70_spill] sm:$0xff] %v19742_v62  ;;  %860 = vst.msk [vmem:[#allocation2 + $0x28] sm:$0xff] %vm24579_vm6, %v827_v46  ;;  %9520 = vperm.xlu0 %18257, %v9431_v33   ;;  %v1121_v31 = vsel %vm24484_vm5, %v19732_v38, 0.0  ;;  %v1122_v57 = vsel %vm24476_vm7, %v19742_v62, 0.0  ;;  %vm6079_vm13 = vcmp.lt.s32.totalorder %v19757_v53, 14  ;;  %v3279_v18 = vsel %vm24485_vm1, %v3247_v8, 0.0 }
 0x106   : > { %16111 = vmatprep.mubr.msk.f32.mxu0 %vm500_vm12, %v1121_v31  ;;  %16309 = vmatmul.mubr.msk.f32.gmra.mrb[24].mxu1 %vm500_vm12, %v3278_v11  ;;  %v19767_v17 = vld [vmem:[%s24363_s1] sm:$0xff]  ;;  %859 = vst.msk [vmem:[#allocation2 + $0x20] sm:$0xff] %vm24579_vm6, %v826_v16  ;;  %v829_v46 = vmax.f32 %v699_v22, 0.0  ;;  %v694_v31 = vadd.f32 %v19562_v43, %v693_v0  ;;  %v16010_v11 = vpop.f32.mrb[8].mxu0  ;;  %vm2024_vm7 = vcmp.eq.s32.totalorder %v19294_v42, 1  ;;  %v19786_v1 = vld [vmem:[%s18592_s30 + $0x94] sm:$0xff] }
 0x107   : > { %vm6078_vm11 = vcmp.lt.s32.totalorder %v19767_v17, 14  ;;  %v19771_v33 = vld [vmem:[%s18592_s30 + $0xa2] sm:$0xff]  ;;  %v19776_v8 = vpop.permute.xlu1 %1023  ;;  %v19778_v39 = vpop.permute.xlu0 %1020  ;;  %16112 = vmatmul.mubr.msk.f32.gmra.mrb[42].mxu0 %vm500_vm12, %v1122_v57  ;;  %16311 = vmatprep.mubr.msk.f32.mxu1 %vm500_vm12, %v3279_v18  ;;  %24929 = vst [vmem:[#allocation73_spill] sm:$0xff] %v19786_v1  ;;  %v9434_v22 = vsel %vm9402_vm14, 1, %v24890_v7  ;;  %v9433_v16 = vsel %vm9401_vm15, 1, %v24890_v7  ;;  %v19794_v0 = vld [vmem:[%s18592_s30 + $0xb2] sm:$0xff]  ;;  %v709_v32 = vadd.f32 %v16010_v11, %v19562_v43 }
 0x108   : > { %24927 = vst [vmem:[#allocation71_spill] sm:$0xff] %v19776_v8  ;;  %24928 = vst [vmem:[#allocation72_spill] sm:$0xff] %v19778_v39  ;;  %v19783_v2 = vld [vmem:[%s18592_s30 + $0x82] sm:$0xff]  ;;  %vm24528_vm5 = vcmp.eq.s32.totalorder %v19776_v8, 1  ;;  %vm1091_vm1 = vcmp.eq.s32.totalorder %v19778_v39, 1  ;;  %5303 = vperm.xlu1 %18258, %v5208_v55   ;;  %v19800_v57 = vld [vmem:[%s18592_s30 + $0x8a] sm:$0xff] }
 0x109   : > { %24930 = vst [vmem:[#allocation74_spill] sm:$0xff] %v19794_v0  ;;  %v6111_v18 = vsel %vm6079_vm13, 1, %v24890_v7  ;;  %862 = vst.msk [vmem:[#allocation2 + $0x38] sm:$0xff] %vm24579_vm6, %v829_v46  ;;  %v828_v5 = vmax.f32 %v694_v31, 0.0  ;;  %v703_v61 = vpop.f32.mrb[9].mxu0  ;;  %5300 = vperm.xlu0 %18257, %v5207_v27   ;;  %v1123_v11 = vsel %vm1091_vm1, %v19783_v2, 0.0 }
 0x10a   : > { %v3280_v62 = vsel %vm24491_vm10, %v19300_v25, 0.0  ;;  %v1124_v55 = vsel %vm24528_vm5, %v19800_v57, 0.0  ;;  %v6110_v46 = vsel %vm6078_vm11, 1, %v24890_v7  ;;  %16114 = vmatprep.mubr.msk.f32.mxu0 %vm500_vm12, %v1123_v11  ;;  %v3281_v27 = vsel %vm2024_vm7, %v19786_v1, 0.0  ;;  %v16013_v45 = vpop.f32.mrb[10].mxu0  ;;  %v19837_v1 = vld [vmem:[%s18592_s30 + $0xa4] sm:$0xff] }
 0x10b   : > { %16312 = vmatmul.mubr.msk.f32.gmra.mrb[26].mxu1 %vm500_vm12, %v3280_v62  ;;  %vm10305_vm15 = vcmp.lt.s32.totalorder %v19757_v53, 13  ;;  %861 = vst.msk [vmem:[#allocation2 + $0x30] sm:$0xff] %vm24579_vm6, %v828_v5  ;;  %v831_v25 = vmax.f32 %v709_v32, 0.0  ;;  %v704_v31 = vadd.f32 %v19562_v43, %v703_v61  ;;  %vm2026_vm11 = vcmp.eq.s32.totalorder %v19319_v3, 1  ;;  %v19827_v8 = vpop.permute.xlu1 %1029  ;;  %v19829_v11 = vpop.permute.xlu0 %1026  ;;  %16115 = vmatmul.mubr.msk.f32.gmra.mrb[44].mxu0 %vm500_vm12, %v1124_v55  ;;  %v19834_v62 = vld [vmem:[%s18592_s30 + $0x92] sm:$0xff]  ;;  %24932 = vst [vmem:[#allocation76_spill] sm:$0xff] %v19837_v1 }
 0x10c   : > { %24931 = vst [vmem:[#allocation75_spill] sm:$0xff] %v19827_v8  ;;  %16314 = vmatprep.mubr.msk.f32.mxu1 %vm500_vm12, %v3281_v27  ;;  %v1127_v32 = vsel %vm24503_vm8, %v19771_v33, 0.0  ;;  %v19843_v5 = vld [vmem:[%s18592_s30 + $0xaa] sm:$0xff]  ;;  %v19848_v61 = vsel %vm24499_vm9, %v19794_v0, 0.0  ;;  %v719_v55 = vadd.f32 %v16013_v45, %v19562_v43  ;;  %vm24504_vm14 = vcmp.eq.s32.totalorder %v19827_v8, 1  ;;  %9529 = vperm.xlu1 %18258, %v9434_v22   ;;  %v19854_v27 = vld [vmem:[%s18592_s30 + $0x9a] sm:$0xff] }
 0x10d   : > { %vm24505_vm13 = vcmp.eq.s32.totalorder %v19829_v11, 1  ;;  %vm10304_vm10 = vcmp.lt.s32.totalorder %v19767_v17, 13  ;;  %864 = vst.msk [vmem:[#allocation2 + $0x48] sm:$0xff] %vm24579_vm6, %v831_v25  ;;  %v830_v15 = vmax.f32 %v704_v31, 0.0  ;;  %v713_v39 = vpop.f32.mrb[11].mxu0  ;;  %9526 = vperm.xlu0 %18257, %v9433_v16   ;;  %v3282_v45 = vsel %vm24497_vm3, %v19325_v60, 0.0 }
 0x10e   : > { %v1125_v13 = vsel %vm24505_vm13, %v19834_v62, 0.0  ;;  %v1126_v22 = vsel %vm24504_vm14, %v19854_v27, 0.0  ;;  %v10337_v0 = vsel %vm10305_vm15, 1, %v24890_v7  ;;  %v19871_v25 = vld [vmem:[%s18592_s30 + $0xba] sm:$0xff]  ;;  %v3283_v16 = vsel %vm2026_vm11, %v19837_v1, 0.0  ;;  %v16016_v51 = vpop.f32.mrb[12].mxu0 }
 0x10f   : > { %16117 = vmatprep.mubr.msk.f32.mxu0 %vm500_vm12, %v1125_v13  ;;  %16315 = vmatmul.mubr.msk.f32.gmra.mrb[28].mxu1 %vm500_vm12, %v3282_v45  ;;  %v18278_v60 = vld [vmem:[%s24363_s1 + $0x18] sm:$0xff]  ;;  %863 = vst.msk [vmem:[#allocation2 + $0x40] sm:$0xff] %vm24579_vm6, %v830_v15  ;;  %v833_v53 = vmax.f32 %v719_v55, 0.0  ;;  %v714_v31 = vadd.f32 %v19562_v43, %v713_v39  ;;  %vm24523_vm15 = vcmp.eq.s32.totalorder %v19338_v54, 1  ;;  %v19884_v13 = vpop.permute.xlu1 %5213  ;;  %v19886_v45 = vpop.permute.xlu0 %5210  ;;  %vm24935_vm9 = vcmp.eq.s32.totalorder %v19028_v20, 1  ;;  %v5119_v20 = vld [vmem:[%s18592_s30 + $0x41] sm:$0xff] }
 0x110   : > { %vm6081_vm3 = vcmp.lt.s32.totalorder %v18278_v60, 14  ;;  %24933 = vst [vmem:[#allocation77_spill] sm:$0xff] %v19884_v13  ;;  %24934 = vst [vmem:[#allocation78_spill] sm:$0xff] %v19886_v45  ;;  %16118 = vmatmul.mubr.msk.f32.gmra.mrb[46].mxu0 %vm500_vm12, %v1126_v22  ;;  %16317 = vmatprep.mubr.msk.f32.mxu1 %vm500_vm12, %v3283_v16  ;;  %v1128_v8 = vsel %vm24935_vm9, %v19843_v5, 0.0  ;;  %v19894_v1 = vld [vmem:[%s18592_s30 + $0xb4] sm:$0xff]  ;;  %v10336_v15 = vsel %vm10304_vm10, 1, %v24890_v7  ;;  %v729_v39 = vadd.f32 %v16016_v51, %v19562_v43 }
 0x111   : > { %v5117_v55 = vld [vmem:[%s18592_s30 + $0x31] sm:$0xff]  ;;  %vm24510_vm8 = vcmp.eq.s32.totalorder %v19886_v45, 1  ;;  %6146 = vperm.xlu1 %18258, %v6111_v18   ;;  %16120 = vmatprep.mubr.msk.f32.mxu0 %vm500_vm12, %v1127_v32  ;;  %vm24936_vm14 = vcmp.eq.s32.totalorder %v19026_v19, 1  ;;  %866 = vst.msk [vmem:[#allocation2 + $0x58] sm:$0xff] %vm24579_vm6, %v833_v53  ;;  %v832_v17 = vmax.f32 %v714_v31, 0.0  ;;  %v723_v51 = vpop.f32.mrb[13].mxu0 }
 0x112   : > { %v1130_v22 = vsel %vm24936_vm14, %v19871_v25, 0.0  ;;  %v18279_v16 = vld [vmem:[%s24363_s1 + $0x10] sm:$0xff]  ;;  %6143 = vperm.xlu0 %18257, %v6110_v46   ;;  %vm24937_vm10 = vcmp.eq.s32.totalorder %v19317_v36, 1  ;;  %v6113_v32 = vsel %vm6081_vm3, 1, %v24890_v7  ;;  %vm10307_vm13 = vcmp.lt.s32.totalorder %v18278_v60, 13  ;;  %v19920_v31 = vld [vmem:[%s18592_s30 + $0xc2] sm:$0xff] }
 0x113   : > { %vm6080_vm9 = vcmp.lt.s32.totalorder %v18279_v16, 14  ;;  %v3284_v18 = vsel %vm24937_vm10, %v19344_v44, 0.0  ;;  %v835_v13 = vmax.f32 %v729_v39, 0.0  ;;  %v3285_v53 = vsel %vm24523_vm15, %v19894_v1, 0.0  ;;  %865 = vst.msk [vmem:[#allocation2 + $0x50] sm:$0xff] %vm24579_vm6, %v832_v17  ;;  %v16019_v46 = vpop.f32.mrb[14].mxu0  ;;  %v19929_v39 = vpop.permute.xlu1 %9439 }
 0x114   : > { %16318 = vmatmul.mubr.msk.f32.gmra.mrb[30].mxu1 %vm500_vm12, %v3284_v18  ;;  %vm10306_vm14 = vcmp.lt.s32.totalorder %v18279_v16, 13  ;;  %v724_v44 = vadd.f32 %v19562_v43, %v723_v51  ;;  %v19926_v36 = vsel %vm24510_vm8, %v5117_v55, 0.0  ;;  %vm24522_vm3 = vcmp.eq.s32.totalorder %v19363_v48, 1  ;;  %24939 = vst [vmem:[#allocation80_spill] sm:$0xff] %v19929_v39  ;;  %v19931_v18 = vpop.permute.xlu0 %9436  ;;  %16121 = vmatmul.mubr.msk.f32.gmra.mrb[48].mxu0 %vm500_vm12, %v1128_v8  ;;  %v19936_v19 = vld [vmem:[%s18592_s30 + $0xc4] sm:$0xff]  ;;  %v9345_v39 = vld [vmem:[%s18592_s30 + $0x30] sm:$0xff] }
 0x115   : > { %24938 = vst [vmem:[#allocation79_spill] sm:$0xff] %v19926_v36  ;;  %24940 = vst [vmem:[#allocation81_spill] sm:$0xff] %v19931_v18  ;;  %16320 = vmatprep.mubr.msk.f32.mxu1 %vm500_vm12, %v3285_v53  ;;  %v6112_v17 = vsel %vm6080_vm9, 1, %v24890_v7  ;;  %vm24942_vm10 = vcmp.eq.s32.totalorder %v19061_v41, 1  ;;  %v19944_v51 = vld [vmem:[%s18592_s30 + $0xca] sm:$0xff]  ;;  %v739_v36 = vadd.f32 %v16019_v46, %v19562_v43  ;;  %vm24519_vm8 = vcmp.eq.s32.totalorder %v19931_v18, 1  ;;  %10372 = vperm.xlu1 %18258, %v10337_v0  }
 0x116   : > { %24941 = vst [vmem:[#allocation82_spill] sm:$0xff] %v19936_v19  ;;  %v1131_v55 = vsel %vm24942_vm10, %v19920_v31, 0.0  ;;  %24943 = vst [vmem:[#allocation83_spill] sm:$0xff] %v19944_v51  ;;  %16123 = vmatprep.mubr.msk.f32.mxu0 %vm500_vm12, %v19848_v61  ;;  %vm24944_vm9 = vcmp.eq.s32.totalorder %v19059_v40, 1  ;;  %v19957_v53 = vsel %vm10307_vm13, 1, %v24890_v7  ;;  %v733_v45 = vpop.f32.mrb[15].mxu0  ;;  %10369 = vperm.xlu0 %18257, %v10336_v15  }
 0x117   : > { %868 = vst.msk [vmem:[#allocation2 + $0x68] sm:$0xff] %vm24579_vm6, %v835_v13  ;;  %v1132_v8 = vsel %vm24944_vm9, %v19944_v51, 0.0  ;;  %v834_v13 = vmax.f32 %v724_v44, 0.0  ;;  %vm24945_vm10 = vcmp.eq.s32.totalorder %v19336_v63, 1  ;;  %v19964_v0 = vsel %vm10306_vm14, 1, %v24890_v7  ;;  %v19969_v61 = vld [vmem:[%s24363_s1 + $0x28] sm:$0xff]  ;;  %v19995_v40 = vpop.permute.xlu1 %5219 }
 0x118   : > { %v3286_v46 = vsel %vm24945_vm10, %v19369_v21, 0.0  ;;  %vm6083_vm9 = vcmp.lt.s32.totalorder %v19969_v61, 14  ;;  %v837_v60 = vmax.f32 %v739_v36, 0.0  ;;  %v3287_v15 = vsel %vm24522_vm3, %v19936_v19, 0.0  ;;  %v19977_v21 = vld [vmem:[%s18592_s30 + $0xd2] sm:$0xff]  ;;  %v19980_v16 = vld [vmem:[%s18592_s30 + $0xda] sm:$0xff]  ;;  %v19997_v41 = vpop.permute.xlu0 %5216  ;;  %16124 = vmatmul.mubr.msk.f32.gmra.mrb[50].mxu0 %vm500_vm12, %v1130_v22 }
 0x119   : > { %16321 = vmatmul.mubr.msk.f32.gmra.mrb[0].mxu1 %vm500_vm12, %v3286_v46  ;;  %v19985_v44 = vld [vmem:[%s24363_s1 + $0x20] sm:$0xff]  ;;  %867 = vst.msk [vmem:[#allocation2 + $0x60] sm:$0xff] %vm24579_vm6, %v834_v13  ;;  %v734_v36 = vadd.f32 %v19562_v43, %v733_v45  ;;  %v16022_v46 = vpop.f32.mrb[16].mxu0  ;;  %v19992_v63 = vsel %vm24519_vm8, %v9345_v39, 0.0  ;;  %vm24527_vm14 = vcmp.eq.s32.totalorder %v19382_v29, 1  ;;  %24947 = vst [vmem:[#allocation85_spill] sm:$0xff] %v19995_v40  ;;  %6152 = vperm.xlu1 %18258, %v6113_v32  }
 0x11a   : > { %vm6082_vm13 = vcmp.lt.s32.totalorder %v19985_v44, 14  ;;  %24946 = vst [vmem:[#allocation84_spill] sm:$0xff] %v19992_v63  ;;  %24948 = vst [vmem:[#allocation86_spill] sm:$0xff] %v19997_v41  ;;  %16323 = vmatprep.mubr.msk.f32.mxu1 %vm500_vm12, %v3287_v15  ;;  %v20002_v19 = vld [vmem:[%s18592_s30 + $0xd4] sm:$0xff]  ;;  %v749_v63 = vadd.f32 %v16022_v46, %v19562_v43  ;;  %v5120_v51 = vld [vmem:[%s18592_s30 + $0x49] sm:$0xff]  ;;  %vm24525_vm3 = vcmp.eq.s32.totalorder %v19995_v40, 1  ;;  %16126 = vmatprep.mubr.msk.f32.mxu0 %vm500_vm12, %v1131_v55 }
 0x11b   : > { %v24949_v13 = vld [vmem:[#allocation10_spill] sm:$0xff]  ;;  %v24951_v18 = vld [vmem:[#allocation9_spill] sm:$0xff]  ;;  %870 = vst.msk [vmem:[#allocation2 + $0x78] sm:$0xff] %vm24579_vm6, %v837_v60  ;;  %vm24526_vm15 = vcmp.eq.s32.totalorder %v19997_v41, 1  ;;  %v20020_v22 = vsel %vm6083_vm9, 1, %v24890_v7  ;;  %v836_v15 = vmax.f32 %v734_v36, 0.0  ;;  %6149 = vperm.xlu0 %18257, %v6112_v17  }
 0x11c   : > { %vm24950_vm10 = vcmp.eq.s32.totalorder %v24949_v13, 1  ;;  %vm24952_vm8 = vcmp.eq.s32.totalorder %v24951_v18, 1  ;;  %v743_v18 = vpop.f32.mrb[17].mxu0  ;;  %v20028_v46 = vsel %vm6082_vm13, 1, %v24890_v7  ;;  %v20031_v32 = vld [vmem:[%s18592_s30 + $0xe2] sm:$0xff]  ;;  %v839_v55 = vmax.f32 %v749_v63, 0.0  ;;  %16127 = vmatmul.mubr.msk.f32.gmra.mrb[52].mxu0 %vm500_vm12, %v1132_v8 }
 0x11d   : > { %v1133_v45 = vsel %vm24950_vm10, %v19977_v21, 0.0  ;;  %v1134_v39 = vsel %vm24952_vm8, %v19980_v16, 0.0  ;;  %vm24953_vm8 = vcmp.eq.s32.totalorder %v19361_v49, 1  ;;  %v744_v13 = vadd.f32 %v19562_v43, %v743_v18  ;;  %v20039_v36 = vld [vmem:[%s18592_s30 + $0xea] sm:$0xff]  ;;  %869 = vst.msk [vmem:[#allocation2 + $0x70] sm:$0xff] %vm24579_vm6, %v836_v15  ;;  %v20054_v49 = vpop.permute.xlu0 %9442  ;;  %10378 = vperm.xlu1 %18258, %v19957_v53   ;;  %v25284_v3 = vld [vmem:[#allocation78_spill] sm:$0xff] }
 0x11e   : > { %v3288_v60 = vsel %vm24953_vm8, %v19388_v9, 0.0  ;;  %v3289_v17 = vsel %vm24527_vm14, %v20002_v19, 0.0  ;;  %vm10309_vm9 = vcmp.lt.s32.totalorder %v19969_v61, 13  ;;  %v16025_v9 = vpop.f32.mrb[18].mxu0  ;;  %v20045_v63 = vsel %vm24526_vm15, %v5119_v20, 0.0  ;;  %24957 = vst [vmem:[#allocation90_spill] sm:$0xff] %v20054_v49  ;;  %16129 = vmatprep.mubr.msk.f32.mxu0 %vm500_vm12, %v1133_v45 }
 0x11f   : > { %16324 = vmatmul.mubr.msk.f32.gmra.mrb[2].mxu1 %vm500_vm12, %v3288_v60  ;;  %24954 = vst [vmem:[#allocation87_spill] sm:$0xff] %v20045_v63  ;;  %v20049_v18 = vsel %vm24525_vm3, %v5120_v51, 0.0  ;;  %vm24536_vm13 = vcmp.eq.s32.totalorder %v19407_v6, 1  ;;  %v20052_v60 = vpop.permute.xlu1 %9445  ;;  %v20059_v15 = vld [vmem:[%s18592_s30 + $0xe4] sm:$0xff]  ;;  %vm10308_vm10 = vcmp.lt.s32.totalorder %v19985_v44, 13  ;;  %872 = vst.msk [vmem:[#allocation2 + $0x88] sm:$0xff] %vm24579_vm6, %v839_v55  ;;  %v759_v51 = vadd.f32 %v16025_v9, %v19562_v43  ;;  %10375 = vperm.xlu0 %18257, %v19964_v0  }
 0x120   : > { %24955 = vst [vmem:[#allocation88_spill] sm:$0xff] %v20049_v18  ;;  %24956 = vst [vmem:[#allocation89_spill] sm:$0xff] %v20052_v60  ;;  %16326 = vmatprep.mubr.msk.f32.mxu1 %vm500_vm12, %v3289_v17  ;;  %v838_v20 = vmax.f32 %v744_v13, 0.0  ;;  %v9347_v18 = vld [vmem:[%s18592_s30 + $0x40] sm:$0xff]  ;;  %v9348_v63 = vld [vmem:[%s18592_s30 + $0x48] sm:$0xff]  ;;  %vm24534_vm8 = vcmp.eq.s32.totalorder %v20052_v60, 1  ;;  %16130 = vmatmul.mubr.msk.f32.gmra.mrb[54].mxu0 %vm500_vm12, %v1134_v39 }
 0x121   : > { %vm24535_vm3 = vcmp.eq.s32.totalorder %v20054_v49, 1  ;;  %v24958_v8 = vld [vmem:[#allocation12_spill] sm:$0xff]  ;;  %vm24960_vm14 = vcmp.eq.s32.totalorder %v19104_v26, 1  ;;  %v753_v55 = vpop.f32.mrb[19].mxu0  ;;  %vm24961_vm5 = vcmp.eq.s32.totalorder %v19380_v24, 1  ;;  %v10341_v53 = vsel %vm10309_vm9, 1, %v24890_v7  ;;  %6158 = vperm.xlu1 %18258, %v20020_v22  }
 0x122   : > { %vm24959_vm15 = vcmp.eq.s32.totalorder %v24958_v8, 1  ;;  %v1136_v13 = vsel %vm24960_vm14, %v20039_v36, 0.0  ;;  %v3290_v9 = vsel %vm24961_vm5, %v19413_v50, 0.0  ;;  %871 = vst.msk [vmem:[#allocation2 + $0x80] sm:$0xff] %vm24579_vm6, %v838_v20  ;;  %v841_v45 = vmax.f32 %v759_v51, 0.0  ;;  %v20093_v24 = vld [vmem:[%s18592_s30 + $0xf2] sm:$0xff] }
 0x123   : > { %v1135_v17 = vsel %vm24959_vm15, %v20031_v32, 0.0  ;;  %v754_v40 = vadd.f32 %v19562_v43, %v753_v55  ;;  %16327 = vmatmul.mubr.msk.f32.gmra.mrb[4].mxu1 %vm500_vm12, %v3290_v9  ;;  %v3291_v0 = vsel %vm24536_vm13, %v20059_v15, 0.0  ;;  %v10340_v50 = vsel %vm10308_vm10, 1, %v24890_v7  ;;  %v16028_v61 = vpop.f32.mrb[20].mxu0  ;;  %v20104_v55 = vpop.permute.xlu1 %5225  ;;  %v20111_v44 = vld [vmem:[%s18592_s30 + $0xf4] sm:$0xff]  ;;  %6155 = vperm.xlu0 %18257, %v20028_v46   ;;  %v20174_v26 = vld [vmem:[%s18592_s30 + $0x104] sm:$0xff] }
 0x124   : > { %v20097_v20 = vsel %vm24535_vm3, %v9347_v18, 0.0  ;;  %v20101_v51 = vsel %vm24534_vm8, %v9348_v63, 0.0  ;;  %vm2036_vm5 = vcmp.eq.s32.totalorder %v19426_v28, 1  ;;  %24964 = vst [vmem:[#allocation92_spill] sm:$0xff] %v20104_v55  ;;  %v20106_v9 = vpop.permute.xlu0 %5222  ;;  %16329 = vmatprep.mubr.msk.f32.mxu1 %vm500_vm12, %v3291_v0  ;;  %24966 = vst [vmem:[#allocation94_spill] sm:$0xff] %v20111_v44  ;;  %v20116_v18 = vld [vmem:[%s24363_s1 + $0x38] sm:$0xff]  ;;  %16132 = vmatprep.mubr.msk.f32.mxu0 %vm500_vm12, %v1135_v17 }
 0x125   : > { %24962 = vst [vmem:[#allocation12_spill] sm:$0xff] %v20097_v20  ;;  %24963 = vst [vmem:[#allocation91_spill] sm:$0xff] %v20101_v51  ;;  %vm6085_vm15 = vcmp.lt.s32.totalorder %v20116_v18, 14  ;;  %v840_v63 = vmax.f32 %v754_v40, 0.0  ;;  %v769_v51 = vadd.f32 %v16028_v61, %v19562_v43  ;;  %v5121_v20 = vld [vmem:[%s18592_s30 + $0x51] sm:$0xff]  ;;  %v5122_v60 = vld [vmem:[%s18592_s30 + $0x59] sm:$0xff]  ;;  %16133 = vmatmul.mubr.msk.f32.gmra.mrb[56].mxu0 %vm500_vm12, %v1136_v13  ;;  %10384 = vperm.xlu1 %18258, %v10341_v53  }
 0x126   : > { %24965 = vst [vmem:[#allocation93_spill] sm:$0xff] %v20106_v9  ;;  %874 = vst.msk [vmem:[#allocation2 + $0x98] sm:$0xff] %vm24579_vm6, %v841_v45  ;;  %vm24547_vm14 = vcmp.eq.s32.totalorder %v20104_v55, 1  ;;  %vm24548_vm9 = vcmp.eq.s32.totalorder %v20106_v9, 1  ;;  %vm24967_vm10 = vcmp.eq.s32.totalorder %v19126_v47, 1  ;;  %v20131_v0 = vld [vmem:[%s18592_s30 + $0xfa] sm:$0xff] }
 0x127   : > { %v1137_v39 = vsel %vm24967_vm10, %v20093_v24, 0.0  ;;  %v20136_v40 = vld [vmem:[%s24363_s1 + $0x30] sm:$0xff]  ;;  %v763_v45 = vpop.f32.mrb[21].mxu0  ;;  %v24968_v22 = vld [vmem:[#allocation42_spill] sm:$0xff]  ;;  %873 = vst.msk [vmem:[#allocation2 + $0x90] sm:$0xff] %vm24579_vm6, %v840_v63  ;;  %v843_v41 = vmax.f32 %v769_v51, 0.0  ;;  %10381 = vperm.xlu0 %18257, %v10340_v50  }
 0x128   : > { %vm6084_vm8 = vcmp.lt.s32.totalorder %v20136_v40, 14  ;;  %vm24969_vm3 = vcmp.eq.s32.totalorder %v24968_v22, 1  ;;  %v24970_v61 = vld [vmem:[#allocation13_spill] sm:$0xff]  ;;  %v764_v47 = vadd.f32 %v19562_v43, %v763_v45  ;;  %v3293_v46 = vsel %vm2036_vm5, %v20111_v44, 0.0  ;;  %v20156_v22 = vld [vmem:[%s18592_s30 + $0x102] sm:$0xff]  ;;  %v20167_v45 = vpop.permute.xlu1 %9451  ;;  %24976 = vst [vmem:[#allocation99_spill] sm:$0xff] %v20174_v26  ;;  %16135 = vmatprep.mubr.msk.f32.mxu0 %vm500_vm12, %v1137_v39 }
 0x129   : > { %v3292_v17 = vsel %vm24969_vm3, %v19432_v30, 0.0  ;;  %vm24971_vm13 = vcmp.eq.s32.totalorder %v24970_v61, 1  ;;  %v6117_v30 = vsel %vm6085_vm15, 1, %v24890_v7  ;;  %v16031_v61 = vpop.f32.mrb[22].mxu0  ;;  %v20160_v51 = vsel %vm24548_vm9, %v5121_v20, 0.0  ;;  %24974 = vst [vmem:[#allocation97_spill] sm:$0xff] %v20167_v45 }
 0x12a   : > { %v1138_v49 = vsel %vm24971_vm13, %v20131_v0, 0.0  ;;  %16330 = vmatmul.mubr.msk.f32.gmra.mrb[6].mxu1 %vm500_vm12, %v3292_v17  ;;  %24972 = vst [vmem:[#allocation95_spill] sm:$0xff] %v20160_v51  ;;  %v20164_v63 = vsel %vm24547_vm14, %v5122_v60, 0.0  ;;  %vm24558_vm3 = vcmp.eq.s32.totalorder %v19451_v52, 1  ;;  %v20169_v17 = vpop.permute.xlu0 %9448  ;;  %v6116_v20 = vsel %vm6084_vm8, 1, %v24890_v7  ;;  %876 = vst.msk [vmem:[#allocation2 + $0xa8] sm:$0xff] %vm24579_vm6, %v843_v41  ;;  %6164 = vperm.xlu1 %18258, %v6117_v30  }
 0x12b   : > { %24973 = vst [vmem:[#allocation96_spill] sm:$0xff] %v20164_v63  ;;  %24975 = vst [vmem:[#allocation98_spill] sm:$0xff] %v20169_v17  ;;  %16332 = vmatprep.mubr.msk.f32.mxu1 %vm500_vm12, %v3293_v46  ;;  %v842_v60 = vmax.f32 %v764_v47, 0.0  ;;  %v779_v63 = vadd.f32 %v16031_v61, %v19562_v43  ;;  %v9349_v51 = vld [vmem:[%s18592_s30 + $0x50] sm:$0xff]  ;;  %v9350_v55 = vld [vmem:[%s18592_s30 + $0x58] sm:$0xff]  ;;  %vm24552_vm13 = vcmp.eq.s32.totalorder %v20167_v45, 1  ;;  %16136 = vmatmul.mubr.msk.f32.gmra.mrb[58].mxu0 %vm500_vm12, %v1138_v49 }
 0x12c   : > { %vm24553_vm15 = vcmp.eq.s32.totalorder %v20169_v17, 1  ;;  %v24977_v13 = vld [vmem:[#allocation16_spill] sm:$0xff]  ;;  %vm10311_vm8 = vcmp.lt.s32.totalorder %v20116_v18, 13  ;;  %v773_v9 = vpop.f32.mrb[23].mxu0  ;;  %vm10310_vm9 = vcmp.lt.s32.totalorder %v20136_v40, 13  ;;  %v3295_v50 = vsel %vm24558_vm3, %v20174_v26, 0.0  ;;  %6161 = vperm.xlu0 %18257, %v6116_v20  }
 0x12d   : > { %vm24978_vm10 = vcmp.eq.s32.totalorder %v24977_v13, 1  ;;  %v24979_v41 = vld [vmem:[#allocation44_spill] sm:$0xff]  ;;  %875 = vst.msk [vmem:[#allocation2 + $0xa0] sm:$0xff] %vm24579_vm6, %v842_v60  ;;  %v845_v53 = vmax.f32 %v779_v63, 0.0  ;;  %v774_v39 = vadd.f32 %v19562_v43, %v773_v9  ;;  %v16034_v13 = vpop.f32.mrb[24].mxu0  ;;  %v20208_v44 = vsel %vm24553_vm15, %v9349_v51, 0.0  ;;  %v20215_v60 = vpop.permute.xlu1 %5231 }
 0x12e   : > { %v1139_v46 = vsel %vm24978_vm10, %v20156_v22, 0.0  ;;  %vm24980_vm14 = vcmp.eq.s32.totalorder %v24979_v41, 1  ;;  %v20194_v61 = vld [vmem:[%s18592_s30 + $0x10a] sm:$0xff]  ;;  %v24982_v41 = vld [vmem:[#allocation15_spill] sm:$0xff]  ;;  %24984 = vst [vmem:[#allocation101_spill] sm:$0xff] %v20208_v44  ;;  %v20212_v9 = vsel %vm24552_vm13, %v9350_v55, 0.0 }
 0x12f   : > { %v3294_v47 = vsel %vm24980_vm14, %v19457_v23, 0.0  ;;  %24981 = vst [vmem:[#allocation100_spill] sm:$0xff] %v20194_v61  ;;  %vm24983_vm14 = vcmp.eq.s32.totalorder %v24982_v41, 1  ;;  %24985 = vst [vmem:[#allocation102_spill] sm:$0xff] %v20212_v9  ;;  %v24986_v63 = vld [vmem:[#allocation50_spill] sm:$0xff]  ;;  %v10343_v51 = vsel %vm10311_vm8, 1, %v24890_v7  ;;  %v789_v9 = vadd.f32 %v16034_v13, %v19562_v43  ;;  %16138 = vmatprep.mubr.msk.f32.mxu0 %vm500_vm12, %v1139_v46 }
 0x130   : > { %16333 = vmatmul.mubr.msk.f32.gmra.mrb[8].mxu1 %vm500_vm12, %v3294_v47  ;;  %v1140_v23 = vsel %vm24983_vm14, %v20194_v61, 0.0  ;;  %vm24568_vm10 = vcmp.eq.s32.totalorder %v24986_v63, 1  ;;  %24987 = vst [vmem:[#allocation103_spill] sm:$0xff] %v20215_v60  ;;  %v20217_v47 = vpop.permute.xlu0 %5228  ;;  %v20222_v41 = vld [vmem:[%s18592_s30 + $0x114] sm:$0xff]  ;;  %878 = vst.msk [vmem:[#allocation2 + $0xb8] sm:$0xff] %vm24579_vm6, %v845_v53  ;;  %v844_v55 = vmax.f32 %v774_v39, 0.0  ;;  %10390 = vperm.xlu1 %18258, %v10343_v51  }
 0x131   : > { %24988 = vst [vmem:[#allocation104_spill] sm:$0xff] %v20217_v47  ;;  %16335 = vmatprep.mubr.msk.f32.mxu1 %vm500_vm12, %v3295_v50  ;;  %24989 = vst [vmem:[#allocation105_spill] sm:$0xff] %v20222_v41  ;;  %v5123_v44 = vld [vmem:[%s18592_s30 + $0x61] sm:$0xff]  ;;  %v5124_v45 = vld [vmem:[%s18592_s30 + $0x69] sm:$0xff]  ;;  %vm24564_vm14 = vcmp.eq.s32.totalorder %v20215_v60, 1  ;;  %vm24565_vm13 = vcmp.eq.s32.totalorder %v20217_v47, 1  ;;  %16139 = vmatmul.mubr.msk.f32.gmra.mrb[60].mxu0 %vm500_vm12, %v1140_v23 }
 0x132   : > { %v10342_v49 = vsel %vm10310_vm9, 1, %v24890_v7  ;;  %v20240_v18 = vld [vmem:[%s24363_s1 + $0x48] sm:$0xff]  ;;  %v783_v13 = vpop.f32.mrb[25].mxu0  ;;  %v24990_v53 = vld [vmem:[#allocation51_spill] sm:$0xff]  ;;  %v24991_v39 = vld [vmem:[#allocation46_spill] sm:$0xff]  ;;  %877 = vst.msk [vmem:[#allocation2 + $0xb0] sm:$0xff] %vm24579_vm6, %v844_v55 }
 0x133   : > { %vm6087_vm8 = vcmp.lt.s32.totalorder %v20240_v18, 14  ;;  %vm24992_vm15 = vcmp.eq.s32.totalorder %v24991_v39, 1  ;;  %v20247_v50 = vld [vmem:[%s18592_s30 + $0x112] sm:$0xff]  ;;  %v20252_v40 = vld [vmem:[%s24363_s1 + $0x40] sm:$0xff]  ;;  %v847_v46 = vmax.f32 %v789_v9, 0.0  ;;  %v784_v17 = vadd.f32 %v19562_v43, %v783_v13  ;;  %v16037_v61 = vpop.f32.mrb[26].mxu0  ;;  %10387 = vperm.xlu0 %18257, %v10342_v49  }
 0x134   : > { %v3296_v30 = vsel %vm24992_vm15, %v24990_v53, 0.0  ;;  %24993 = vst [vmem:[#allocation51_spill] sm:$0xff] %v20247_v50  ;;  %vm6086_vm9 = vcmp.lt.s32.totalorder %v20252_v40, 14  ;;  %v3297_v20 = vsel %vm24568_vm10, %v20222_v41, 0.0  ;;  %v24994_v53 = vld [vmem:[#allocation18_spill] sm:$0xff]  ;;  %v20269_v9 = vsel %vm24565_vm13, %v5123_v44, 0.0  ;;  %v20278_v41 = vpop.permute.xlu0 %9454 }
 0x135   : > { %16336 = vmatmul.mubr.msk.f32.gmra.mrb[10].mxu1 %vm500_vm12, %v3296_v30  ;;  %vm24995_vm15 = vcmp.eq.s32.totalorder %v24994_v53, 1  ;;  %v20265_v26 = vld [vmem:[%s18592_s30 + $0x11a] sm:$0xff]  ;;  %24997 = vst [vmem:[#allocation107_spill] sm:$0xff] %v20269_v9  ;;  %v20273_v55 = vsel %vm24564_vm14, %v5124_v45, 0.0  ;;  %v20276_v30 = vpop.permute.xlu1 %9457  ;;  %25001 = vst [vmem:[#allocation109_spill] sm:$0xff] %v20278_v41  ;;  %v25002_v53 = vld [vmem:[#allocation17_spill] sm:$0xff] }
 0x136   : > { %v1141_v39 = vsel %vm24995_vm15, %v20247_v50, 0.0  ;;  %24996 = vst [vmem:[#allocation106_spill] sm:$0xff] %v20265_v26  ;;  %24998 = vst [vmem:[#allocation108_spill] sm:$0xff] %v20273_v55  ;;  %v24999_v13 = vld [vmem:[#allocation54_spill] sm:$0xff]  ;;  %16338 = vmatprep.mubr.msk.f32.mxu1 %vm500_vm12, %v3297_v20  ;;  %vm25003_vm15 = vcmp.eq.s32.totalorder %v25002_v53, 1  ;;  %v3267_v9 = vld [vmem:[%s18592_s30 + $0x124] sm:$0xff]  ;;  %v799_v55 = vadd.f32 %v16037_v61, %v19562_v43 }
 0x137   : > { %vm2042_vm3 = vcmp.eq.s32.totalorder %v24999_v13, 1  ;;  %25000 = vst [vmem:[#allocation54_spill] sm:$0xff] %v20276_v30  ;;  %v1142_v44 = vsel %vm25003_vm15, %v20265_v26, 0.0  ;;  %880 = vst.msk [vmem:[#allocation2 + $0xc8] sm:$0xff] %vm24579_vm6, %v847_v46  ;;  %v846_v45 = vmax.f32 %v784_v17, 0.0  ;;  %v9351_v60 = vld [vmem:[%s18592_s30 + $0x60] sm:$0xff]  ;;  %16141 = vmatprep.mubr.msk.f32.mxu0 %vm500_vm12, %v1141_v39 }
 0x138   : > { %v9352_v47 = vld [vmem:[%s18592_s30 + $0x68] sm:$0xff]  ;;  %vm24572_vm14 = vcmp.eq.s32.totalorder %v20276_v30, 1  ;;  %vm24573_vm13 = vcmp.eq.s32.totalorder %v20278_v41, 1  ;;  %v6119_v23 = vsel %vm6087_vm8, 1, %v24890_v7  ;;  %v6118_v17 = vsel %vm6086_vm9, 1, %v24890_v7  ;;  %v793_v61 = vpop.f32.mrb[27].mxu0  ;;  %16142 = vmatmul.mubr.msk.f32.gmra.mrb[62].mxu0 %vm500_vm12, %v1142_v44 }
 0x139   : > { %v1820_v46 = vld [vmem:[%s18592_s30 + $0x24] sm:$0xff]  ;;  %v1821_v20 = vld [vmem:[%s18592_s30 + $0x2c] sm:$0xff]  ;;  %vm10313_vm10 = vcmp.lt.s32.totalorder %v20240_v18, 13  ;;  %879 = vst.msk [vmem:[#allocation2 + $0xc0] sm:$0xff] %vm24579_vm6, %v846_v45  ;;  %v849_v51 = vmax.f32 %v799_v55, 0.0  ;;  %v794_v39 = vadd.f32 %v19562_v43, %v793_v61  ;;  %v3299_v50 = vsel %vm2042_vm3, %v3267_v9, 0.0  ;;  %v20320_v45 = vpop.permute.xlu1 %5237  ;;  %v20322_v61 = vpop.permute.xlu0 %5234  ;;  %6170 = vperm.xlu1 %18258, %v6119_v23   ;;  %6167 = vperm.xlu0 %18257, %v6118_v17  }
 0x13a   : > { %v25004_v53 = vld [vmem:[#allocation55_spill] sm:$0xff]  ;;  %v25005_v26 = vld [vmem:[#allocation49_spill] sm:$0xff]  ;;  %vm10312_vm8 = vcmp.lt.s32.totalorder %v20252_v40, 13  ;;  %v16040_v49 = vpop.f32.mrb[28].mxu0  ;;  %v20318_v55 = vsel %vm24572_vm14, %v9352_v47, 0.0  ;;  %25009 = vst [vmem:[#allocation111_spill] sm:$0xff] %v20320_v45 }
 0x13b   : > { %vm25006_vm15 = vcmp.eq.s32.totalorder %v25005_v26, 1  ;;  %v3268_v52 = vld [vmem:[%s18592_s30 + $0x12c] sm:$0xff]  ;;  %25008 = vst [vmem:[#allocation110_spill] sm:$0xff] %v20318_v55  ;;  %25010 = vst [vmem:[#allocation112_spill] sm:$0xff] %v20322_v61  ;;  %vm25011_vm9 = vcmp.eq.s32.totalorder %v19182_v59, 1  ;;  %v809_v9 = vadd.f32 %v16040_v49, %v19562_v43  ;;  %v5126_v47 = vld [vmem:[%s18592_s30 + $0x79] sm:$0xff] }
 0x13c   : > { %v3298_v63 = vsel %vm25006_vm15, %v25004_v53, 0.0  ;;  %v20314_v53 = vsel %vm24573_vm13, %v9351_v60, 0.0  ;;  %882 = vst.msk [vmem:[#allocation2 + $0xd8] sm:$0xff] %vm24579_vm6, %v849_v51  ;;  %v848_v60 = vmax.f32 %v794_v39, 0.0  ;;  %v2045_v55 = vsel %vm2013_vm4, %v1821_v20, 0.0  ;;  %v803_v44 = vpop.f32.mrb[29].mxu0 }
 0x13d   : > { %16339 = vmatmul.mubr.msk.f32.gmra.mrb[12].mxu1 %vm500_vm12, %v3298_v63  ;;  %25007 = vst [vmem:[#allocation55_spill] sm:$0xff] %v20314_v53  ;;  %v2044_v63 = vsel %vm25011_vm9, %v1820_v46, 0.0  ;;  %v5125_v53 = vld [vmem:[%s18592_s30 + $0x71] sm:$0xff]  ;;  %vm24576_vm15 = vcmp.eq.s32.totalorder %v20320_v45, 1  ;;  %vm24719_vm14 = vcmp.eq.s32.totalorder %v20322_v61, 1  ;;  %v10344_v58 = vsel %vm10312_vm8, 1, %v24890_v7 }
 0x13e   : > { %16341 = vmatprep.mubr.msk.f32.mxu1 %vm500_vm12, %v3299_v50  ;;  %16146 = vmatprep.mubr.msk.f32.mxu0 %vm500_vm12, %v2044_v63  ;;  %v10345_v50 = vsel %vm10313_vm10, 1, %v24890_v7  ;;  %v25012_v46 = vld [vmem:[#allocation53_spill] sm:$0xff]  ;;  %v1823_v20 = vld [vmem:[%s18592_s30 + $0x3c] sm:$0xff]  ;;  %881 = vst.msk [vmem:[#allocation2 + $0xd0] sm:$0xff] %vm24579_vm6, %v848_v60  ;;  %v851_v23 = vmax.f32 %v809_v9, 0.0  ;;  %v804_v39 = vadd.f32 %v19562_v43, %v803_v44  ;;  %vm25014_vm4 = vcmp.eq.s32.totalorder %v19518_v14, 1  ;;  %v20363_v63 = vpop.permute.xlu1 %9463  ;;  %v20365_v60 = vpop.permute.xlu0 %9460 }
 0x13f   : > { %vm25013_vm9 = vcmp.eq.s32.totalorder %v25012_v46, 1  ;;  %v3688_v18 = vsel %vm25014_vm4, %v19603_v56, 0.0  ;;  %v16043_v40 = vpop.f32.mrb[30].mxu0  ;;  %v20357_v17 = vsel %vm24719_vm14, %v5125_v53, 0.0  ;;  %v20361_v49 = vsel %vm24576_vm15, %v5126_v47, 0.0  ;;  %25017 = vst [vmem:[#allocation115_spill] sm:$0xff] %v20363_v63  ;;  %16147 = vmatmul.mubr.msk.f32.vlgmr.msra.gmra.mrb[32].mxu0 %vm500_vm12, %v2045_v55  ;;  %10396 = vperm.xlu1 %18258, %v10345_v50  }
 0x140   : > { %v3300_v51 = vsel %vm25013_vm9, %v3268_v52, 0.0  ;;  %v18286_v52 = vld [vmem:[%s24363_s1 + $0x58] sm:$0xff]  ;;  %25015 = vst [vmem:[#allocation113_spill] sm:$0xff] %v20357_v17  ;;  %25016 = vst [vmem:[#allocation114_spill] sm:$0xff] %v20361_v49  ;;  %vm25019_vm8 = vcmp.eq.s32.totalorder %v19200_v35, 1  ;;  %v18288_v53 = vld [vmem:[%s24363_s1 + $0x50] sm:$0xff]  ;;  %v819_v55 = vadd.f32 %v16043_v40, %v19562_v43  ;;  %10393 = vperm.xlu0 %18257, %v10344_v58   ;;  %16195 = vmatpush3.msra.mxu0 %v19651_v34 }
 0x141   : > { %16342 = vmatmul.mubr.msk.f32.gmra.mrb[14].mxu1 %vm500_vm12, %v3300_v51  ;;  %vm6089_vm10 = vcmp.lt.s32.totalorder %v18286_v52, 14  ;;  %25018 = vst [vmem:[#allocation116_spill] sm:$0xff] %v20365_v60  ;;  %v18287_v56 = vld [vmem:[%s18592_s30 + $0x34] sm:$0xff]  ;;  %vm6088_vm9 = vcmp.lt.s32.totalorder %v18288_v53, 14  ;;  %v20378_v47 = vld [vmem:[%s24368_s6 + $0x8] sm:$0xff]  ;;  %884 = vst.msk [vmem:[#allocation2 + $0xe8] sm:$0xff] %vm24579_vm6, %v851_v23 }
 0x142   : > { %16346 = vmatprep.mubr.msk.f32.mxu1 %vm500_vm12, %v3688_v18  ;;  %v2046_v9 = vsel %vm25019_vm8, %v18287_v56, 0.0  ;;  %v850_v44 = vmax.f32 %v804_v39, 0.0  ;;  %v9353_v51 = vld [vmem:[%s18592_s30 + $0x70] sm:$0xff]  ;;  %v9354_v18 = vld [vmem:[%s18592_s30 + $0x78] sm:$0xff]  ;;  %vm24577_vm4 = vcmp.eq.s32.totalorder %v20363_v63, 1  ;;  %vm24578_vm8 = vcmp.eq.s32.totalorder %v20365_v60, 1  ;;  %16494 = vmatprep.subr.mxu0 %v20378_v47 }
 0x143   : > { %16149 = vmatprep.mubr.msk.f32.mxu0 %vm500_vm12, %v2046_v9  ;;  %v25020_v56 = vld [vmem:[#allocation20_spill] sm:$0xff]  ;;  %v813_v17 = vpop.f32.mrb[31].mxu0  ;;  %v25022_v30 = vld [vmem:[#allocation61_spill] sm:$0xff]  ;;  %v6121_v43 = vsel %vm6089_vm10, 1, %v24890_v7  ;;  %v853_v50 = vmax.f32 %v819_v55, 0.0  ;;  %v20407_v34 = vsel %vm24578_vm8, %v9353_v51, 0.0  ;;  %v20416_v55 = vpop.permute.xlu1 %5243 }
 0x144   : > { %vm25021_vm13 = vcmp.eq.s32.totalorder %v25020_v56, 1  ;;  %v25023_v23 = vld [vmem:[#allocation57_spill] sm:$0xff]  ;;  %883 = vst.msk [vmem:[#allocation2 + $0xe0] sm:$0xff] %vm24579_vm6, %v850_v44  ;;  %v18289_v40 = vld [vmem:[%s24365_s3] ss:$0 sm:$0xff]  ;;  %v5127_v58 = vld [vmem:[%s18592_s30 + $0x81] sm:$0xff]  ;;  %6176 = vperm.xlu1 %18258, %v6121_v43  }
 0x145   : > { %v2047_v49 = vsel %vm25021_vm13, %v1823_v20, 0.0  ;;  %vm25024_vm15 = vcmp.eq.s32.totalorder %v25023_v23, 1  ;;  %v814_v20 = vadd.f32 %v18289_v40, %v813_v17  ;;  %vm10315_vm13 = vcmp.lt.s32.totalorder %v18286_v52, 13  ;;  %v5128_v9 = vld [vmem:[%s18592_s30 + $0x89] sm:$0xff]  ;;  %25025 = vst [vmem:[#allocation20_spill] sm:$0xff] %v20407_v34  ;;  %v18290_v17 = vld [vmem:[%s24366_s4 + $0x38] sm:$0xff]  ;;  %v20418_v23 = vpop.permute.xlu0 %5240 }
 0x146   : > { %v3689_v39 = vsel %vm25024_vm15, %v25022_v30, 0.0  ;;  %v6120_v30 = vsel %vm6088_vm9, 1, %v24890_v7  ;;  %v20411_v44 = vsel %vm24577_vm4, %v9354_v18, 0.0  ;;  %25027 = vst [vmem:[#allocation57_spill] sm:$0xff] %v20416_v55  ;;  %25028 = vst [vmem:[#allocation117_spill] sm:$0xff] %v20418_v23  ;;  %16150 = vmatmul.mubr.msk.f32.gmra.mrb[34].mxu0 %vm500_vm12, %v2047_v49  ;;  %v1825_v40 = vld [vmem:[%s18592_s30 + $0x4c] sm:$0xff] }
 0x147   : > { %16347 = vmatmul.mubr.msk.f32.vlgmr.msra.gmra.mrb[16].mxu1 %vm500_vm12, %v3689_v39  ;;  %25026 = vst [vmem:[#allocation61_spill] sm:$0xff] %v20411_v44  ;;  %v25029_v39 = vld [vmem:[#allocation60_spill] sm:$0xff]  ;;  %vm10314_vm10 = vcmp.lt.s32.totalorder %v18288_v53, 13  ;;  %v20428_v18 = vld [vmem:[%s24366_s4 + $0x40] sm:$0xff]  ;;  %886 = vst.msk [vmem:[#allocation2 + $0xf8] sm:$0xff] %vm24579_vm6, %v853_v50  ;;  %vm24580_vm9 = vcmp.eq.s32.totalorder %v20416_v55, 1  ;;  %6173 = vperm.xlu0 %18257, %v6120_v30  }
 0x148   : > { %16395 = vmatpush3.msra.mxu1 %v18290_v17  ;;  %vm25030_vm15 = vcmp.eq.s32.totalorder %v25029_v39, 1  ;;  %v852_v17 = vmax.f32 %v814_v20, 0.0  ;;  %vm24717_vm4 = vcmp.eq.s32.totalorder %v20418_v23, 1  ;;  %v18291_v49 = vld [vmem:[%s18592_s30 + $0x44] sm:$0xff]  ;;  %v25031_v44 = vld [vmem:[#allocation22_spill] sm:$0xff]  ;;  %v10347_v20 = vsel %vm10315_vm13, 1, %v24890_v7 }
 0x149   : > { %v3690_v51 = vsel %vm25030_vm15, %v19637_v37, 0.0  ;;  %vm25032_vm15 = vcmp.eq.s32.totalorder %v25031_v44, 1  ;;  %v25033_v34 = vld [vmem:[#allocation59_spill] sm:$0xff]  ;;  %v20446_v43 = vsel %vm24717_vm4, %v5127_v58, 0.0  ;;  %v18292_v58 = vld [vmem:[%s24363_s1 + $0x68] sm:$0xff]  ;;  %16444 = vmatprep.subr.mxu1 %v20428_v18  ;;  %10402 = vperm.xlu1 %18258, %v10347_v20   ;;  %v25048_v20 = vld [vmem:[#allocation65_spill] sm:$0xff] }
 0x14a   : > { %16349 = vmatprep.mubr.msk.f32.mxu1 %vm500_vm12, %v3690_v51  ;;  %v2048_v37 = vsel %vm25032_vm15, %v18291_v49, 0.0  ;;  %vm25034_vm8 = vcmp.eq.s32.totalorder %v25033_v34, 1  ;;  %885 = vst.msk [vmem:[#allocation2 + $0xf0] sm:$0xff] %vm24579_vm6, %v852_v17  ;;  %25035 = vst [vmem:[#allocation60_spill] sm:$0xff] %v20446_v43  ;;  %v20450_v51 = vsel %vm24580_vm9, %v5128_v9, 0.0  ;;  %v2049_v49 = vsel %vm2017_vm0, %v1825_v40, 0.0 }
 0x14b   : > { %16152 = vmatprep.mubr.msk.f32.mxu0 %vm500_vm12, %v2048_v37  ;;  %v3691_v50 = vsel %vm25034_vm8, %v19646_v12, 0.0  ;;  %25036 = vst [vmem:[#allocation22_spill] sm:$0xff] %v20450_v51  ;;  %v25038_v12 = vld [vmem:[#allocation63_spill] sm:$0xff]  ;;  %v10346_v17 = vsel %vm10314_vm10, 1, %v24890_v7  ;;  %vm6091_vm13 = vcmp.lt.s32.totalorder %v18292_v58, 14  ;;  %v9356_v37 = vld [vmem:[%s18592_s30 + $0x88] sm:$0xff]  ;;  %v20468_v51 = vpop.permute.xlu0 %9466 }
 0x14c   : > { %16350 = vmatmul.mubr.msk.f32.gmra.mrb[18].mxu1 %vm500_vm12, %v3691_v50  ;;  %vm25039_vm8 = vcmp.eq.s32.totalorder %v25038_v12, 1  ;;  %v9355_v9 = vld [vmem:[%s18592_s30 + $0x80] sm:$0xff]  ;;  %v20466_v50 = vpop.permute.xlu1 %9469  ;;  %25041 = vst [vmem:[#allocation21_spill] sm:$0xff] %v20468_v51  ;;  %16153 = vmatmul.mubr.msk.f32.gmra.mrb[36].mxu0 %vm500_vm12, %v2049_v49  ;;  %v25042_v53 = vld [vmem:[#allocation24_spill] sm:$0xff]  ;;  %vm24590_vm6 = vcmp.eq.s32.totalorder %v20468_v51, 1  ;;  %v25044_v49 = vld [vmem:[#allocation62_spill] sm:$0xff] }
 0x14d   : > { %v3692_v52 = vsel %vm25039_vm8, %v19682_v4, 0.0  ;;  %25040 = vst [vmem:[#allocation59_spill] sm:$0xff] %v20466_v50  ;;  %v18293_v4 = vld [vmem:[%s18592_s30 + $0x54] sm:$0xff]  ;;  %vm25043_vm10 = vcmp.eq.s32.totalorder %v25042_v53, 1  ;;  %v18294_v43 = vld [vmem:[%s24363_s1 + $0x60] sm:$0xff]  ;;  %vm24589_vm8 = vcmp.eq.s32.totalorder %v20466_v50, 1  ;;  %10399 = vperm.xlu0 %18257, %v10346_v17  }
 0x14e   : > { %16352 = vmatprep.mubr.msk.f32.mxu1 %vm500_vm12, %v3692_v52  ;;  %v2050_v40 = vsel %vm25043_vm10, %v18293_v4, 0.0  ;;  %vm6090_vm15 = vcmp.lt.s32.totalorder %v18294_v43, 14  ;;  %vm25045_vm9 = vcmp.eq.s32.totalorder %v25044_v49, 1  ;;  %v6123_v4 = vsel %vm6091_vm13, 1, %v24890_v7  ;;  %v5130_v41 = vld [vmem:[%s18592_s30 + $0x99] sm:$0xff]  ;;  %v18298_v26 = vld [vmem:[%s24363_s1 + $0x70] sm:$0xff] }
 0x14f   : > { %16155 = vmatprep.mubr.msk.f32.mxu0 %vm500_vm12, %v2050_v40  ;;  %v3693_v52 = vsel %vm25045_vm9, %v19697_v10, 0.0  ;;  %v20488_v63 = vsel %vm24590_vm6, %v9355_v9, 0.0  ;;  %v20492_v60 = vsel %vm24589_vm8, %v9356_v37, 0.0  ;;  %vm25049_vm10 = vcmp.eq.s32.totalorder %v25048_v20, 1  ;;  %v5129_v10 = vld [vmem:[%s18592_s30 + $0x91] sm:$0xff]  ;;  %v20503_v51 = vpop.permute.xlu0 %5246  ;;  %v18295_v37 = vld [vmem:[%s18592_s30 + $0x64] sm:$0xff]  ;;  %6182 = vperm.xlu1 %18258, %v6123_v4  }
 0x150   : > { %25046 = vst [vmem:[#allocation63_spill] sm:$0xff] %v20488_v63  ;;  %25047 = vst [vmem:[#allocation24_spill] sm:$0xff] %v20492_v60  ;;  %16353 = vmatmul.mubr.msk.f32.gmra.mrb[20].mxu1 %vm500_vm12, %v3693_v52  ;;  %v3694_v17 = vsel %vm25049_vm10, %v19732_v38, 0.0  ;;  %v6122_v40 = vsel %vm6090_vm15, 1, %v24890_v7  ;;  %vm10317_vm9 = vcmp.lt.s32.totalorder %v18292_v58, 13  ;;  %v20501_v46 = vpop.permute.xlu1 %5249  ;;  %v25052_v9 = vld [vmem:[#allocation25_spill] sm:$0xff] }
 0x151   : > { %25050 = vst [vmem:[#allocation62_spill] sm:$0xff] %v20501_v46  ;;  %25051 = vst [vmem:[#allocation65_spill] sm:$0xff] %v20503_v51  ;;  %16156 = vmatmul.mubr.msk.f32.gmra.mrb[38].mxu0 %vm500_vm12, %v25052_v9  ;;  %16355 = vmatprep.mubr.msk.f32.mxu1 %vm500_vm12, %v3694_v17  ;;  %v2052_v60 = vsel %vm2020_vm2, %v18295_v37, 0.0  ;;  %vm10316_vm13 = vcmp.lt.s32.totalorder %v18294_v43, 13  ;;  %vm24593_vm15 = vcmp.eq.s32.totalorder %v20501_v46, 1  ;;  %vm24594_vm10 = vcmp.eq.s32.totalorder %v20503_v51, 1 }
 0x152   : > { %16158 = vmatprep.mubr.msk.f32.mxu0 %vm500_vm12, %v2052_v60  ;;  %6179 = vperm.xlu0 %18257, %v6122_v40   ;;  %v25054_v38 = vld [vmem:[#allocation70_spill] sm:$0xff]  ;;  %v25055_v63 = vld [vmem:[#allocation64_spill] sm:$0xff]  ;;  %v10349_v9 = vsel %vm10317_vm9, 1, %v24890_v7  ;;  %v20521_v43 = vsel %vm24594_vm10, %v5129_v10, 0.0  ;;  %v20525_v37 = vsel %vm24593_vm15, %v5130_v41, 0.0  ;;  %v25059_v60 = vld [vmem:[#allocation67_spill] sm:$0xff] }
 0x153   : > { %vm25056_vm8 = vcmp.eq.s32.totalorder %v25055_v63, 1  ;;  %25057 = vst [vmem:[#allocation25_spill] sm:$0xff] %v20521_v43  ;;  %25058 = vst [vmem:[#allocation27_spill] sm:$0xff] %v20525_v37  ;;  %vm25060_vm6 = vcmp.eq.s32.totalorder %v25059_v60, 1  ;;  %v10348_v40 = vsel %vm10316_vm13, 1, %v24890_v7  ;;  %v18296_v58 = vld [vmem:[%s24363_s1 + $0x78] sm:$0xff]  ;;  %v20539_v50 = vpop.permute.xlu0 %9472  ;;  %10408 = vperm.xlu1 %18258, %v10349_v9  }
 0x154   : > { %v3695_v17 = vsel %vm25056_vm8, %v25054_v38, 0.0  ;;  %v3696_v4 = vsel %vm25060_vm6, %v19783_v2, 0.0  ;;  %vm6093_vm8 = vcmp.lt.s32.totalorder %v18296_v58, 14  ;;  %v9357_v38 = vld [vmem:[%s18592_s30 + $0x90] sm:$0xff]  ;;  %v9358_v10 = vld [vmem:[%s18592_s30 + $0x98] sm:$0xff]  ;;  %v20537_v43 = vpop.permute.xlu1 %9475  ;;  %25062 = vst [vmem:[#allocation64_spill] sm:$0xff] %v20539_v50 }
 0x155   : > { %16356 = vmatmul.mubr.msk.f32.gmra.mrb[22].mxu1 %vm500_vm12, %v3695_v17  ;;  %25061 = vst [vmem:[#allocation70_spill] sm:$0xff] %v20537_v43  ;;  %v25063_v41 = vld [vmem:[#allocation28_spill] sm:$0xff]  ;;  %v18297_v17 = vld [vmem:[%s18592_s30 + $0x74] sm:$0xff]  ;;  %vm6092_vm9 = vcmp.lt.s32.totalorder %v18298_v26, 14  ;;  %vm24605_vm13 = vcmp.eq.s32.totalorder %v20537_v43, 1  ;;  %vm24606_vm15 = vcmp.eq.s32.totalorder %v20539_v50, 1 }
 0x156   : > { %16159 = vmatmul.mubr.msk.f32.gmra.mrb[40].mxu0 %vm500_vm12, %v25063_v41  ;;  %16358 = vmatprep.mubr.msk.f32.mxu1 %vm500_vm12, %v3696_v4  ;;  %v25064_v2 = vld [vmem:[#allocation30_spill] sm:$0xff]  ;;  %v20560_v46 = vsel %vm24606_vm15, %v9357_v38, 0.0  ;;  %v20564_v51 = vsel %vm24605_vm13, %v9358_v10, 0.0  ;;  %v25070_v9 = vld [vmem:[#allocation69_spill] sm:$0xff]  ;;  %v25074_v38 = vld [vmem:[#allocation31_spill] sm:$0xff] }
 0x157   : > { %vm25065_vm6 = vcmp.eq.s32.totalorder %v25064_v2, 1  ;;  %10405 = vperm.xlu0 %18257, %v10348_v40   ;;  %v25066_v4 = vld [vmem:[#allocation66_spill] sm:$0xff]  ;;  %25068 = vst [vmem:[#allocation67_spill] sm:$0xff] %v20560_v46  ;;  %25069 = vst [vmem:[#allocation28_spill] sm:$0xff] %v20564_v51  ;;  %v6124_v40 = vsel %vm6092_vm9, 1, %v24890_v7  ;;  %v5132_v55 = vld [vmem:[%s18592_s30 + $0xa9] sm:$0xff]  ;;  %v20575_v50 = vpop.permute.xlu0 %5252 }
 0x158   : > { %v2054_v37 = vsel %vm25065_vm6, %v18297_v17, 0.0  ;;  %vm25067_vm10 = vcmp.eq.s32.totalorder %v25066_v4, 1  ;;  %v6125_v17 = vsel %vm6093_vm8, 1, %v24890_v7  ;;  %vm25071_vm6 = vcmp.eq.s32.totalorder %v25070_v9, 1  ;;  %v20573_v23 = vpop.permute.xlu1 %5255  ;;  %25073 = vst [vmem:[#allocation66_spill] sm:$0xff] %v20575_v50  ;;  %v18299_v10 = vld [vmem:[%s18592_s30 + $0x84] sm:$0xff] }
 0x159   : > { %16161 = vmatprep.mubr.msk.f32.mxu0 %vm500_vm12, %v2054_v37  ;;  %v3697_v41 = vsel %vm25067_vm10, %v19800_v57, 0.0  ;;  %v3698_v37 = vsel %vm25071_vm6, %v19834_v62, 0.0  ;;  %vm10319_vm10 = vcmp.lt.s32.totalorder %v18296_v58, 13  ;;  %v5131_v57 = vld [vmem:[%s18592_s30 + $0xa1] sm:$0xff]  ;;  %25072 = vst [vmem:[#allocation30_spill] sm:$0xff] %v20573_v23  ;;  %vm10318_vm8 = vcmp.lt.s32.totalorder %v18298_v26, 13  ;;  %6188 = vperm.xlu1 %18258, %v6125_v17  }
 0x15a   : > { %16359 = vmatmul.mubr.msk.f32.gmra.mrb[24].mxu1 %vm500_vm12, %v3697_v41  ;;  %16162 = vmatmul.mubr.msk.f32.gmra.mrb[42].mxu0 %vm500_vm12, %v25074_v38  ;;  %v2056_v41 = vsel %vm2024_vm7, %v18299_v10, 0.0  ;;  %vm24607_vm9 = vcmp.eq.s32.totalorder %v20573_v23, 1  ;;  %vm24610_vm6 = vcmp.eq.s32.totalorder %v20575_v50, 1  ;;  %v25075_v62 = vld [vmem:[#allocation68_spill] sm:$0xff]  ;;  %v9359_v58 = vld [vmem:[%s18592_s30 + $0xa0] sm:$0xff]  ;;  %v25268_v52 = vld [vmem:[#allocation26_spill] sm:$0xff] }
 0x15b   : > { %16361 = vmatprep.mubr.msk.f32.mxu1 %vm500_vm12, %v3698_v37  ;;  %16164 = vmatprep.mubr.msk.f32.mxu0 %vm500_vm12, %v2056_v41  ;;  %vm25076_vm13 = vcmp.eq.s32.totalorder %v25075_v62, 1  ;;  %v10351_v37 = vsel %vm10319_vm10, 1, %v24890_v7  ;;  %v20593_v10 = vsel %vm24610_vm6, %v5131_v57, 0.0  ;;  %v20597_v26 = vsel %vm24607_vm9, %v5132_v55, 0.0  ;;  %v9360_v57 = vld [vmem:[%s18592_s30 + $0xa8] sm:$0xff]  ;;  %v20611_v46 = vpop.permute.xlu0 %9478  ;;  %v25082_v55 = vld [vmem:[#allocation33_spill] sm:$0xff] }
 0x15c   : > { %6185 = vperm.xlu0 %18257, %v6124_v40   ;;  %v3699_v38 = vsel %vm25076_vm13, %v19854_v27, 0.0  ;;  %25077 = vst [vmem:[#allocation69_spill] sm:$0xff] %v20593_v10  ;;  %25078 = vst [vmem:[#allocation31_spill] sm:$0xff] %v20597_v26  ;;  %v3700_v40 = vsel %vm1091_vm1, %v19771_v33, 0.0  ;;  %v10350_v41 = vsel %vm10318_vm8, 1, %v24890_v7  ;;  %v18300_v27 = vld [vmem:[%s24363_s1 + $0x88] sm:$0xff]  ;;  %v20609_v51 = vpop.permute.xlu1 %9481 }
 0x15d   : > { %vm6095_vm13 = vcmp.lt.s32.totalorder %v18300_v27, 14  ;;  %25080 = vst [vmem:[#allocation68_spill] sm:$0xff] %v20609_v51  ;;  %25081 = vst [vmem:[#allocation72_spill] sm:$0xff] %v20611_v46  ;;  %v18301_v26 = vld [vmem:[%s24363_s1 + $0x80] sm:$0xff]  ;;  %vm24617_vm8 = vcmp.eq.s32.totalorder %v20609_v51, 1  ;;  %vm24618_vm15 = vcmp.eq.s32.totalorder %v20611_v46, 1  ;;  %10414 = vperm.xlu1 %18258, %v10351_v37  }
 0x15e   : > { %16362 = vmatmul.mubr.msk.f32.gmra.mrb[26].mxu1 %vm500_vm12, %v3699_v38  ;;  %16165 = vmatmul.mubr.msk.f32.gmra.mrb[44].mxu0 %vm500_vm12, %v25082_v55  ;;  %v25083_v38 = vld [vmem:[#allocation73_spill] sm:$0xff]  ;;  %vm6094_vm10 = vcmp.lt.s32.totalorder %v18301_v26, 14  ;;  %v20632_v10 = vsel %vm24618_vm15, %v9359_v58, 0.0  ;;  %v20636_v43 = vsel %vm24617_vm8, %v9360_v57, 0.0  ;;  %v25088_v37 = vld [vmem:[#allocation74_spill] sm:$0xff]  ;;  %vm25089_vm6 = vcmp.eq.s32.totalorder %v19829_v11, 1 }
 0x15f   : > { %16364 = vmatprep.mubr.msk.f32.mxu1 %vm500_vm12, %v3700_v40  ;;  %v2058_v33 = vsel %vm2026_vm11, %v25083_v38, 0.0  ;;  %v25084_v40 = vld [vmem:[#allocation71_spill] sm:$0xff]  ;;  %v6127_v38 = vsel %vm6095_vm13, 1, %v24890_v7  ;;  %25086 = vst [vmem:[#allocation33_spill] sm:$0xff] %v20632_v10  ;;  %25087 = vst [vmem:[#allocation73_spill] sm:$0xff] %v20636_v43  ;;  %v20647_v46 = vpop.permute.xlu0 %5258  ;;  %v25093_v57 = vld [vmem:[#allocation76_spill] sm:$0xff] }
 0x160   : > { %16167 = vmatprep.mubr.msk.f32.mxu0 %vm500_vm12, %v2058_v33  ;;  %10411 = vperm.xlu0 %18257, %v10350_v41   ;;  %vm25085_vm9 = vcmp.eq.s32.totalorder %v25084_v40, 1  ;;  %v3702_v41 = vsel %vm25089_vm6, %v25088_v37, 0.0  ;;  %v6126_v33 = vsel %vm6094_vm10, 1, %v24890_v7  ;;  %v5134_v23 = vld [vmem:[%s18592_s30 + $0xb9] sm:$0xff]  ;;  %v20645_v50 = vpop.permute.xlu1 %5261  ;;  %25091 = vst [vmem:[#allocation74_spill] sm:$0xff] %v20647_v46  ;;  %vm25094_vm13 = vcmp.eq.s32.totalorder %v19338_v54, 1 }
 0x161   : > { %v3701_v55 = vsel %vm25085_vm9, %v19843_v5, 0.0  ;;  %vm10321_vm9 = vcmp.lt.s32.totalorder %v18300_v27, 13  ;;  %v5133_v5 = vld [vmem:[%s18592_s30 + $0xb1] sm:$0xff]  ;;  %25090 = vst [vmem:[#allocation71_spill] sm:$0xff] %v20645_v50  ;;  %v25092_v58 = vld [vmem:[#allocation35_spill] sm:$0xff]  ;;  %vm10320_vm6 = vcmp.lt.s32.totalorder %v18301_v26, 13  ;;  %6194 = vperm.xlu1 %18258, %v6127_v38  }
 0x162   : > { %16365 = vmatmul.mubr.msk.f32.gmra.mrb[28].mxu1 %vm500_vm12, %v3701_v55  ;;  %16168 = vmatmul.mubr.msk.f32.gmra.mrb[46].mxu0 %vm500_vm12, %v25092_v58  ;;  %v2060_v55 = vsel %vm25094_vm13, %v25093_v57, 0.0  ;;  %vm24619_vm10 = vcmp.eq.s32.totalorder %v20645_v50, 1  ;;  %vm24620_vm8 = vcmp.eq.s32.totalorder %v20647_v46, 1  ;;  %v25095_v27 = vld [vmem:[#allocation75_spill] sm:$0xff]  ;;  %v25099_v38 = vld [vmem:[#allocation4_spill] sm:$0xff]  ;;  %v10352_v57 = vsel %vm10320_vm6, 1, %v24890_v7 }
 0x163   : > { %16367 = vmatprep.mubr.msk.f32.mxu1 %vm500_vm12, %v3702_v41  ;;  %16170 = vmatprep.mubr.msk.f32.mxu0 %vm500_vm12, %v2060_v55  ;;  %vm25096_vm15 = vcmp.eq.s32.totalorder %v25095_v27, 1  ;;  %v10353_v41 = vsel %vm10321_vm9, 1, %v24890_v7  ;;  %v20664_v58 = vsel %vm24620_vm8, %v5133_v5, 0.0  ;;  %v20668_v26 = vsel %vm24619_vm10, %v5134_v23, 0.0  ;;  %v9361_v55 = vld [vmem:[%s18592_s30 + $0xb0] sm:$0xff]  ;;  %v9362_v5 = vld [vmem:[%s18592_s30 + $0xb8] sm:$0xff]  ;;  %v20682_v10 = vpop.permute.xlu0 %9484 }
 0x164   : > { %6191 = vperm.xlu0 %18257, %v6126_v33   ;;  %v3703_v37 = vsel %vm25096_vm15, %v19871_v25, 0.0  ;;  %25097 = vst [vmem:[#allocation35_spill] sm:$0xff] %v20664_v58  ;;  %25098 = vst [vmem:[#allocation76_spill] sm:$0xff] %v20668_v26  ;;  %vm25100_vm13 = vcmp.eq.s32.totalorder %v25099_v38, 1  ;;  %v18302_v25 = vld [vmem:[%s24363_s1 + $0x98] sm:$0xff]  ;;  %v20680_v43 = vpop.permute.xlu1 %9487  ;;  %v25103_v23 = vld [vmem:[#allocation37_spill] sm:$0xff] }
 0x165   : > { %v3704_v33 = vsel %vm25100_vm13, %v19920_v31, 0.0  ;;  %vm6097_vm15 = vcmp.lt.s32.totalorder %v18302_v25, 14  ;;  %25101 = vst [vmem:[#allocation75_spill] sm:$0xff] %v20680_v43  ;;  %25102 = vst [vmem:[#allocation4_spill] sm:$0xff] %v20682_v10  ;;  %vm25104_vm9 = vcmp.eq.s32.totalorder %v19363_v48, 1  ;;  %vm24625_vm13 = vcmp.eq.s32.totalorder %v20680_v43, 1  ;;  %10420 = vperm.xlu1 %18258, %v10353_v41  }
 0x166   : > { %16368 = vmatmul.mubr.msk.f32.gmra.mrb[30].mxu1 %vm500_vm12, %v3703_v37  ;;  %16171 = vmatmul.mubr.msk.f32.gmra.mrb[48].mxu0 %vm500_vm12, %v25103_v23  ;;  %v2062_v31 = vsel %vm25104_vm9, %v19894_v1, 0.0  ;;  %v18303_v37 = vld [vmem:[%s24363_s1 + $0x90] sm:$0xff]  ;;  %vm24626_vm10 = vcmp.eq.s32.totalorder %v20682_v10, 1  ;;  %v25105_v38 = vld [vmem:[#allocation83_spill] sm:$0xff]  ;;  %v6129_v1 = vsel %vm6097_vm15, 1, %v24890_v7  ;;  %v20707_v58 = vsel %vm24625_vm13, %v9362_v5, 0.0 }
 0x167   : > { %16370 = vmatprep.mubr.msk.f32.mxu1 %vm500_vm12, %v3704_v33  ;;  %vm6096_vm6 = vcmp.lt.s32.totalorder %v18303_v37, 14  ;;  %16173 = vmatprep.mubr.msk.f32.mxu0 %vm500_vm12, %v2062_v31  ;;  %v25106_v33 = vld [vmem:[#allocation6_spill] sm:$0xff]  ;;  %v20703_v26 = vsel %vm24626_vm10, %v9361_v55, 0.0  ;;  %25109 = vst [vmem:[#allocation83_spill] sm:$0xff] %v20707_v58  ;;  %v25110_v41 = vld [vmem:[#allocation3_spill] sm:$0xff]  ;;  %v20718_v10 = vpop.permute.xlu0 %5264  ;;  %vm25116_vm15 = vcmp.eq.s32.totalorder %v19382_v29, 1 }
 0x168   : > { %10417 = vperm.xlu0 %18257, %v10352_v57   ;;  %vm25107_vm8 = vcmp.eq.s32.totalorder %v25106_v33, 1  ;;  %25108 = vst [vmem:[#allocation37_spill] sm:$0xff] %v20703_v26  ;;  %vm25111_vm9 = vcmp.eq.s32.totalorder %v25110_v41, 1  ;;  %v6128_v31 = vsel %vm6096_vm6, 1, %v24890_v7  ;;  %v5136_v33 = vld [vmem:[%s18592_s30 + $0xc9] sm:$0xff]  ;;  %v20716_v51 = vpop.permute.xlu1 %5267  ;;  %25113 = vst [vmem:[#allocation3_spill] sm:$0xff] %v20718_v10 }
 0x169   : > { %v3705_v23 = vsel %vm25107_vm8, %v25105_v38, 0.0  ;;  %v3706_v57 = vsel %vm25111_vm9, %v19977_v21, 0.0  ;;  %vm10323_vm8 = vcmp.lt.s32.totalorder %v18302_v25, 13  ;;  %v5135_v38 = vld [vmem:[%s18592_s30 + $0xc1] sm:$0xff]  ;;  %25112 = vst [vmem:[#allocation6_spill] sm:$0xff] %v20716_v51  ;;  %v25115_v5 = vld [vmem:[#allocation82_spill] sm:$0xff]  ;;  %6200 = vperm.xlu1 %18258, %v6129_v1  }
 0x16a   : > { %16371 = vmatmul.mubr.msk.f32.gmra.mrb[0].mxu1 %vm500_vm12, %v3705_v23  ;;  %v25114_v55 = vld [vmem:[#allocation39_spill] sm:$0xff]  ;;  %v2064_v23 = vsel %vm25116_vm15, %v25115_v5, 0.0  ;;  %vm10322_vm9 = vcmp.lt.s32.totalorder %v18303_v37, 13  ;;  %vm24627_vm6 = vcmp.eq.s32.totalorder %v20716_v51, 1  ;;  %vm24628_vm13 = vcmp.eq.s32.totalorder %v20718_v10, 1  ;;  %v25117_v21 = vld [vmem:[#allocation5_spill] sm:$0xff] }
 0x16b   : > { %16174 = vmatmul.mubr.msk.f32.gmra.mrb[50].mxu0 %vm500_vm12, %v25114_v55  ;;  %16373 = vmatprep.mubr.msk.f32.mxu1 %vm500_vm12, %v3706_v57  ;;  %vm25118_vm10 = vcmp.eq.s32.totalorder %v25117_v21, 1  ;;  %v10355_v41 = vsel %vm10323_vm8, 1, %v24890_v7  ;;  %v20735_v57 = vsel %vm24628_vm13, %v5135_v38, 0.0  ;;  %v20739_v37 = vsel %vm24627_vm6, %v5136_v33, 0.0  ;;  %v25121_v1 = vld [vmem:[#allocation8_spill] sm:$0xff]  ;;  %v9363_v5 = vld [vmem:[%s18592_s30 + $0xc0] sm:$0xff]  ;;  %v20753_v21 = vpop.permute.xlu0 %9490 }
 0x16c   : > { %16176 = vmatprep.mubr.msk.f32.mxu0 %vm500_vm12, %v2064_v23  ;;  %6197 = vperm.xlu0 %18257, %v6128_v31   ;;  %v3707_v25 = vsel %vm25118_vm10, %v19980_v16, 0.0  ;;  %25119 = vst [vmem:[#allocation39_spill] sm:$0xff] %v20735_v57  ;;  %25120 = vst [vmem:[#allocation82_spill] sm:$0xff] %v20739_v37  ;;  %vm25122_vm15 = vcmp.eq.s32.totalorder %v25121_v1, 1  ;;  %v10354_v55 = vsel %vm10322_vm9, 1, %v24890_v7  ;;  %v18304_v16 = vld [vmem:[%s24363_s1 + $0xa8] sm:$0xff]  ;;  %v20751_v23 = vpop.permute.xlu1 %9493 }
 0x16d   : > { %v3708_v31 = vsel %vm25122_vm15, %v20031_v32, 0.0  ;;  %vm6099_vm10 = vcmp.lt.s32.totalorder %v18304_v16, 14  ;;  %v9364_v38 = vld [vmem:[%s18592_s30 + $0xc8] sm:$0xff]  ;;  %25123 = vst [vmem:[#allocation5_spill] sm:$0xff] %v20751_v23  ;;  %25124 = vst [vmem:[#allocation8_spill] sm:$0xff] %v20753_v21  ;;  %v25125_v33 = vld [vmem:[#allocation41_spill] sm:$0xff]  ;;  %10426 = vperm.xlu1 %18258, %v10355_v41  }
 0x16e   : > { %16374 = vmatmul.mubr.msk.f32.gmra.mrb[2].mxu1 %vm500_vm12, %v3707_v25  ;;  %vm25126_vm8 = vcmp.eq.s32.totalorder %v19407_v6, 1  ;;  %v18305_v25 = vld [vmem:[%s24363_s1 + $0xa0] sm:$0xff]  ;;  %vm24629_vm15 = vcmp.eq.s32.totalorder %v20751_v23, 1  ;;  %vm24630_vm6 = vcmp.eq.s32.totalorder %v20753_v21, 1  ;;  %v25131_v41 = vld [vmem:[#allocation10_spill] sm:$0xff]  ;;  %v25277_v42 = vld [vmem:[#allocation32_spill] sm:$0xff] }
 0x16f   : > { %16177 = vmatmul.mubr.msk.f32.gmra.mrb[52].mxu0 %vm500_vm12, %v25125_v33  ;;  %16376 = vmatprep.mubr.msk.f32.mxu1 %vm500_vm12, %v3708_v31  ;;  %v2066_v32 = vsel %vm25126_vm8, %v20002_v19, 0.0  ;;  %vm6098_vm9 = vcmp.lt.s32.totalorder %v18305_v25, 14  ;;  %v25127_v1 = vld [vmem:[#allocation7_spill] sm:$0xff]  ;;  %v6131_v19 = vsel %vm6099_vm10, 1, %v24890_v7  ;;  %v20774_v33 = vsel %vm24630_vm6, %v9363_v5, 0.0  ;;  %v20789_v37 = vpop.permute.xlu0 %5270 }
 0x170   : > { %16179 = vmatprep.mubr.msk.f32.mxu0 %vm500_vm12, %v2066_v32  ;;  %10423 = vperm.xlu0 %18257, %v10354_v55   ;;  %vm25128_vm13 = vcmp.eq.s32.totalorder %v25127_v1, 1  ;;  %25129 = vst [vmem:[#allocation41_spill] sm:$0xff] %v20774_v33  ;;  %v20778_v58 = vsel %vm24629_vm15, %v9364_v38, 0.0  ;;  %vm25132_vm8 = vcmp.eq.s32.totalorder %v25131_v41, 1  ;;  %v6130_v32 = vsel %vm6098_vm9, 1, %v24890_v7  ;;  %v5138_v1 = vld [vmem:[%s18592_s30 + $0xd9] sm:$0xff]  ;;  %v20787_v26 = vpop.permute.xlu1 %5273 }
 0x171   : > { %v3709_v31 = vsel %vm25128_vm13, %v20039_v36, 0.0  ;;  %25130 = vst [vmem:[#allocation7_spill] sm:$0xff] %v20778_v58  ;;  %v3710_v55 = vsel %vm25132_vm8, %v20093_v24, 0.0  ;;  %vm10325_vm13 = vcmp.lt.s32.totalorder %v18304_v16, 13  ;;  %v5137_v36 = vld [vmem:[%s18592_s30 + $0xd1] sm:$0xff]  ;;  %25133 = vst [vmem:[#allocation10_spill] sm:$0xff] %v20787_v26  ;;  %6206 = vperm.xlu1 %18258, %v6131_v19  }
 0x172   : > { %16377 = vmatmul.mubr.msk.f32.gmra.mrb[4].mxu1 %vm500_vm12, %v3709_v31  ;;  %25134 = vst [vmem:[#allocation118_spill] sm:$0xff] %v20789_v37  ;;  %v25135_v5 = vld [vmem:[#allocation43_spill] sm:$0xff]  ;;  %v2068_v38 = vsel %vm2036_vm5, %v20059_v15, 0.0  ;;  %vm10324_vm10 = vcmp.lt.s32.totalorder %v18305_v25, 13  ;;  %vm24631_vm9 = vcmp.eq.s32.totalorder %v20787_v26, 1  ;;  %vm24632_vm8 = vcmp.eq.s32.totalorder %v20789_v37, 1 }
 0x173   : > { %16180 = vmatmul.mubr.msk.f32.gmra.mrb[54].mxu0 %vm500_vm12, %v25135_v5  ;;  %16379 = vmatprep.mubr.msk.f32.mxu1 %vm500_vm12, %v3710_v55  ;;  %v25136_v24 = vld [vmem:[#allocation9_spill] sm:$0xff]  ;;  %v10357_v31 = vsel %vm10325_vm13, 1, %v24890_v7  ;;  %v20806_v15 = vsel %vm24632_vm8, %v5137_v36, 0.0  ;;  %v20810_v25 = vsel %vm24631_vm9, %v5138_v1, 0.0  ;;  %vm25140_vm6 = vcmp.eq.s32.totalorder %v24958_v8, 1  ;;  %v20824_v5 = vpop.permute.xlu0 %9496  ;;  %v25144_v8 = vld [vmem:[#allocation94_spill] sm:$0xff] }
 0x174   : > { %16182 = vmatprep.mubr.msk.f32.mxu0 %vm500_vm12, %v2068_v38  ;;  %6203 = vperm.xlu0 %18257, %v6130_v32   ;;  %vm25137_vm15 = vcmp.eq.s32.totalorder %v25136_v24, 1  ;;  %25138 = vst [vmem:[#allocation43_spill] sm:$0xff] %v20806_v15  ;;  %25139 = vst [vmem:[#allocation9_spill] sm:$0xff] %v20810_v25  ;;  %v3712_v19 = vsel %vm25140_vm6, %v20156_v22, 0.0  ;;  %v10356_v41 = vsel %vm10324_vm10, 1, %v24890_v7  ;;  %v9365_v55 = vld [vmem:[%s18592_s30 + $0xd0] sm:$0xff]  ;;  %v20822_v36 = vpop.permute.xlu1 %9499 }
 0x175   : > { %v3711_v16 = vsel %vm25137_vm15, %v20131_v0, 0.0  ;;  %v18306_v0 = vld [vmem:[%s24363_s1 + $0xb8] sm:$0xff]  ;;  %25141 = vst [vmem:[#allocation119_spill] sm:$0xff] %v20822_v36  ;;  %25142 = vst [vmem:[#allocation120_spill] sm:$0xff] %v20824_v5  ;;  %v25143_v1 = vld [vmem:[#allocation45_spill] sm:$0xff]  ;;  %vm24633_vm10 = vcmp.eq.s32.totalorder %v20822_v36, 1  ;;  %10432 = vperm.xlu1 %18258, %v10357_v31  }
 0x176   : > { %16380 = vmatmul.mubr.msk.f32.gmra.mrb[6].mxu1 %vm500_vm12, %v3711_v16  ;;  %vm6101_vm15 = vcmp.lt.s32.totalorder %v18306_v0, 14  ;;  %v9366_v32 = vld [vmem:[%s18592_s30 + $0xd8] sm:$0xff]  ;;  %v25145_v22 = vld [vmem:[#allocation47_spill] sm:$0xff]  ;;  %v18307_v24 = vld [vmem:[%s24363_s1 + $0xb0] sm:$0xff]  ;;  %vm24634_vm9 = vcmp.eq.s32.totalorder %v20824_v5, 1 }
 0x177   : > { %16183 = vmatmul.mubr.msk.f32.gmra.mrb[56].mxu0 %vm500_vm12, %v25143_v1  ;;  %16382 = vmatprep.mubr.msk.f32.mxu1 %vm500_vm12, %v3712_v19  ;;  %vm25146_vm6 = vcmp.eq.s32.totalorder %v25145_v22, 1  ;;  %vm6100_vm13 = vcmp.lt.s32.totalorder %v18307_v24, 14  ;;  %v25147_v16 = vld [vmem:[#allocation100_spill] sm:$0xff]  ;;  %v25148_v19 = vld [vmem:[#allocation11_spill] sm:$0xff]  ;;  %v20845_v58 = vsel %vm24634_vm9, %v9365_v55, 0.0  ;;  %v20849_v33 = vsel %vm24633_vm10, %v9366_v32, 0.0  ;;  %v20860_v57 = vpop.permute.xlu0 %5276 }
 0x178   : > { %v2070_v38 = vsel %vm25146_vm6, %v25144_v8, 0.0  ;;  %10429 = vperm.xlu0 %18257, %v10356_v41   ;;  %vm25149_vm8 = vcmp.eq.s32.totalorder %v25148_v19, 1  ;;  %v6133_v8 = vsel %vm6101_vm15, 1, %v24890_v7  ;;  %25150 = vst [vmem:[#allocation45_spill] sm:$0xff] %v20845_v58  ;;  %25151 = vst [vmem:[#allocation94_spill] sm:$0xff] %v20849_v33  ;;  %v25152_v31 = vld [vmem:[#allocation51_spill] sm:$0xff]  ;;  %v20858_v15 = vpop.permute.xlu1 %5279 }
 0x179   : > { %16185 = vmatprep.mubr.msk.f32.mxu0 %vm500_vm12, %v2070_v38  ;;  %v3713_v1 = vsel %vm25149_vm8, %v25147_v16, 0.0  ;;  %v25153_v41 = vld [vmem:[#allocation14_spill] sm:$0xff]  ;;  %v6132_v19 = vsel %vm6100_vm13, 1, %v24890_v7  ;;  %vm10327_vm8 = vcmp.lt.s32.totalorder %v18306_v0, 13  ;;  %v5139_v16 = vld [vmem:[%s18592_s30 + $0xe1] sm:$0xff]  ;;  %v5140_v25 = vld [vmem:[%s18592_s30 + $0xe9] sm:$0xff]  ;;  %6212 = vperm.xlu1 %18258, %v6133_v8  }
 0x17a   : > { %16383 = vmatmul.mubr.msk.f32.gmra.mrb[8].mxu1 %vm500_vm12, %v3713_v1  ;;  %vm25154_vm6 = vcmp.eq.s32.totalorder %v25153_v41, 1  ;;  %25155 = vst [vmem:[#allocation47_spill] sm:$0xff] %v20858_v15  ;;  %25156 = vst [vmem:[#allocation100_spill] sm:$0xff] %v20860_v57  ;;  %v25157_v55 = vld [vmem:[#allocation48_spill] sm:$0xff]  ;;  %v25158_v32 = vld [vmem:[#allocation99_spill] sm:$0xff]  ;;  %vm24637_vm13 = vcmp.eq.s32.totalorder %v20858_v15, 1 }
 0x17b   : > { %v3714_v38 = vsel %vm25154_vm6, %v25152_v31, 0.0  ;;  %16186 = vmatmul.mubr.msk.f32.gmra.mrb[58].mxu0 %vm500_vm12, %v25157_v55  ;;  %v25159_v1 = vld [vmem:[#allocation50_spill] sm:$0xff]  ;;  %v3684_v31 = vld [vmem:[%s18592_s30 + $0x122] sm:$0xff]  ;;  %vm10326_vm6 = vcmp.lt.s32.totalorder %v18307_v24, 13  ;;  %vm24644_vm10 = vcmp.eq.s32.totalorder %v20860_v57, 1  ;;  %v25162_v33 = vld [vmem:[#allocation13_spill] sm:$0xff] }
 0x17c   : > { %16385 = vmatprep.mubr.msk.f32.mxu1 %vm500_vm12, %v3714_v38  ;;  %vm25160_vm15 = vcmp.eq.s32.totalorder %v25159_v1, 1  ;;  %6209 = vperm.xlu0 %18257, %v6132_v19   ;;  %v25161_v55 = vld [vmem:[#allocation106_spill] sm:$0xff]  ;;  %vm25163_vm9 = vcmp.eq.s32.totalorder %v25162_v33, 1  ;;  %v10359_v58 = vsel %vm10327_vm8, 1, %v24890_v7  ;;  %v20879_v24 = vsel %vm24644_vm10, %v5139_v16, 0.0  ;;  %v25166_v8 = vld [vmem:[#allocation16_spill] sm:$0xff] }
 0x17d   : > { %v2072_v41 = vsel %vm25160_vm15, %v25158_v32, 0.0  ;;  %v3715_v38 = vsel %vm25163_vm9, %v25161_v55, 0.0  ;;  %25164 = vst [vmem:[#allocation11_spill] sm:$0xff] %v20879_v24  ;;  %v20883_v32 = vsel %vm24637_vm13, %v5140_v25, 0.0  ;;  %vm25167_vm15 = vcmp.eq.s32.totalorder %v25166_v8, 1  ;;  %v18308_v0 = vld [vmem:[%s24363_s1 + $0xc8] sm:$0xff]  ;;  %v20895_v24 = vpop.permute.xlu1 %9505  ;;  %v20897_v25 = vpop.permute.xlu0 %9502  ;;  %10438 = vperm.xlu1 %18258, %v10359_v58  }
 0x17e   : > { %16188 = vmatprep.mubr.msk.f32.mxu0 %vm500_vm12, %v2072_v41  ;;  %25165 = vst [vmem:[#allocation51_spill] sm:$0xff] %v20883_v32  ;;  %16386 = vmatmul.mubr.msk.f32.gmra.mrb[10].mxu1 %vm500_vm12, %v3715_v38  ;;  %v3716_v19 = vsel %vm25167_vm15, %v3684_v31, 0.0  ;;  %v10358_v33 = vsel %vm10326_vm6, 1, %v24890_v7  ;;  %v3685_v41 = vld [vmem:[%s18592_s30 + $0x12a] sm:$0xff]  ;;  %vm6103_vm9 = vcmp.lt.s32.totalorder %v18308_v0, 14  ;;  %v9367_v16 = vld [vmem:[%s18592_s30 + $0xe0] sm:$0xff] }
 0x17f   : > { %v9368_v55 = vld [vmem:[%s18592_s30 + $0xe8] sm:$0xff]  ;;  %25168 = vst [vmem:[#allocation14_spill] sm:$0xff] %v20895_v24  ;;  %25169 = vst [vmem:[#allocation48_spill] sm:$0xff] %v20897_v25  ;;  %16388 = vmatprep.mubr.msk.f32.mxu1 %vm500_vm12, %v3716_v19  ;;  %v25171_v31 = vld [vmem:[#allocation105_spill] sm:$0xff]  ;;  %vm24649_vm6 = vcmp.eq.s32.totalorder %v20895_v24, 1  ;;  %vm24650_vm15 = vcmp.eq.s32.totalorder %v20897_v25, 1 }
 0x180   : > { %v25170_v32 = vld [vmem:[#allocation52_spill] sm:$0xff]  ;;  %v2074_v38 = vsel %vm2042_vm3, %v25171_v31, 0.0  ;;  %v3686_v8 = vld [vmem:[%s18592_s30 + $0x132] sm:$0xff]  ;;  %v18309_v36 = vld [vmem:[%s24363_s1 + $0xc0] sm:$0xff]  ;;  %10435 = vperm.xlu0 %18257, %v10358_v33   ;;  %v6135_v5 = vsel %vm6103_vm9, 1, %v24890_v7  ;;  %v20919_v23 = vsel %vm24650_vm15, %v9367_v16, 0.0 }
 0x181   : > { %16189 = vmatmul.mubr.msk.f32.gmra.mrb[60].mxu0 %vm500_vm12, %v25170_v32  ;;  %vm6102_vm8 = vcmp.lt.s32.totalorder %v18309_v36, 14  ;;  %v2431_v32 = vld [vmem:[%s18592_s30 + $0x32] sm:$0xff]  ;;  %v25172_v19 = vld [vmem:[#allocation15_spill] sm:$0xff]  ;;  %25174 = vst [vmem:[#allocation99_spill] sm:$0xff] %v20919_v23  ;;  %v20923_v21 = vsel %vm24649_vm6, %v9368_v55, 0.0  ;;  %v20932_v25 = vpop.permute.xlu1 %5285  ;;  %v20934_v16 = vpop.permute.xlu0 %5282  ;;  %v25180_v23 = vld [vmem:[#allocation56_spill] sm:$0xff]  ;;  %6218 = vperm.xlu1 %18258, %v6135_v5  }
 0x182   : > { %16191 = vmatprep.mubr.msk.f32.mxu0 %vm500_vm12, %v2074_v38  ;;  %vm25173_vm13 = vcmp.eq.s32.totalorder %v25172_v19, 1  ;;  %25175 = vst [vmem:[#allocation50_spill] sm:$0xff] %v20923_v21  ;;  %v25176_v58 = vld [vmem:[#allocation18_spill] sm:$0xff]  ;;  %v6134_v33 = vsel %vm6102_vm8, 1, %v24890_v7  ;;  %25178 = vst [vmem:[#allocation106_spill] sm:$0xff] %v20932_v25  ;;  %vm25181_vm9 = vcmp.eq.s32.totalorder %v19518_v14, 1 }
 0x183   : > { %v3717_v31 = vsel %vm25173_vm13, %v3685_v41, 0.0  ;;  %vm25177_vm10 = vcmp.eq.s32.totalorder %v25176_v58, 1  ;;  %v3687_v41 = vld [vmem:[%s18592_s30 + $0x13a] sm:$0xff]  ;;  %vm10329_vm13 = vcmp.lt.s32.totalorder %v18308_v0, 13  ;;  %v5141_v19 = vld [vmem:[%s18592_s30 + $0xf1] sm:$0xff]  ;;  %25179 = vst [vmem:[#allocation13_spill] sm:$0xff] %v20934_v16 }
 0x184   : > { %16389 = vmatmul.mubr.msk.f32.gmra.mrb[12].mxu1 %vm500_vm12, %v3717_v31  ;;  %v3718_v38 = vsel %vm25177_vm10, %v3686_v8, 0.0  ;;  %v5142_v43 = vld [vmem:[%s18592_s30 + $0xf9] sm:$0xff]  ;;  %v2463_v55 = vsel %vm25181_vm9, %v2431_v32, 0.0  ;;  %vm10328_vm10 = vcmp.lt.s32.totalorder %v18309_v36, 13  ;;  %vm24651_vm8 = vcmp.eq.s32.totalorder %v20932_v25, 1  ;;  %v2433_v8 = vld [vmem:[%s18592_s30 + $0x42] sm:$0xff]  ;;  %6215 = vperm.xlu0 %18257, %v6134_v33  }
 0x185   : > { %16192 = vmatmul.mubr.msk.f32.gmra.mrb[62].mxu0 %vm500_vm12, %v25180_v23  ;;  %16391 = vmatprep.mubr.msk.f32.mxu1 %vm500_vm12, %v3718_v38  ;;  %vm24722_vm6 = vcmp.eq.s32.totalorder %v20934_v16, 1  ;;  %v20946_v31 = vld [vmem:[%s18592_s30 + $0x43] sm:$0xff]  ;;  %v25182_v23 = vld [vmem:[#allocation17_spill] sm:$0xff]  ;;  %v10361_v14 = vsel %vm10329_vm13, 1, %v24890_v7  ;;  %v20958_v5 = vsel %vm24651_vm8, %v5142_v43, 0.0  ;;  %v10360_v32 = vsel %vm10328_vm10, 1, %v24890_v7 }
 0x186   : > { %16196 = vmatprep.mubr.msk.f32.mxu0 %vm500_vm12, %v2463_v55  ;;  %vm25183_vm15 = vcmp.eq.s32.totalorder %v25182_v23, 1  ;;  %v20954_v36 = vsel %vm24722_vm6, %v5141_v19, 0.0  ;;  %25185 = vst [vmem:[#allocation52_spill] sm:$0xff] %v20958_v5  ;;  %v2434_v38 = vld [vmem:[%s18592_s30 + $0x4a] sm:$0xff]  ;;  %v18310_v33 = vld [vmem:[%s24363_s1 + $0xd8] sm:$0xff]  ;;  %v20969_v19 = vpop.permute.xlu0 %9508  ;;  %vm25189_vm13 = vcmp.eq.s32.totalorder %v25029_v39, 1  ;;  %10444 = vperm.xlu1 %18258, %v10361_v14  }
 0x187   : > { %v3719_v58 = vsel %vm25183_vm15, %v3687_v41, 0.0  ;;  %25184 = vst [vmem:[#allocation16_spill] sm:$0xff] %v20954_v36  ;;  %vm6105_vm15 = vcmp.lt.s32.totalorder %v18310_v33, 14  ;;  %v9369_v0 = vld [vmem:[%s18592_s30 + $0xf0] sm:$0xff]  ;;  %v20967_v41 = vpop.permute.xlu1 %9511  ;;  %25187 = vst [vmem:[#allocation15_spill] sm:$0xff] %v20969_v19  ;;  %v25188_v55 = vld [vmem:[#allocation58_spill] sm:$0xff] }
 0x188   : > { %16392 = vmatmul.mubr.msk.f32.gmra.mrb[14].mxu1 %vm500_vm12, %v3719_v58  ;;  %25186 = vst [vmem:[#allocation105_spill] sm:$0xff] %v20967_v41  ;;  %v2465_v43 = vsel %vm25189_vm13, %v2433_v8, 0.0  ;;  %v20978_v23 = vld [vmem:[%s18592_s30 + $0x4b] sm:$0xff]  ;;  %v20986_v21 = vld [vmem:[%s24368_s6] sm:$0xff]  ;;  %vm24656_vm10 = vcmp.eq.s32.totalorder %v20967_v41, 1  ;;  %vm24657_vm13 = vcmp.eq.s32.totalorder %v20969_v19, 1  ;;  %10441 = vperm.xlu0 %18257, %v10360_v32  }
 0x189   : > { %16197 = vmatmul.mubr.msk.f32.vlgmr.msra.gmra.mrb[32].mxu0 %vm500_vm12, %v25188_v55  ;;  %16396 = vmatprep.mubr.msk.f32.mxu1 %vm500_vm12, %v20946_v31  ;;  %v18311_v58 = vld [vmem:[%s24363_s1 + $0xd0] sm:$0xff]  ;;  %v9370_v55 = vld [vmem:[%s18592_s30 + $0xf8] sm:$0xff]  ;;  %v6137_v8 = vsel %vm6105_vm15, 1, %v24890_v7  ;;  %v20999_v36 = vsel %vm24657_vm13, %v9369_v0, 0.0  ;;  %vm25191_vm8 = vcmp.eq.s32.totalorder %v25033_v34, 1  ;;  %vm10331_vm15 = vcmp.lt.s32.totalorder %v18310_v33, 13 }
 0x18a   : > { %vm6104_vm9 = vcmp.lt.s32.totalorder %v18311_v58, 14  ;;  %16199 = vmatprep.mubr.msk.f32.mxu0 %vm500_vm12, %v2465_v43  ;;  %v2435_v39 = vld [vmem:[%s18592_s30 + $0x52] sm:$0xff]  ;;  %v2436_v5 = vld [vmem:[%s18592_s30 + $0x5a] sm:$0xff]  ;;  %16495 = vmatpush3.msra.mxu0 %v20378_v47  ;;  %25190 = vst [vmem:[#allocation18_spill] sm:$0xff] %v20999_v36  ;;  %v2466_v14 = vsel %vm25191_vm8, %v2434_v38, 0.0  ;;  %v21011_v47 = vld [vmem:[%s18592_s30 + $0x109] sm:$0xff] }
 0x18b   : > { %v6136_v32 = vsel %vm6104_vm9, 1, %v24890_v7  ;;  %v21007_v43 = vld [vmem:[%s18592_s30 + $0x53] sm:$0xff]  ;;  %16544 = vmatprep.subr.mxu0 %v20986_v21  ;;  %25192 = vst [vmem:[#allocation56_spill] sm:$0xff] %v21011_v47  ;;  %v21015_v0 = vsel %vm24656_vm10, %v9370_v55, 0.0  ;;  %v21018_v36 = vpop.permute.xlu1 %5291  ;;  %vm25195_vm8 = vcmp.eq.s32.totalorder %v25038_v12, 1  ;;  %v21024_v38 = vld [vmem:[%s18592_s30 + $0x5b] sm:$0xff]  ;;  %6224 = vperm.xlu1 %18258, %v6137_v8  }
 0x18c   : > { %16397 = vmatmul.mubr.msk.f32.vlgmr.msra.gmra.mrb[16].mxu1 %vm500_vm12, %v20978_v23  ;;  %25193 = vst [vmem:[#allocation17_spill] sm:$0xff] %v21015_v0  ;;  %25194 = vst [vmem:[#allocation58_spill] sm:$0xff] %v21018_v36  ;;  %v2467_v34 = vsel %vm25195_vm8, %v2435_v39, 0.0  ;;  %vm10330_vm9 = vcmp.lt.s32.totalorder %v18311_v58, 13  ;;  %v21029_v19 = vld [vmem:[%s24370_s8 + $0x8] sm:$0xff]  ;;  %vm24660_vm10 = vcmp.eq.s32.totalorder %v21018_v36, 1  ;;  %6221 = vperm.xlu0 %18257, %v6136_v32  }
 0x18d   : > { %16445 = vmatpush3.msra.mxu1 %v20428_v18  ;;  %16200 = vmatmul.mubr.msk.f32.gmra.mrb[34].mxu0 %vm500_vm12, %v2466_v14  ;;  %v21032_v41 = vld [vmem:[%s18592_s30 + $0x101] sm:$0xff]  ;;  %v21035_v18 = vpop.permute.xlu0 %5288  ;;  %v10363_v39 = vsel %vm10331_vm15, 1, %v24890_v7  ;;  %v21050_v8 = vsel %vm24660_vm10, %v21011_v47, 0.0  ;;  %vm25199_vm13 = vcmp.eq.s32.totalorder %v25044_v49, 1  ;;  %v10362_v32 = vsel %vm10330_vm9, 1, %v24890_v7  ;;  %v2438_v58 = vld [vmem:[%s18592_s30 + $0x6a] sm:$0xff] }
 0x18e   : > { %25196 = vst [vmem:[#allocation121_spill] sm:$0xff] %v21032_v41  ;;  %25197 = vst [vmem:[#allocation122_spill] sm:$0xff] %v21035_v18  ;;  %16202 = vmatprep.mubr.msk.f32.mxu0 %vm500_vm12, %v2467_v34  ;;  %v2437_v55 = vld [vmem:[%s18592_s30 + $0x62] sm:$0xff]  ;;  %vm24661_vm8 = vcmp.eq.s32.totalorder %v21035_v18, 1  ;;  %16399 = vmatprep.mubr.msk.f32.mxu1 %vm500_vm12, %v21007_v43  ;;  %v2468_v14 = vsel %vm25199_vm13, %v2436_v5, 0.0  ;;  %vm25202_vm13 = vcmp.eq.s32.totalorder %v25048_v20, 1 }
 0x18f   : > { %v21040_v12 = vld [vmem:[%s18592_s30 + $0x63] sm:$0xff]  ;;  %25198 = vst [vmem:[#allocation123_spill] sm:$0xff] %v21050_v8  ;;  %16944 = vmatprep.subr.mxu1 %v21029_v19  ;;  %v21065_v34 = vsel %vm24661_vm8, %v21032_v41, 0.0  ;;  %v21067_v0 = vpop.permute.xlu1 %9517  ;;  %v2469_v49 = vsel %vm25202_vm13, %v2437_v55, 0.0  ;;  %v21075_v5 = vld [vmem:[%s18592_s30 + $0x6b] sm:$0xff]  ;;  %10450 = vperm.xlu1 %18258, %v10363_v39   ;;  %v21086_v55 = vld [vmem:[%s18592_s30 + $0x73] sm:$0xff] }
 0x190   : > { %16400 = vmatmul.mubr.msk.f32.gmra.mrb[18].mxu1 %vm500_vm12, %v21024_v38  ;;  %v18312_v33 = vld [vmem:[%s24363_s1 + $0xe8] sm:$0xff]  ;;  %25200 = vst [vmem:[#allocation124_spill] sm:$0xff] %v21065_v34  ;;  %25201 = vst [vmem:[#allocation125_spill] sm:$0xff] %v21067_v0  ;;  %v18313_v8 = vld [vmem:[%s24363_s1 + $0xe0] sm:$0xff]  ;;  %10447 = vperm.xlu0 %18257, %v10362_v32   ;;  %vm25204_vm13 = vcmp.eq.s32.totalorder %v25055_v63, 1  ;;  %vm25206_vm8 = vcmp.eq.s32.totalorder %v25059_v60, 1 }
 0x191   : > { %vm6107_vm15 = vcmp.lt.s32.totalorder %v18312_v33, 14  ;;  %16203 = vmatmul.mubr.msk.f32.gmra.mrb[36].mxu0 %vm500_vm12, %v2468_v14  ;;  %16402 = vmatprep.mubr.msk.f32.mxu1 %vm500_vm12, %v21040_v12  ;;  %vm6106_vm9 = vcmp.lt.s32.totalorder %v18313_v8, 14  ;;  %v21081_v34 = vpop.permute.xlu0 %9514  ;;  %v2439_v20 = vld [vmem:[%s18592_s30 + $0x72] sm:$0xff]  ;;  %v2470_v0 = vsel %vm25204_vm13, %v2438_v58, 0.0  ;;  %vm10333_vm10 = vcmp.lt.s32.totalorder %v18312_v33, 13  ;;  %v2440_v24 = vld [vmem:[%s18592_s30 + $0x7a] sm:$0xff] }
 0x192   : > { %25203 = vst [vmem:[#allocation126_spill] sm:$0xff] %v21081_v34  ;;  %16205 = vmatprep.mubr.msk.f32.mxu0 %vm500_vm12, %v2469_v49  ;;  %v6139_v14 = vsel %vm6107_vm15, 1, %v24890_v7  ;;  %v6138_v34 = vsel %vm6106_vm9, 1, %v24890_v7  ;;  %v2471_v32 = vsel %vm25206_vm8, %v2439_v20, 0.0  ;;  %v21103_v49 = vld [vmem:[%s18592_s30 + $0x7b] sm:$0xff]  ;;  %vm10332_vm15 = vcmp.lt.s32.totalorder %v18313_v8, 13 }
 0x193   : > { %v21095_v39 = vpop.permute.xlu1 %5297  ;;  %6230 = vperm.xlu1 %18258, %v6139_v14   ;;  %v2441_v63 = vld [vmem:[%s18592_s30 + $0x82] sm:$0xff]  ;;  %v10365_v60 = vsel %vm10333_vm10, 1, %v24890_v7  ;;  %vm25208_vm8 = vcmp.eq.s32.totalorder %v25066_v4, 1  ;;  %v10364_v8 = vsel %vm10332_vm15, 1, %v24890_v7  ;;  %v18314_v58 = vld [vmem:[%s24363_s1 + $0xf8] sm:$0xff]  ;;  %vm25210_vm10 = vcmp.eq.s32.totalorder %v25070_v9, 1 }
 0x194   : > { %16403 = vmatmul.mubr.msk.f32.gmra.mrb[20].mxu1 %vm500_vm12, %v21075_v5  ;;  %25205 = vst [vmem:[#allocation127_spill] sm:$0xff] %v21095_v39  ;;  %v21111_v33 = vld [vmem:[%s18592_s30 + $0x83] sm:$0xff]  ;;  %6227 = vperm.xlu0 %18257, %v6138_v34   ;;  %vm6109_vm9 = vcmp.lt.s32.totalorder %v18314_v58, 14  ;;  %v2473_v34 = vsel %vm25210_vm10, %v2441_v63, 0.0  ;;  %v21130_v4 = vld [vmem:[%s18592_s30 + $0x8b] sm:$0xff]  ;;  %v21141_v63 = vld [vmem:[%s18592_s30 + $0x93] sm:$0xff] }
 0x195   : > { %16206 = vmatmul.mubr.msk.f32.gmra.mrb[38].mxu0 %vm500_vm12, %v2470_v0  ;;  %16405 = vmatprep.mubr.msk.f32.mxu1 %vm500_vm12, %v21086_v55  ;;  %v21106_v47 = vpop.permute.xlu0 %5294  ;;  %v2472_v0 = vsel %vm25208_vm8, %v2440_v24, 0.0  ;;  %v2442_v24 = vld [vmem:[%s18592_s30 + $0x8a] sm:$0xff]  ;;  %v2443_v9 = vld [vmem:[%s18592_s30 + $0x92] sm:$0xff]  ;;  %vm25212_vm15 = vcmp.eq.s32.totalorder %v25075_v62, 1  ;;  %vm10335_vm8 = vcmp.lt.s32.totalorder %v18314_v58, 13  ;;  %v2444_v41 = vld [vmem:[%s18592_s30 + $0x9a] sm:$0xff] }
 0x196   : > { %25207 = vst [vmem:[#allocation128_spill] sm:$0xff] %v21106_v47  ;;  %16208 = vmatprep.mubr.msk.f32.mxu0 %vm500_vm12, %v2471_v32  ;;  %v18315_v14 = vld [vmem:[%s24363_s1 + $0xf0] sm:$0xff]  ;;  %v2445_v58 = vld [vmem:[%s18592_s30 + $0xa2] sm:$0xff]  ;;  %v10367_v17 = vsel %vm10335_vm8, 1, %v24890_v7  ;;  %vm25217_vm10 = vcmp.eq.s32.totalorder %v19829_v11, 1 }
 0x197   : > { %v21122_v20 = vpop.permute.xlu1 %9523  ;;  %vm6108_vm13 = vcmp.lt.s32.totalorder %v18315_v14, 14  ;;  %10456 = vperm.xlu1 %18258, %v10365_v60   ;;  %v21191_v11 = vld [vmem:[%s18592_s30 + $0x13] sm:$0xff]  ;;  %v11715_v61 = vld [vmem:[%s18592_s30 + $0x106] sm:$0xff] }
 0x198   : > { %16406 = vmatmul.mubr.msk.f32.gmra.mrb[22].mxu1 %vm500_vm12, %v21103_v49  ;;  %25209 = vst [vmem:[#allocation129_spill] sm:$0xff] %v21122_v20  ;;  %10453 = vperm.xlu0 %18257, %v10364_v8   ;;  %v2474_v20 = vsel %vm25212_vm15, %v2442_v24, 0.0  ;;  %v2475_v8 = vsel %vm1091_vm1, %v2443_v9, 0.0  ;;  %vm25215_vm1 = vcmp.eq.s32.totalorder %v25084_v40, 1  ;;  %v11697_v47 = vld [vmem:[%s18592_s30 + $0x76] sm:$0xff]  ;;  %v18321_v28 = vld [vmem:[%s18592_s30 + $0x61] sm:$0xff] }
 0x199   : > { %16209 = vmatmul.mubr.msk.f32.gmra.mrb[40].mxu0 %vm500_vm12, %v2472_v0  ;;  %16408 = vmatprep.mubr.msk.f32.mxu1 %vm500_vm12, %v21111_v33  ;;  %v21136_v32 = vpop.permute.xlu0 %9520  ;;  %v6141_v0 = vsel %vm6109_vm9, 1, %v24890_v7  ;;  %vm10334_vm9 = vcmp.lt.s32.totalorder %v18315_v14, 13  ;;  %v2476_v24 = vsel %vm25215_vm1, %v2444_v41, 0.0  ;;  %v21295_v25 = vld [vmem:[%s18592_s30 + $0xf3] sm:$0xff] }
 0x19a   : > { %25211 = vst [vmem:[#allocation130_spill] sm:$0xff] %v21136_v32  ;;  %16211 = vmatprep.mubr.msk.f32.mxu0 %vm500_vm12, %v2473_v34  ;;  %v6140_v32 = vsel %vm6108_vm13, 1, %v24890_v7  ;;  %v21157_v34 = vld [vmem:[%s18592_s30 + $0x9b] sm:$0xff]  ;;  %v10366_v14 = vsel %vm10334_vm9, 1, %v24890_v7  ;;  %v21188_v7 = vld [vmem:[%s18592_s30 + $0xb3] sm:$0xff]  ;;  %vm25219_vm13 = vcmp.eq.s32.totalorder %v25095_v27, 1 }
 0x19b   : > { %v21149_v60 = vpop.permute.xlu1 %5303  ;;  %6236 = vperm.xlu1 %18258, %v6141_v0   ;;  %v2477_v0 = vsel %vm25217_vm10, %v2445_v58, 0.0  ;;  %v21210_v27 = vld [vmem:[%s18592_s30 + $0x1b] sm:$0xff] }
 0x19c   : > { %16409 = vmatmul.mubr.msk.f32.gmra.mrb[24].mxu1 %vm500_vm12, %v21130_v4  ;;  %25213 = vst [vmem:[#allocation131_spill] sm:$0xff] %v21149_v60  ;;  %6233 = vperm.xlu0 %18257, %v6140_v32   ;;  %v21181_v32 = vld [vmem:[%s18592_s30 + $0xab] sm:$0xff]  ;;  %v21248_v60 = vld [vmem:[%s18592_s30 + $0x33] sm:$0xff] }
 0x19d   : > { %16212 = vmatmul.mubr.msk.f32.gmra.mrb[42].mxu0 %vm500_vm12, %v2474_v20  ;;  %16411 = vmatprep.mubr.msk.f32.mxu1 %vm500_vm12, %v21141_v63  ;;  %v21160_v62 = vpop.permute.xlu0 %5300  ;;  %v21165_v20 = vld [vmem:[%s18592_s30 + $0xa3] sm:$0xff]  ;;  %25224 = vst [vmem:[#allocation139_spill] sm:$0xff] %v21248_v60 }
 0x19e   : > { %25214 = vst [vmem:[#allocation132_spill] sm:$0xff] %v21160_v62  ;;  %16214 = vmatprep.mubr.msk.f32.mxu0 %vm500_vm12, %v2475_v8  ;;  %v2446_v8 = vld [vmem:[%s18592_s30 + $0xaa] sm:$0xff] }
 0x19f   : > { %v21173_v9 = vpop.permute.xlu1 %9529  ;;  %10462 = vperm.xlu1 %18258, %v10367_v17   ;;  %v2478_v41 = vsel %vm25219_vm13, %v2446_v8, 0.0  ;;  %v21203_v17 = vld [vmem:[%s18592_s30 + $0xbb] sm:$0xff]  ;;  %v21223_v8 = vld [vmem:[%s24368_s6 + $0x10] sm:$0xff] }
 0x1a0   : > { %16412 = vmatmul.mubr.msk.f32.gmra.mrb[26].mxu1 %vm500_vm12, %v21157_v34  ;;  %25216 = vst [vmem:[#allocation133_spill] sm:$0xff] %v21173_v9  ;;  %10459 = vperm.xlu0 %18257, %v10366_v14   ;;  %v21213_v14 = vld [vmem:[%s18592_s30 + $0xc3] sm:$0xff]  ;;  %v21232_v9 = vld [vmem:[%s18592_s30 + $0xcb] sm:$0xff] }
 0x1a1   : > { %16215 = vmatmul.mubr.msk.f32.gmra.mrb[44].mxu0 %vm500_vm12, %v2476_v24  ;;  %16414 = vmatprep.mubr.msk.f32.mxu1 %vm500_vm12, %v21165_v20  ;;  %v21184_v40 = vpop.permute.xlu0 %9526 }
 0x1a2   : > { %25218 = vst [vmem:[#allocation134_spill] sm:$0xff] %v21184_v40  ;;  %16217 = vmatprep.mubr.msk.f32.mxu0 %vm500_vm12, %v2477_v0  ;;  %v21216_v0 = vld [vmem:[%s18592_s30 + $0x23] sm:$0xff] }
 0x1a3   : > { %v21197_v58 = vpop.permute.xlu1 %6146  ;;  %v11695_v40 = vld [vmem:[%s18592_s30 + $0x66] sm:$0xff] }
 0x1a4   : > { %16415 = vmatmul.mubr.msk.f32.gmra.mrb[28].mxu1 %vm500_vm12, %v21181_v32  ;;  %25220 = vst [vmem:[#allocation135_spill] sm:$0xff] %v21197_v58 }
 0x1a5   : > { %16218 = vmatmul.mubr.msk.f32.gmra.mrb[46].mxu0 %vm500_vm12, %v2478_v41  ;;  %16417 = vmatprep.mubr.msk.f32.mxu1 %vm500_vm12, %v21188_v7  ;;  %v21205_v24 = vpop.permute.xlu0 %6143 }
 0x1a6   : > { %25221 = vst [vmem:[#allocation136_spill] sm:$0xff] %v21205_v24  ;;  %16496 = vmatprep.mubr.msk.f32.mxu0 %vm500_vm12, %v21191_v11  ;;  %v21240_v24 = vld [vmem:[%s18592_s30 + $0x2b] sm:$0xff] }
 0x1a7   : > { %v21225_v41 = vpop.permute.xlu1 %10372 }
 0x1a8   : > { %16418 = vmatmul.mubr.msk.f32.gmra.mrb[30].mxu1 %vm500_vm12, %v21203_v17  ;;  %25222 = vst [vmem:[#allocation137_spill] sm:$0xff] %v21225_v41  ;;  %v21243_v41 = vld [vmem:[%s18592_s30 + $0xd3] sm:$0xff] }
 0x1a9   : > { %16497 = vmatmul.mubr.msk.f32.vlgmr.msra.gmra.mrb[64].mxu0 %vm500_vm12, %v21210_v27  ;;  %16420 = vmatprep.mubr.msk.f32.mxu1 %vm500_vm12, %v21213_v14  ;;  %v21235_v58 = vpop.permute.xlu0 %10369 }
 0x1aa   : > { %25223 = vst [vmem:[#allocation138_spill] sm:$0xff] %v21235_v58  ;;  %16499 = vmatprep.mubr.msk.f32.mxu0 %vm500_vm12, %v21216_v0  ;;  %16545 = vmatpush3.msra.mxu0 %v20986_v21  ;;  %vm10464_vm15 = vcmp.eq.s32.totalorder %v21235_v58, 1  ;;  %v21264_v21 = vld [vmem:[%s18592_s30 + $0xdb] sm:$0xff] }
 0x1ab   : > { %16594 = vmatprep.subr.mxu0 %v21223_v8  ;;  %v21255_v62 = vsel %vm10464_vm15, %v11695_v40, 0.0  ;;  %v21257_v39 = vpop.permute.xlu1 %6152  ;;  %v21271_v58 = vld [vmem:[%s18592_s30 + $0x3b] sm:$0xff]  ;;  %v21274_v40 = vld [vmem:[%s18592_s30 + $0xe3] sm:$0xff] }
 0x1ac   : > { %16421 = vmatmul.mubr.msk.f32.gmra.mrb[0].mxu1 %vm500_vm12, %v21232_v9  ;;  %25225 = vst [vmem:[#allocation140_spill] sm:$0xff] %v21255_v62  ;;  %25226 = vst [vmem:[#allocation141_spill] sm:$0xff] %v21257_v39  ;;  %v11698_v62 = vld [vmem:[%s18592_s30 + $0x7e] sm:$0xff] }
 0x1ad   : > { %16500 = vmatmul.mubr.msk.f32.gmra.mrb[66].mxu0 %vm500_vm12, %v21240_v24  ;;  %16423 = vmatprep.mubr.msk.f32.mxu1 %vm500_vm12, %v21243_v41  ;;  %v21266_v36 = vpop.permute.xlu0 %6149  ;;  %25228 = vst [vmem:[#allocation143_spill] sm:$0xff] %v21271_v58 }
 0x1ae   : > { %25227 = vst [vmem:[#allocation142_spill] sm:$0xff] %v21266_v36  ;;  %16502 = vmatprep.mubr.msk.f32.mxu0 %vm500_vm12, %v21248_v60  ;;  %v21286_v36 = vld [vmem:[%s18592_s30 + $0xeb] sm:$0xff] }
 0x1af   : > { %v21279_v39 = vpop.permute.xlu1 %10378 }
 0x1b0   : > { %16424 = vmatmul.mubr.msk.f32.gmra.mrb[2].mxu1 %vm500_vm12, %v21264_v21  ;;  %25229 = vst [vmem:[#allocation144_spill] sm:$0xff] %v21279_v39  ;;  %vm24838_vm8 = vcmp.eq.s32.totalorder %v21279_v39, 1  ;;  %v11699_v39 = vld [vmem:[%s18592_s30 + $0x86] sm:$0xff] }
 0x1b1   : > { %16503 = vmatmul.mubr.msk.f32.gmra.mrb[68].mxu0 %vm500_vm12, %v21271_v58  ;;  %16426 = vmatprep.mubr.msk.f32.mxu1 %vm500_vm12, %v21274_v40  ;;  %v21290_v18 = vpop.permute.xlu0 %10375  ;;  %v21300_v58 = vsel %vm24838_vm8, %v11698_v62, 0.0 }
 0x1b2   : > { %25230 = vst [vmem:[#allocation145_spill] sm:$0xff] %v21290_v18  ;;  %16505 = vmatprep.mubr.msk.f32.mxu0 %vm500_vm12, %v20946_v31  ;;  %vm24834_vm9 = vcmp.eq.s32.totalorder %v21290_v18, 1  ;;  %25231 = vst [vmem:[#allocation146_spill] sm:$0xff] %v21300_v58  ;;  %v21315_v31 = vld [vmem:[%s18592_s30 + $0xfb] sm:$0xff]  ;;  %v21322_v58 = vld [vmem:[%s18592_s30 + $0x103] sm:$0xff] }
 0x1b3   : > { %v21306_v16 = vsel %vm24834_vm9, %v11697_v47, 0.0  ;;  %v21308_v60 = vpop.permute.xlu1 %6158  ;;  %v11700_v47 = vld [vmem:[%s18592_s30 + $0x8e] sm:$0xff] }
 0x1b4   : > { %16427 = vmatmul.mubr.msk.f32.gmra.mrb[4].mxu1 %vm500_vm12, %v21286_v36  ;;  %25232 = vst [vmem:[#allocation147_spill] sm:$0xff] %v21306_v16  ;;  %25233 = vst [vmem:[#allocation148_spill] sm:$0xff] %v21308_v60  ;;  %v4101_v18 = vld [vmem:[%s18592_s30 + $0x113] sm:$0xff] }
 0x1b5   : > { %16506 = vmatmul.mubr.msk.f32.gmra.mrb[70].mxu0 %vm500_vm12, %v20978_v23  ;;  %16429 = vmatprep.mubr.msk.f32.mxu1 %vm500_vm12, %v21295_v25  ;;  %v21317_v62 = vpop.permute.xlu0 %6155  ;;  %v21334_v23 = vld [vmem:[%s18592_s30 + $0x10b] sm:$0xff] }
 0x1b6   : > { %25234 = vst [vmem:[#allocation149_spill] sm:$0xff] %v21317_v62  ;;  %16508 = vmatprep.mubr.msk.f32.mxu0 %vm500_vm12, %v21007_v43 }
 0x1b7   : > { %v21327_v16 = vpop.permute.xlu1 %10384 }
 0x1b8   : > { %16430 = vmatmul.mubr.msk.f32.gmra.mrb[6].mxu1 %vm500_vm12, %v21315_v31  ;;  %25235 = vst [vmem:[#allocation150_spill] sm:$0xff] %v21327_v16  ;;  %vm24699_vm1 = vcmp.eq.s32.totalorder %v21327_v16, 1 }
 0x1b9   : > { %16509 = vmatmul.mubr.msk.f32.gmra.mrb[72].mxu0 %vm500_vm12, %v21024_v38  ;;  %16432 = vmatprep.mubr.msk.f32.mxu1 %vm500_vm12, %v21322_v58  ;;  %v21338_v43 = vpop.permute.xlu0 %10381  ;;  %v21346_v38 = vsel %vm24699_vm1, %v11700_v47, 0.0  ;;  %v4103_v47 = vld [vmem:[%s18592_s30 + $0x123] sm:$0xff] }
 0x1ba   : > { %25236 = vst [vmem:[#allocation151_spill] sm:$0xff] %v21338_v43  ;;  %16511 = vmatprep.mubr.msk.f32.mxu0 %vm500_vm12, %v21040_v12  ;;  %vm24706_vm10 = vcmp.eq.s32.totalorder %v21338_v43, 1  ;;  %25237 = vst [vmem:[#allocation152_spill] sm:$0xff] %v21346_v38  ;;  %v4102_v12 = vld [vmem:[%s18592_s30 + $0x11b] sm:$0xff]  ;;  %v4462_v43 = vld [vmem:[%s18592_s30 + $0x44] sm:$0xff] }
 0x1bb   : > { %v21352_v60 = vsel %vm24706_vm10, %v11699_v39, 0.0  ;;  %v21354_v62 = vpop.permute.xlu1 %6164  ;;  %v11702_v38 = vld [vmem:[%s18592_s30 + $0x9e] sm:$0xff]  ;;  %vm25252_vm10 = vcmp.eq.s32.totalorder %v19200_v35, 1 }
 0x1bc   : > { %16433 = vmatmul.mubr.msk.f32.gmra.mrb[8].mxu1 %vm500_vm12, %v21334_v23  ;;  %25238 = vst [vmem:[#allocation153_spill] sm:$0xff] %v21352_v60  ;;  %25239 = vst [vmem:[#allocation154_spill] sm:$0xff] %v21354_v62 }
 0x1bd   : > { %16512 = vmatmul.mubr.msk.f32.gmra.mrb[74].mxu0 %vm500_vm12, %v21075_v5  ;;  %16435 = vmatprep.mubr.msk.f32.mxu1 %vm500_vm12, %v4101_v18  ;;  %v21360_v16 = vpop.permute.xlu0 %6161  ;;  %v4104_v18 = vld [vmem:[%s18592_s30 + $0x12b] sm:$0xff]  ;;  %v11701_v5 = vld [vmem:[%s18592_s30 + $0x96] sm:$0xff] }
 0x1be   : > { %25240 = vst [vmem:[#allocation155_spill] sm:$0xff] %v21360_v16  ;;  %16514 = vmatprep.mubr.msk.f32.mxu0 %vm500_vm12, %v21086_v55  ;;  %v4105_v55 = vld [vmem:[%s18592_s30 + $0x133] sm:$0xff] }
 0x1bf   : > { %v21367_v39 = vpop.permute.xlu1 %10390 }
 0x1c0   : > { %16436 = vmatmul.mubr.msk.f32.gmra.mrb[10].mxu1 %vm500_vm12, %v4102_v12  ;;  %25241 = vst [vmem:[#allocation156_spill] sm:$0xff] %v21367_v39  ;;  %vm24704_vm13 = vcmp.eq.s32.totalorder %v21367_v39, 1 }
 0x1c1   : > { %16515 = vmatmul.mubr.msk.f32.gmra.mrb[76].mxu0 %vm500_vm12, %v21103_v49  ;;  %16438 = vmatprep.mubr.msk.f32.mxu1 %vm500_vm12, %v4103_v47  ;;  %v21375_v60 = vpop.permute.xlu0 %10387  ;;  %v21383_v12 = vsel %vm24704_vm13, %v11702_v38, 0.0  ;;  %vm25247_vm13 = vcmp.eq.s32.totalorder %v19182_v59, 1  ;;  %v21421_v59 = vld [vmem:[%s24370_s8] sm:$0xff] }
 0x1c2   : > { %25242 = vst [vmem:[#allocation157_spill] sm:$0xff] %v21375_v60  ;;  %16517 = vmatprep.mubr.msk.f32.mxu0 %vm500_vm12, %v21111_v33  ;;  %vm24705_vm1 = vcmp.eq.s32.totalorder %v21375_v60, 1  ;;  %25243 = vst [vmem:[#allocation158_spill] sm:$0xff] %v21383_v12  ;;  %v4106_v33 = vld [vmem:[%s18592_s30 + $0x13b] sm:$0xff]  ;;  %v4494_v38 = vsel %vm25247_vm13, %v4462_v43, 0.0 }
 0x1c3   : > { %v21388_v49 = vsel %vm24705_vm1, %v11701_v5, 0.0  ;;  %v21390_v47 = vpop.permute.xlu1 %6170  ;;  %v25251_v43 = vld [vmem:[#allocation19_spill] sm:$0xff] }
 0x1c4   : > { %16439 = vmatmul.mubr.msk.f32.gmra.mrb[12].mxu1 %vm500_vm12, %v4104_v18  ;;  %25244 = vst [vmem:[#allocation159_spill] sm:$0xff] %v21388_v49  ;;  %25245 = vst [vmem:[#allocation160_spill] sm:$0xff] %v21390_v47  ;;  %v11704_v18 = vld [vmem:[%s18592_s30 + $0xae] sm:$0xff] }
 0x1c5   : > { %16518 = vmatmul.mubr.msk.f32.gmra.mrb[78].mxu0 %vm500_vm12, %v21130_v4  ;;  %16441 = vmatprep.mubr.msk.f32.mxu1 %vm500_vm12, %v4105_v55  ;;  %v21397_v39 = vpop.permute.xlu0 %6167  ;;  %v4464_v4 = vld [vmem:[%s18592_s30 + $0x54] sm:$0xff]  ;;  %v11703_v55 = vld [vmem:[%s18592_s30 + $0xa6] sm:$0xff] }
 0x1c6   : > { %25246 = vst [vmem:[#allocation161_spill] sm:$0xff] %v21397_v39  ;;  %16520 = vmatprep.mubr.msk.f32.mxu0 %vm500_vm12, %v21141_v63  ;;  %v4483_v49 = vld [vmem:[%s18592_s30 + $0xec] sm:$0xff] }
 0x1c7   : > { %v21405_v5 = vpop.permute.xlu1 %10396 }
 0x1c8   : > { %16442 = vmatmul.mubr.msk.f32.gmra.mrb[14].mxu1 %vm500_vm12, %v4106_v33  ;;  %25248 = vst [vmem:[#allocation162_spill] sm:$0xff] %v21405_v5  ;;  %vm24707_vm1 = vcmp.eq.s32.totalorder %v21405_v5, 1  ;;  %v4496_v33 = vsel %vm25252_vm10, %v4464_v4, 0.0  ;;  %vm25256_vm10 = vcmp.eq.s32.totalorder %v25020_v56, 1  ;;  %v4467_v4 = vld [vmem:[%s18592_s30 + $0x6c] sm:$0xff] }
 0x1c9   : > { %16446 = vmatprep.mubr.msk.f32.mxu1 %vm500_vm12, %v4494_v38  ;;  %16521 = vmatmul.mubr.msk.f32.gmra.mrb[80].mxu0 %vm500_vm12, %v21157_v34  ;;  %v21413_v63 = vpop.permute.xlu0 %10393  ;;  %v21425_v34 = vsel %vm24707_vm1, %v11704_v18, 0.0  ;;  %v4466_v18 = vld [vmem:[%s18592_s30 + $0x64] sm:$0xff]  ;;  %vm25257_vm1 = vcmp.eq.s32.totalorder %v25031_v44, 1  ;;  %v4499_v44 = vsel %vm2017_vm0, %v4467_v4, 0.0 }
 0x1ca   : > { %25249 = vst [vmem:[#allocation163_spill] sm:$0xff] %v21413_v63  ;;  %16523 = vmatprep.mubr.msk.f32.mxu0 %vm500_vm12, %v21165_v20  ;;  %vm24708_vm13 = vcmp.eq.s32.totalorder %v21413_v63, 1  ;;  %25250 = vst [vmem:[#allocation164_spill] sm:$0xff] %v21425_v34  ;;  %v4465_v20 = vld [vmem:[%s18592_s30 + $0x5c] sm:$0xff] }
 0x1cb   : > { %v21434_v38 = vsel %vm24708_vm13, %v11703_v55, 0.0  ;;  %v21437_v12 = vpop.permute.xlu1 %6176  ;;  %v4497_v35 = vsel %vm25256_vm10, %v4465_v20, 0.0  ;;  %v11706_v55 = vld [vmem:[%s18592_s30 + $0xbe] sm:$0xff] }
 0x1cc   : > { %16447 = vmatmul.mubr.msk.f32.vlgmr.msra.gmra.mrb[16].mxu1 %vm500_vm12, %v25251_v43  ;;  %25253 = vst [vmem:[#allocation19_spill] sm:$0xff] %v21434_v38  ;;  %25254 = vst [vmem:[#allocation165_spill] sm:$0xff] %v21437_v12 }
 0x1cd   : > { %16945 = vmatpush3.msra.mxu1 %v21029_v19  ;;  %16449 = vmatprep.mubr.msk.f32.mxu1 %vm500_vm12, %v4496_v33  ;;  %v21441_v34 = vpop.permute.xlu0 %6173  ;;  %v4498_v19 = vsel %vm25257_vm1, %v4466_v18, 0.0  ;;  %v11705_v33 = vld [vmem:[%s18592_s30 + $0xb6] sm:$0xff]  ;;  %vm25261_vm1 = vcmp.eq.s32.totalorder %v25042_v53, 1 }
 0x1ce   : > { %25255 = vst [vmem:[#allocation166_spill] sm:$0xff] %v21441_v34  ;;  %16524 = vmatmul.mubr.msk.f32.gmra.mrb[82].mxu0 %vm500_vm12, %v21181_v32  ;;  %16994 = vmatprep.subr.mxu1 %v21421_v59  ;;  %v4468_v32 = vld [vmem:[%s18592_s30 + $0x74] sm:$0xff] }
 0x1cf   : > { %16526 = vmatprep.mubr.msk.f32.mxu0 %vm500_vm12, %v21188_v7  ;;  %v21455_v43 = vpop.permute.xlu1 %10402  ;;  %v4500_v20 = vsel %vm25261_vm1, %v4468_v32, 0.0  ;;  %v11708_v32 = vld [vmem:[%s18592_s30 + $0xce] sm:$0xff] }
 0x1d0   : > { %16450 = vmatmul.mubr.msk.f32.gmra.mrb[18].mxu1 %vm500_vm12, %v4497_v35  ;;  %25258 = vst [vmem:[#allocation167_spill] sm:$0xff] %v21455_v43  ;;  %vm24709_vm10 = vcmp.eq.s32.totalorder %v21455_v43, 1 }
 0x1d1   : > { %16452 = vmatprep.mubr.msk.f32.mxu1 %vm500_vm12, %v4498_v19  ;;  %v21461_v56 = vpop.permute.xlu0 %10399  ;;  %v21472_v7 = vsel %vm24709_vm10, %v11706_v55, 0.0  ;;  %v25265_v19 = vld [vmem:[#allocation23_spill] sm:$0xff]  ;;  %v4471_v55 = vld [vmem:[%s18592_s30 + $0x8c] sm:$0xff]  ;;  %vm25271_vm10 = vcmp.eq.s32.totalorder %v25064_v2, 1 }
 0x1d2   : > { %25259 = vst [vmem:[#allocation168_spill] sm:$0xff] %v21461_v56  ;;  %16527 = vmatmul.mubr.msk.f32.gmra.mrb[84].mxu0 %vm500_vm12, %v21203_v17  ;;  %vm10474_vm13 = vcmp.eq.s32.totalorder %v21461_v56, 1  ;;  %25260 = vst [vmem:[#allocation169_spill] sm:$0xff] %v21472_v7  ;;  %v4469_v17 = vld [vmem:[%s18592_s30 + $0x7c] sm:$0xff]  ;;  %vm25266_vm0 = vcmp.eq.s32.totalorder %v25265_v19, 1  ;;  %v11712_v7 = vld [vmem:[%s18592_s30 + $0xee] sm:$0xff] }
 0x1d3   : > { %16529 = vmatprep.mubr.msk.f32.mxu0 %vm500_vm12, %v21213_v14  ;;  %v21480_v30 = vsel %vm10474_vm13, %v11705_v33, 0.0  ;;  %v21482_v18 = vpop.permute.xlu1 %6182  ;;  %v4470_v14 = vld [vmem:[%s18592_s30 + $0x84] sm:$0xff]  ;;  %v4501_v53 = vsel %vm25266_vm0, %v4469_v17, 0.0 }
 0x1d4   : > { %16453 = vmatmul.mubr.msk.f32.gmra.mrb[20].mxu1 %vm500_vm12, %v4499_v44  ;;  %25262 = vst [vmem:[#allocation170_spill] sm:$0xff] %v21480_v30  ;;  %25263 = vst [vmem:[#allocation171_spill] sm:$0xff] %v21482_v18  ;;  %v4502_v4 = vsel %vm2020_vm2, %v4470_v14, 0.0  ;;  %v11707_v44 = vld [vmem:[%s18592_s30 + $0xc6] sm:$0xff]  ;;  %vm25269_vm2 = vcmp.eq.s32.totalorder %v25268_v52, 1 }
 0x1d5   : > { %16455 = vmatprep.mubr.msk.f32.mxu1 %vm500_vm12, %v4500_v20  ;;  %v21486_v35 = vpop.permute.xlu0 %6179 }
 0x1d6   : > { %25264 = vst [vmem:[#allocation172_spill] sm:$0xff] %v21486_v35  ;;  %16530 = vmatmul.mubr.msk.f32.gmra.mrb[86].mxu0 %vm500_vm12, %v21232_v9  ;;  %v4472_v9 = vld [vmem:[%s18592_s30 + $0x94] sm:$0xff] }
 0x1d7   : > { %16532 = vmatprep.mubr.msk.f32.mxu0 %vm500_vm12, %v21243_v41  ;;  %v21499_v33 = vpop.permute.xlu1 %10408  ;;  %v4503_v41 = vsel %vm25269_vm2, %v4471_v55, 0.0  ;;  %v4504_v14 = vsel %vm25271_vm10, %v4472_v9, 0.0  ;;  %v25275_v55 = vld [vmem:[#allocation29_spill] sm:$0xff] }
 0x1d8   : > { %16456 = vmatmul.mubr.msk.f32.gmra.mrb[22].mxu1 %vm500_vm12, %v4501_v53  ;;  %25267 = vst [vmem:[#allocation23_spill] sm:$0xff] %v21499_v33  ;;  %vm24712_vm1 = vcmp.eq.s32.totalorder %v21499_v33, 1  ;;  %vm25276_vm2 = vcmp.eq.s32.totalorder %v25275_v55, 1  ;;  %v4475_v9 = vld [vmem:[%s18592_s30 + $0xac] sm:$0xff] }
 0x1d9   : > { %16458 = vmatprep.mubr.msk.f32.mxu1 %vm500_vm12, %v4502_v4  ;;  %v21505_v20 = vpop.permute.xlu0 %10405  ;;  %v21516_v17 = vsel %vm24712_vm1, %v11708_v32, 0.0 }
 0x1da   : > { %16533 = vmatmul.mubr.msk.f32.gmra.mrb[88].mxu0 %vm500_vm12, %v21264_v21  ;;  %vm24715_vm0 = vcmp.eq.s32.totalorder %v21505_v20, 1  ;;  %25270 = vst [vmem:[#allocation26_spill] sm:$0xff] %v21516_v17  ;;  %v4473_v21 = vld [vmem:[%s18592_s30 + $0x9c] sm:$0xff] }
 0x1db   : > { %16535 = vmatprep.mubr.msk.f32.mxu0 %vm500_vm12, %v21274_v40  ;;  %v21524_v19 = vsel %vm24715_vm0, %v11707_v44, 0.0  ;;  %v21526_v53 = vpop.permute.xlu1 %6188  ;;  %v4474_v40 = vld [vmem:[%s18592_s30 + $0xa4] sm:$0xff]  ;;  %v4505_v2 = vsel %vm25276_vm2, %v4473_v21, 0.0  ;;  %vm25278_vm2 = vcmp.eq.s32.totalorder %v25277_v42, 1  ;;  %vm25312_vm0 = vcmp.eq.s32.totalorder %v19407_v6, 1 }
 0x1dc   : > { %16459 = vmatmul.mubr.msk.f32.gmra.mrb[24].mxu1 %vm500_vm12, %v4503_v41  ;;  %25272 = vst [vmem:[#allocation173_spill] sm:$0xff] %v21524_v19  ;;  %25273 = vst [vmem:[#allocation174_spill] sm:$0xff] %v21526_v53  ;;  %v4506_v32 = vsel %vm2024_vm7, %v4474_v40, 0.0  ;;  %v11710_v44 = vld [vmem:[%s18592_s30 + $0xde] sm:$0xff]  ;;  %v11709_v41 = vld [vmem:[%s18592_s30 + $0xd6] sm:$0xff]  ;;  %v4507_v21 = vsel %vm25278_vm2, %v4475_v9, 0.0 }
 0x1dd   : > { %16461 = vmatprep.mubr.msk.f32.mxu1 %vm500_vm12, %v4504_v14  ;;  %v21530_v4 = vpop.permute.xlu0 %6185  ;;  %v5113_v40 = vld [vmem:[%s18592_s30 + $0x11] sm:$0xff] }
 0x1de   : > { %25274 = vst [vmem:[#allocation175_spill] sm:$0xff] %v21530_v4  ;;  %16536 = vmatmul.mubr.msk.f32.gmra.mrb[90].mxu0 %vm500_vm12, %v21286_v36  ;;  %v4476_v36 = vld [vmem:[%s18592_s30 + $0xb4] sm:$0xff]  ;;  %v4479_v19 = vld [vmem:[%s18592_s30 + $0xcc] sm:$0xff] }
 0x1df   : > { %16538 = vmatprep.mubr.msk.f32.mxu0 %vm500_vm12, %v21295_v25  ;;  %v21543_v52 = vpop.permute.xlu1 %10414 }
 0x1e0   : > { %16462 = vmatmul.mubr.msk.f32.gmra.mrb[26].mxu1 %vm500_vm12, %v4505_v2  ;;  %vm24710_vm10 = vcmp.eq.s32.totalorder %v21543_v52, 1  ;;  %v4508_v2 = vsel %vm2026_vm11, %v4476_v36, 0.0  ;;  %vm25285_vm11 = vcmp.eq.s32.totalorder %v25284_v3, 1 }
 0x1e1   : > { %16464 = vmatprep.mubr.msk.f32.mxu1 %vm500_vm12, %v4506_v32  ;;  %v21549_v14 = vpop.permute.xlu0 %10411  ;;  %v21561_v55 = vsel %vm24710_vm10, %v11710_v44, 0.0  ;;  %v4477_v32 = vld [vmem:[%s18592_s30 + $0xbc] sm:$0xff]  ;;  %v5337_v36 = vsel %vm25285_vm11, %v5113_v40, 0.0  ;;  %v4480_v40 = vld [vmem:[%s18592_s30 + $0xd4] sm:$0xff] }
 0x1e2   : > { %16539 = vmatmul.mubr.msk.f32.gmra.mrb[92].mxu0 %vm500_vm12, %v21315_v31  ;;  %vm24711_vm7 = vcmp.eq.s32.totalorder %v21549_v14, 1  ;;  %25279 = vst [vmem:[#allocation29_spill] sm:$0xff] %v21561_v55  ;;  %v5114_v44 = vld [vmem:[%s18592_s30 + $0x19] sm:$0xff]  ;;  %v25282_v55 = vld [vmem:[#allocation77_spill] sm:$0xff] }
 0x1e3   : > { %16541 = vmatprep.mubr.msk.f32.mxu0 %vm500_vm12, %v21322_v58  ;;  %v21569_v9 = vsel %vm24711_vm7, %v11709_v41, 0.0  ;;  %v21571_v42 = vpop.permute.xlu1 %6194  ;;  %v4478_v58 = vld [vmem:[%s18592_s30 + $0xc4] sm:$0xff]  ;;  %vm24824_vm2 = vcmp.eq.s32.totalorder %v25282_v55, 1  ;;  %v25286_v41 = vld [vmem:[#allocation34_spill] sm:$0xff]  ;;  %vm25288_vm7 = vcmp.eq.s32.totalorder %v19338_v54, 1 }
 0x1e4   : > { %16465 = vmatmul.mubr.msk.f32.gmra.mrb[28].mxu1 %vm500_vm12, %v4507_v21  ;;  %25280 = vst [vmem:[#allocation32_spill] sm:$0xff] %v21569_v9  ;;  %25281 = vst [vmem:[#allocation176_spill] sm:$0xff] %v21571_v42  ;;  %vm25287_vm10 = vcmp.eq.s32.totalorder %v25286_v41, 1  ;;  %v4510_v17 = vsel %vm25288_vm7, %v4478_v58, 0.0  ;;  %v25289_v58 = vld [vmem:[#allocation86_spill] sm:$0xff] }
 0x1e5   : > { %16467 = vmatprep.mubr.msk.f32.mxu1 %vm500_vm12, %v4508_v2  ;;  %v21577_v21 = vpop.permute.xlu0 %6191  ;;  %v4509_v9 = vsel %vm25287_vm10, %v4477_v32, 0.0  ;;  %v5115_v2 = vld [vmem:[%s18592_s30 + $0x21] sm:$0xff]  ;;  %v21601_v32 = vld [vmem:[%s24368_s6 + $0x18] sm:$0xff]  ;;  %vm25290_vm7 = vcmp.eq.s32.totalorder %v25289_v58, 1 }
 0x1e6   : > { %25283 = vst [vmem:[#allocation177_spill] sm:$0xff] %v21577_v21  ;;  %16542 = vmatmul.mubr.msk.f32.gmra.mrb[94].mxu0 %vm500_vm12, %v21334_v23  ;;  %v5338_v23 = vsel %vm24824_vm2, %v5114_v44, 0.0  ;;  %v5339_v44 = vsel %vm25290_vm7, %v5115_v2, 0.0  ;;  %vm25294_vm7 = vcmp.eq.s32.totalorder %v19363_v48, 1 }
 0x1e7   : > { %16546 = vmatprep.mubr.msk.f32.mxu0 %vm500_vm12, %v5337_v36  ;;  %v21594_v30 = vpop.permute.xlu1 %10420  ;;  %v5116_v36 = vld [vmem:[%s18592_s30 + $0x29] sm:$0xff]  ;;  %v4512_v2 = vsel %vm25294_vm7, %v4480_v40, 0.0  ;;  %v18316_v40 = vld [vmem:[%s18592_s30 + $0x31] sm:$0xff] }
 0x1e8   : > { %16468 = vmatmul.mubr.msk.f32.gmra.mrb[30].mxu1 %vm500_vm12, %v4509_v9  ;;  %v11711_v9 = vld [vmem:[%s18592_s30 + $0xe6] sm:$0xff]  ;;  %vm24713_vm10 = vcmp.eq.s32.totalorder %v21594_v30, 1 }
 0x1e9   : > { %16470 = vmatprep.mubr.msk.f32.mxu1 %vm500_vm12, %v4510_v17  ;;  %v21605_v54 = vpop.permute.xlu0 %10417  ;;  %v25291_v17 = vld [vmem:[#allocation36_spill] sm:$0xff]  ;;  %v21618_v38 = vsel %vm24713_vm10, %v11712_v7, 0.0 }
 0x1ea   : > { %16547 = vmatmul.mubr.msk.f32.vlgmr.msra.gmra.mrb[64].mxu0 %vm500_vm12, %v5338_v23  ;;  %vm24714_vm11 = vcmp.eq.s32.totalorder %v21605_v54, 1  ;;  %vm25292_vm1 = vcmp.eq.s32.totalorder %v25291_v17, 1  ;;  %25293 = vst [vmem:[#allocation34_spill] sm:$0xff] %v21618_v38  ;;  %v4481_v23 = vld [vmem:[%s18592_s30 + $0xdc] sm:$0xff]  ;;  %v4482_v17 = vld [vmem:[%s18592_s30 + $0xe4] sm:$0xff] }
 0x1eb   : > { %16549 = vmatprep.mubr.msk.f32.mxu0 %vm500_vm12, %v5339_v44  ;;  %v4511_v41 = vsel %vm25292_vm1, %v4479_v19, 0.0  ;;  %16595 = vmatpush3.msra.mxu0 %v21223_v8  ;;  %v21627_v19 = vsel %vm24714_vm11, %v11711_v9, 0.0  ;;  %v21629_v44 = vpop.permute.xlu1 %6200  ;;  %v25297_v8 = vld [vmem:[#allocation85_spill] sm:$0xff]  ;;  %v5118_v9 = vld [vmem:[%s18592_s30 + $0x39] sm:$0xff] }
 0x1ec   : > { %16471 = vmatmul.mubr.msk.f32.gmra.mrb[0].mxu1 %vm500_vm12, %v4511_v41  ;;  %16644 = vmatprep.subr.mxu0 %v21601_v32  ;;  %25295 = vst [vmem:[#allocation36_spill] sm:$0xff] %v21627_v19  ;;  %25296 = vst [vmem:[#allocation178_spill] sm:$0xff] %v21629_v44  ;;  %vm25298_vm1 = vcmp.eq.s32.totalorder %v25297_v8, 1  ;;  %v25300_v41 = vld [vmem:[#allocation93_spill] sm:$0xff]  ;;  %v25302_v19 = vld [vmem:[#allocation38_spill] sm:$0xff] }
 0x1ed   : > { %16473 = vmatprep.mubr.msk.f32.mxu1 %vm500_vm12, %v4512_v2  ;;  %v5340_v7 = vsel %vm25298_vm1, %v5116_v36, 0.0  ;;  %v21635_v48 = vpop.permute.xlu0 %6197  ;;  %vm25301_vm7 = vcmp.eq.s32.totalorder %v25300_v41, 1  ;;  %vm25303_vm10 = vcmp.eq.s32.totalorder %v25302_v19, 1  ;;  %vm25304_vm1 = vcmp.eq.s32.totalorder %v19382_v29, 1  ;;  %v11714_v8 = vld [vmem:[%s18592_s30 + $0xfe] sm:$0xff]  ;;  %v4484_v41 = vld [vmem:[%s18592_s30 + $0xf4] sm:$0xff] }
 0x1ee   : > { %25299 = vst [vmem:[#allocation179_spill] sm:$0xff] %v21635_v48  ;;  %16550 = vmatmul.mubr.msk.f32.gmra.mrb[66].mxu0 %vm500_vm12, %v5340_v7  ;;  %v5341_v38 = vsel %vm25301_vm7, %v18316_v40, 0.0  ;;  %v4513_v2 = vsel %vm25303_vm10, %v4481_v23, 0.0  ;;  %v4514_v36 = vsel %vm25304_vm1, %v4482_v17, 0.0  ;;  %v25305_v7 = vld [vmem:[#allocation92_spill] sm:$0xff] }
 0x1ef   : > { %16552 = vmatprep.mubr.msk.f32.mxu0 %vm500_vm12, %v5341_v38  ;;  %v21650_v58 = vpop.permute.xlu1 %10426  ;;  %vm25306_vm7 = vcmp.eq.s32.totalorder %v25305_v7, 1  ;;  %v11713_v38 = vld [vmem:[%s18592_s30 + $0xf6] sm:$0xff]  ;;  %v18317_v29 = vld [vmem:[%s18592_s30 + $0x41] sm:$0xff] }
 0x1f0   : > { %16474 = vmatmul.mubr.msk.f32.gmra.mrb[2].mxu1 %vm500_vm12, %v4513_v2  ;;  %v5342_v40 = vsel %vm25306_vm7, %v5118_v9, 0.0  ;;  %vm24776_vm10 = vcmp.eq.s32.totalorder %v21650_v58, 1  ;;  %v25307_v19 = vld [vmem:[#allocation104_spill] sm:$0xff] }
 0x1f1   : > { %16476 = vmatprep.mubr.msk.f32.mxu1 %vm500_vm12, %v4514_v36  ;;  %v21658_v23 = vpop.permute.xlu0 %10423  ;;  %vm25308_vm1 = vcmp.eq.s32.totalorder %v25307_v19, 1  ;;  %v25309_v9 = vld [vmem:[#allocation40_spill] sm:$0xff]  ;;  %v21670_v36 = vsel %vm24776_vm10, %v11714_v8, 0.0  ;;  %v4485_v19 = vld [vmem:[%s18592_s30 + $0xfc] sm:$0xff]  ;;  %vm24785_vm10 = vcmp.eq.s32.totalorder %v21629_v44, 1 }
 0x1f2   : > { %16553 = vmatmul.mubr.msk.f32.gmra.mrb[68].mxu0 %vm500_vm12, %v5342_v40  ;;  %v5343_v17 = vsel %vm25308_vm1, %v18317_v29, 0.0  ;;  %vm24846_vm11 = vcmp.eq.s32.totalorder %v21658_v23, 1  ;;  %vm25310_vm7 = vcmp.eq.s32.totalorder %v25309_v9, 1  ;;  %25311 = vst [vmem:[#allocation38_spill] sm:$0xff] %v21670_v36  ;;  %v4516_v40 = vsel %vm25312_vm0, %v4484_v41, 0.0  ;;  %v25315_v8 = vld [vmem:[#allocation103_spill] sm:$0xff] }
 0x1f3   : > { %16555 = vmatprep.mubr.msk.f32.mxu0 %vm500_vm12, %v5343_v17  ;;  %v4515_v2 = vsel %vm25310_vm7, %v4483_v49, 0.0  ;;  %v21678_v29 = vsel %vm24846_vm11, %v11713_v38, 0.0  ;;  %v21680_v17 = vpop.permute.xlu1 %6206  ;;  %v18318_v49 = vld [vmem:[%s18592_s30 + $0x49] sm:$0xff]  ;;  %vm25316_vm1 = vcmp.eq.s32.totalorder %v25315_v8, 1  ;;  %v18319_v41 = vld [vmem:[%s18592_s30 + $0x51] sm:$0xff]  ;;  %vm25320_vm7 = vcmp.eq.s32.totalorder %v20320_v45, 1 }
 0x1f4   : > { %16477 = vmatmul.mubr.msk.f32.gmra.mrb[4].mxu1 %vm500_vm12, %v4515_v2  ;;  %25313 = vst [vmem:[#allocation40_spill] sm:$0xff] %v21678_v29  ;;  %25314 = vst [vmem:[#allocation180_spill] sm:$0xff] %v21680_v17  ;;  %v5344_v9 = vsel %vm25316_vm1, %v18318_v49, 0.0  ;;  %v4486_v2 = vld [vmem:[%s18592_s30 + $0x104] sm:$0xff]  ;;  %v5345_v38 = vsel %vm24719_vm14, %v18319_v41, 0.0  ;;  %v4487_v29 = vld [vmem:[%s18592_s30 + $0x10c] sm:$0xff] }
 0x1f5   : > { %16479 = vmatprep.mubr.msk.f32.mxu1 %vm500_vm12, %v4516_v40  ;;  %v21687_v6 = vpop.permute.xlu0 %6203  ;;  %v25318_v40 = vld [vmem:[#allocation42_spill] sm:$0xff]  ;;  %v4518_v49 = vsel %vm2036_vm5, %v4486_v2, 0.0  ;;  %v11716_v8 = vld [vmem:[%s18592_s30 + $0x10e] sm:$0xff]  ;;  %v5347_v2 = vsel %vm24717_vm4, %v18321_v28, 0.0 }
 0x1f6   : > { %25317 = vst [vmem:[#allocation181_spill] sm:$0xff] %v21687_v6  ;;  %16556 = vmatmul.mubr.msk.f32.gmra.mrb[70].mxu0 %vm500_vm12, %v5344_v9  ;;  %vm25319_vm0 = vcmp.eq.s32.totalorder %v25318_v40, 1  ;;  %v18320_v9 = vld [vmem:[%s18592_s30 + $0x59] sm:$0xff]  ;;  %v25322_v40 = vld [vmem:[#allocation44_spill] sm:$0xff] }
 0x1f7   : > { %16558 = vmatprep.mubr.msk.f32.mxu0 %vm500_vm12, %v5345_v38  ;;  %v4517_v36 = vsel %vm25319_vm0, %v4485_v19, 0.0  ;;  %v21701_v7 = vpop.permute.xlu1 %10432  ;;  %v5346_v41 = vsel %vm25320_vm7, %v18320_v9, 0.0  ;;  %v4488_v38 = vld [vmem:[%s18592_s30 + $0x114] sm:$0xff]  ;;  %vm25323_vm0 = vcmp.eq.s32.totalorder %v25322_v40, 1  ;;  %vm25325_vm7 = vcmp.eq.s32.totalorder %v25145_v22, 1  ;;  %v11718_v45 = vld [vmem:[%s18592_s30 + $0x11e] sm:$0xff] }
 0x1f8   : > { %16480 = vmatmul.mubr.msk.f32.gmra.mrb[6].mxu1 %vm500_vm12, %v4517_v36  ;;  %vm24729_vm1 = vcmp.eq.s32.totalorder %v21701_v7, 1  ;;  %v4489_v36 = vld [vmem:[%s18592_s30 + $0x11c] sm:$0xff] }
 0x1f9   : > { %16482 = vmatprep.mubr.msk.f32.mxu1 %vm500_vm12, %v4518_v49  ;;  %v21710_v19 = vpop.permute.xlu0 %10429  ;;  %v4519_v49 = vsel %vm25323_vm0, %v4487_v29, 0.0  ;;  %v21722_v9 = vsel %vm24729_vm1, %v11716_v8, 0.0  ;;  %v18322_v29 = vld [vmem:[%s18592_s30 + $0x69] sm:$0xff] }
 0x1fa   : > { %16559 = vmatmul.mubr.msk.f32.gmra.mrb[72].mxu0 %vm500_vm12, %v5346_v41  ;;  %vm24736_vm5 = vcmp.eq.s32.totalorder %v21710_v19, 1  ;;  %25324 = vst [vmem:[#allocation42_spill] sm:$0xff] %v21722_v9  ;;  %v4520_v41 = vsel %vm25325_vm7, %v4488_v38, 0.0  ;;  %v25328_v8 = vld [vmem:[#allocation57_spill] sm:$0xff] }
 0x1fb   : > { %16561 = vmatprep.mubr.msk.f32.mxu0 %vm500_vm12, %v5347_v2  ;;  %v21730_v28 = vsel %vm24736_vm5, %v11715_v61, 0.0  ;;  %v21732_v2 = vpop.permute.xlu1 %6212  ;;  %vm25329_vm0 = vcmp.eq.s32.totalorder %v25328_v8, 1  ;;  %v18323_v38 = vld [vmem:[%s18592_s30 + $0x71] sm:$0xff]  ;;  %vm24741_vm5 = vcmp.eq.s32.totalorder %v21360_v16, 1 }
 0x1fc   : > { %16483 = vmatmul.mubr.msk.f32.gmra.mrb[8].mxu1 %vm500_vm12, %v4519_v49  ;;  %25326 = vst [vmem:[#allocation44_spill] sm:$0xff] %v21730_v28  ;;  %25327 = vst [vmem:[#allocation182_spill] sm:$0xff] %v21732_v2  ;;  %v5348_v40 = vsel %vm25329_vm0, %v18322_v29, 0.0  ;;  %v4490_v49 = vld [vmem:[%s18592_s30 + $0x124] sm:$0xff]  ;;  %v25331_v9 = vld [vmem:[#allocation65_spill] sm:$0xff]  ;;  %vm25335_vm0 = vcmp.eq.s32.totalorder %v25159_v1, 1 }
 0x1fd   : > { %16485 = vmatprep.mubr.msk.f32.mxu1 %vm500_vm12, %v4520_v41  ;;  %v21739_v22 = vpop.permute.xlu0 %6209  ;;  %vm25332_vm7 = vcmp.eq.s32.totalorder %v25331_v9, 1  ;;  %v25333_v41 = vld [vmem:[#allocation46_spill] sm:$0xff]  ;;  %v4522_v29 = vsel %vm25335_vm0, %v4490_v49, 0.0  ;;  %v4491_v8 = vld [vmem:[%s18592_s30 + $0x12c] sm:$0xff]  ;;  %v18325_v1 = vld [vmem:[%s18592_s30 + $0x81] sm:$0xff] }
 0x1fe   : > { %25330 = vst [vmem:[#allocation183_spill] sm:$0xff] %v21739_v22  ;;  %16562 = vmatmul.mubr.msk.f32.gmra.mrb[74].mxu0 %vm500_vm12, %v5348_v40  ;;  %v5349_v61 = vsel %vm25332_vm7, %v18323_v38, 0.0  ;;  %vm25334_vm4 = vcmp.eq.s32.totalorder %v25333_v41, 1  ;;  %v18324_v40 = vld [vmem:[%s18592_s30 + $0x79] sm:$0xff] }
 0x1ff   : > { %16564 = vmatprep.mubr.msk.f32.mxu0 %vm500_vm12, %v5349_v61  ;;  %v4521_v28 = vsel %vm25334_vm4, %v4489_v36, 0.0  ;;  %v21753_v3 = vpop.permute.xlu1 %10438  ;;  %v25336_v38 = vld [vmem:[#allocation62_spill] sm:$0xff] }
 0x200   : > { %16486 = vmatmul.mubr.msk.f32.gmra.mrb[10].mxu1 %vm500_vm12, %v4521_v28  ;;  %vm25337_vm7 = vcmp.eq.s32.totalorder %v25336_v38, 1  ;;  %v4492_v61 = vld [vmem:[%s18592_s30 + $0x134] sm:$0xff]  ;;  %vm24720_vm4 = vcmp.eq.s32.totalorder %v21753_v3, 1 }
 0x201   : > { %16488 = vmatprep.mubr.msk.f32.mxu1 %vm500_vm12, %v4522_v29  ;;  %v5350_v9 = vsel %vm25337_vm7, %v18324_v40, 0.0  ;;  %v11717_v41 = vld [vmem:[%s18592_s30 + $0x116] sm:$0xff]  ;;  %v21762_v36 = vpop.permute.xlu0 %10435  ;;  %v21774_v38 = vsel %vm24720_vm4, %v11718_v45, 0.0  ;;  %vm25349_vm4 = vcmp.eq.s32.totalorder %v20645_v50, 1 }
 0x202   : > { %16565 = vmatmul.mubr.msk.f32.gmra.mrb[76].mxu0 %vm500_vm12, %v5350_v9  ;;  %v25338_v28 = vld [vmem:[#allocation66_spill] sm:$0xff]  ;;  %vm24726_vm14 = vcmp.eq.s32.totalorder %v21762_v36, 1  ;;  %v25340_v29 = vld [vmem:[#allocation49_spill] sm:$0xff]  ;;  %25342 = vst [vmem:[#allocation46_spill] sm:$0xff] %v21774_v38  ;;  %v4524_v9 = vsel %vm2042_vm3, %v4492_v61, 0.0  ;;  %v9596_v61 = vld [vmem:[%s18592_s30 + $0x3] sm:$0xff] }
 0x203   : > { %vm25339_vm0 = vcmp.eq.s32.totalorder %v25338_v28, 1  ;;  %vm25341_vm7 = vcmp.eq.s32.totalorder %v25340_v29, 1  ;;  %v4493_v28 = vld [vmem:[%s18592_s30 + $0x13c] sm:$0xff]  ;;  %v18327_v45 = vld [vmem:[%s18592_s30 + $0x91] sm:$0xff] }
 0x204   : > { %v5351_v49 = vsel %vm25339_vm0, %v18325_v1, 0.0  ;;  %v4523_v40 = vsel %vm25341_vm7, %v4491_v8, 0.0  ;;  %v21782_v1 = vsel %vm24726_vm14, %v11717_v41, 0.0  ;;  %v18326_v8 = vld [vmem:[%s18592_s30 + $0x89] sm:$0xff]  ;;  %vm25346_vm7 = vcmp.eq.s32.totalorder %v20647_v46, 1  ;;  %v18339_v38 = vld [vmem:[%s18592_s30 + $0xf1] sm:$0xff] }
 0x205   : > { %16567 = vmatprep.mubr.msk.f32.mxu0 %vm500_vm12, %v5351_v49  ;;  %16489 = vmatmul.mubr.msk.f32.gmra.mrb[12].mxu1 %vm500_vm12, %v4523_v40  ;;  %25343 = vst [vmem:[#allocation49_spill] sm:$0xff] %v21782_v1  ;;  %v25344_v49 = vld [vmem:[#allocation30_spill] sm:$0xff]  ;;  %v5353_v13 = vsel %vm25346_vm7, %v18327_v45, 0.0  ;;  %v25347_v40 = vld [vmem:[#allocation53_spill] sm:$0xff]  ;;  %v18329_v45 = vld [vmem:[%s18592_s30 + $0xa1] sm:$0xff]  ;;  %vm25352_vm7 = vcmp.eq.s32.totalorder %v20789_v37, 1 }
 0x206   : > { %16491 = vmatprep.mubr.msk.f32.mxu1 %vm500_vm12, %v4524_v9  ;;  %vm25345_vm0 = vcmp.eq.s32.totalorder %v25344_v49, 1  ;;  %vm25348_vm3 = vcmp.eq.s32.totalorder %v25347_v40, 1  ;;  %v18328_v9 = vld [vmem:[%s18592_s30 + $0x99] sm:$0xff]  ;;  %v21887_v1 = vld [vmem:[%s18592_s30 + $0x63] sm:$0xff]  ;;  %v9613_v46 = vld [vmem:[%s18592_s30 + $0x8b] sm:$0xff] }
 0x207   : > { %v5352_v29 = vsel %vm25345_vm0, %v18326_v8, 0.0  ;;  %v4525_v41 = vsel %vm25348_vm3, %v4493_v28, 0.0  ;;  %v5354_v8 = vsel %vm25349_vm4, %v18328_v9, 0.0  ;;  %vm25350_vm0 = vcmp.eq.s32.totalorder %v20718_v10, 1  ;;  %v21810_v28 = vld [vmem:[%s24370_s8 + $0x10] sm:$0xff]  ;;  %v25372_v37 = vld [vmem:[#allocation135_spill] sm:$0xff] }
 0x208   : > { %16568 = vmatmul.mubr.msk.f32.gmra.mrb[78].mxu0 %vm500_vm12, %v5352_v29  ;;  %v9597_v29 = vld [vmem:[%s18592_s30 + $0xb] sm:$0xff]  ;;  %vm25351_vm4 = vcmp.eq.s32.totalorder %v20716_v51, 1  ;;  %vm25353_vm3 = vcmp.eq.s32.totalorder %v20787_v26, 1  ;;  %v6047_v26 = vld [vmem:[%s18592_s30 + $0x1d] sm:$0xff]  ;;  %vm24733_vm14 = vcmp.eq.s32.totalorder %v25372_v37, 1 }
 0x209   : > { %16570 = vmatprep.mubr.msk.f32.mxu0 %vm500_vm12, %v5353_v13  ;;  %16492 = vmatmul.mubr.msk.f32.gmra.mrb[14].mxu1 %vm500_vm12, %v4525_v41  ;;  %v5355_v13 = vsel %vm25350_vm0, %v18329_v45, 0.0  ;;  %v18331_v41 = vld [vmem:[%s18592_s30 + $0xb1] sm:$0xff]  ;;  %vm25354_vm0 = vcmp.eq.s32.totalorder %v20860_v57, 1  ;;  %v25371_v57 = vld [vmem:[#allocation56_spill] sm:$0xff]  ;;  %v6271_v50 = vsel %vm24733_vm14, %v6047_v26, 0.0 }
 0x20a   : > { %16946 = vmatprep.mubr.msk.f32.mxu1 %vm500_vm12, %v9596_v61  ;;  %v18330_v61 = vld [vmem:[%s18592_s30 + $0xa9] sm:$0xff]  ;;  %v5357_v9 = vsel %vm25352_vm7, %v18331_v41, 0.0  ;;  %v25373_v10 = vld [vmem:[#allocation142_spill] sm:$0xff] }
 0x20b   : > { %v5356_v40 = vsel %vm25351_vm4, %v18330_v61, 0.0  ;;  %vm25355_vm4 = vcmp.eq.s32.totalorder %v20858_v15, 1  ;;  %v21849_v41 = vld [vmem:[%s18592_s30 + $0x43] sm:$0xff]  ;;  %v21907_v61 = vld [vmem:[%s18592_s30 + $0x73] sm:$0xff]  ;;  %vm24735_vm1 = vcmp.eq.s32.totalorder %v25373_v10, 1 }
 0x20c   : > { %16571 = vmatmul.mubr.msk.f32.gmra.mrb[80].mxu0 %vm500_vm12, %v5354_v8  ;;  %v25370_v15 = vld [vmem:[#allocation136_spill] sm:$0xff]  ;;  %v9614_v26 = vld [vmem:[%s18592_s30 + $0x93] sm:$0xff] }
 0x20d   : > { %16573 = vmatprep.mubr.msk.f32.mxu0 %vm500_vm12, %v5355_v13  ;;  %16947 = vmatmul.mubr.msk.f32.vlgmr.msra.gmra.mrb[32].mxu1 %vm500_vm12, %v9597_v29  ;;  %v25356_v13 = vld [vmem:[#allocation139_spill] sm:$0xff]  ;;  %v25375_v49 = vld [vmem:[#allocation149_spill] sm:$0xff]  ;;  %v25376_v10 = vld [vmem:[#allocation148_spill] sm:$0xff] }
 0x20e   : > { %16995 = vmatpush3.msra.mxu1 %v21421_v59  ;;  %16949 = vmatprep.mubr.msk.f32.mxu1 %vm500_vm12, %v21191_v11  ;;  %v18332_v59 = vld [vmem:[%s18592_s30 + $0xb9] sm:$0xff]  ;;  %v18333_v11 = vld [vmem:[%s18592_s30 + $0xc1] sm:$0xff]  ;;  %vm24737_vm14 = vcmp.eq.s32.totalorder %v25375_v49, 1 }
 0x20f   : > { %17044 = vmatprep.subr.mxu1 %v21810_v28  ;;  %v5358_v8 = vsel %vm25353_vm3, %v18332_v59, 0.0  ;;  %v5359_v29 = vsel %vm25354_vm0, %v18333_v11, 0.0  ;;  %v25359_v59 = vld [vmem:[#allocation106_spill] sm:$0xff]  ;;  %v21860_v11 = vld [vmem:[%s18592_s30 + $0x4b] sm:$0xff]  ;;  %v9612_v51 = vld [vmem:[%s18592_s30 + $0x83] sm:$0xff] }
 0x210   : > { %16574 = vmatmul.mubr.msk.f32.gmra.mrb[82].mxu0 %vm500_vm12, %v5356_v40  ;;  %vm25360_vm7 = vcmp.eq.s32.totalorder %v25359_v59, 1  ;;  %v9618_v49 = vld [vmem:[%s18592_s30 + $0xb3] sm:$0xff] }
 0x211   : > { %16576 = vmatprep.mubr.msk.f32.mxu0 %vm500_vm12, %v5357_v9  ;;  %16950 = vmatmul.mubr.msk.f32.gmra.mrb[34].mxu1 %vm500_vm12, %v21210_v27  ;;  %v18334_v27 = vld [vmem:[%s18592_s30 + $0xc9] sm:$0xff]  ;;  %v18336_v9 = vld [vmem:[%s18592_s30 + $0xd9] sm:$0xff] }
 0x212   : > { %16952 = vmatprep.mubr.msk.f32.mxu1 %vm500_vm12, %v21216_v0  ;;  %v5360_v45 = vsel %vm25355_vm4, %v18334_v27, 0.0  ;;  %v18335_v0 = vld [vmem:[%s18592_s30 + $0xd1] sm:$0xff] }
 0x213   : > { %v5361_v40 = vsel %vm24722_vm6, %v18335_v0, 0.0  ;;  %v25361_v27 = vld [vmem:[#allocation122_spill] sm:$0xff]  ;;  %v25363_v0 = vld [vmem:[#allocation128_spill] sm:$0xff]  ;;  %vm24732_vm6 = vcmp.eq.s32.totalorder %v25370_v15, 1 }
 0x214   : > { %16577 = vmatmul.mubr.msk.f32.gmra.mrb[84].mxu0 %vm500_vm12, %v5358_v8  ;;  %v5362_v8 = vsel %vm25360_vm7, %v18336_v9, 0.0  ;;  %vm25362_vm3 = vcmp.eq.s32.totalorder %v25361_v27, 1  ;;  %vm5333_vm0 = vcmp.eq.s32.totalorder %v25363_v0, 1  ;;  %v25367_v27 = vld [vmem:[#allocation132_spill] sm:$0xff] }
 0x215   : > { %16579 = vmatprep.mubr.msk.f32.mxu0 %vm500_vm12, %v5359_v29  ;;  %16953 = vmatmul.mubr.msk.f32.gmra.mrb[36].mxu1 %vm500_vm12, %v21240_v24  ;;  %v25358_v24 = vld [vmem:[#allocation143_spill] sm:$0xff] }
 0x216   : > { %16955 = vmatprep.mubr.msk.f32.mxu1 %vm500_vm12, %v25356_v13  ;;  %v18337_v29 = vld [vmem:[%s18592_s30 + $0xe1] sm:$0xff]  ;;  %v21867_v13 = vld [vmem:[%s18592_s30 + $0x53] sm:$0xff] }
 0x218   : > { %16580 = vmatmul.mubr.msk.f32.gmra.mrb[86].mxu0 %vm500_vm12, %v5360_v45  ;;  %v5363_v45 = vsel %vm25362_vm3, %v18337_v29, 0.0  ;;  %v25366_v29 = vld [vmem:[#allocation127_spill] sm:$0xff]  ;;  %vm5335_vm3 = vcmp.eq.s32.totalorder %v25367_v27, 1  ;;  %v18374_v27 = vld [vmem:[%s18592_s30 + $0xae] sm:$0xff] }
 0x219   : > { %16582 = vmatprep.mubr.msk.f32.mxu0 %vm500_vm12, %v5361_v40  ;;  %16956 = vmatmul.mubr.msk.f32.gmra.mrb[38].mxu1 %vm500_vm12, %v25358_v24  ;;  %v18338_v40 = vld [vmem:[%s18592_s30 + $0xe9] sm:$0xff]  ;;  %v25364_v24 = vld [vmem:[#allocation58_spill] sm:$0xff]  ;;  %vm5334_vm7 = vcmp.eq.s32.totalorder %v25366_v29, 1 }
 0x21a   : > { %16958 = vmatprep.mubr.msk.f32.mxu1 %vm500_vm12, %v21849_v41  ;;  %vm25365_vm4 = vcmp.eq.s32.totalorder %v25364_v24, 1  ;;  %v21899_v24 = vld [vmem:[%s18592_s30 + $0x6b] sm:$0xff] }
 0x21b   : > { %v5364_v9 = vsel %vm25365_vm4, %v18338_v40, 0.0  ;;  %v18340_v40 = vld [vmem:[%s18592_s30 + $0xf9] sm:$0xff]  ;;  %v18373_v29 = vld [vmem:[%s18592_s30 + $0xa6] sm:$0xff] }
 0x21c   : > { %16583 = vmatmul.mubr.msk.f32.gmra.mrb[88].mxu0 %vm500_vm12, %v5362_v8  ;;  %v21879_v8 = vld [vmem:[%s18592_s30 + $0x5b] sm:$0xff] }
 0x21d   : > { %16585 = vmatprep.mubr.msk.f32.mxu0 %vm500_vm12, %v5363_v45  ;;  %16959 = vmatmul.mubr.msk.f32.gmra.mrb[40].mxu1 %vm500_vm12, %v21860_v11  ;;  %v5365_v45 = vsel %vm5333_vm0, %v18339_v38, 0.0  ;;  %v25368_v38 = vld [vmem:[#allocation131_spill] sm:$0xff] }
 0x21e   : > { %16961 = vmatprep.mubr.msk.f32.mxu1 %vm500_vm12, %v21867_v13  ;;  %vm5336_vm4 = vcmp.eq.s32.totalorder %v25368_v38, 1 }
 0x220   : > { %16586 = vmatmul.mubr.msk.f32.gmra.mrb[90].mxu0 %vm500_vm12, %v5364_v9  ;;  %v5366_v9 = vsel %vm5334_vm7, %v18340_v40, 0.0  ;;  %v6046_v40 = vld [vmem:[%s18592_s30 + $0x15] sm:$0xff] }
 0x221   : > { %16588 = vmatprep.mubr.msk.f32.mxu0 %vm500_vm12, %v5365_v45  ;;  %16962 = vmatmul.mubr.msk.f32.gmra.mrb[42].mxu1 %vm500_vm12, %v21879_v8  ;;  %v25369_v45 = vld [vmem:[#allocation121_spill] sm:$0xff] }
 0x222   : > { %16964 = vmatprep.mubr.msk.f32.mxu1 %vm500_vm12, %v21887_v1  ;;  %v5367_v59 = vsel %vm5335_vm3, %v25369_v45, 0.0  ;;  %v9611_v45 = vld [vmem:[%s18592_s30 + $0x7b] sm:$0xff] }
 0x224   : > { %16589 = vmatmul.mubr.msk.f32.gmra.mrb[92].mxu0 %vm500_vm12, %v5366_v9  ;;  %v5368_v9 = vsel %vm5336_vm4, %v25371_v57, 0.0  ;;  %v6048_v57 = vld [vmem:[%s18592_s30 + $0x25] sm:$0xff] }
 0x225   : > { %16591 = vmatprep.mubr.msk.f32.mxu0 %vm500_vm12, %v5367_v59  ;;  %16965 = vmatmul.mubr.msk.f32.gmra.mrb[44].mxu1 %vm500_vm12, %v21899_v24  ;;  %v6270_v59 = vsel %vm24732_vm6, %v6046_v40, 0.0  ;;  %v21937_v40 = vld [vmem:[%s24368_s6 + $0x20] sm:$0xff] }
 0x226   : > { %16967 = vmatprep.mubr.msk.f32.mxu1 %vm500_vm12, %v21907_v61 }
 0x228   : > { %16592 = vmatmul.mubr.msk.f32.gmra.mrb[94].mxu0 %vm500_vm12, %v5368_v9  ;;  %v25374_v9 = vld [vmem:[#allocation141_spill] sm:$0xff] }
 0x229   : > { %16596 = vmatprep.mubr.msk.f32.mxu0 %vm500_vm12, %v6270_v59  ;;  %16968 = vmatmul.mubr.msk.f32.gmra.mrb[46].mxu1 %vm500_vm12, %v9611_v45  ;;  %vm24739_vm6 = vcmp.eq.s32.totalorder %v25374_v9, 1  ;;  %v6272_v45 = vsel %vm24735_vm1, %v6048_v57, 0.0  ;;  %v6049_v59 = vld [vmem:[%s18592_s30 + $0x2d] sm:$0xff]  ;;  %v9615_v57 = vld [vmem:[%s18592_s30 + $0x9b] sm:$0xff]  ;;  %vm24740_vm1 = vcmp.eq.s32.totalorder %v25376_v10, 1 }
 0x22a   : > { %16970 = vmatprep.mubr.msk.f32.mxu1 %vm500_vm12, %v9612_v51  ;;  %v6050_v51 = vld [vmem:[%s18592_s30 + $0x35] sm:$0xff] }
 0x22c   : > { %16597 = vmatmul.mubr.msk.f32.vlgmr.msra.gmra.mrb[64].mxu0 %vm500_vm12, %v6271_v50  ;;  %v6273_v50 = vsel %vm24739_vm6, %v6049_v59, 0.0  ;;  %v6052_v59 = vld [vmem:[%s18592_s30 + $0x45] sm:$0xff]  ;;  %vm24742_vm6 = vcmp.eq.s32.totalorder %v21397_v39, 1  ;;  %v9622_v39 = vld [vmem:[%s18592_s30 + $0xd3] sm:$0xff] }
 0x22d   : > { %16599 = vmatprep.mubr.msk.f32.mxu0 %vm500_vm12, %v6272_v45  ;;  %16645 = vmatpush3.msra.mxu0 %v21601_v32  ;;  %v6274_v32 = vsel %vm24737_vm14, %v6050_v51, 0.0  ;;  %v6051_v45 = vld [vmem:[%s18592_s30 + $0x3d] sm:$0xff]  ;;  %vm24745_vm14 = vcmp.eq.s32.totalorder %v21354_v62, 1  ;;  %v6276_v51 = vsel %vm24741_vm5, %v6052_v59, 0.0  ;;  %vm24748_vm5 = vcmp.eq.s32.totalorder %v21441_v34, 1 }
 0x22e   : > { %16971 = vmatmul.mubr.msk.f32.gmra.mrb[48].mxu1 %vm500_vm12, %v9613_v46  ;;  %16694 = vmatprep.subr.mxu0 %v21937_v40  ;;  %v9616_v46 = vld [vmem:[%s18592_s30 + $0xa3] sm:$0xff]  ;;  %v9623_v34 = vld [vmem:[%s18592_s30 + $0xdb] sm:$0xff] }
 0x22f   : > { %16973 = vmatprep.mubr.msk.f32.mxu1 %vm500_vm12, %v9614_v26  ;;  %v6275_v26 = vsel %vm24740_vm1, %v6051_v45, 0.0  ;;  %vm24753_vm1 = vcmp.eq.s32.totalorder %v21390_v47, 1  ;;  %v9624_v62 = vld [vmem:[%s18592_s30 + $0xe3] sm:$0xff] }
 0x230   : > { %16600 = vmatmul.mubr.msk.f32.gmra.mrb[66].mxu0 %vm500_vm12, %v6273_v50  ;;  %v9617_v50 = vld [vmem:[%s18592_s30 + $0xab] sm:$0xff] }
 0x231   : > { %16602 = vmatprep.mubr.msk.f32.mxu0 %vm500_vm12, %v6274_v32  ;;  %v6053_v32 = vld [vmem:[%s18592_s30 + $0x4d] sm:$0xff] }
 0x232   : > { %16974 = vmatmul.mubr.msk.f32.gmra.mrb[50].mxu1 %vm500_vm12, %v9615_v57  ;;  %v6054_v57 = vld [vmem:[%s18592_s30 + $0x55] sm:$0xff]  ;;  %v6277_v45 = vsel %vm24745_vm14, %v6053_v32, 0.0  ;;  %v21992_v32 = vpop.permute.xlu0 %6215  ;;  %vm24758_vm14 = vcmp.eq.s32.totalorder %v21486_v35, 1 }
 0x233   : > { %16976 = vmatprep.mubr.msk.f32.mxu1 %vm500_vm12, %v9616_v46  ;;  %v9619_v46 = vld [vmem:[%s18592_s30 + $0xbb] sm:$0xff]  ;;  %v6278_v59 = vsel %vm24742_vm6, %v6054_v57, 0.0  ;;  %25377 = vst [vmem:[#allocation53_spill] sm:$0xff] %v21992_v32  ;;  %vm24759_vm6 = vcmp.eq.s32.totalorder %v21437_v12, 1 }
 0x234   : > { %16603 = vmatmul.mubr.msk.f32.gmra.mrb[68].mxu0 %vm500_vm12, %v6275_v26  ;;  %v6055_v26 = vld [vmem:[%s18592_s30 + $0x5d] sm:$0xff] }
 0x235   : > { %16605 = vmatprep.mubr.msk.f32.mxu0 %vm500_vm12, %v6276_v51  ;;  %v9620_v51 = vld [vmem:[%s18592_s30 + $0xc3] sm:$0xff] }
 0x236   : > { %16977 = vmatmul.mubr.msk.f32.gmra.mrb[52].mxu1 %vm500_vm12, %v9617_v50  ;;  %v6056_v50 = vld [vmem:[%s18592_s30 + $0x65] sm:$0xff]  ;;  %v22020_v47 = vpop.permute.xlu0 %10441 }
 0x237   : > { %16979 = vmatprep.mubr.msk.f32.mxu1 %vm500_vm12, %v9618_v49  ;;  %v6279_v49 = vsel %vm24753_vm1, %v6055_v26, 0.0  ;;  %v6280_v57 = vsel %vm24748_vm5, %v6056_v50, 0.0  ;;  %v6058_v26 = vld [vmem:[%s18592_s30 + $0x75] sm:$0xff]  ;;  %vm24767_vm5 = vcmp.eq.s32.totalorder %v21482_v18, 1  ;;  %vm24764_vm1 = vcmp.eq.s32.totalorder %v21530_v4, 1  ;;  %v6063_v4 = vld [vmem:[%s18592_s30 + $0x9d] sm:$0xff] }
 0x238   : > { %16606 = vmatmul.mubr.msk.f32.gmra.mrb[70].mxu0 %vm500_vm12, %v6277_v45  ;;  %v9621_v45 = vld [vmem:[%s18592_s30 + $0xcb] sm:$0xff]  ;;  %v6062_v18 = vld [vmem:[%s18592_s30 + $0x95] sm:$0xff] }
 0x239   : > { %16608 = vmatprep.mubr.msk.f32.mxu0 %vm500_vm12, %v6278_v59  ;;  %v6057_v59 = vld [vmem:[%s18592_s30 + $0x6d] sm:$0xff] }
 0x23a   : > { %16980 = vmatmul.mubr.msk.f32.gmra.mrb[54].mxu1 %vm500_vm12, %v9619_v46  ;;  %v22006_v46 = vpop.permute.xlu1 %6218  ;;  %v6281_v50 = vsel %vm24759_vm6, %v6057_v59, 0.0  ;;  %vm24772_vm6 = vcmp.eq.s32.totalorder %v21577_v21, 1 }
 0x23b   : > { %16982 = vmatprep.mubr.msk.f32.mxu1 %vm500_vm12, %v9620_v51  ;;  %25378 = vst [vmem:[#allocation139_spill] sm:$0xff] %v22006_v46  ;;  %v22010_v51 = vpop.f32.mrb[48].mxu0 }
 0x23c   : > { %16609 = vmatmul.mubr.msk.f32.gmra.mrb[72].mxu0 %vm500_vm12, %v6279_v49  ;;  %v22013_v49 = vpop.f32.mrb[49].mxu0 }
 0x23d   : > { %16611 = vmatprep.mubr.msk.f32.mxu0 %vm500_vm12, %v6280_v57  ;;  %25379 = vst [vmem:[#allocation143_spill] sm:$0xff] %v22013_v49  ;;  %v6282_v57 = vsel %vm24758_vm14, %v6058_v26, 0.0  ;;  %vm24770_vm14 = vcmp.eq.s32.totalorder %v21526_v53, 1  ;;  %v9340_v53 = vld [vmem:[%s18592_s30 + $0x8] sm:$0xff]  ;;  %v25473_v49 = vld [vmem:[#allocation137_spill] sm:$0xff] }
 0x23e   : > { %16983 = vmatmul.mubr.msk.f32.gmra.mrb[56].mxu1 %vm500_vm12, %v9621_v45  ;;  %v6059_v45 = vld [vmem:[%s18592_s30 + $0x7d] sm:$0xff]  ;;  %v22030_v59 = vpop.f32.mrb[50].mxu0  ;;  %v22033_v12 = vpop.permute.xlu1 %10444 }
 0x23f   : > { %16985 = vmatprep.mubr.msk.f32.mxu1 %vm500_vm12, %v9622_v39  ;;  %v6060_v39 = vld [vmem:[%s18592_s30 + $0x85] sm:$0xff]  ;;  %25380 = vst [vmem:[#allocation127_spill] sm:$0xff] %v22030_v59  ;;  %v22035_v16 = vpop.f32.mrb[51].mxu0  ;;  %v6283_v26 = vsel %vm24767_vm5, %v6059_v45, 0.0  ;;  %v22049_v45 = vpop.permute.xlu0 %6221  ;;  %vm24778_vm5 = vcmp.eq.s32.totalorder %v21635_v48, 1  ;;  %v25463_v59 = vld [vmem:[#allocation130_spill] sm:$0xff] }
 0x240   : > { %16612 = vmatmul.mubr.msk.f32.gmra.mrb[74].mxu0 %vm500_vm12, %v6281_v50  ;;  %25381 = vst [vmem:[#allocation132_spill] sm:$0xff] %v22035_v16  ;;  %v9625_v50 = vld [vmem:[%s18592_s30 + $0xeb] sm:$0xff]  ;;  %25382 = vst [vmem:[#allocation131_spill] sm:$0xff] %v22049_v45 }
 0x241   : > { %16614 = vmatprep.mubr.msk.f32.mxu0 %vm500_vm12, %v6282_v57  ;;  %v6284_v57 = vsel %vm24764_vm1, %v6060_v39, 0.0  ;;  %v9339_v39 = vld [vmem:[%s18592_s30] sm:$0xff]  ;;  %vm24784_vm1 = vcmp.eq.s32.totalorder %v21571_v42, 1 }
 0x242   : > { %16986 = vmatmul.mubr.msk.f32.gmra.mrb[58].mxu1 %vm500_vm12, %v9623_v34  ;;  %v6061_v34 = vld [vmem:[%s18592_s30 + $0x8d] sm:$0xff]  ;;  %v6287_v9 = vsel %vm24784_vm1, %v6063_v4, 0.0  ;;  %v6066_v4 = vld [vmem:[%s18592_s30 + $0xb5] sm:$0xff]  ;;  %vm24797_vm1 = vcmp.eq.s32.totalorder %v21680_v17, 1 }
 0x243   : > { %16988 = vmatprep.mubr.msk.f32.mxu1 %vm500_vm12, %v9624_v62  ;;  %v22051_v62 = vpop.f32.mrb[52].mxu0  ;;  %v22086_v37 = vpop.permute.xlu0 %10447  ;;  %v9346_v17 = vld [vmem:[%s18592_s30 + $0x38] sm:$0xff] }
 0x244   : > { %16615 = vmatmul.mubr.msk.f32.gmra.mrb[76].mxu0 %vm500_vm12, %v6283_v26  ;;  %25383 = vst [vmem:[#allocation121_spill] sm:$0xff] %v22051_v62  ;;  %v22054_v35 = vpop.f32.mrb[53].mxu0  ;;  %v6285_v26 = vsel %vm24770_vm14, %v6061_v34, 0.0  ;;  %v6064_v34 = vld [vmem:[%s18592_s30 + $0xa5] sm:$0xff] }
 0x245   : > { %16617 = vmatprep.mubr.msk.f32.mxu0 %vm500_vm12, %v6284_v57  ;;  %25384 = vst [vmem:[#allocation56_spill] sm:$0xff] %v22054_v35  ;;  %v6286_v57 = vsel %vm24772_vm6, %v6062_v18, 0.0 }
 0x246   : > { %16989 = vmatmul.mubr.msk.f32.gmra.mrb[60].mxu1 %vm500_vm12, %v9625_v50  ;;  %v22067_v50 = vpop.permute.xlu1 %6224  ;;  %v22073_v10 = vpop.f32.mrb[54].mxu0 }
 0x247   : > { %16991 = vmatprep.mubr.msk.f32.mxu1 %vm500_vm12, %v21295_v25  ;;  %25385 = vst [vmem:[#allocation184_spill] sm:$0xff] %v22067_v50  ;;  %v25386_v25 = vld [vmem:[#allocation80_spill] sm:$0xff]  ;;  %25387 = vst [vmem:[#allocation185_spill] sm:$0xff] %v22073_v10  ;;  %v22079_v21 = vpop.f32.mrb[55].mxu0 }
 0x248   : > { %16618 = vmatmul.mubr.msk.f32.gmra.mrb[78].mxu0 %vm500_vm12, %v6285_v26  ;;  %vm24791_vm14 = vcmp.eq.s32.totalorder %v25386_v25, 1  ;;  %v25388_v26 = vld [vmem:[#allocation81_spill] sm:$0xff]  ;;  %25390 = vst [vmem:[#allocation186_spill] sm:$0xff] %v22079_v21 }
 0x249   : > { %16620 = vmatprep.mubr.msk.f32.mxu0 %vm500_vm12, %v6286_v57  ;;  %vm25389_vm6 = vcmp.eq.s32.totalorder %v25388_v26, 1  ;;  %v9341_v57 = vld [vmem:[%s18592_s30 + $0x10] sm:$0xff]  ;;  %v9564_v26 = vsel %vm24791_vm14, %v9340_v53, 0.0  ;;  %v9342_v53 = vld [vmem:[%s18592_s30 + $0x18] sm:$0xff] }
 0x24a   : > { %16992 = vmatmul.mubr.msk.f32.gmra.mrb[62].mxu1 %vm500_vm12, %v21315_v31  ;;  %v9563_v18 = vsel %vm25389_vm6, %v9339_v39, 0.0  ;;  %v6288_v31 = vsel %vm24778_vm5, %v6064_v34, 0.0  ;;  %v6065_v39 = vld [vmem:[%s18592_s30 + $0xad] sm:$0xff]  ;;  %vm24788_vm6 = vcmp.eq.s32.totalorder %v21687_v6, 1  ;;  %v25392_v34 = vld [vmem:[#allocation90_spill] sm:$0xff]  ;;  %v22108_v42 = vpop.permute.xlu1 %10450 }
 0x24b   : > { %16996 = vmatprep.mubr.msk.f32.mxu1 %vm500_vm12, %v9563_v18  ;;  %v22100_v18 = vld [vmem:[%s24370_s8 + $0x18] sm:$0xff]  ;;  %vm25393_vm5 = vcmp.eq.s32.totalorder %v25392_v34, 1  ;;  %v6289_v15 = vsel %vm24785_vm10, %v6065_v39, 0.0  ;;  %v22128_v34 = vpop.permute.xlu0 %6227  ;;  %v9344_v6 = vld [vmem:[%s18592_s30 + $0x28] sm:$0xff] }
 0x24c   : > { %16621 = vmatmul.mubr.msk.f32.gmra.mrb[80].mxu0 %vm500_vm12, %v6287_v9  ;;  %v22102_v9 = vpop.f32.mrb[56].mxu0  ;;  %v9565_v48 = vsel %vm25393_vm5, %v9341_v57, 0.0  ;;  %v6067_v57 = vld [vmem:[%s18592_s30 + $0xbd] sm:$0xff]  ;;  %vm24794_vm5 = vcmp.eq.s32.totalorder %v21739_v22, 1  ;;  %25397 = vst [vmem:[#allocation189_spill] sm:$0xff] %v22128_v34  ;;  %v25406_v22 = vld [vmem:[#allocation109_spill] sm:$0xff] }
 0x24d   : > { %16623 = vmatprep.mubr.msk.f32.mxu0 %vm500_vm12, %v6288_v31  ;;  %25391 = vst [vmem:[#allocation187_spill] sm:$0xff] %v22102_v9  ;;  %v22111_v31 = vpop.f32.mrb[57].mxu0  ;;  %v9343_v9 = vld [vmem:[%s18592_s30 + $0x20] sm:$0xff] }
 0x24e   : > { %16997 = vmatmul.mubr.msk.f32.vlgmr.msra.gmra.mrb[32].mxu1 %vm500_vm12, %v9564_v26  ;;  %25394 = vst [vmem:[#allocation188_spill] sm:$0xff] %v22111_v31  ;;  %v6290_v26 = vsel %vm24788_vm6, %v6066_v4, 0.0  ;;  %v22130_v44 = vpop.f32.mrb[58].mxu0 }
 0x24f   : > { %17045 = vmatpush3.msra.mxu1 %v21810_v28  ;;  %16999 = vmatprep.mubr.msk.f32.mxu1 %vm500_vm12, %v9565_v48  ;;  %v25395_v28 = vld [vmem:[#allocation89_spill] sm:$0xff]  ;;  %v6068_v48 = vld [vmem:[%s18592_s30 + $0xc5] sm:$0xff]  ;;  %25398 = vst [vmem:[#allocation190_spill] sm:$0xff] %v22130_v44  ;;  %v22136_v31 = vpop.f32.mrb[59].mxu0 }
 0x250   : > { %16624 = vmatmul.mubr.msk.f32.gmra.mrb[82].mxu0 %vm500_vm12, %v6289_v15  ;;  %17094 = vmatprep.subr.mxu1 %v22100_v18  ;;  %vm25396_vm10 = vcmp.eq.s32.totalorder %v25395_v28, 1  ;;  %v25399_v15 = vld [vmem:[#allocation98_spill] sm:$0xff]  ;;  %25401 = vst [vmem:[#allocation191_spill] sm:$0xff] %v22136_v31  ;;  %v25443_v44 = vld [vmem:[#allocation120_spill] sm:$0xff] }
 0x251   : > { %16626 = vmatprep.mubr.msk.f32.mxu0 %vm500_vm12, %v6290_v26  ;;  %v9566_v39 = vsel %vm25396_vm10, %v9342_v53, 0.0  ;;  %vm25400_vm6 = vcmp.eq.s32.totalorder %v25399_v15, 1  ;;  %v6291_v26 = vsel %vm24797_vm1, %v6067_v57, 0.0  ;;  %vm24800_vm10 = vcmp.eq.s32.totalorder %v21732_v2, 1  ;;  %v25403_v15 = vld [vmem:[#allocation97_spill] sm:$0xff]  ;;  %v25412_v2 = vld [vmem:[#allocation116_spill] sm:$0xff] }
 0x252   : > { %17000 = vmatmul.mubr.msk.f32.gmra.mrb[34].mxu1 %vm500_vm12, %v9566_v39  ;;  %v9567_v4 = vsel %vm25400_vm6, %v9343_v9, 0.0  ;;  %v6292_v53 = vsel %vm24794_vm5, %v6068_v48, 0.0  ;;  %v6069_v39 = vld [vmem:[%s18592_s30 + $0xcd] sm:$0xff]  ;;  %vm24803_vm6 = vcmp.eq.s32.totalorder %v21992_v32, 1  ;;  %v22147_v9 = vpop.permute.xlu1 %6230  ;;  %vm25404_vm14 = vcmp.eq.s32.totalorder %v25403_v15, 1  ;;  %v6070_v28 = vld [vmem:[%s18592_s30 + $0xd5] sm:$0xff] }
 0x253   : > { %17002 = vmatprep.mubr.msk.f32.mxu1 %vm500_vm12, %v9567_v4  ;;  %25402 = vst [vmem:[#allocation192_spill] sm:$0xff] %v22147_v9  ;;  %v9568_v57 = vsel %vm25404_vm14, %v9344_v6, 0.0  ;;  %vm25407_vm5 = vcmp.eq.s32.totalorder %v25406_v22, 1  ;;  %vm24829_vm14 = vcmp.eq.s32.totalorder %v22006_v46, 1  ;;  %v22166_v6 = vpop.permute.xlu0 %10453  ;;  %v6071_v22 = vld [vmem:[%s18592_s30 + $0xdd] sm:$0xff] }
 0x254   : > { %16627 = vmatmul.mubr.msk.f32.gmra.mrb[84].mxu0 %vm500_vm12, %v6291_v26  ;;  %v22153_v4 = vpop.f32.mrb[60].mxu0  ;;  %v18341_v26 = vld [vmem:[%s18592_s30 + $0x30] sm:$0xff] }
 0x255   : > { %16629 = vmatprep.mubr.msk.f32.mxu0 %vm500_vm12, %v6292_v53  ;;  %25405 = vst [vmem:[#allocation193_spill] sm:$0xff] %v22153_v4  ;;  %v9569_v48 = vsel %vm25407_vm5, %v18341_v26, 0.0  ;;  %v22160_v31 = vpop.f32.mrb[61].mxu0  ;;  %v6293_v53 = vsel %vm24800_vm10, %v6069_v39, 0.0  ;;  %vm24806_vm5 = vcmp.eq.s32.totalorder %v22049_v45, 1  ;;  %v25409_v26 = vld [vmem:[#allocation54_spill] sm:$0xff] }
 0x256   : > { %17003 = vmatmul.mubr.msk.f32.gmra.mrb[36].mxu1 %vm500_vm12, %v9568_v57  ;;  %25408 = vst [vmem:[#allocation194_spill] sm:$0xff] %v22160_v31  ;;  %v6294_v57 = vsel %vm24803_vm6, %v6070_v28, 0.0  ;;  %vm25410_vm1 = vcmp.eq.s32.totalorder %v25409_v26, 1  ;;  %vm25413_vm10 = vcmp.eq.s32.totalorder %v25412_v2, 1  ;;  %v22183_v32 = vpop.permute.xlu1 %10456  ;;  %v25415_v2 = vld [vmem:[#allocation115_spill] sm:$0xff] }
 0x257   : > { %17005 = vmatprep.mubr.msk.f32.mxu1 %vm500_vm12, %v9569_v48  ;;  %v9570_v39 = vsel %vm25410_vm1, %v9346_v17, 0.0  ;;  %v6072_v48 = vld [vmem:[%s18592_s30 + $0xe5] sm:$0xff]  ;;  %vm24809_vm1 = vcmp.eq.s32.totalorder %v22067_v50, 1  ;;  %vm25416_vm6 = vcmp.eq.s32.totalorder %v25415_v2, 1 }
 0x258   : > { %16630 = vmatmul.mubr.msk.f32.gmra.mrb[86].mxu0 %vm500_vm12, %v6293_v53  ;;  %v22177_v15 = vpop.f32.mrb[62].mxu0  ;;  %v18342_v53 = vld [vmem:[%s18592_s30 + $0x40] sm:$0xff]  ;;  %v6296_v17 = vsel %vm24806_vm5, %v6072_v48, 0.0  ;;  %v18344_v48 = vld [vmem:[%s18592_s30 + $0x50] sm:$0xff] }
 0x259   : > { %16632 = vmatprep.mubr.msk.f32.mxu0 %vm500_vm12, %v6294_v57  ;;  %25411 = vst [vmem:[#allocation195_spill] sm:$0xff] %v22177_v15  ;;  %v9571_v28 = vsel %vm25413_vm10, %v18342_v53, 0.0  ;;  %v22185_v31 = vpop.f32.mrb[63].mxu0  ;;  %v6295_v57 = vsel %vm24829_vm14, %v6071_v22, 0.0  ;;  %vm24812_vm10 = vcmp.eq.s32.totalorder %v22128_v34, 1  ;;  %v18343_v53 = vld [vmem:[%s18592_s30 + $0x48] sm:$0xff] }
 0x25a   : > { %17006 = vmatmul.mubr.msk.f32.gmra.mrb[38].mxu1 %vm500_vm12, %v9570_v39  ;;  %25414 = vst [vmem:[#allocation196_spill] sm:$0xff] %v22185_v31  ;;  %v6073_v39 = vld [vmem:[%s18592_s30 + $0xed] sm:$0xff]  ;;  %v9572_v26 = vsel %vm25416_vm6, %v18343_v53, 0.0  ;;  %v6074_v22 = vld [vmem:[%s18592_s30 + $0xf5] sm:$0xff]  ;;  %vm24817_vm6 = vcmp.eq.s32.totalorder %v22147_v9, 1  ;;  %v22219_v2 = vpop.permute.xlu1 %6236 }
 0x25b   : > { %17008 = vmatprep.mubr.msk.f32.mxu1 %vm500_vm12, %v9571_v28  ;;  %v22201_v28 = vpop.permute.xlu0 %6233  ;;  %v6298_v53 = vsel %vm24812_vm10, %v6074_v22, 0.0  ;;  %25420 = vst [vmem:[#allocation198_spill] sm:$0xff] %v22219_v2  ;;  %v18346_v22 = vld [vmem:[%s18592_s30 + $0x60] sm:$0xff]  ;;  %v25427_v9 = vld [vmem:[#allocation72_spill] sm:$0xff] }
 0x25c   : > { %16633 = vmatmul.mubr.msk.f32.gmra.mrb[88].mxu0 %vm500_vm12, %v6295_v57  ;;  %25417 = vst [vmem:[#allocation197_spill] sm:$0xff] %v22201_v28  ;;  %v22203_v46 = vpop.f32.mrb[32].mxu0  ;;  %v25418_v57 = vld [vmem:[#allocation21_spill] sm:$0xff] }
 0x25d   : > { %16635 = vmatprep.mubr.msk.f32.mxu0 %vm500_vm12, %v6296_v17  ;;  %vm25419_vm5 = vcmp.eq.s32.totalorder %v25418_v57, 1  ;;  %v22209_v31 = vpop.f32.mrb[33].mxu0  ;;  %v6297_v17 = vsel %vm24809_vm1, %v6073_v39, 0.0  ;;  %v25421_v39 = vld [vmem:[#allocation59_spill] sm:$0xff] }
 0x25e   : > { %17009 = vmatmul.mubr.msk.f32.gmra.mrb[40].mxu1 %vm500_vm12, %v9572_v26  ;;  %v9573_v45 = vsel %vm25419_vm5, %v18344_v48, 0.0  ;;  %v6075_v26 = vld [vmem:[%s18592_s30 + $0xfd] sm:$0xff]  ;;  %vm24827_vm5 = vcmp.eq.s32.totalorder %v22201_v28, 1  ;;  %vm25422_vm1 = vcmp.eq.s32.totalorder %v25421_v39, 1  ;;  %v6076_v57 = vld [vmem:[%s18592_s30 + $0x105] sm:$0xff] }
 0x25f   : > { %17011 = vmatprep.mubr.msk.f32.mxu1 %vm500_vm12, %v9573_v45  ;;  %v18345_v48 = vld [vmem:[%s18592_s30 + $0x58] sm:$0xff] }
 0x260   : > { %16636 = vmatmul.mubr.msk.f32.gmra.mrb[90].mxu0 %vm500_vm12, %v6297_v17  ;;  %v9574_v45 = vsel %vm25422_vm1, %v18345_v48, 0.0  ;;  %v22227_v50 = vpop.f32.mrb[34].mxu0  ;;  %v25423_v17 = vld [vmem:[#allocation64_spill] sm:$0xff]  ;;  %vm24825_vm1 = vcmp.eq.s32.totalorder %v22219_v2, 1  ;;  %v6300_v48 = vsel %vm24827_vm5, %v6076_v57, 0.0 }
 0x261   : > { %16638 = vmatprep.mubr.msk.f32.mxu0 %vm500_vm12, %v6298_v53  ;;  %vm25424_vm10 = vcmp.eq.s32.totalorder %v25423_v17, 1  ;;  %v22233_v15 = vpop.f32.mrb[35].mxu0  ;;  %v6299_v53 = vsel %vm24817_vm6, %v6075_v26, 0.0  ;;  %v25425_v17 = vld [vmem:[#allocation70_spill] sm:$0xff]  ;;  %vm25428_vm6 = vcmp.eq.s32.totalorder %v25427_v9, 1  ;;  %v18350_v9 = vld [vmem:[%s18592_s30 + $0x80] sm:$0xff] }
 0x262   : > { %17012 = vmatmul.mubr.msk.f32.gmra.mrb[42].mxu1 %vm500_vm12, %v9574_v45  ;;  %v9575_v34 = vsel %vm25424_vm10, %v18346_v22, 0.0  ;;  %v6077_v45 = vld [vmem:[%s18592_s30 + $0x10d] sm:$0xff]  ;;  %vm25426_vm10 = vcmp.eq.s32.totalorder %v25425_v17, 1  ;;  %v18349_v17 = vld [vmem:[%s18592_s30 + $0x78] sm:$0xff] }
 0x263   : > { %17014 = vmatprep.mubr.msk.f32.mxu1 %vm500_vm12, %v9575_v34  ;;  %v18347_v22 = vld [vmem:[%s18592_s30 + $0x68] sm:$0xff]  ;;  %v18348_v34 = vld [vmem:[%s18592_s30 + $0x70] sm:$0xff]  ;;  %v6301_v57 = vsel %vm24825_vm1, %v6077_v45, 0.0  ;;  %vm9559_vm1 = vcmp.eq.s32.totalorder %v25463_v59, 1 }
 0x264   : > { %16639 = vmatmul.mubr.msk.f32.gmra.mrb[92].mxu0 %vm500_vm12, %v6299_v53  ;;  %v9576_v39 = vsel %vm25426_vm10, %v18347_v22, 0.0  ;;  %v22247_v26 = vpop.f32.mrb[36].mxu0  ;;  %v9577_v53 = vsel %vm25428_vm6, %v18348_v34, 0.0  ;;  %v25429_v22 = vld [vmem:[#allocation79_spill] sm:$0xff]  ;;  %v25432_v45 = vld [vmem:[#allocation4_spill] sm:$0xff] }
 0x265   : > { %16641 = vmatprep.mubr.msk.f32.mxu0 %vm500_vm12, %v6300_v48  ;;  %v22253_v4 = vpop.f32.mrb[37].mxu0  ;;  %v6658_v48 = vld [vmem:[%s18592_s30 + $0x39] sm:$0xff]  ;;  %vm25433_vm6 = vcmp.eq.s32.totalorder %v25432_v45, 1 }
 0x266   : > { %17015 = vmatmul.mubr.msk.f32.gmra.mrb[44].mxu1 %vm500_vm12, %v9576_v39  ;;  %v25430_v39 = vld [vmem:[#allocation68_spill] sm:$0xff]  ;;  %v6690_v2 = vsel %vm24824_vm2, %v6658_v48, 0.0 }
 0x267   : > { %17017 = vmatprep.mubr.msk.f32.mxu1 %vm500_vm12, %v9577_v53  ;;  %vm25431_vm10 = vcmp.eq.s32.totalorder %v25430_v39, 1  ;;  %v9579_v53 = vsel %vm25433_vm6, %v18350_v9, 0.0  ;;  %v25435_v9 = vld [vmem:[#allocation75_spill] sm:$0xff]  ;;  %v25437_v39 = vld [vmem:[#allocation8_spill] sm:$0xff] }
 0x268   : > { %16642 = vmatmul.mubr.msk.f32.gmra.mrb[94].mxu0 %vm500_vm12, %v6301_v57  ;;  %v9578_v28 = vsel %vm25431_vm10, %v18349_v17, 0.0  ;;  %v22265_v34 = vpop.f32.mrb[38].mxu0  ;;  %v22279_v17 = vld [vmem:[%s24368_s6 + $0x28] sm:$0xff]  ;;  %vm25436_vm10 = vcmp.eq.s32.totalorder %v25435_v9, 1  ;;  %vm25438_vm6 = vcmp.eq.s32.totalorder %v25437_v39, 1 }
 0x269   : > { %16646 = vmatprep.mubr.msk.f32.mxu0 %vm500_vm12, %v25429_v22  ;;  %v22273_v57 = vpop.f32.mrb[39].mxu0  ;;  %v18351_v22 = vld [vmem:[%s18592_s30 + $0x88] sm:$0xff] }
 0x26a   : > { %17018 = vmatmul.mubr.msk.f32.gmra.mrb[46].mxu1 %vm500_vm12, %v9578_v28  ;;  %v25434_v28 = vld [vmem:[#allocation87_spill] sm:$0xff]  ;;  %v9580_v48 = vsel %vm25436_vm10, %v18351_v22, 0.0 }
 0x26b   : > { %17020 = vmatprep.mubr.msk.f32.mxu1 %vm500_vm12, %v9579_v53  ;;  %v18352_v53 = vld [vmem:[%s18592_s30 + $0x90] sm:$0xff]  ;;  %v25440_v22 = vld [vmem:[#allocation95_spill] sm:$0xff] }
 0x26c   : > { %16647 = vmatmul.mubr.msk.f32.vlgmr.msra.gmra.mrb[64].mxu0 %vm500_vm12, %v6690_v2  ;;  %v22288_v45 = vpop.f32.mrb[40].mxu0  ;;  %v9581_v55 = vsel %vm25438_vm6, %v18352_v53, 0.0  ;;  %v18354_v53 = vld [vmem:[%s18592_s30 + $0xa0] sm:$0xff]  ;;  %vm25444_vm6 = vcmp.eq.s32.totalorder %v25443_v44, 1  ;;  %v25449_v44 = vld [vmem:[#allocation48_spill] sm:$0xff] }
 0x26d   : > { %16649 = vmatprep.mubr.msk.f32.mxu0 %vm500_vm12, %v25434_v28  ;;  %16695 = vmatpush3.msra.mxu0 %v21937_v40  ;;  %v22295_v2 = vpop.f32.mrb[41].mxu0  ;;  %v25439_v28 = vld [vmem:[#allocation88_spill] sm:$0xff]  ;;  %v18353_v40 = vld [vmem:[%s18592_s30 + $0x98] sm:$0xff] }
 0x26e   : > { %17021 = vmatmul.mubr.msk.f32.gmra.mrb[48].mxu1 %vm500_vm12, %v9580_v48  ;;  %16744 = vmatprep.subr.mxu0 %v22279_v17  ;;  %v25441_v48 = vld [vmem:[#allocation5_spill] sm:$0xff] }
 0x26f   : > { %17023 = vmatprep.mubr.msk.f32.mxu1 %vm500_vm12, %v9581_v55  ;;  %vm25442_vm10 = vcmp.eq.s32.totalorder %v25441_v48, 1  ;;  %v9583_v55 = vsel %vm25444_vm6, %v18354_v53, 0.0  ;;  %v25447_v48 = vld [vmem:[#allocation119_spill] sm:$0xff]  ;;  %v18356_v53 = vld [vmem:[%s18592_s30 + $0xb0] sm:$0xff]  ;;  %vm25450_vm6 = vcmp.eq.s32.totalorder %v25449_v44, 1 }
 0x270   : > { %16650 = vmatmul.mubr.msk.f32.gmra.mrb[66].mxu0 %vm500_vm12, %v25439_v28  ;;  %v9582_v9 = vsel %vm25442_vm10, %v18353_v40, 0.0  ;;  %v22305_v39 = vpop.f32.mrb[42].mxu0  ;;  %v25445_v28 = vld [vmem:[#allocation96_spill] sm:$0xff]  ;;  %vm25448_vm10 = vcmp.eq.s32.totalorder %v25447_v48, 1  ;;  %v9585_v25 = vsel %vm25450_vm6, %v18356_v53, 0.0  ;;  %v25453_v48 = vld [vmem:[#allocation14_spill] sm:$0xff] }
 0x271   : > { %16652 = vmatprep.mubr.msk.f32.mxu0 %vm500_vm12, %v25440_v22  ;;  %v22311_v21 = vpop.f32.mrb[43].mxu0  ;;  %v25446_v22 = vld [vmem:[#allocation107_spill] sm:$0xff]  ;;  %v18355_v40 = vld [vmem:[%s18592_s30 + $0xa8] sm:$0xff] }
 0x272   : > { %17024 = vmatmul.mubr.msk.f32.gmra.mrb[50].mxu1 %vm500_vm12, %v9582_v9  ;;  %v9584_v9 = vsel %vm25448_vm10, %v18355_v40, 0.0  ;;  %v18357_v40 = vld [vmem:[%s18592_s30 + $0xb8] sm:$0xff]  ;;  %vm25454_vm10 = vcmp.eq.s32.totalorder %v25453_v48, 1  ;;  %v18358_v53 = vld [vmem:[%s18592_s30 + $0xc0] sm:$0xff]  ;;  %v25459_v48 = vld [vmem:[#allocation60_spill] sm:$0xff] }
 0x273   : > { %17026 = vmatprep.mubr.msk.f32.mxu1 %vm500_vm12, %v9583_v55  ;;  %v25455_v44 = vld [vmem:[#allocation15_spill] sm:$0xff] }
 0x274   : > { %16653 = vmatmul.mubr.msk.f32.gmra.mrb[68].mxu0 %vm500_vm12, %v25445_v28  ;;  %v22321_v10 = vpop.f32.mrb[44].mxu0  ;;  %v25451_v28 = vld [vmem:[#allocation108_spill] sm:$0xff]  ;;  %vm25456_vm6 = vcmp.eq.s32.totalorder %v25455_v44, 1  ;;  %v25462_v44 = vld [vmem:[#allocation125_spill] sm:$0xff] }
 0x275   : > { %16655 = vmatprep.mubr.msk.f32.mxu0 %vm500_vm12, %v25446_v22  ;;  %v22327_v55 = vpop.f32.mrb[45].mxu0  ;;  %v25452_v22 = vld [vmem:[#allocation113_spill] sm:$0xff]  ;;  %v9587_v62 = vsel %vm25456_vm6, %v18358_v53, 0.0  ;;  %vm9558_vm6 = vcmp.eq.s32.totalorder %v25462_v44, 1 }
 0x276   : > { %17027 = vmatmul.mubr.msk.f32.gmra.mrb[52].mxu1 %vm500_vm12, %v9584_v9  ;;  %v9586_v9 = vsel %vm25454_vm10, %v18357_v40, 0.0  ;;  %v18359_v40 = vld [vmem:[%s18592_s30 + $0xc8] sm:$0xff]  ;;  %v18360_v53 = vld [vmem:[%s18592_s30 + $0xd0] sm:$0xff] }
 0x277   : > { %17029 = vmatprep.mubr.msk.f32.mxu1 %vm500_vm12, %v9585_v25  ;;  %v25457_v25 = vld [vmem:[#allocation126_spill] sm:$0xff]  ;;  %v25470_v44 = vld [vmem:[#allocation133_spill] sm:$0xff] }
 0x278   : > { %16656 = vmatmul.mubr.msk.f32.gmra.mrb[70].mxu0 %vm500_vm12, %v25451_v28  ;;  %v22337_v35 = vpop.f32.mrb[46].mxu0  ;;  %vm9557_vm2 = vcmp.eq.s32.totalorder %v25457_v25, 1  ;;  %v25467_v25 = vld [vmem:[#allocation134_spill] sm:$0xff]  ;;  %vm9562_vm14 = vcmp.eq.s32.totalorder %v25470_v44, 1  ;;  %v25484_v44 = vld [vmem:[#allocation11_spill] sm:$0xff] }
 0x279   : > { %16658 = vmatprep.mubr.msk.f32.mxu0 %vm500_vm12, %v25452_v22  ;;  %v22344_v28 = vpop.f32.mrb[47].mxu0  ;;  %v25458_v22 = vld [vmem:[#allocation114_spill] sm:$0xff]  ;;  %vm9561_vm5 = vcmp.eq.s32.totalorder %v25467_v25, 1  ;;  %v25475_v25 = vld [vmem:[#allocation76_spill] sm:$0xff] }
 0x27a   : > { %17030 = vmatmul.mubr.msk.f32.gmra.mrb[54].mxu1 %vm500_vm12, %v9586_v9  ;;  %v25460_v9 = vld [vmem:[#allocation105_spill] sm:$0xff] }
 0x27b   : > { %17032 = vmatprep.mubr.msk.f32.mxu1 %vm500_vm12, %v9587_v62  ;;  %vm25461_vm10 = vcmp.eq.s32.totalorder %v25460_v9, 1  ;;  %v9589_v62 = vsel %vm9557_vm2, %v18360_v53, 0.0  ;;  %v25466_v9 = vld [vmem:[#allocation129_spill] sm:$0xff]  ;;  %v18362_v53 = vld [vmem:[%s18592_s30 + $0xe0] sm:$0xff] }
 0x27c   : > { %16659 = vmatmul.mubr.msk.f32.gmra.mrb[72].mxu0 %vm500_vm12, %v25458_v22  ;;  %v9588_v16 = vsel %vm25461_vm10, %v18359_v40, 0.0  ;;  %v25464_v22 = vld [vmem:[#allocation22_spill] sm:$0xff]  ;;  %vm24832_vm10 = vcmp.eq.s32.totalorder %v25466_v9, 1 }
 0x27d   : > { %16661 = vmatprep.mubr.msk.f32.mxu0 %vm500_vm12, %v25459_v48  ;;  %v25465_v48 = vld [vmem:[#allocation25_spill] sm:$0xff]  ;;  %v18361_v40 = vld [vmem:[%s18592_s30 + $0xd8] sm:$0xff] }
 0x27e   : > { %17033 = vmatmul.mubr.msk.f32.gmra.mrb[56].mxu1 %vm500_vm12, %v9588_v16  ;;  %v9590_v16 = vsel %vm9558_vm6, %v18361_v40, 0.0  ;;  %v18363_v40 = vld [vmem:[%s18592_s30 + $0xe8] sm:$0xff] }
 0x27f   : > { %17035 = vmatprep.mubr.msk.f32.mxu1 %vm500_vm12, %v9589_v62  ;;  %v9591_v62 = vsel %vm9559_vm1, %v18362_v53, 0.0  ;;  %v18364_v53 = vld [vmem:[%s18592_s30 + $0xf0] sm:$0xff] }
 0x280   : > { %16662 = vmatmul.mubr.msk.f32.gmra.mrb[74].mxu0 %vm500_vm12, %v25464_v22  ;;  %v25468_v22 = vld [vmem:[#allocation27_spill] sm:$0xff]  ;;  %v9593_v59 = vsel %vm9561_vm5, %v18364_v53, 0.0 }
 0x281   : > { %16664 = vmatprep.mubr.msk.f32.mxu0 %vm500_vm12, %v25465_v48  ;;  %v25469_v48 = vld [vmem:[#allocation69_spill] sm:$0xff]  ;;  %v10275_v53 = vld [vmem:[%s18592_s30 + $0x1e] sm:$0xff] }
 0x282   : > { %17036 = vmatmul.mubr.msk.f32.gmra.mrb[58].mxu1 %vm500_vm12, %v9590_v16  ;;  %v9592_v16 = vsel %vm24832_vm10, %v18363_v40, 0.0  ;;  %v18365_v40 = vld [vmem:[%s18592_s30 + $0xf8] sm:$0xff]  ;;  %vm24837_vm10 = vcmp.eq.s32.totalorder %v25473_v49, 1 }
 0x283   : > { %17038 = vmatprep.mubr.msk.f32.mxu1 %vm500_vm12, %v9591_v62  ;;  %v10272_v62 = vld [vmem:[%s18592_s30 + $0x6] sm:$0xff]  ;;  %v9594_v9 = vsel %vm9562_vm14, %v18365_v40, 0.0  ;;  %v10278_v49 = vld [vmem:[%s18592_s30 + $0x36] sm:$0xff] }
 0x284   : > { %16665 = vmatmul.mubr.msk.f32.gmra.mrb[76].mxu0 %vm500_vm12, %v25468_v22  ;;  %v25471_v22 = vld [vmem:[#allocation31_spill] sm:$0xff] }
 0x285   : > { %16667 = vmatprep.mubr.msk.f32.mxu0 %vm500_vm12, %v25469_v48  ;;  %v25472_v48 = vld [vmem:[#allocation35_spill] sm:$0xff] }
 0x286   : > { %17039 = vmatmul.mubr.msk.f32.gmra.mrb[60].mxu1 %vm500_vm12, %v9592_v16  ;;  %v10273_v16 = vld [vmem:[%s18592_s30 + $0xe] sm:$0xff]  ;;  %v25476_v40 = vld [vmem:[#allocation39_spill] sm:$0xff] }
 0x287   : > { %17041 = vmatprep.mubr.msk.f32.mxu1 %vm500_vm12, %v9593_v59  ;;  %v10496_v59 = vsel %vm10464_vm15, %v10272_v62, 0.0  ;;  %v10499_v62 = vsel %vm24838_vm8, %v10275_v53, 0.0  ;;  %vm25487_vm8 = vcmp.eq.s32.totalorder %v21375_v60, 1  ;;  %v25493_v60 = vld [vmem:[#allocation52_spill] sm:$0xff] }
 0x288   : > { %16668 = vmatmul.mubr.msk.f32.gmra.mrb[78].mxu0 %vm500_vm12, %v25471_v22  ;;  %v10274_v22 = vld [vmem:[%s18592_s30 + $0x16] sm:$0xff] }
 0x289   : > { %16670 = vmatprep.mubr.msk.f32.mxu0 %vm500_vm12, %v25472_v48  ;;  %v10497_v48 = vsel %vm24837_vm10, %v10273_v16, 0.0  ;;  %v25478_v16 = vld [vmem:[#allocation82_spill] sm:$0xff] }
 0x28a   : > { %17042 = vmatmul.mubr.msk.f32.gmra.mrb[62].mxu1 %vm500_vm12, %v9594_v9  ;;  %v22412_v9 = vld [vmem:[%s24370_s8 + $0x20] sm:$0xff] }
 0x28b   : > { %17046 = vmatprep.mubr.msk.f32.mxu1 %vm500_vm12, %v10496_v59  ;;  %v10498_v59 = vsel %vm24834_vm9, %v10274_v22, 0.0  ;;  %v25481_v22 = vld [vmem:[#allocation151_spill] sm:$0xff] }
 0x28c   : > { %16671 = vmatmul.mubr.msk.f32.gmra.mrb[80].mxu0 %vm500_vm12, %v25475_v25  ;;  %v10276_v25 = vld [vmem:[%s18592_s30 + $0x26] sm:$0xff]  ;;  %vm25482_vm9 = vcmp.eq.s32.totalorder %v25481_v22, 1 }
 0x28d   : > { %16673 = vmatprep.mubr.msk.f32.mxu0 %vm500_vm12, %v25476_v40  ;;  %v25479_v40 = vld [vmem:[#allocation43_spill] sm:$0xff] }
 0x28e   : > { %17047 = vmatmul.mubr.msk.f32.vlgmr.msra.gmra.mrb[32].mxu1 %vm500_vm12, %v10497_v48  ;;  %v25480_v48 = vld [vmem:[#allocation144_spill] sm:$0xff]  ;;  %v25488_v22 = vld [vmem:[#allocation51_spill] sm:$0xff] }
 0x28f   : > { %17095 = vmatpush3.msra.mxu1 %v22100_v18  ;;  %17049 = vmatprep.mubr.msk.f32.mxu1 %vm500_vm12, %v10498_v59  ;;  %v10500_v18 = vsel %vm25482_vm9, %v10276_v25, 0.0  ;;  %v10277_v59 = vld [vmem:[%s18592_s30 + $0x2e] sm:$0xff]  ;;  %v10279_v25 = vld [vmem:[%s18592_s30 + $0x3e] sm:$0xff] }
 0x290   : > { %16674 = vmatmul.mubr.msk.f32.gmra.mrb[82].mxu0 %vm500_vm12, %v25478_v16  ;;  %17144 = vmatprep.subr.mxu1 %v22412_v9  ;;  %v25483_v16 = vld [vmem:[#allocation9_spill] sm:$0xff] }
 0x291   : > { %16676 = vmatprep.mubr.msk.f32.mxu0 %vm500_vm12, %v25479_v40  ;;  %v25485_v40 = vld [vmem:[#allocation150_spill] sm:$0xff] }
 0x292   : > { %17050 = vmatmul.mubr.msk.f32.gmra.mrb[34].mxu1 %vm500_vm12, %v10499_v62  ;;  %vm25486_vm10 = vcmp.eq.s32.totalorder %v25485_v40, 1  ;;  %v10502_v62 = vsel %vm25487_vm8, %v10278_v49, 0.0  ;;  %vm25495_vm8 = vcmp.eq.s32.totalorder %v21405_v5, 1 }
 0x293   : > { %17052 = vmatprep.mubr.msk.f32.mxu1 %vm500_vm12, %v10500_v18  ;;  %v10501_v53 = vsel %vm25486_vm10, %v10277_v59, 0.0  ;;  %v10280_v18 = vld [vmem:[%s18592_s30 + $0x46] sm:$0xff]  ;;  %vm25492_vm10 = vcmp.eq.s32.totalorder %v21413_v63, 1 }
 0x294   : > { %16677 = vmatmul.mubr.msk.f32.gmra.mrb[84].mxu0 %vm500_vm12, %v25483_v16  ;;  %v25489_v16 = vld [vmem:[#allocation16_spill] sm:$0xff]  ;;  %v10504_v49 = vsel %vm25492_vm10, %v10280_v18, 0.0  ;;  %v25496_v63 = vld [vmem:[#allocation123_spill] sm:$0xff]  ;;  %vm25498_vm10 = vcmp.eq.s32.totalorder %v21505_v20, 1 }
 0x295   : > { %16679 = vmatprep.mubr.msk.f32.mxu0 %vm500_vm12, %v25484_v44  ;;  %v25490_v44 = vld [vmem:[#allocation156_spill] sm:$0xff] }
 0x296   : > { %17053 = vmatmul.mubr.msk.f32.gmra.mrb[36].mxu1 %vm500_vm12, %v10501_v53  ;;  %vm25491_vm9 = vcmp.eq.s32.totalorder %v25490_v44, 1  ;;  %v10281_v53 = vld [vmem:[%s18592_s30 + $0x4e] sm:$0xff] }
 0x297   : > { %17055 = vmatprep.mubr.msk.f32.mxu1 %vm500_vm12, %v10502_v62  ;;  %v10503_v59 = vsel %vm25491_vm9, %v10279_v25, 0.0  ;;  %v10282_v62 = vld [vmem:[%s18592_s30 + $0x56] sm:$0xff]  ;;  %v10505_v25 = vsel %vm25495_vm8, %v10281_v53, 0.0  ;;  %vm25497_vm9 = vcmp.eq.s32.totalorder %v21455_v43, 1  ;;  %vm25499_vm8 = vcmp.eq.s32.totalorder %v21499_v33, 1 }
 0x298   : > { %16680 = vmatmul.mubr.msk.f32.gmra.mrb[86].mxu0 %vm500_vm12, %v25488_v22  ;;  %v25494_v22 = vld [vmem:[#allocation124_spill] sm:$0xff]  ;;  %v10506_v18 = vsel %vm10474_vm13, %v10282_v62, 0.0  ;;  %v22480_v62 = vld [vmem:[%s24367_s5] ss:$0 sm:$0xff] }
 0x299   : > { %16682 = vmatprep.mubr.msk.f32.mxu0 %vm500_vm12, %v25489_v16  ;;  %v6685_v16 = vld [vmem:[%s18592_s30 + $0x111] sm:$0xff] }
 0x29a   : > { %17056 = vmatmul.mubr.msk.f32.gmra.mrb[38].mxu1 %vm500_vm12, %v10503_v59  ;;  %v10283_v59 = vld [vmem:[%s18592_s30 + $0x5e] sm:$0xff] }
 0x29b   : > { %17058 = vmatprep.mubr.msk.f32.mxu1 %vm500_vm12, %v10504_v49  ;;  %v10284_v49 = vld [vmem:[%s18592_s30 + $0x66] sm:$0xff] }
 0x29c   : > { %16683 = vmatmul.mubr.msk.f32.gmra.mrb[88].mxu0 %vm500_vm12, %v25493_v60  ;;  %v6717_v60 = vsel %vm5333_vm0, %v6685_v16, 0.0  ;;  %v10508_v16 = vsel %vm25498_vm10, %v10284_v49, 0.0  ;;  %vm25501_vm10 = vcmp.eq.s32.totalorder %v21543_v52, 1 }
 0x29d   : > { %16685 = vmatprep.mubr.msk.f32.mxu0 %vm500_vm12, %v25494_v22  ;;  %v6686_v22 = vld [vmem:[%s18592_s30 + $0x119] sm:$0xff] }
 0x29e   : > { %17059 = vmatmul.mubr.msk.f32.gmra.mrb[40].mxu1 %vm500_vm12, %v10505_v25  ;;  %v10507_v25 = vsel %vm25497_vm9, %v10283_v59, 0.0  ;;  %v6718_v5 = vsel %vm5334_vm7, %v6686_v22, 0.0  ;;  %v10286_v59 = vld [vmem:[%s18592_s30 + $0x76] sm:$0xff]  ;;  %vm25500_vm9 = vcmp.eq.s32.totalorder %v21549_v14, 1 }
 0x29f   : > { %17061 = vmatprep.mubr.msk.f32.mxu1 %vm500_vm12, %v10506_v18  ;;  %v16448_v53 = vpop.f32.mrb[16].mxu1  ;;  %v6687_v18 = vld [vmem:[%s18592_s30 + $0x121] sm:$0xff] }
 0x2a0   : > { %16686 = vmatmul.mubr.msk.f32.gmra.mrb[90].mxu0 %vm500_vm12, %v25496_v63  ;;  %v17476_v63 = vadd.f32 %v16448_v53, %v22203_v46  ;;  %v4690_v56 = vpop.f32.mrb[17].mxu1  ;;  %v6719_v46 = vsel %vm5335_vm3, %v6687_v18, 0.0  ;;  %v6688_v53 = vld [vmem:[%s18592_s30 + $0x129] sm:$0xff]  ;;  %v22509_v18 = vld [vmem:[%s18592_s30 + $0x33] sm:$0xff] }
 0x2a1   : > { %16688 = vmatprep.mubr.msk.f32.mxu0 %vm500_vm12, %v6717_v60  ;;  %v10285_v60 = vld [vmem:[%s18592_s30 + $0x6e] sm:$0xff]  ;;  %v17477_v0 = vadd.f32 %v4690_v56, %v22209_v31  ;;  %v6720_v33 = vsel %vm5336_vm4, %v6688_v53, 0.0  ;;  %v22527_v53 = vld [vmem:[%s18592_s30 + $0x3b] sm:$0xff] }
 0x2a2   : > { %17062 = vmatmul.mubr.msk.f32.gmra.mrb[42].mxu1 %vm500_vm12, %v10507_v25  ;;  %v4889_v43 = vadd.f32 %v17476_v63, %v22480_v62  ;;  %v10509_v31 = vsel %vm25499_vm8, %v10285_v60, 0.0  ;;  %v10287_v63 = vld [vmem:[%s18592_s30 + $0x7e] sm:$0xff]  ;;  %vm25502_vm8 = vcmp.eq.s32.totalorder %v21605_v54, 1 }
 0x2a3   : > { %17064 = vmatprep.mubr.msk.f32.mxu1 %vm500_vm12, %v10508_v16  ;;  %v4888_v49 = vadd.f32 %v17477_v0, %v22480_v62  ;;  %v16451_v56 = vpop.f32.mrb[18].mxu1 }
 0x2a4   : > { %16689 = vmatmul.mubr.msk.f32.gmra.mrb[92].mxu0 %vm500_vm12, %v6718_v5  ;;  %v4921_v22 = vmax.f32 %v4889_v43, 0.0  ;;  %v17478_v25 = vadd.f32 %v16451_v56, %v22227_v50  ;;  %v4700_v16 = vpop.f32.mrb[19].mxu1  ;;  %v10510_v5 = vsel %vm25500_vm9, %v10286_v59, 0.0  ;;  %v10288_v43 = vld [vmem:[%s18592_s30 + $0x86] sm:$0xff]  ;;  %vm25503_vm9 = vcmp.eq.s32.totalorder %v21594_v30, 1 }
 0x2a5   : > { %16691 = vmatprep.mubr.msk.f32.mxu0 %vm500_vm12, %v6719_v46  ;;  %v4920_v0 = vmax.f32 %v4888_v49, 0.0  ;;  %v17479_v46 = vadd.f32 %v4700_v16, %v22233_v15  ;;  %v10511_v15 = vsel %vm25501_vm10, %v10287_v63, 0.0  ;;  %vm25504_vm10 = vcmp.eq.s32.totalorder %v21650_v58, 1 }
 0x2a6   : > { %17065 = vmatmul.mubr.msk.f32.gmra.mrb[44].mxu1 %vm500_vm12, %v10509_v31  ;;  %v4891_v50 = vadd.f32 %v17478_v25, %v22480_v62  ;;  %4986 = vrot.lane.b32.xlu1 %v4921_v22, %s18398_s26  ;;  %v10512_v31 = vsel %vm25502_vm8, %v10288_v43, 0.0  ;;  %v10289_v22 = vld [vmem:[%s18592_s30 + $0x8e] sm:$0xff]  ;;  %vm25505_vm8 = vcmp.eq.s32.totalorder %v21710_v19, 1 }
 0x2a7   : > { %17067 = vmatprep.mubr.msk.f32.mxu1 %vm500_vm12, %v10510_v5  ;;  %v4890_v60 = vadd.f32 %v17479_v46, %v22480_v62  ;;  %v16454_v59 = vpop.f32.mrb[20].mxu1  ;;  %4984 = vrot.lane.b32.xlu0 %v4920_v0, %s18398_s26  ;;  %v10290_v5 = vld [vmem:[%s18592_s30 + $0x96] sm:$0xff]  ;;  %v10513_v46 = vsel %vm25503_vm9, %v10289_v22, 0.0  ;;  %vm25506_vm9 = vcmp.eq.s32.totalorder %v21701_v7, 1 }
 0x2a8   : > { %16692 = vmatmul.mubr.msk.f32.gmra.mrb[94].mxu0 %vm500_vm12, %v6720_v33  ;;  %v4923_v49 = vmax.f32 %v4891_v50, 0.0  ;;  %v17480_v33 = vadd.f32 %v16454_v59, %v22247_v26  ;;  %v4710_v56 = vpop.f32.mrb[21].mxu1  ;;  %v22544_v26 = vld [vmem:[%s24368_s6 + $0x30] sm:$0xff]  ;;  %v10514_v59 = vsel %vm24846_vm11, %v10290_v5, 0.0  ;;  %vm24848_vm11 = vcmp.eq.s32.totalorder %v22086_v37, 1 }
 0x2a9   : > { %16696 = vmatprep.mubr.msk.f32.mxu0 %vm500_vm12, %v22509_v18  ;;  %v4922_v25 = vmax.f32 %v4890_v60, 0.0  ;;  %v17481_v16 = vadd.f32 %v4710_v56, %v22253_v4 }
 0x2aa   : > { %17068 = vmatmul.mubr.msk.f32.gmra.mrb[46].mxu1 %vm500_vm12, %v10511_v15  ;;  %v4893_v63 = vadd.f32 %v17480_v33, %v22480_v62  ;;  %4990 = vrot.lane.b32.xlu1 %v4923_v49, %s18398_s26  ;;  %v10291_v15 = vld [vmem:[%s18592_s30 + $0x9e] sm:$0xff] }
 0x2ab   : > { %17070 = vmatprep.mubr.msk.f32.mxu1 %vm500_vm12, %v10512_v31  ;;  %v4892_v0 = vadd.f32 %v17481_v16, %v22480_v62  ;;  %v16457_v4 = vpop.f32.mrb[22].mxu1  ;;  %4988 = vrot.lane.b32.xlu0 %v4922_v25, %s18398_s26  ;;  %v10293_v16 = vld [vmem:[%s18592_s30 + $0xae] sm:$0xff] }
 0x2ac   : > { %16697 = vmatmul.mubr.msk.f32.vlgmr.msra.gmra.mrb[64].mxu0 %vm500_vm12, %v22527_v53  ;;  %v4925_v43 = vmax.f32 %v4893_v63, 0.0  ;;  %v17482_v50 = vadd.f32 %v16457_v4, %v22265_v34  ;;  %v4720_v60 = vpop.f32.mrb[23].mxu1 }
 0x2ad   : > { %16699 = vmatprep.mubr.msk.f32.mxu0 %vm500_vm12, %v21849_v41  ;;  %16745 = vmatpush3.msra.mxu0 %v22279_v17  ;;  %v4924_v49 = vmax.f32 %v4892_v0, 0.0  ;;  %v17483_v33 = vadd.f32 %v4720_v60, %v22273_v57  ;;  %v10292_v41 = vld [vmem:[%s18592_s30 + $0xa6] sm:$0xff]  ;;  %v10515_v57 = vsel %vm25504_vm10, %v10291_v15, 0.0  ;;  %vm25507_vm10 = vcmp.eq.s32.totalorder %v21762_v36, 1  ;;  %v10295_v60 = vld [vmem:[%s18592_s30 + $0xbe] sm:$0xff] }
 0x2ae   : > { %17071 = vmatmul.mubr.msk.f32.gmra.mrb[48].mxu1 %vm500_vm12, %v10513_v46  ;;  %16794 = vmatprep.subr.mxu0 %v22544_v26  ;;  %v4895_v34 = vadd.f32 %v17482_v50, %v22480_v62 }
 0x2af   : > { %17073 = vmatprep.mubr.msk.f32.mxu1 %vm500_vm12, %v10514_v59  ;;  %4994 = vrot.lane.b32.xlu1 %v4925_v43, %s18398_s26  ;;  %v4894_v56 = vadd.f32 %v17483_v33, %v22480_v62  ;;  %v16460_v17 = vpop.f32.mrb[24].mxu1 }
 0x2b0   : > { %16700 = vmatmul.mubr.msk.f32.gmra.mrb[66].mxu0 %vm500_vm12, %v21860_v11  ;;  %4992 = vrot.lane.b32.xlu0 %v4924_v49, %s18398_s26  ;;  %v4927_v31 = vmax.f32 %v4895_v34, 0.0  ;;  %v17484_v22 = vadd.f32 %v16460_v17, %v22288_v45  ;;  %v4730_v25 = vpop.f32.mrb[25].mxu1  ;;  %v10516_v11 = vsel %vm25505_vm8, %v10292_v41, 0.0  ;;  %vm24847_vm8 = vcmp.eq.s32.totalorder %v22020_v47, 1  ;;  %v22610_v41 = vld [vmem:[%s18592_s30 + $0x7b] sm:$0xff] }
 0x2b1   : > { %16702 = vmatprep.mubr.msk.f32.mxu0 %vm500_vm12, %v21867_v13  ;;  %v4926_v5 = vmax.f32 %v4894_v56, 0.0  ;;  %v17485_v63 = vadd.f32 %v4730_v25, %v22295_v2  ;;  %v10294_v13 = vld [vmem:[%s18592_s30 + $0xb6] sm:$0xff]  ;;  %v10517_v2 = vsel %vm25506_vm9, %v10293_v16, 0.0  ;;  %vm25508_vm9 = vcmp.eq.s32.totalorder %v21753_v3, 1 }
 0x2b2   : > { %17074 = vmatmul.mubr.msk.f32.gmra.mrb[50].mxu1 %vm500_vm12, %v10515_v57  ;;  %v4897_v0 = vadd.f32 %v17484_v22, %v22480_v62  ;;  %v22618_v57 = vld [vmem:[%s18592_s30 + $0x83] sm:$0xff]  ;;  %v10298_v25 = vld [vmem:[%s18592_s30 + $0xd6] sm:$0xff] }
 0x2b3   : > { %17076 = vmatprep.mubr.msk.f32.mxu1 %vm500_vm12, %v10516_v11  ;;  %4998 = vrot.lane.b32.xlu1 %v4927_v31, %s18398_s26  ;;  %v4896_v45 = vadd.f32 %v17485_v63, %v22480_v62  ;;  %v16463_v4 = vpop.f32.mrb[26].mxu1 }
 0x2b4   : > { %16703 = vmatmul.mubr.msk.f32.gmra.mrb[68].mxu0 %vm500_vm12, %v21879_v8  ;;  %4996 = vrot.lane.b32.xlu0 %v4926_v5, %s18398_s26  ;;  %v4929_v46 = vmax.f32 %v4897_v0, 0.0  ;;  %v17486_v43 = vadd.f32 %v16463_v4, %v22305_v39  ;;  %v4740_v50 = vpop.f32.mrb[27].mxu1  ;;  %v10518_v8 = vsel %vm25507_vm10, %v10294_v13, 0.0  ;;  %vm10489_vm10 = vcmp.eq.s32.totalorder %v22033_v12, 1  ;;  %v22636_v5 = vld [vmem:[%s18592_s30 + $0x8b] sm:$0xff]  ;;  %v22644_v4 = vld [vmem:[%s18592_s30 + $0x93] sm:$0xff] }
 0x2b5   : > { %16705 = vmatprep.mubr.msk.f32.mxu0 %vm500_vm12, %v21887_v1  ;;  %v4928_v59 = vmax.f32 %v4896_v45, 0.0  ;;  %v17487_v15 = vadd.f32 %v4740_v50, %v22311_v21  ;;  %v10296_v1 = vld [vmem:[%s18592_s30 + $0xc6] sm:$0xff]  ;;  %v10519_v21 = vsel %vm25508_vm9, %v10295_v60, 0.0  ;;  %vm24849_vm9 = vcmp.eq.s32.totalorder %v22108_v42, 1  ;;  %v12944_v12 = vld [vmem:[%s18592_s30 + $0x156] sm:$0xff] }
 0x2b6   : > { %17077 = vmatmul.mubr.msk.f32.gmra.mrb[52].mxu1 %vm500_vm12, %v10517_v2  ;;  %v4899_v49 = vadd.f32 %v17486_v43, %v22480_v62  ;;  %v10520_v17 = vsel %vm24847_vm8, %v10296_v1, 0.0  ;;  %v10522_v45 = vsel %vm24848_vm11, %v10298_v25, 0.0  ;;  %v10299_v2 = vld [vmem:[%s18592_s30 + $0xde] sm:$0xff]  ;;  %vm24850_vm8 = vcmp.eq.s32.totalorder %v22166_v6, 1  ;;  %v10300_v50 = vld [vmem:[%s18592_s30 + $0xe6] sm:$0xff] }
 0x2b7   : > { %17079 = vmatprep.mubr.msk.f32.mxu1 %vm500_vm12, %v10518_v8  ;;  %5002 = vrot.lane.b32.xlu1 %v4929_v46, %s18398_s26  ;;  %v4898_v39 = vadd.f32 %v17487_v15, %v22480_v62  ;;  %v16466_v33 = vpop.f32.mrb[28].mxu1  ;;  %v22651_v8 = vpop.permute.xlu0 %10459  ;;  %v22664_v15 = vld [vmem:[%s18592_s30 + $0x9b] sm:$0xff]  ;;  %vm24853_vm11 = vcmp.eq.s32.totalorder %v22183_v32, 1 }
 0x2b8   : > { %16706 = vmatmul.mubr.msk.f32.gmra.mrb[70].mxu0 %vm500_vm12, %v21899_v24  ;;  %5000 = vrot.lane.b32.xlu0 %v4928_v59, %s18398_s26  ;;  %v4931_v34 = vmax.f32 %v4899_v49, 0.0  ;;  %v17488_v24 = vadd.f32 %v16466_v33, %v22321_v10  ;;  %v4750_v56 = vpop.f32.mrb[29].mxu1  ;;  %25509 = vst [vmem:[#allocation79_spill] sm:$0xff] %v22651_v8  ;;  %v10524_v33 = vsel %vm24850_vm8, %v10300_v50, 0.0 }
 0x2b9   : > { %16708 = vmatprep.mubr.msk.f32.mxu0 %vm500_vm12, %v21907_v61  ;;  %v10297_v61 = vld [vmem:[%s18592_s30 + $0xce] sm:$0xff]  ;;  %v4930_v31 = vmax.f32 %v4898_v39, 0.0  ;;  %v17489_v22 = vadd.f32 %v4750_v56, %v22327_v55  ;;  %v10302_v56 = vld [vmem:[%s18592_s30 + $0xf6] sm:$0xff] }
 0x2ba   : > { %17080 = vmatmul.mubr.msk.f32.gmra.mrb[54].mxu1 %vm500_vm12, %v10519_v21  ;;  %v4901_v10 = vadd.f32 %v17488_v24, %v22480_v62  ;;  %v10521_v55 = vsel %vm10489_vm10, %v10297_v61, 0.0  ;;  %v22672_v21 = vld [vmem:[%s18592_s30 + $0xa3] sm:$0xff]  ;;  %v22675_v24 = vpop.permute.xlu1 %10462 }
 0x2bb   : > { %17082 = vmatprep.mubr.msk.f32.mxu1 %vm500_vm12, %v10520_v17  ;;  %5006 = vrot.lane.b32.xlu1 %v4931_v34, %s18398_s26  ;;  %v4900_v11 = vadd.f32 %v17489_v22, %v22480_v62  ;;  %v16469_v16 = vpop.f32.mrb[30].mxu1  ;;  %v10301_v34 = vld [vmem:[%s18592_s30 + $0xee] sm:$0xff]  ;;  %25510 = vst [vmem:[#allocation87_spill] sm:$0xff] %v22675_v24  ;;  %v25511_v61 = vld [vmem:[#allocation143_spill] sm:$0xff]  ;;  %vm24851_vm8 = vcmp.eq.s32.totalorder %v22675_v24, 1 }
 0x2bc   : > { %16709 = vmatmul.mubr.msk.f32.gmra.mrb[72].mxu0 %vm500_vm12, %v22610_v41  ;;  %5004 = vrot.lane.b32.xlu0 %v4930_v31, %s18398_s26  ;;  %v4933_v63 = vmax.f32 %v4901_v10, 0.0  ;;  %v17490_v13 = vadd.f32 %v16469_v16, %v22337_v35  ;;  %v4760_v0 = vpop.f32.mrb[31].mxu1  ;;  %v10525_v10 = vsel %vm24853_vm11, %v10301_v34, 0.0  ;;  %v10303_v16 = vld [vmem:[%s18592_s30 + $0xfe] sm:$0xff] }
 0x2bd   : > { %16711 = vmatprep.mubr.msk.f32.mxu0 %vm500_vm12, %v22618_v57  ;;  %v4932_v46 = vmax.f32 %v4900_v11, 0.0  ;;  %v17491_v43 = vadd.f32 %v4760_v0, %v22344_v28  ;;  %v10523_v28 = vsel %vm24849_vm9, %v10299_v2, 0.0  ;;  %vm24852_vm9 = vcmp.eq.s32.totalorder %v22651_v8, 1  ;;  %v22692_v11 = vld [vmem:[%s18592_s30 + $0xab] sm:$0xff]  ;;  %v22701_v2 = vld [vmem:[%s18592_s30 + $0xb3] sm:$0xff]  ;;  %v7476_v24 = vld [vmem:[%s18592_s30 + $0x9d] sm:$0xff] }
 0x2be   : > { %17083 = vmatmul.mubr.msk.f32.gmra.mrb[56].mxu1 %vm500_vm12, %v10521_v55  ;;  %v4903_v35 = vadd.f32 %v17490_v13, %v22480_v62  ;;  %v10526_v55 = vsel %vm24852_vm9, %v10302_v56, 0.0  ;;  %v25512_v13 = vld [vmem:[#allocation127_spill] sm:$0xff] }
 0x2bf   : > { %17085 = vmatprep.mubr.msk.f32.mxu1 %vm500_vm12, %v10522_v45  ;;  %5010 = vrot.lane.b32.xlu1 %v4933_v63, %s18398_s26  ;;  %v4902_v60 = vadd.f32 %v17491_v43, %v22480_v62  ;;  %v16472_v59 = vpop.f32.mrb[0].mxu1  ;;  %v25513_v43 = vld [vmem:[#allocation132_spill] sm:$0xff]  ;;  %v25582_v8 = vld [vmem:[#allocation171_spill] sm:$0xff] }
 0x2c0   : > { %16712 = vmatmul.mubr.msk.f32.gmra.mrb[74].mxu0 %vm500_vm12, %v22636_v5  ;;  %5008 = vrot.lane.b32.xlu0 %v4932_v46, %s18398_s26  ;;  %v4935_v1 = vmax.f32 %v4903_v35, 0.0  ;;  %v17492_v49 = vadd.f32 %v16472_v59, %v22010_v51  ;;  %v4770_v39 = vpop.f32.mrb[1].mxu1 }
 0x2c1   : > { %16714 = vmatprep.mubr.msk.f32.mxu0 %vm500_vm12, %v22644_v4  ;;  %v4934_v17 = vmax.f32 %v4902_v60, 0.0  ;;  %v17493_v31 = vadd.f32 %v4770_v39, %v25511_v61  ;;  %v10527_v60 = vsel %vm24851_vm8, %v10303_v16, 0.0 }
 0x2c2   : > { %17086 = vmatmul.mubr.msk.f32.gmra.mrb[58].mxu1 %vm500_vm12, %v10523_v28  ;;  %v4905_v51 = vadd.f32 %v17492_v49, %v22480_v62  ;;  %v10884_v49 = vld [vmem:[%s18592_s30 + $0x38] sm:$0xff] }
 0x2c3   : > { %17088 = vmatprep.mubr.msk.f32.mxu1 %vm500_vm12, %v10524_v33  ;;  %5014 = vrot.lane.b32.xlu1 %v4935_v1, %s18398_s26  ;;  %v4904_v22 = vadd.f32 %v17493_v31, %v22480_v62  ;;  %v16475_v25 = vpop.f32.mrb[2].mxu1  ;;  %v22716_v1 = vld [vmem:[%s18592_s30 + $0xbb] sm:$0xff]  ;;  %v25514_v33 = vld [vmem:[#allocation121_spill] sm:$0xff]  ;;  %v25515_v31 = vld [vmem:[#allocation56_spill] sm:$0xff] }
 0x2c4   : > { %16715 = vmatmul.mubr.msk.f32.gmra.mrb[76].mxu0 %vm500_vm12, %v22664_v15  ;;  %5012 = vrot.lane.b32.xlu0 %v4934_v17, %s18398_s26  ;;  %v4937_v63 = vmax.f32 %v4905_v51, 0.0  ;;  %v17494_v0 = vadd.f32 %v16475_v25, %v25512_v13  ;;  %v4780_v45 = vpop.f32.mrb[3].mxu1  ;;  %v22722_v17 = vld [vmem:[%s18592_s30 + $0xc3] sm:$0xff]  ;;  %v22738_v13 = vld [vmem:[%s18592_s30 + $0xcb] sm:$0xff] }
 0x2c5   : > { %16717 = vmatprep.mubr.msk.f32.mxu0 %vm500_vm12, %v22672_v21  ;;  %v4936_v46 = vmax.f32 %v4904_v22, 0.0  ;;  %v17495_v50 = vadd.f32 %v4780_v45, %v25513_v43  ;;  %v25516_v22 = vld [vmem:[#allocation84_spill] sm:$0xff]  ;;  %v25519_v45 = vld [vmem:[#allocation185_spill] sm:$0xff] }
 0x2c6   : > { %17089 = vmatmul.mubr.msk.f32.gmra.mrb[60].mxu1 %vm500_vm12, %v10525_v10  ;;  %v4907_v35 = vadd.f32 %v17494_v0, %v22480_v62  ;;  %v25517_v10 = vld [vmem:[#allocation80_spill] sm:$0xff] }
 0x2c7   : > { %17091 = vmatprep.mubr.msk.f32.mxu1 %vm500_vm12, %v10526_v55  ;;  %5018 = vrot.lane.b32.xlu1 %v4937_v63, %s18398_s26  ;;  %v4906_v59 = vadd.f32 %v17495_v50, %v22480_v62  ;;  %v16478_v28 = vpop.f32.mrb[4].mxu1  ;;  %vm25518_vm8 = vcmp.eq.s32.totalorder %v25517_v10, 1  ;;  %v22743_v50 = vld [vmem:[%s18592_s30 + $0xd3] sm:$0xff] }
 0x2c8   : > { %16718 = vmatmul.mubr.msk.f32.gmra.mrb[78].mxu0 %vm500_vm12, %v22692_v11  ;;  %5016 = vrot.lane.b32.xlu0 %v4936_v46, %s18398_s26  ;;  %v4939_v39 = vmax.f32 %v4907_v35, 0.0  ;;  %v17496_v34 = vadd.f32 %v16478_v28, %v25514_v33  ;;  %v4790_v56 = vpop.f32.mrb[5].mxu1  ;;  %v10916_v16 = vsel %vm25518_vm8, %v10884_v49, 0.0  ;;  %v25521_v28 = vld [vmem:[#allocation12_spill] sm:$0xff]  ;;  %v25576_v10 = vld [vmem:[#allocation165_spill] sm:$0xff] }
 0x2c9   : > { %16720 = vmatprep.mubr.msk.f32.mxu0 %vm500_vm12, %v22701_v2  ;;  %v4938_v61 = vmax.f32 %v4906_v59, 0.0  ;;  %v17497_v51 = vadd.f32 %v4790_v56, %v25515_v31  ;;  %v22752_v49 = vld [vmem:[%s24370_s8 + $0x28] sm:$0xff] }
 0x2ca   : > { %17092 = vmatmul.mubr.msk.f32.gmra.mrb[62].mxu1 %vm500_vm12, %v10527_v60  ;;  %v4909_v25 = vadd.f32 %v17496_v34, %v22480_v62  ;;  %v25520_v60 = vld [vmem:[#allocation186_spill] sm:$0xff] }
 0x2cb   : > { %17096 = vmatprep.mubr.msk.f32.mxu1 %vm500_vm12, %v25516_v22  ;;  %5022 = vrot.lane.b32.xlu1 %v4939_v39, %s18398_s26  ;;  %v4908_v55 = vadd.f32 %v17497_v51, %v22480_v62  ;;  %v16481_v63 = vpop.f32.mrb[6].mxu1  ;;  %v25523_v22 = vld [vmem:[#allocation91_spill] sm:$0xff] }
 0x2cc   : > { %16721 = vmatmul.mubr.msk.f32.gmra.mrb[80].mxu0 %vm500_vm12, %v22716_v1  ;;  %5020 = vrot.lane.b32.xlu0 %v4938_v61, %s18398_s26  ;;  %v4941_v0 = vmax.f32 %v4909_v25, 0.0  ;;  %v17498_v46 = vadd.f32 %v16481_v63, %v25519_v45  ;;  %v4800_v43 = vpop.f32.mrb[7].mxu1  ;;  %v25522_v61 = vld [vmem:[#allocation187_spill] sm:$0xff] }
 0x2cd   : > { %16723 = vmatprep.mubr.msk.f32.mxu0 %vm500_vm12, %v22722_v17  ;;  %v4940_v35 = vmax.f32 %v4908_v55, 0.0  ;;  %v17499_v59 = vadd.f32 %v4800_v43, %v25520_v60  ;;  %v22769_v25 = vld [vmem:[%s18592_s30 + $0xe3] sm:$0xff] }
 0x2ce   : > { %17097 = vmatmul.mubr.msk.f32.vlgmr.msra.gmra.mrb[32].mxu1 %vm500_vm12, %v10916_v16  ;;  %v4911_v39 = vadd.f32 %v17498_v46, %v22480_v62  ;;  %v25524_v55 = vld [vmem:[#allocation188_spill] sm:$0xff] }
 0x2cf   : > { %17145 = vmatpush3.msra.mxu1 %v22412_v9  ;;  %17099 = vmatprep.mubr.msk.f32.mxu1 %vm500_vm12, %v25521_v28  ;;  %v4910_v33 = vadd.f32 %v17499_v59, %v22480_v62  ;;  %v16484_v34 = vpop.f32.mrb[8].mxu1  ;;  %v22763_v9 = vld [vmem:[%s18592_s30 + $0xdb] sm:$0xff] }
 0x2d0   : > { %16724 = vmatmul.mubr.msk.f32.gmra.mrb[82].mxu0 %vm500_vm12, %v22738_v13  ;;  %5026 = vrot.lane.b32.xlu1 %v4941_v0, %s18398_s26  ;;  %v4943_v56 = vmax.f32 %v4911_v39, 0.0  ;;  %v17500_v31 = vadd.f32 %v16484_v34, %v25522_v61  ;;  %v4810_v51 = vpop.f32.mrb[9].mxu1  ;;  %v25525_v0 = vld [vmem:[#allocation101_spill] sm:$0xff]  ;;  %v25526_v59 = vld [vmem:[#allocation190_spill] sm:$0xff]  ;;  %v25528_v61 = vld [vmem:[#allocation191_spill] sm:$0xff] }
 0x2d1   : > { %5024 = vrot.lane.b32.xlu0 %v4940_v35, %s18398_s26  ;;  %16726 = vmatprep.mubr.msk.f32.mxu0 %vm500_vm12, %v22743_v50  ;;  %v4942_v16 = vmax.f32 %v4910_v33, 0.0  ;;  %v17501_v63 = vadd.f32 %v4810_v51, %v25524_v55  ;;  %v22784_v35 = vld [vmem:[%s18592_s30 + $0xeb] sm:$0xff]  ;;  %v25527_v33 = vld [vmem:[#allocation102_spill] sm:$0xff]  ;;  %v25529_v51 = vld [vmem:[#allocation55_spill] sm:$0xff] }
 0x2d2   : > { %17100 = vmatmul.mubr.msk.f32.gmra.mrb[34].mxu1 %vm500_vm12, %v25523_v22  ;;  %17194 = vmatprep.subr.mxu1 %v22752_v49  ;;  %v4913_v45 = vadd.f32 %v17500_v31, %v22480_v62  ;;  %v22790_v34 = vld [vmem:[%s18592_s30 + $0xf3] sm:$0xff] }
 0x2d3   : > { %17102 = vmatprep.mubr.msk.f32.mxu1 %vm500_vm12, %v25525_v0  ;;  %v4912_v46 = vadd.f32 %v17501_v63, %v22480_v62  ;;  %v16487_v43 = vpop.f32.mrb[10].mxu1  ;;  %v22804_v63 = vld [vmem:[%s18592_s30 + $0xfb] sm:$0xff] }
 0x2d4   : > { %16727 = vmatmul.mubr.msk.f32.gmra.mrb[84].mxu0 %vm500_vm12, %v22763_v9  ;;  %5030 = vrot.lane.b32.xlu1 %v4943_v56, %s18398_s26  ;;  %v4945_v60 = vmax.f32 %v4913_v45, 0.0  ;;  %v17502_v28 = vadd.f32 %v16487_v43, %v25526_v59  ;;  %v4820_v39 = vpop.f32.mrb[11].mxu1  ;;  %v25530_v45 = vld [vmem:[#allocation193_spill] sm:$0xff]  ;;  %v25531_v59 = vld [vmem:[#allocation110_spill] sm:$0xff] }
 0x2d5   : > { %5028 = vrot.lane.b32.xlu0 %v4942_v16, %s18398_s26  ;;  %16729 = vmatprep.mubr.msk.f32.mxu0 %vm500_vm12, %v22769_v25  ;;  %v4944_v56 = vmax.f32 %v4912_v46, 0.0  ;;  %v17503_v31 = vadd.f32 %v4820_v39, %v25528_v61  ;;  %v25532_v39 = vld [vmem:[#allocation194_spill] sm:$0xff] }
 0x2d6   : > { %17103 = vmatmul.mubr.msk.f32.gmra.mrb[36].mxu1 %vm500_vm12, %v25527_v33  ;;  %v4915_v22 = vadd.f32 %v17502_v28, %v22480_v62  ;;  %v22810_v28 = vld [vmem:[%s18592_s30 + $0x103] sm:$0xff] }
 0x2d7   : > { %17105 = vmatprep.mubr.msk.f32.mxu1 %vm500_vm12, %v25529_v51  ;;  %v4914_v16 = vadd.f32 %v17503_v31, %v22480_v62 }
 0x2d8   : > { %16730 = vmatmul.mubr.msk.f32.gmra.mrb[86].mxu0 %vm500_vm12, %v22784_v35  ;;  %5034 = vrot.lane.b32.xlu1 %v4945_v60, %s18398_s26  ;;  %v16490_v55 = vpop.f32.mrb[12].mxu1  ;;  %v4947_v0 = vmax.f32 %v4915_v22, 0.0  ;;  %v22824_v22 = vld [vmem:[%s18592_s30 + $0x10b] sm:$0xff] }
 0x2d9   : > { %5032 = vrot.lane.b32.xlu0 %v4944_v56, %s18398_s26  ;;  %16732 = vmatprep.mubr.msk.f32.mxu0 %vm500_vm12, %v22790_v34  ;;  %v17504_v46 = vadd.f32 %v16490_v55, %v25530_v45  ;;  %v4830_v43 = vpop.f32.mrb[13].mxu1  ;;  %v4946_v60 = vmax.f32 %v4914_v16, 0.0  ;;  %v25533_v56 = vld [vmem:[#allocation20_spill] sm:$0xff]  ;;  %v25534_v55 = vld [vmem:[#allocation195_spill] sm:$0xff] }
 0x2da   : > { %17106 = vmatmul.mubr.msk.f32.gmra.mrb[38].mxu1 %vm500_vm12, %v25531_v59  ;;  %v17505_v33 = vadd.f32 %v4830_v43, %v25532_v39  ;;  %v25535_v43 = vld [vmem:[#allocation61_spill] sm:$0xff]  ;;  %v25536_v39 = vld [vmem:[#allocation196_spill] sm:$0xff] }
 0x2db   : > { %17108 = vmatprep.mubr.msk.f32.mxu1 %vm500_vm12, %v25533_v56  ;;  %v4917_v61 = vadd.f32 %v17504_v46, %v22480_v62 }
 0x2dc   : > { %16733 = vmatmul.mubr.msk.f32.gmra.mrb[88].mxu0 %vm500_vm12, %v22804_v63  ;;  %5038 = vrot.lane.b32.xlu1 %v4947_v0, %s18398_s26  ;;  %v4916_v31 = vadd.f32 %v17505_v33, %v22480_v62  ;;  %v16493_v51 = vpop.f32.mrb[14].mxu1  ;;  %v22830_v0 = vld [vmem:[%s18592_s30 + $0x113] sm:$0xff] }
 0x2dd   : > { %5036 = vrot.lane.b32.xlu0 %v4946_v60, %s18398_s26  ;;  %16735 = vmatprep.mubr.msk.f32.mxu0 %vm500_vm12, %v22810_v28  ;;  %v4949_v16 = vmax.f32 %v4917_v61, 0.0  ;;  %v17506_v45 = vadd.f32 %v16493_v51, %v25534_v55  ;;  %v4840_v46 = vpop.f32.mrb[15].mxu1  ;;  %v25537_v60 = vld [vmem:[#allocation63_spill] sm:$0xff]  ;;  %v25538_v55 = vld [vmem:[#allocation24_spill] sm:$0xff] }
 0x2de   : > { %17109 = vmatmul.mubr.msk.f32.gmra.mrb[40].mxu1 %vm500_vm12, %v25535_v43  ;;  %v4948_v59 = vmax.f32 %v4916_v31, 0.0  ;;  %v17507_v33 = vadd.f32 %v4840_v46, %v25536_v39  ;;  %v22844_v31 = vld [vmem:[%s18592_s30 + $0x11b] sm:$0xff]  ;;  %v25541_v39 = vld [vmem:[#allocation33_spill] sm:$0xff] }
 0x2df   : > { %17111 = vmatprep.mubr.msk.f32.mxu1 %vm500_vm12, %v25537_v60  ;;  %v4919_v56 = vadd.f32 %v17506_v45, %v22480_v62  ;;  %v22849_v45 = vld [vmem:[%s18592_s30 + $0x123] sm:$0xff] }
 0x2e0   : > { %16736 = vmatmul.mubr.msk.f32.gmra.mrb[90].mxu0 %vm500_vm12, %v22824_v22  ;;  %5042 = vrot.lane.b32.xlu1 %v4949_v16, %s18398_s26  ;;  %v4918_v61 = vadd.f32 %v17507_v33, %v22480_v62  ;;  %v25539_v43 = vld [vmem:[#allocation67_spill] sm:$0xff]  ;;  %v22860_v62 = vld [vmem:[%s18592_s30 + $0x12b] sm:$0xff]  ;;  %v7463_v16 = vld [vmem:[%s18592_s30 + $0x35] sm:$0xff] }
 0x2e1   : > { %5040 = vrot.lane.b32.xlu0 %v4948_v59, %s18398_s26  ;;  %16738 = vmatprep.mubr.msk.f32.mxu0 %vm500_vm12, %v22830_v0  ;;  %v4951_v51 = vmax.f32 %v4919_v56, 0.0  ;;  %v25540_v59 = vld [vmem:[#allocation28_spill] sm:$0xff]  ;;  %v7464_v33 = vld [vmem:[%s18592_s30 + $0x3d] sm:$0xff] }
 0x2e2   : > { %17112 = vmatmul.mubr.msk.f32.gmra.mrb[42].mxu1 %vm500_vm12, %v25538_v55  ;;  %v4950_v46 = vmax.f32 %v4918_v61, 0.0  ;;  %v25542_v60 = vld [vmem:[#allocation136_spill] sm:$0xff]  ;;  %v25545_v55 = vld [vmem:[#allocation135_spill] sm:$0xff] }
 0x2e3   : > { %17114 = vmatprep.mubr.msk.f32.mxu1 %vm500_vm12, %v25539_v43  ;;  %vm25543_vm8 = vcmp.eq.s32.totalorder %v25542_v60, 1  ;;  %v7465_v61 = vld [vmem:[%s18592_s30 + $0x45] sm:$0xff]  ;;  %vm25546_vm9 = vcmp.eq.s32.totalorder %v25545_v55, 1  ;;  %v25547_v43 = vld [vmem:[#allocation37_spill] sm:$0xff] }
 0x2e4   : > { %16739 = vmatmul.mubr.msk.f32.gmra.mrb[92].mxu0 %vm500_vm12, %v22844_v31  ;;  %5046 = vrot.lane.b32.xlu1 %v4951_v51, %s18398_s26  ;;  %v7495_v56 = vsel %vm25543_vm8, %v7463_v16, 0.0  ;;  %v25544_v51 = vld [vmem:[#allocation73_spill] sm:$0xff]  ;;  %v25548_v16 = vld [vmem:[#allocation142_spill] sm:$0xff]  ;;  %v25557_v60 = vld [vmem:[#allocation148_spill] sm:$0xff] }
 0x2e5   : > { %5044 = vrot.lane.b32.xlu0 %v4950_v46, %s18398_s26  ;;  %16741 = vmatprep.mubr.msk.f32.mxu0 %vm500_vm12, %v22849_v45  ;;  %v7496_v46 = vsel %vm25546_vm9, %v7464_v33, 0.0  ;;  %vm25549_vm8 = vcmp.eq.s32.totalorder %v25548_v16, 1  ;;  %v25550_v33 = vld [vmem:[#allocation83_spill] sm:$0xff]  ;;  %vm25558_vm11 = vcmp.eq.s32.totalorder %v25557_v60, 1 }
 0x2e6   : > { %17115 = vmatmul.mubr.msk.f32.gmra.mrb[44].mxu1 %vm500_vm12, %v25540_v59  ;;  %v22883_v59 = vld [vmem:[%s24368_s6 + $0x38] sm:$0xff]  ;;  %v25565_v60 = vld [vmem:[#allocation99_spill] sm:$0xff] }
 0x2e7   : > { %17117 = vmatprep.mubr.msk.f32.mxu1 %vm500_vm12, %v25541_v39  ;;  %v7497_v39 = vsel %vm25549_vm8, %v7465_v61, 0.0  ;;  %v25554_v61 = vld [vmem:[#allocation149_spill] sm:$0xff]  ;;  %v7468_v16 = vld [vmem:[%s18592_s30 + $0x5d] sm:$0xff] }
 0x2e8   : > { %16742 = vmatmul.mubr.msk.f32.gmra.mrb[94].mxu0 %vm500_vm12, %v22860_v62  ;;  %vm25555_vm8 = vcmp.eq.s32.totalorder %v25554_v61, 1  ;;  %v25562_v61 = vld [vmem:[#allocation94_spill] sm:$0xff] }
 0x2e9   : > { %16746 = vmatprep.mubr.msk.f32.mxu0 %vm500_vm12, %v7495_v56  ;;  %v7466_v56 = vld [vmem:[%s18592_s30 + $0x4d] sm:$0xff] }
 0x2ea   : > { %17118 = vmatmul.mubr.msk.f32.gmra.mrb[46].mxu1 %vm500_vm12, %v25544_v51  ;;  %v7467_v51 = vld [vmem:[%s18592_s30 + $0x55] sm:$0xff] }
 0x2eb   : > { %17120 = vmatprep.mubr.msk.f32.mxu1 %vm500_vm12, %v25547_v43  ;;  %v25551_v43 = vld [vmem:[#allocation141_spill] sm:$0xff] }
 0x2ec   : > { %16747 = vmatmul.mubr.msk.f32.vlgmr.msra.gmra.mrb[64].mxu0 %vm500_vm12, %v7496_v46  ;;  %vm25552_vm9 = vcmp.eq.s32.totalorder %v25551_v43, 1  ;;  %v25553_v46 = vld [vmem:[#allocation41_spill] sm:$0xff] }
 0x2ed   : > { %16749 = vmatprep.mubr.msk.f32.mxu0 %vm500_vm12, %v7497_v39  ;;  %16795 = vmatpush3.msra.mxu0 %v22544_v26  ;;  %v7498_v55 = vsel %vm25552_vm9, %v7466_v56, 0.0  ;;  %v7499_v39 = vsel %vm25555_vm8, %v7467_v51, 0.0  ;;  %v7469_v26 = vld [vmem:[%s18592_s30 + $0x65] sm:$0xff]  ;;  %v7500_v56 = vsel %vm25558_vm11, %v7468_v16, 0.0  ;;  %v25559_v43 = vld [vmem:[#allocation45_spill] sm:$0xff] }
 0x2ee   : > { %17121 = vmatmul.mubr.msk.f32.gmra.mrb[48].mxu1 %vm500_vm12, %v25550_v33  ;;  %16844 = vmatprep.subr.mxu0 %v22883_v59  ;;  %v25556_v33 = vld [vmem:[#allocation7_spill] sm:$0xff] }
 0x2ef   : > { %17123 = vmatprep.mubr.msk.f32.mxu1 %vm500_vm12, %v25553_v46  ;;  %v7470_v46 = vld [vmem:[%s18592_s30 + $0x6d] sm:$0xff] }
 0x2f0   : > { %16750 = vmatmul.mubr.msk.f32.gmra.mrb[66].mxu0 %vm500_vm12, %v7498_v55  ;;  %v25560_v55 = vld [vmem:[#allocation155_spill] sm:$0xff] }
 0x2f1   : > { %16752 = vmatprep.mubr.msk.f32.mxu0 %vm500_vm12, %v7499_v39  ;;  %vm25561_vm9 = vcmp.eq.s32.totalorder %v25560_v55, 1  ;;  %v7471_v39 = vld [vmem:[%s18592_s30 + $0x75] sm:$0xff] }
 0x2f2   : > { %17124 = vmatmul.mubr.msk.f32.gmra.mrb[50].mxu1 %vm500_vm12, %v25556_v33  ;;  %v7501_v51 = vsel %vm25561_vm9, %v7469_v26, 0.0  ;;  %v25563_v33 = vld [vmem:[#allocation154_spill] sm:$0xff] }
 0x2f3   : > { %17126 = vmatprep.mubr.msk.f32.mxu1 %vm500_vm12, %v25559_v43  ;;  %vm25564_vm8 = vcmp.eq.s32.totalorder %v25563_v33, 1  ;;  %v25566_v43 = vld [vmem:[#allocation161_spill] sm:$0xff]  ;;  %v25568_v55 = vld [vmem:[#allocation50_spill] sm:$0xff] }
 0x2f4   : > { %16753 = vmatmul.mubr.msk.f32.gmra.mrb[68].mxu0 %vm500_vm12, %v7500_v56  ;;  %v7502_v16 = vsel %vm25564_vm8, %v7470_v46, 0.0  ;;  %vm25567_vm11 = vcmp.eq.s32.totalorder %v25566_v43, 1  ;;  %v7472_v56 = vld [vmem:[%s18592_s30 + $0x7d] sm:$0xff]  ;;  %v7475_v43 = vld [vmem:[%s18592_s30 + $0x95] sm:$0xff] }
 0x2f5   : > { %16755 = vmatprep.mubr.msk.f32.mxu0 %vm500_vm12, %v7501_v51  ;;  %v7503_v26 = vsel %vm25567_vm11, %v7471_v39, 0.0  ;;  %v7473_v51 = vld [vmem:[%s18592_s30 + $0x85] sm:$0xff]  ;;  %v25571_v33 = vld [vmem:[#allocation18_spill] sm:$0xff]  ;;  %vm25577_vm11 = vcmp.eq.s32.totalorder %v25576_v10, 1 }
 0x2f6   : > { %17127 = vmatmul.mubr.msk.f32.gmra.mrb[52].mxu1 %vm500_vm12, %v25562_v61  ;;  %v25569_v61 = vld [vmem:[#allocation160_spill] sm:$0xff]  ;;  %v10912_v10 = vld [vmem:[%s18592_s30 + $0x118] sm:$0xff] }
 0x2f7   : > { %17129 = vmatprep.mubr.msk.f32.mxu1 %vm500_vm12, %v25565_v60  ;;  %vm25570_vm9 = vcmp.eq.s32.totalorder %v25569_v61, 1  ;;  %v10909_v60 = vld [vmem:[%s18592_s30 + $0x100] sm:$0xff] }
 0x2f8   : > { %16756 = vmatmul.mubr.msk.f32.gmra.mrb[70].mxu0 %vm500_vm12, %v7502_v16  ;;  %v7504_v46 = vsel %vm25570_vm9, %v7472_v56, 0.0  ;;  %v25572_v16 = vld [vmem:[#allocation166_spill] sm:$0xff]  ;;  %v10941_v61 = vsel %vm9557_vm2, %v10909_v60, 0.0  ;;  %v7477_v56 = vld [vmem:[%s18592_s30 + $0xa5] sm:$0xff] }
 0x2f9   : > { %16758 = vmatprep.mubr.msk.f32.mxu0 %vm500_vm12, %v7503_v26  ;;  %vm25573_vm8 = vcmp.eq.s32.totalorder %v25572_v16, 1  ;;  %v7474_v26 = vld [vmem:[%s18592_s30 + $0x8d] sm:$0xff] }
 0x2fa   : > { %17130 = vmatmul.mubr.msk.f32.gmra.mrb[54].mxu1 %vm500_vm12, %v25568_v55  ;;  %v7505_v39 = vsel %vm25573_vm8, %v7473_v51, 0.0  ;;  %v25574_v55 = vld [vmem:[#allocation17_spill] sm:$0xff]  ;;  %vm25583_vm8 = vcmp.eq.s32.totalorder %v25582_v8, 1  ;;  %v10914_v8 = vld [vmem:[%s18592_s30 + $0x128] sm:$0xff] }
 0x2fb   : > { %17132 = vmatprep.mubr.msk.f32.mxu1 %vm500_vm12, %v25571_v33  ;;  %v10910_v33 = vld [vmem:[%s18592_s30 + $0x108] sm:$0xff]  ;;  %v10911_v51 = vld [vmem:[%s18592_s30 + $0x110] sm:$0xff] }
 0x2fc   : > { %16759 = vmatmul.mubr.msk.f32.gmra.mrb[72].mxu0 %vm500_vm12, %v7504_v46  ;;  %v7506_v46 = vsel %vm25577_vm11, %v7474_v26, 0.0  ;;  %v10942_v60 = vsel %vm9558_vm6, %v10910_v33, 0.0  ;;  %v7479_v26 = vld [vmem:[%s18592_s30 + $0xb5] sm:$0xff] }
 0x2fd   : > { %16761 = vmatprep.mubr.msk.f32.mxu0 %vm500_vm12, %v7505_v39  ;;  %v25578_v39 = vld [vmem:[#allocation172_spill] sm:$0xff] }
 0x2fe   : > { %17133 = vmatmul.mubr.msk.f32.gmra.mrb[56].mxu1 %vm500_vm12, %v25574_v55  ;;  %vm25579_vm9 = vcmp.eq.s32.totalorder %v25578_v39, 1  ;;  %v7478_v55 = vld [vmem:[%s18592_s30 + $0xad] sm:$0xff] }
 0x2ff   : > { %17135 = vmatprep.mubr.msk.f32.mxu1 %vm500_vm12, %v10941_v61  ;;  %v7507_v16 = vsel %vm25579_vm9, %v7475_v43, 0.0  ;;  %v10943_v61 = vsel %vm9559_vm1, %v10911_v51, 0.0  ;;  %v10913_v43 = vld [vmem:[%s18592_s30 + $0x120] sm:$0xff] }
 0x300   : > { %16762 = vmatmul.mubr.msk.f32.gmra.mrb[74].mxu0 %vm500_vm12, %v7506_v46  ;;  %v7508_v46 = vsel %vm25583_vm8, %v7476_v24, 0.0  ;;  %v10946_v24 = vsel %vm9562_vm14, %v10914_v8, 0.0  ;;  %v11304_v8 = vld [vmem:[%s18592_s30 + $0x43] sm:$0xff] }
 0x301   : > { %16764 = vmatprep.mubr.msk.f32.mxu0 %vm500_vm12, %v7507_v16  ;;  %v25584_v16 = vld [vmem:[#allocation175_spill] sm:$0xff] }
 0x302   : > { %17136 = vmatmul.mubr.msk.f32.gmra.mrb[58].mxu1 %vm500_vm12, %v10942_v60  ;;  %vm25585_vm11 = vcmp.eq.s32.totalorder %v25584_v16, 1  ;;  %v25586_v60 = vld [vmem:[#allocation129_spill] sm:$0xff] }
 0x303   : > { %17138 = vmatprep.mubr.msk.f32.mxu1 %vm500_vm12, %v10943_v61  ;;  %v7509_v33 = vsel %vm25585_vm11, %v7477_v56, 0.0  ;;  %vm25587_vm9 = vcmp.eq.s32.totalorder %v25586_v60, 1  ;;  %v10945_v61 = vsel %vm9561_vm5, %v10913_v43, 0.0  ;;  %v25591_v56 = vld [vmem:[#allocation177_spill] sm:$0xff]  ;;  %v7481_v43 = vld [vmem:[%s18592_s30 + $0xc5] sm:$0xff] }
 0x304   : > { %16765 = vmatmul.mubr.msk.f32.gmra.mrb[76].mxu0 %vm500_vm12, %v7508_v46  ;;  %v10944_v51 = vsel %vm25587_vm9, %v10912_v10, 0.0  ;;  %v25589_v46 = vld [vmem:[#allocation174_spill] sm:$0xff]  ;;  %vm25592_vm11 = vcmp.eq.s32.totalorder %v25591_v56, 1  ;;  %v7490_v56 = vld [vmem:[%s18592_s30 + $0x10d] sm:$0xff] }
 0x305   : > { %16767 = vmatprep.mubr.msk.f32.mxu0 %vm500_vm12, %v7509_v33  ;;  %vm25590_vm8 = vcmp.eq.s32.totalorder %v25589_v46, 1  ;;  %v7511_v10 = vsel %vm25592_vm11, %v7479_v26, 0.0  ;;  %v7480_v33 = vld [vmem:[%s18592_s30 + $0xbd] sm:$0xff]  ;;  %v25594_v46 = vld [vmem:[#allocation176_spill] sm:$0xff] }
 0x306   : > { %17139 = vmatmul.mubr.msk.f32.gmra.mrb[60].mxu1 %vm500_vm12, %v10944_v51  ;;  %v7510_v16 = vsel %vm25590_vm8, %v7478_v55, 0.0  ;;  %vm25595_vm9 = vcmp.eq.s32.totalorder %v25594_v46, 1  ;;  %v25596_v26 = vld [vmem:[#allocation179_spill] sm:$0xff]  ;;  %v23019_v46 = vld [vmem:[%s18592_s30 + $0x53] sm:$0xff] }
 0x307   : > { %17141 = vmatprep.mubr.msk.f32.mxu1 %vm500_vm12, %v10945_v61  ;;  %v7512_v55 = vsel %vm25595_vm9, %v7480_v33, 0.0  ;;  %vm25597_vm8 = vcmp.eq.s32.totalorder %v25596_v26, 1  ;;  %v7482_v61 = vld [vmem:[%s18592_s30 + $0xcd] sm:$0xff]  ;;  %v7484_v26 = vld [vmem:[%s18592_s30 + $0xdd] sm:$0xff] }
 0x308   : > { %16768 = vmatmul.mubr.msk.f32.gmra.mrb[78].mxu0 %vm500_vm12, %v7510_v16  ;;  %v7513_v16 = vsel %vm25597_vm8, %v7481_v43, 0.0  ;;  %v11305_v43 = vld [vmem:[%s18592_s30 + $0x4b] sm:$0xff]  ;;  %v25610_v51 = vld [vmem:[#allocation139_spill] sm:$0xff] }
 0x309   : > { %16770 = vmatprep.mubr.msk.f32.mxu0 %vm500_vm12, %v7511_v10  ;;  %v7483_v10 = vld [vmem:[%s18592_s30 + $0xd5] sm:$0xff] }
 0x30a   : > { %17142 = vmatmul.mubr.msk.f32.gmra.mrb[62].mxu1 %vm500_vm12, %v10946_v24  ;;  %v23005_v24 = vld [vmem:[%s24370_s8 + $0x30] sm:$0xff] }
 0x30b   : > { %17146 = vmatprep.mubr.msk.f32.mxu1 %vm500_vm12, %v22509_v18  ;;  %v25598_v18 = vld [vmem:[#allocation178_spill] sm:$0xff] }
 0x30c   : > { %16771 = vmatmul.mubr.msk.f32.gmra.mrb[80].mxu0 %vm500_vm12, %v7512_v55  ;;  %vm25599_vm11 = vcmp.eq.s32.totalorder %v25598_v18, 1  ;;  %v25600_v55 = vld [vmem:[#allocation181_spill] sm:$0xff] }
 0x30d   : > { %16773 = vmatprep.mubr.msk.f32.mxu0 %vm500_vm12, %v7513_v16  ;;  %v7514_v33 = vsel %vm25599_vm11, %v7482_v61, 0.0  ;;  %vm25601_vm9 = vcmp.eq.s32.totalorder %v25600_v55, 1  ;;  %v23037_v55 = vld [vmem:[%s18592_s30 + $0x63] sm:$0xff]  ;;  %v23055_v18 = vld [vmem:[%s18592_s30 + $0x73] sm:$0xff] }
 0x30e   : > { %17147 = vmatmul.mubr.msk.f32.vlgmr.msra.gmra.mrb[32].mxu1 %vm500_vm12, %v22527_v53  ;;  %v7515_v16 = vsel %vm25601_vm9, %v7483_v10, 0.0  ;;  %v7485_v53 = vld [vmem:[%s18592_s30 + $0xe5] sm:$0xff] }
 0x30f   : > { %17195 = vmatpush3.msra.mxu1 %v22752_v49  ;;  %17149 = vmatprep.mubr.msk.f32.mxu1 %vm500_vm12, %v11304_v8  ;;  %v25602_v49 = vld [vmem:[#allocation180_spill] sm:$0xff]  ;;  %v23030_v8 = vld [vmem:[%s18592_s30 + $0x5b] sm:$0xff] }
 0x310   : > { %16774 = vmatmul.mubr.msk.f32.gmra.mrb[82].mxu0 %vm500_vm12, %v7514_v33  ;;  %17244 = vmatprep.subr.mxu1 %v23005_v24  ;;  %vm25603_vm8 = vcmp.eq.s32.totalorder %v25602_v49, 1  ;;  %v25604_v10 = vld [vmem:[#allocation183_spill] sm:$0xff] }
 0x311   : > { %16776 = vmatprep.mubr.msk.f32.mxu0 %vm500_vm12, %v7515_v16  ;;  %v7516_v61 = vsel %vm25603_vm8, %v7484_v26, 0.0  ;;  %vm25605_vm11 = vcmp.eq.s32.totalorder %v25604_v10, 1  ;;  %v7486_v16 = vld [vmem:[%s18592_s30 + $0xed] sm:$0xff]  ;;  %v25606_v26 = vld [vmem:[#allocation182_spill] sm:$0xff] }
 0x312   : > { %17150 = vmatmul.mubr.msk.f32.gmra.mrb[34].mxu1 %vm500_vm12, %v11305_v43  ;;  %v7517_v33 = vsel %vm25605_vm11, %v7485_v53, 0.0  ;;  %v7487_v43 = vld [vmem:[%s18592_s30 + $0xf5] sm:$0xff]  ;;  %vm25607_vm9 = vcmp.eq.s32.totalorder %v25606_v26, 1  ;;  %vm5080_vm11 = vcmask 261248   ;;  %v7489_v26 = vld [vmem:[%s18592_s30 + $0x105] sm:$0xff] }
 0x313   : > { %17152 = vmatprep.mubr.msk.f32.mxu1 %vm500_vm12, %v23019_v46  ;;  %v7518_v49 = vsel %vm25607_vm9, %v7486_v16, 0.0  ;;  %v25608_v53 = vld [vmem:[#allocation53_spill] sm:$0xff]  ;;  %vm25611_vm9 = vcmp.eq.s32.totalorder %v25610_v51, 1  ;;  %v25614_v51 = vld [vmem:[#allocation184_spill] sm:$0xff] }
 0x314   : > { %16777 = vmatmul.mubr.msk.f32.gmra.mrb[84].mxu0 %vm500_vm12, %v7516_v61  ;;  %v23048_v61 = vld [vmem:[%s18592_s30 + $0x6b] sm:$0xff]  ;;  %vm25609_vm8 = vcmp.eq.s32.totalorder %v25608_v53, 1 }
 0x315   : > { %16779 = vmatprep.mubr.msk.f32.mxu0 %vm500_vm12, %v7517_v33  ;;  %v7519_v10 = vsel %vm25609_vm8, %v7487_v43, 0.0  ;;  %v7488_v33 = vld [vmem:[%s18592_s30 + $0xfd] sm:$0xff] }
 0x316   : > { %17153 = vmatmul.mubr.msk.f32.gmra.mrb[36].mxu1 %vm500_vm12, %v23030_v8 }
 0x317   : > { %17155 = vmatprep.mubr.msk.f32.mxu1 %vm500_vm12, %v23037_v55 }
 0x318   : > { %16780 = vmatmul.mubr.msk.f32.gmra.mrb[86].mxu0 %vm500_vm12, %v7518_v49  ;;  %v4987_v16 = vpop.permute.xlu1 %4986  ;;  %v7520_v49 = vsel %vm25611_vm9, %v7488_v33, 0.0  ;;  %vm25615_vm9 = vcmp.eq.s32.totalorder %v25614_v51, 1 }
 0x319   : > { %16782 = vmatprep.mubr.msk.f32.mxu0 %vm500_vm12, %v7519_v10  ;;  %5082 = vst.msk [vmem:[#allocation2 + $0x8] sm:$0xff] %vm5080_vm11, %v4987_v16  ;;  %v4985_v53 = vpop.permute.xlu0 %4984  ;;  %v25612_v10 = vld [vmem:[#allocation131_spill] sm:$0xff]  ;;  %v7491_v16 = vld [vmem:[%s18592_s30 + $0x115] sm:$0xff]  ;;  %v7522_v60 = vsel %vm25615_vm9, %v7490_v56, 0.0 }
 0x31a   : > { %17156 = vmatmul.mubr.msk.f32.gmra.mrb[38].mxu1 %vm500_vm12, %v23048_v61  ;;  %5081 = vst.msk [vmem:[#allocation2] sm:$0xff] %vm5080_vm11, %v4985_v53  ;;  %vm25613_vm8 = vcmp.eq.s32.totalorder %v25612_v10, 1 }
 0x31b   : > { %17158 = vmatprep.mubr.msk.f32.mxu1 %vm500_vm12, %v23055_v18  ;;  %v7521_v43 = vsel %vm25613_vm8, %v7489_v26, 0.0  ;;  %v25616_v26 = vld [vmem:[#allocation189_spill] sm:$0xff] }
 0x31c   : > { %16783 = vmatmul.mubr.msk.f32.gmra.mrb[88].mxu0 %vm500_vm12, %v7520_v49  ;;  %v4991_v33 = vpop.permute.xlu1 %4990  ;;  %vm25617_vm8 = vcmp.eq.s32.totalorder %v25616_v26, 1 }
 0x31d   : > { %16785 = vmatprep.mubr.msk.f32.mxu0 %vm500_vm12, %v7521_v43  ;;  %5084 = vst.msk [vmem:[#allocation2 + $0x18] sm:$0xff] %vm5080_vm11, %v4991_v33  ;;  %v4989_v49 = vpop.permute.xlu0 %4988  ;;  %v7523_v53 = vsel %vm25617_vm8, %v7491_v16, 0.0  ;;  %v7493_v43 = vld [vmem:[%s18592_s30 + $0x125] sm:$0xff]  ;;  %v25620_v16 = vld [vmem:[#allocation197_spill] sm:$0xff] }
 0x31e   : > { %17159 = vmatmul.mubr.msk.f32.gmra.mrb[40].mxu1 %vm500_vm12, %v22610_v41  ;;  %5083 = vst.msk [vmem:[#allocation2 + $0x10] sm:$0xff] %vm5080_vm11, %v4989_v49  ;;  %v7492_v41 = vld [vmem:[%s18592_s30 + $0x11d] sm:$0xff]  ;;  %vm25621_vm8 = vcmp.eq.s32.totalorder %v25620_v16, 1 }
 0x31f   : > { %17161 = vmatprep.mubr.msk.f32.mxu1 %vm500_vm12, %v22618_v57  ;;  %v25618_v57 = vld [vmem:[#allocation192_spill] sm:$0xff]  ;;  %v7525_v49 = vsel %vm25621_vm8, %v7493_v43, 0.0  ;;  %v25624_v43 = vld [vmem:[#allocation78_spill] sm:$0xff] }
 0x320   : > { %16786 = vmatmul.mubr.msk.f32.gmra.mrb[90].mxu0 %vm500_vm12, %v7522_v60  ;;  %vm25619_vm9 = vcmp.eq.s32.totalorder %v25618_v57, 1  ;;  %vm25625_vm8 = vcmp.eq.s32.totalorder %v25624_v43, 1 }
 0x321   : > { %16788 = vmatprep.mubr.msk.f32.mxu0 %vm500_vm12, %v7523_v53  ;;  %v4995_v56 = vpop.permute.xlu1 %4994  ;;  %v7524_v60 = vsel %vm25619_vm9, %v7492_v41, 0.0  ;;  %v7882_v53 = vld [vmem:[%s18592_s30 + $0x51] sm:$0xff] }
 0x322   : > { %17162 = vmatmul.mubr.msk.f32.gmra.mrb[42].mxu1 %vm500_vm12, %v22636_v5  ;;  %5086 = vst.msk [vmem:[#allocation2 + $0x28] sm:$0xff] %vm5080_vm11, %v4995_v56  ;;  %v4993_v33 = vpop.permute.xlu0 %4992  ;;  %v7494_v5 = vld [vmem:[%s18592_s30 + $0x12d] sm:$0xff]  ;;  %v25622_v56 = vld [vmem:[#allocation198_spill] sm:$0xff] }
 0x323   : > { %17164 = vmatprep.mubr.msk.f32.mxu1 %vm500_vm12, %v22644_v4  ;;  %5085 = vst.msk [vmem:[#allocation2 + $0x20] sm:$0xff] %vm5080_vm11, %v4993_v33  ;;  %vm25623_vm9 = vcmp.eq.s32.totalorder %v25622_v56, 1  ;;  %v7883_v33 = vld [vmem:[%s18592_s30 + $0x59] sm:$0xff] }
 0x324   : > { %16789 = vmatmul.mubr.msk.f32.gmra.mrb[92].mxu0 %vm500_vm12, %v7524_v60  ;;  %v7526_v4 = vsel %vm25623_vm9, %v7494_v5, 0.0 }
 0x325   : > { %16791 = vmatprep.mubr.msk.f32.mxu0 %vm500_vm12, %v7525_v49  ;;  %v4999_v41 = vpop.permute.xlu1 %4998  ;;  %v7884_v49 = vld [vmem:[%s18592_s30 + $0x61] sm:$0xff] }
 0x326   : > { %17165 = vmatmul.mubr.msk.f32.gmra.mrb[44].mxu1 %vm500_vm12, %v22664_v15  ;;  %5088 = vst.msk [vmem:[#allocation2 + $0x38] sm:$0xff] %vm5080_vm11, %v4999_v41  ;;  %v4997_v60 = vpop.permute.xlu0 %4996  ;;  %v7914_v15 = vsel %vm25625_vm8, %v7882_v53, 0.0  ;;  %v25626_v41 = vld [vmem:[#allocation77_spill] sm:$0xff]  ;;  %v23125_v53 = vld [vmem:[%s24368_s6 + $0x40] sm:$0xff] }
 0x327   : > { %17167 = vmatprep.mubr.msk.f32.mxu1 %vm500_vm12, %v22672_v21  ;;  %5087 = vst.msk [vmem:[#allocation2 + $0x30] sm:$0xff] %vm5080_vm11, %v4997_v60  ;;  %vm25627_vm9 = vcmp.eq.s32.totalorder %v25626_v41, 1  ;;  %v7885_v60 = vld [vmem:[%s18592_s30 + $0x69] sm:$0xff] }
 0x328   : > { %16792 = vmatmul.mubr.msk.f32.gmra.mrb[94].mxu0 %vm500_vm12, %v7526_v4  ;;  %v7915_v21 = vsel %vm25627_vm9, %v7883_v33, 0.0  ;;  %v7886_v33 = vld [vmem:[%s18592_s30 + $0x71] sm:$0xff] }
 0x329   : > { %16796 = vmatprep.mubr.msk.f32.mxu0 %vm500_vm12, %v7914_v15  ;;  %v5003_v5 = vpop.permute.xlu1 %5002 }
 0x32a   : > { %17168 = vmatmul.mubr.msk.f32.gmra.mrb[46].mxu1 %vm500_vm12, %v22692_v11  ;;  %5090 = vst.msk [vmem:[#allocation2 + $0x48] sm:$0xff] %vm5080_vm11, %v5003_v5  ;;  %v5001_v56 = vpop.permute.xlu0 %5000  ;;  %v25628_v11 = vld [vmem:[#allocation86_spill] sm:$0xff]  ;;  %v7888_v5 = vld [vmem:[%s18592_s30 + $0x81] sm:$0xff] }
 0x32b   : > { %17170 = vmatprep.mubr.msk.f32.mxu1 %vm500_vm12, %v22701_v2  ;;  %5089 = vst.msk [vmem:[#allocation2 + $0x40] sm:$0xff] %vm5080_vm11, %v5001_v56  ;;  %vm25629_vm8 = vcmp.eq.s32.totalorder %v25628_v11, 1  ;;  %v25630_v56 = vld [vmem:[#allocation85_spill] sm:$0xff] }
 0x32c   : > { %16797 = vmatmul.mubr.msk.f32.vlgmr.msra.gmra.mrb[64].mxu0 %vm500_vm12, %v7915_v21  ;;  %v7916_v4 = vsel %vm25629_vm8, %v7884_v49, 0.0  ;;  %vm25631_vm9 = vcmp.eq.s32.totalorder %v25630_v56, 1  ;;  %v7887_v49 = vld [vmem:[%s18592_s30 + $0x79] sm:$0xff] }
 0x32d   : > { %16799 = vmatprep.mubr.msk.f32.mxu0 %vm500_vm12, %v7916_v4  ;;  %16845 = vmatpush3.msra.mxu0 %v22883_v59  ;;  %v5007_v2 = vpop.permute.xlu1 %5006  ;;  %v7917_v43 = vsel %vm25631_vm9, %v7885_v60, 0.0  ;;  %v25632_v59 = vld [vmem:[#allocation93_spill] sm:$0xff]  ;;  %v25636_v4 = vld [vmem:[#allocation104_spill] sm:$0xff] }
 0x32e   : > { %17171 = vmatmul.mubr.msk.f32.gmra.mrb[48].mxu1 %vm500_vm12, %v22716_v1  ;;  %16894 = vmatprep.subr.mxu0 %v23125_v53  ;;  %5092 = vst.msk [vmem:[#allocation2 + $0x58] sm:$0xff] %vm5080_vm11, %v5007_v2  ;;  %v5005_v15 = vpop.permute.xlu0 %5004  ;;  %vm25633_vm8 = vcmp.eq.s32.totalorder %v25632_v59, 1 }
 0x32f   : > { %17173 = vmatprep.mubr.msk.f32.mxu1 %vm500_vm12, %v22722_v17  ;;  %5091 = vst.msk [vmem:[#allocation2 + $0x50] sm:$0xff] %vm5080_vm11, %v5005_v15  ;;  %v7918_v1 = vsel %vm25633_vm8, %v7886_v33, 0.0  ;;  %v25634_v17 = vld [vmem:[#allocation92_spill] sm:$0xff]  ;;  %vm25637_vm8 = vcmp.eq.s32.totalorder %v25636_v4, 1  ;;  %v7890_v33 = vld [vmem:[%s18592_s30 + $0x91] sm:$0xff] }
 0x330   : > { %16800 = vmatmul.mubr.msk.f32.gmra.mrb[66].mxu0 %vm500_vm12, %v7917_v43  ;;  %vm25635_vm9 = vcmp.eq.s32.totalorder %v25634_v17, 1  ;;  %v7920_v60 = vsel %vm25637_vm8, %v7888_v5, 0.0  ;;  %v25640_v15 = vld [vmem:[#allocation112_spill] sm:$0xff]  ;;  %v25644_v17 = vld [vmem:[#allocation117_spill] sm:$0xff] }
 0x331   : > { %16802 = vmatprep.mubr.msk.f32.mxu0 %vm500_vm12, %v7918_v1  ;;  %v5011_v41 = vpop.permute.xlu1 %5010  ;;  %v7919_v21 = vsel %vm25635_vm9, %v7887_v49, 0.0  ;;  %vm25641_vm8 = vcmp.eq.s32.totalorder %v25640_v15, 1  ;;  %v7892_v1 = vld [vmem:[%s18592_s30 + $0xa1] sm:$0xff] }
 0x332   : > { %17174 = vmatmul.mubr.msk.f32.gmra.mrb[50].mxu1 %vm500_vm12, %v22738_v13  ;;  %5094 = vst.msk [vmem:[#allocation2 + $0x68] sm:$0xff] %vm5080_vm11, %v5011_v41  ;;  %v5009_v11 = vpop.permute.xlu0 %5008  ;;  %v7889_v13 = vld [vmem:[%s18592_s30 + $0x89] sm:$0xff]  ;;  %v7922_v59 = vsel %vm25641_vm8, %v7890_v33, 0.0  ;;  %vm25645_vm8 = vcmp.eq.s32.totalorder %v25644_v17, 1  ;;  %v25656_v17 = vld [vmem:[#allocation74_spill] sm:$0xff] }
 0x333   : > { %17176 = vmatprep.mubr.msk.f32.mxu1 %vm500_vm12, %v22743_v50  ;;  %5093 = vst.msk [vmem:[#allocation2 + $0x60] sm:$0xff] %vm5080_vm11, %v5009_v11  ;;  %v25638_v50 = vld [vmem:[#allocation103_spill] sm:$0xff]  ;;  %v7894_v11 = vld [vmem:[%s18592_s30 + $0xb1] sm:$0xff] }
 0x334   : > { %16803 = vmatmul.mubr.msk.f32.gmra.mrb[68].mxu0 %vm500_vm12, %v7919_v21  ;;  %vm25639_vm9 = vcmp.eq.s32.totalorder %v25638_v50, 1  ;;  %v7924_v21 = vsel %vm25645_vm8, %v7892_v1, 0.0  ;;  %v25648_v33 = vld [vmem:[#allocation65_spill] sm:$0xff]  ;;  %v7896_v50 = vld [vmem:[%s18592_s30 + $0xc1] sm:$0xff] }
 0x335   : > { %16805 = vmatprep.mubr.msk.f32.mxu0 %vm500_vm12, %v7920_v60  ;;  %v5015_v2 = vpop.permute.xlu1 %5014  ;;  %v7921_v56 = vsel %vm25639_vm9, %v7889_v13, 0.0  ;;  %vm25649_vm8 = vcmp.eq.s32.totalorder %v25648_v33, 1  ;;  %v7898_v1 = vld [vmem:[%s18592_s30 + $0xd1] sm:$0xff] }
 0x336   : > { %17177 = vmatmul.mubr.msk.f32.gmra.mrb[52].mxu1 %vm500_vm12, %v22763_v9  ;;  %5096 = vst.msk [vmem:[#allocation2 + $0x78] sm:$0xff] %vm5080_vm11, %v5015_v2  ;;  %v5013_v43 = vpop.permute.xlu0 %5012  ;;  %v7891_v9 = vld [vmem:[%s18592_s30 + $0x99] sm:$0xff]  ;;  %v7926_v2 = vsel %vm25649_vm8, %v7894_v11, 0.0 }
 0x337   : > { %17179 = vmatprep.mubr.msk.f32.mxu1 %vm500_vm12, %v22769_v25  ;;  %5095 = vst.msk [vmem:[#allocation2 + $0x70] sm:$0xff] %vm5080_vm11, %v5013_v43  ;;  %v25642_v25 = vld [vmem:[#allocation111_spill] sm:$0xff] }
 0x338   : > { %16806 = vmatmul.mubr.msk.f32.gmra.mrb[70].mxu0 %vm500_vm12, %v7921_v56  ;;  %vm25643_vm9 = vcmp.eq.s32.totalorder %v25642_v25, 1  ;;  %v11690_v11 = vld [vmem:[%s18592_s30 + $0x3e] sm:$0xff] }
 0x339   : > { %16808 = vmatprep.mubr.msk.f32.mxu0 %vm500_vm12, %v7922_v59  ;;  %v5019_v49 = vpop.permute.xlu1 %5018  ;;  %v7923_v5 = vsel %vm25643_vm9, %v7891_v9, 0.0  ;;  %v25652_v59 = vld [vmem:[#allocation66_spill] sm:$0xff] }
 0x33a   : > { %17180 = vmatmul.mubr.msk.f32.gmra.mrb[54].mxu1 %vm500_vm12, %v22784_v35  ;;  %5098 = vst.msk [vmem:[#allocation2 + $0x88] sm:$0xff] %vm5080_vm11, %v5019_v49  ;;  %v5017_v41 = vpop.permute.xlu0 %5016  ;;  %v7893_v35 = vld [vmem:[%s18592_s30 + $0xa9] sm:$0xff]  ;;  %vm25653_vm8 = vcmp.eq.s32.totalorder %v25652_v59, 1 }
 0x33b   : > { %17182 = vmatprep.mubr.msk.f32.mxu1 %vm500_vm12, %v22790_v34  ;;  %5097 = vst.msk [vmem:[#allocation2 + $0x80] sm:$0xff] %vm5080_vm11, %v5017_v41  ;;  %v25646_v34 = vld [vmem:[#allocation57_spill] sm:$0xff]  ;;  %v7928_v9 = vsel %vm25653_vm8, %v7896_v50, 0.0  ;;  %vm25657_vm8 = vcmp.eq.s32.totalorder %v25656_v17, 1 }
 0x33c   : > { %16809 = vmatmul.mubr.msk.f32.gmra.mrb[72].mxu0 %vm500_vm12, %v7923_v5  ;;  %vm25647_vm9 = vcmp.eq.s32.totalorder %v25646_v34, 1  ;;  %v11689_v41 = vld [vmem:[%s18592_s30 + $0x36] sm:$0xff]  ;;  %v7901_v50 = vld [vmem:[%s18592_s30 + $0xe9] sm:$0xff] }
 0x33d   : > { %16811 = vmatprep.mubr.msk.f32.mxu0 %vm500_vm12, %v7924_v21  ;;  %v5023_v4 = vpop.permute.xlu1 %5022  ;;  %v7925_v60 = vsel %vm25647_vm9, %v7893_v35, 0.0  ;;  %v7930_v21 = vsel %vm25657_vm8, %v7898_v1, 0.0  ;;  %v7900_v35 = vld [vmem:[%s18592_s30 + $0xe1] sm:$0xff]  ;;  %v11721_v34 = vsel %vm10464_vm15, %v11689_v41, 0.0  ;;  %v11692_v1 = vld [vmem:[%s18592_s30 + $0x4e] sm:$0xff]  ;;  %v25669_v41 = vld [vmem:[#allocation118_spill] sm:$0xff] }
 0x33e   : > { %17183 = vmatmul.mubr.msk.f32.gmra.mrb[56].mxu1 %vm500_vm12, %v22804_v63  ;;  %5100 = vst.msk [vmem:[#allocation2 + $0x98] sm:$0xff] %vm5080_vm11, %v5023_v4  ;;  %v5021_v13 = vpop.permute.xlu0 %5020  ;;  %v7895_v63 = vld [vmem:[%s18592_s30 + $0xb9] sm:$0xff] }
 0x33f   : > { %17185 = vmatprep.mubr.msk.f32.mxu1 %vm500_vm12, %v22810_v28  ;;  %5099 = vst.msk [vmem:[#allocation2 + $0x90] sm:$0xff] %vm5080_vm11, %v5021_v13  ;;  %v25650_v28 = vld [vmem:[#allocation62_spill] sm:$0xff] }
 0x340   : > { %16812 = vmatmul.mubr.msk.f32.gmra.mrb[74].mxu0 %vm500_vm12, %v7925_v60  ;;  %vm25651_vm9 = vcmp.eq.s32.totalorder %v25650_v28, 1  ;;  %v25659_v60 = vld [vmem:[#allocation71_spill] sm:$0xff] }
 0x341   : > { %16814 = vmatprep.mubr.msk.f32.mxu0 %vm500_vm12, %v7926_v2  ;;  %v7927_v43 = vsel %vm25651_vm9, %v7895_v63, 0.0  ;;  %v11691_v2 = vld [vmem:[%s18592_s30 + $0x46] sm:$0xff]  ;;  %v11694_v4 = vld [vmem:[%s18592_s30 + $0x5e] sm:$0xff] }
 0x342   : > { %17186 = vmatmul.mubr.msk.f32.gmra.mrb[58].mxu1 %vm500_vm12, %v22824_v22  ;;  %v5027_v56 = vpop.permute.xlu1 %5026  ;;  %v7897_v22 = vld [vmem:[%s18592_s30 + $0xc9] sm:$0xff]  ;;  %v25661_v63 = vld [vmem:[#allocation3_spill] sm:$0xff] }
 0x343   : > { %5102 = vst.msk [vmem:[#allocation2 + $0xa8] sm:$0xff] %vm5080_vm11, %v5027_v56  ;;  %v5025_v15 = vpop.permute.xlu0 %5024  ;;  %17188 = vmatprep.mubr.msk.f32.mxu1 %vm500_vm12, %v22830_v0  ;;  %v25654_v0 = vld [vmem:[#allocation30_spill] sm:$0xff]  ;;  %vm25662_vm8 = vcmp.eq.s32.totalorder %v25661_v63, 1  ;;  %v25663_v56 = vld [vmem:[#allocation137_spill] sm:$0xff] }
 0x344   : > { %16815 = vmatmul.mubr.msk.f32.gmra.mrb[76].mxu0 %vm500_vm12, %v7927_v43  ;;  %5101 = vst.msk [vmem:[#allocation2 + $0xa0] sm:$0xff] %vm5080_vm11, %v5025_v15  ;;  %vm25655_vm9 = vcmp.eq.s32.totalorder %v25654_v0, 1  ;;  %vm25664_vm15 = vcmp.eq.s32.totalorder %v25663_v56, 1  ;;  %v7902_v43 = vld [vmem:[%s18592_s30 + $0xf1] sm:$0xff] }
 0x345   : > { %16817 = vmatprep.mubr.msk.f32.mxu0 %vm500_vm12, %v7928_v9  ;;  %v7929_v25 = vsel %vm25655_vm9, %v7897_v22, 0.0  ;;  %vm25660_vm9 = vcmp.eq.s32.totalorder %v25659_v60, 1  ;;  %v11722_v28 = vsel %vm25664_vm15, %v11690_v11, 0.0  ;;  %v23257_v15 = vld [vmem:[%s24370_s8 + $0x38] sm:$0xff]  ;;  %v25665_v9 = vld [vmem:[#allocation145_spill] sm:$0xff]  ;;  %vm25670_vm15 = vcmp.eq.s32.totalorder %v25669_v41, 1 }
 0x346   : > { %17189 = vmatmul.mubr.msk.f32.gmra.mrb[60].mxu1 %vm500_vm12, %v22844_v31  ;;  %v5031_v49 = vpop.permute.xlu1 %5030  ;;  %v7899_v31 = vld [vmem:[%s18592_s30 + $0xd9] sm:$0xff]  ;;  %v7934_v17 = vsel %vm25670_vm15, %v7902_v43, 0.0  ;;  %v25679_v43 = vld [vmem:[#allocation157_spill] sm:$0xff]  ;;  %v7908_v41 = vld [vmem:[%s18592_s30 + $0x121] sm:$0xff] }
 0x347   : > { %5104 = vst.msk [vmem:[#allocation2 + $0xb8] sm:$0xff] %vm5080_vm11, %v5031_v49  ;;  %v5029_v5 = vpop.permute.xlu0 %5028  ;;  %17191 = vmatprep.mubr.msk.f32.mxu1 %vm500_vm12, %v22849_v45  ;;  %v7931_v13 = vsel %vm25660_vm9, %v7899_v31, 0.0  ;;  %vm25666_vm9 = vcmp.eq.s32.totalorder %v25665_v9, 1  ;;  %v25667_v49 = vld [vmem:[#allocation6_spill] sm:$0xff]  ;;  %v7904_v31 = vld [vmem:[%s18592_s30 + $0x101] sm:$0xff]  ;;  %v11696_v9 = vld [vmem:[%s18592_s30 + $0x6e] sm:$0xff] }
 0x348   : > { %16818 = vmatmul.mubr.msk.f32.gmra.mrb[78].mxu0 %vm500_vm12, %v7929_v25  ;;  %5103 = vst.msk [vmem:[#allocation2 + $0xb0] sm:$0xff] %vm5080_vm11, %v5029_v5  ;;  %v11723_v22 = vsel %vm25666_vm9, %v11691_v2, 0.0  ;;  %v11693_v5 = vld [vmem:[%s18592_s30 + $0x56] sm:$0xff]  ;;  %vm25671_vm9 = vcmp.eq.s32.totalorder %v25480_v48, 1  ;;  %v25672_v11 = vld [vmem:[#allocation151_spill] sm:$0xff]  ;;  %v7905_v2 = vld [vmem:[%s18592_s30 + $0x109] sm:$0xff] }
 0x349   : > { %16820 = vmatprep.mubr.msk.f32.mxu0 %vm500_vm12, %v7930_v21  ;;  %v7903_v21 = vld [vmem:[%s18592_s30 + $0xf9] sm:$0xff] }
 0x34a   : > { %17192 = vmatmul.mubr.msk.f32.gmra.mrb[62].mxu1 %vm500_vm12, %v22860_v62  ;;  %v5035_v45 = vpop.permute.xlu1 %5034  ;;  %v7932_v62 = vsel %vm25662_vm8, %v7900_v35, 0.0  ;;  %vm25668_vm8 = vcmp.eq.s32.totalorder %v25667_v49, 1  ;;  %v25683_v49 = vld [vmem:[#allocation13_spill] sm:$0xff] }
 0x34b   : > { %5106 = vst.msk [vmem:[#allocation2 + $0xc8] sm:$0xff] %vm5080_vm11, %v5035_v45  ;;  %17196 = vmatprep.mubr.msk.f32.mxu1 %vm500_vm12, %v11721_v34  ;;  %v5033_v33 = vpop.permute.xlu0 %5032  ;;  %v7933_v0 = vsel %vm25668_vm8, %v7901_v50, 0.0  ;;  %vm25673_vm8 = vcmp.eq.s32.totalorder %v25672_v11, 1  ;;  %v25674_v34 = vld [vmem:[#allocation10_spill] sm:$0xff] }
 0x34c   : > { %16821 = vmatmul.mubr.msk.f32.gmra.mrb[80].mxu0 %vm500_vm12, %v7931_v13  ;;  %5105 = vst.msk [vmem:[#allocation2 + $0xc0] sm:$0xff] %vm5080_vm11, %v5033_v33  ;;  %v11725_v45 = vsel %vm25673_vm8, %v11693_v5, 0.0  ;;  %vm25675_vm15 = vcmp.eq.s32.totalorder %v25674_v34, 1  ;;  %v25676_v13 = vld [vmem:[#allocation100_spill] sm:$0xff]  ;;  %vm25678_vm8 = vcmp.eq.s32.totalorder %v25485_v40, 1  ;;  %v25690_v11 = vld [vmem:[#allocation122_spill] sm:$0xff] }
 0x34d   : > { %16823 = vmatprep.mubr.msk.f32.mxu0 %vm500_vm12, %v7932_v62  ;;  %v7935_v60 = vsel %vm25675_vm15, %v7903_v21, 0.0  ;;  %v11726_v63 = vsel %vm25678_vm8, %v11694_v4, 0.0  ;;  %v7906_v62 = vld [vmem:[%s18592_s30 + $0x111] sm:$0xff]  ;;  %vm25680_vm15 = vcmp.eq.s32.totalorder %v25679_v43, 1  ;;  %vm25684_vm8 = vcmp.eq.s32.totalorder %v25683_v49, 1  ;;  %v25686_v21 = vld [vmem:[#allocation163_spill] sm:$0xff] }
 0x34e   : > { %17197 = vmatmul.mubr.msk.f32.vlgmr.msra.gmra.mrb[32].mxu1 %vm500_vm12, %v11722_v28  ;;  %v5039_v59 = vpop.permute.xlu1 %5038  ;;  %v18366_v28 = vld [vmem:[%s18592_s30 + $0x66] sm:$0xff]  ;;  %v18368_v4 = vld [vmem:[%s18592_s30 + $0x7e] sm:$0xff] }
 0x34f   : > { %17245 = vmatpush3.msra.mxu1 %v23005_v24  ;;  %5108 = vst.msk [vmem:[#allocation2 + $0xd8] sm:$0xff] %vm5080_vm11, %v5039_v59  ;;  %17199 = vmatprep.mubr.msk.f32.mxu1 %vm500_vm12, %v11723_v22  ;;  %v5037_v25 = vpop.permute.xlu0 %5036  ;;  %v11724_v24 = vsel %vm25671_vm9, %v11692_v1, 0.0  ;;  %vm25677_vm9 = vcmp.eq.s32.totalorder %v25676_v13, 1  ;;  %v11727_v59 = vsel %vm25680_vm15, %v18366_v28, 0.0  ;;  %v25681_v22 = vld [vmem:[#allocation47_spill] sm:$0xff]  ;;  %vm25685_vm15 = vcmp.eq.s32.totalorder %v25490_v44, 1 }
 0x350   : > { %16824 = vmatmul.mubr.msk.f32.gmra.mrb[82].mxu0 %vm500_vm12, %v7933_v0  ;;  %5107 = vst.msk [vmem:[#allocation2 + $0xd0] sm:$0xff] %vm5080_vm11, %v5037_v25  ;;  %17294 = vmatprep.subr.mxu1 %v23257_v15  ;;  %v7936_v33 = vsel %vm25677_vm9, %v7904_v31, 0.0  ;;  %vm25682_vm9 = vcmp.eq.s32.totalorder %v25681_v22, 1  ;;  %v7938_v0 = vsel %vm25684_vm8, %v7906_v62, 0.0  ;;  %v7907_v25 = vld [vmem:[%s18592_s30 + $0x119] sm:$0xff]  ;;  %v11728_v5 = vsel %vm25685_vm15, %v11696_v9, 0.0 }
 0x351   : > { %16826 = vmatprep.mubr.msk.f32.mxu0 %vm500_vm12, %v7934_v17  ;;  %v7937_v1 = vsel %vm25682_vm9, %v7905_v2, 0.0  ;;  %v18367_v17 = vld [vmem:[%s18592_s30 + $0x76] sm:$0xff]  ;;  %vm25687_vm9 = vcmp.eq.s32.totalorder %v25686_v21, 1  ;;  %vm25691_vm8 = vcmp.eq.s32.totalorder %v25690_v11, 1  ;;  %v18369_v13 = vld [vmem:[%s18592_s30 + $0x86] sm:$0xff] }
 0x352   : > { %17200 = vmatmul.mubr.msk.f32.gmra.mrb[34].mxu1 %vm500_vm12, %v11724_v24  ;;  %v5043_v35 = vpop.permute.xlu1 %5042  ;;  %v11729_v24 = vsel %vm25687_vm9, %v18367_v17, 0.0  ;;  %v25688_v31 = vld [vmem:[#allocation106_spill] sm:$0xff]  ;;  %v7940_v44 = vsel %vm25691_vm8, %v7908_v41, 0.0  ;;  %v11731_v2 = vsel %vm10474_vm13, %v18369_v13, 0.0  ;;  %v25698_v9 = vld [vmem:[#allocation167_spill] sm:$0xff]  ;;  %vm25700_vm13 = vcmp.eq.s32.totalorder %v21505_v20, 1 }
 0x353   : > { %5110 = vst.msk [vmem:[#allocation2 + $0xe8] sm:$0xff] %vm5080_vm11, %v5043_v35  ;;  %17202 = vmatprep.mubr.msk.f32.mxu1 %vm500_vm12, %v11725_v45  ;;  %v5041_v48 = vpop.permute.xlu0 %5040  ;;  %v7909_v45 = vld [vmem:[%s18592_s30 + $0x129] sm:$0xff]  ;;  %v25692_v34 = vld [vmem:[#allocation162_spill] sm:$0xff]  ;;  %v25701_v17 = vld [vmem:[#allocation23_spill] sm:$0xff]  ;;  %vm25705_vm8 = vcmp.eq.s32.totalorder %v21605_v54, 1 }
 0x354   : > { %16827 = vmatmul.mubr.msk.f32.gmra.mrb[84].mxu0 %vm500_vm12, %v7935_v60  ;;  %5109 = vst.msk [vmem:[#allocation2 + $0xe0] sm:$0xff] %vm5080_vm11, %v5041_v48  ;;  %vm25693_vm15 = vcmp.eq.s32.totalorder %v25692_v34, 1  ;;  %v7910_v48 = vld [vmem:[%s18592_s30 + $0x131] sm:$0xff]  ;;  %v7911_v43 = vld [vmem:[%s18592_s30 + $0x139] sm:$0xff]  ;;  %v18377_v54 = vld [vmem:[%s18592_s30 + $0xc6] sm:$0xff] }
 0x355   : > { %16829 = vmatprep.mubr.msk.f32.mxu0 %vm500_vm12, %v7936_v33  ;;  %v11730_v60 = vsel %vm25693_vm15, %v18368_v4, 0.0  ;;  %v7942_v28 = vsel %vm5333_vm0, %v7910_v48, 0.0  ;;  %v18372_v41 = vld [vmem:[%s18592_s30 + $0x9e] sm:$0xff]  ;;  %vm25702_vm0 = vcmp.eq.s32.totalorder %v25701_v17, 1  ;;  %vm25707_vm15 = vcmp.eq.s32.totalorder %v21658_v23, 1  ;;  %v18379_v23 = vld [vmem:[%s18592_s30 + $0xd6] sm:$0xff] }
 0x356   : > { %17203 = vmatmul.mubr.msk.f32.gmra.mrb[36].mxu1 %vm500_vm12, %v11726_v63  ;;  %v5047_v50 = vpop.permute.xlu1 %5046  ;;  %v25695_v63 = vld [vmem:[#allocation58_spill] sm:$0xff]  ;;  %v11734_v20 = vsel %vm25702_vm0, %v18372_v41, 0.0  ;;  %v23407_v11 = vld [vmem:[%s18592_s30 + $0x83] sm:$0xff]  ;;  %vm25711_vm0 = vcmp.eq.s32.totalorder %v21762_v36, 1  ;;  %v23454_v33 = vld [vmem:[%s18592_s30 + $0xab] sm:$0xff] }
 0x357   : > { %5112 = vst.msk [vmem:[#allocation2 + $0xf8] sm:$0xff] %vm5080_vm11, %v5047_v50  ;;  %17205 = vmatprep.mubr.msk.f32.mxu1 %vm500_vm12, %v11727_v59  ;;  %v5045_v40 = vpop.permute.xlu0 %5044  ;;  %vm25696_vm9 = vcmp.eq.s32.totalorder %v25695_v63, 1  ;;  %v18370_v59 = vld [vmem:[%s18592_s30 + $0x8e] sm:$0xff]  ;;  %v23436_v36 = vld [vmem:[%s18592_s30 + $0x9b] sm:$0xff]  ;;  %v23443_v48 = vld [vmem:[%s18592_s30 + $0xa3] sm:$0xff] }
 0x358   : > { %16830 = vmatmul.mubr.msk.f32.gmra.mrb[86].mxu0 %vm500_vm12, %v7937_v1  ;;  %5111 = vst.msk [vmem:[#allocation2 + $0xf0] sm:$0xff] %vm5080_vm11, %v5045_v40  ;;  %vm25689_vm11 = vcmp.eq.s32.totalorder %v25688_v31, 1  ;;  %v7941_v62 = vsel %vm25696_vm9, %v7909_v45, 0.0  ;;  %v7912_v1 = vld [vmem:[%s18592_s30 + $0x141] sm:$0xff]  ;;  %v18371_v40 = vld [vmem:[%s18592_s30 + $0x96] sm:$0xff]  ;;  %vm25708_vm9 = vcmp.eq.s32.totalorder %v21650_v58, 1 }
 0x359   : > { %16832 = vmatprep.mubr.msk.f32.mxu0 %vm500_vm12, %v7938_v0  ;;  %v7939_v35 = vsel %vm25689_vm11, %v7907_v25, 0.0  ;;  %vm25699_vm11 = vcmp.eq.s32.totalorder %v25698_v9, 1  ;;  %v11733_v49 = vsel %vm25700_vm13, %v18371_v40, 0.0  ;;  %v7943_v0 = vsel %vm5334_vm7, %v7911_v43, 0.0  ;;  %v18380_v58 = vld [vmem:[%s18592_s30 + $0xde] sm:$0xff]  ;;  %v23425_v45 = vld [vmem:[%s18592_s30 + $0x93] sm:$0xff] }
 0x35a   : > { %17206 = vmatmul.mubr.msk.f32.gmra.mrb[38].mxu1 %vm500_vm12, %v11728_v5  ;;  %v11732_v22 = vsel %vm25699_vm11, %v18370_v59, 0.0  ;;  %v7944_v25 = vsel %vm5335_vm3, %v7912_v1, 0.0  ;;  %v7913_v5 = vld [vmem:[%s18592_s30 + $0x149] sm:$0xff]  ;;  %vm25703_vm7 = vcmp.eq.s32.totalorder %v21549_v14, 1  ;;  %vm25704_vm3 = vcmp.eq.s32.totalorder %v21543_v52, 1  ;;  %v18375_v14 = vld [vmem:[%s18592_s30 + $0xb6] sm:$0xff] }
 0x35b   : > { %17208 = vmatprep.mubr.msk.f32.mxu1 %vm500_vm12, %v11729_v24  ;;  %v11735_v21 = vsel %vm25703_vm7, %v18373_v29, 0.0  ;;  %v7945_v24 = vsel %vm5336_vm4, %v7913_v5, 0.0  ;;  %v11736_v31 = vsel %vm25704_vm3, %v18374_v27, 0.0  ;;  %v11737_v38 = vsel %vm25705_vm8, %v18375_v14, 0.0  ;;  %v18376_v52 = vld [vmem:[%s18592_s30 + $0xbe] sm:$0xff]  ;;  %v18383_v34 = vld [vmem:[%s18592_s30 + $0xf6] sm:$0xff] }
 0x35c   : > { %16833 = vmatmul.mubr.msk.f32.gmra.mrb[88].mxu0 %vm500_vm12, %v7939_v35  ;;  %vm25706_vm4 = vcmp.eq.s32.totalorder %v21594_v30, 1  ;;  %v11739_v35 = vsel %vm25707_vm15, %v18377_v54, 0.0  ;;  %v18378_v30 = vld [vmem:[%s18592_s30 + $0xce] sm:$0xff]  ;;  %vm25709_vm11 = vcmp.eq.s32.totalorder %v21710_v19, 1  ;;  %vm25710_vm13 = vcmp.eq.s32.totalorder %v21701_v7, 1  ;;  %v23472_v43 = vld [vmem:[%s18592_s30 + $0xbb] sm:$0xff] }
 0x35d   : > { %16835 = vmatprep.mubr.msk.f32.mxu0 %vm500_vm12, %v7940_v44  ;;  %v23418_v19 = vld [vmem:[%s18592_s30 + $0x8b] sm:$0xff]  ;;  %vm25712_vm7 = vcmp.eq.s32.totalorder %v21753_v3, 1  ;;  %vm25713_vm3 = vcmp.eq.s32.totalorder %v22020_v47, 1  ;;  %v18384_v3 = vld [vmem:[%s18592_s30 + $0xfe] sm:$0xff]  ;;  %vm25714_vm8 = vcmp.eq.s32.totalorder %v22086_v37, 1  ;;  %v18387_v59 = vld [vmem:[%s18592_s30 + $0x116] sm:$0xff] }
 0x35e   : > { %17209 = vmatmul.mubr.msk.f32.gmra.mrb[40].mxu1 %vm500_vm12, %v11730_v60  ;;  %v18382_v7 = vld [vmem:[%s18592_s30 + $0xee] sm:$0xff]  ;;  %v11745_v60 = vsel %vm25713_vm3, %v18383_v34, 0.0  ;;  %v11746_v13 = vsel %vm10489_vm10, %v18384_v3, 0.0  ;;  %vm25716_vm15 = vcmp.eq.s32.totalorder %v22166_v6, 1  ;;  %v11719_v1 = vld [vmem:[%s18592_s30 + $0x126] sm:$0xff]  ;;  %v18388_v40 = vld [vmem:[%s18592_s30 + $0x11e] sm:$0xff] }
 0x35f   : > { %17211 = vmatprep.mubr.msk.f32.mxu1 %vm500_vm12, %v11731_v2  ;;  %v11744_v4 = vsel %vm25712_vm7, %v18382_v7, 0.0  ;;  %v18385_v2 = vld [vmem:[%s18592_s30 + $0x106] sm:$0xff]  ;;  %v18386_v50 = vld [vmem:[%s18592_s30 + $0x10e] sm:$0xff]  ;;  %v11749_v9 = vsel %vm25716_vm15, %v18387_v59, 0.0  ;;  %v23552_v7 = vld [vmem:[%s18592_s30 + $0xfb] sm:$0xff] }
 0x360   : > { %16836 = vmatmul.mubr.msk.f32.gmra.mrb[90].mxu0 %vm500_vm12, %v7941_v62  ;;  %v11747_v63 = vsel %vm25714_vm8, %v18385_v2, 0.0  ;;  %v23461_v62 = vld [vmem:[%s18592_s30 + $0xb3] sm:$0xff]  ;;  %v25718_v5 = vld [vmem:[#allocation79_spill] sm:$0xff]  ;;  %v12109_v27 = vld [vmem:[%s18592_s30 + $0x68] sm:$0xff] }
 0x361   : > { %16838 = vmatprep.mubr.msk.f32.mxu0 %vm500_vm12, %v7942_v28  ;;  %v23498_v17 = vld [vmem:[%s18592_s30 + $0xd3] sm:$0xff]  ;;  %v25720_v29 = vld [vmem:[#allocation87_spill] sm:$0xff] }
 0x362   : > { %17212 = vmatmul.mubr.msk.f32.gmra.mrb[42].mxu1 %vm500_vm12, %v11732_v22  ;;  %v23479_v22 = vld [vmem:[%s18592_s30 + $0xc3] sm:$0xff]  ;;  %v12114_v3 = vld [vmem:[%s18592_s30 + $0x90] sm:$0xff] }
 0x363   : > { %17214 = vmatprep.mubr.msk.f32.mxu1 %vm500_vm12, %v11733_v49  ;;  %v23558_v34 = vld [vmem:[%s18592_s30 + $0x103] sm:$0xff]  ;;  %v23576_v59 = vld [vmem:[%s18592_s30 + $0x113] sm:$0xff] }
 0x364   : > { %16839 = vmatmul.mubr.msk.f32.gmra.mrb[92].mxu0 %vm500_vm12, %v7943_v0  ;;  %v23491_v0 = vld [vmem:[%s18592_s30 + $0xcb] sm:$0xff] }
 0x365   : > { %16841 = vmatprep.mubr.msk.f32.mxu0 %vm500_vm12, %v7944_v25  ;;  %v11720_v25 = vld [vmem:[%s18592_s30 + $0x12e] sm:$0xff] }
 0x366   : > { %17215 = vmatmul.mubr.msk.f32.gmra.mrb[44].mxu1 %vm500_vm12, %v11734_v20  ;;  %v12108_v20 = vld [vmem:[%s18592_s30 + $0x60] sm:$0xff] }
 0x367   : > { %17217 = vmatprep.mubr.msk.f32.mxu1 %vm500_vm12, %v11735_v21 }
 0x368   : > { %16842 = vmatmul.mubr.msk.f32.gmra.mrb[94].mxu0 %vm500_vm12, %v7945_v24  ;;  %v23509_v24 = vld [vmem:[%s18592_s30 + $0xdb] sm:$0xff] }
 0x369   : > { %16846 = vmatprep.mubr.msk.f32.mxu0 %vm500_vm12, %v23019_v46  ;;  %v11738_v46 = vsel %vm25706_vm4, %v18376_v52, 0.0  ;;  %vm25715_vm4 = vcmp.eq.s32.totalorder %v22108_v42, 1  ;;  %v12110_v52 = vld [vmem:[%s18592_s30 + $0x70] sm:$0xff] }
 0x36a   : > { %17218 = vmatmul.mubr.msk.f32.gmra.mrb[46].mxu1 %vm500_vm12, %v11736_v31  ;;  %v11748_v28 = vsel %vm25715_vm4, %v18386_v50, 0.0  ;;  %v25722_v31 = vld [vmem:[#allocation81_spill] sm:$0xff] }
 0x36b   : > { %17220 = vmatprep.mubr.msk.f32.mxu1 %vm500_vm12, %v11737_v38  ;;  %v23516_v38 = vld [vmem:[%s18592_s30 + $0xe3] sm:$0xff]  ;;  %v25734_v50 = vld [vmem:[#allocation109_spill] sm:$0xff] }
 0x36c   : > { %16847 = vmatmul.mubr.msk.f32.vlgmr.msra.gmra.mrb[64].mxu0 %vm500_vm12, %v23030_v8  ;;  %v23400_v8 = vld [vmem:[%s18592_s30 + $0x7b] sm:$0xff] }
 0x36d   : > { %16849 = vmatprep.mubr.msk.f32.mxu0 %vm500_vm12, %v23037_v55  ;;  %16895 = vmatpush3.msra.mxu0 %v23125_v53  ;;  %v11740_v55 = vsel %vm25708_vm9, %v18378_v30, 0.0  ;;  %v11741_v53 = vsel %vm25709_vm11, %v18379_v23, 0.0  ;;  %vm25717_vm9 = vcmp.eq.s32.totalorder %v22183_v32, 1  ;;  %vm25719_vm11 = vcmp.eq.s32.totalorder %v25718_v5, 1  ;;  %v23532_v30 = vld [vmem:[%s24370_s8 + $0x40] sm:$0xff] }
 0x36e   : > { %17221 = vmatmul.mubr.msk.f32.gmra.mrb[48].mxu1 %vm500_vm12, %v11738_v46  ;;  %v11750_v49 = vsel %vm25717_vm9, %v18388_v40, 0.0  ;;  %v11751_v41 = vsel %vm25719_vm11, %v11719_v1, 0.0  ;;  %v25724_v46 = vld [vmem:[#allocation80_spill] sm:$0xff]  ;;  %vm25735_vm9 = vcmp.eq.s32.totalorder %v25734_v50, 1  ;;  %v12116_v1 = vld [vmem:[%s18592_s30 + $0xa0] sm:$0xff]  ;;  %v25736_v40 = vld [vmem:[#allocation54_spill] sm:$0xff] }
 0x36f   : > { %17223 = vmatprep.mubr.msk.f32.mxu1 %vm500_vm12, %v11739_v35  ;;  %vm25725_vm7 = vcmp.eq.s32.totalorder %v25724_v46, 1  ;;  %v23527_v35 = vld [vmem:[%s18592_s30 + $0xeb] sm:$0xff]  ;;  %vm25737_vm11 = vcmp.eq.s32.totalorder %v25736_v40, 1  ;;  %v25748_v50 = vld [vmem:[#allocation70_spill] sm:$0xff] }
 0x370   : > { %16850 = vmatmul.mubr.msk.f32.gmra.mrb[66].mxu0 %vm500_vm12, %v23048_v61  ;;  %v18381_v61 = vld [vmem:[%s18592_s30 + $0xe6] sm:$0xff]  ;;  %v12141_v54 = vsel %vm25725_vm7, %v12109_v27, 0.0 }
 0x371   : > { %16852 = vmatprep.mubr.msk.f32.mxu0 %vm500_vm12, %v23055_v18  ;;  %v11742_v18 = vsel %vm25710_vm13, %v18380_v58, 0.0  ;;  %v11743_v44 = vsel %vm25711_vm0, %v18381_v61, 0.0  ;;  %vm25721_vm13 = vcmp.eq.s32.totalorder %v25720_v29, 1  ;;  %vm25723_vm0 = vcmp.eq.s32.totalorder %v25722_v31, 1  ;;  %v12111_v58 = vld [vmem:[%s18592_s30 + $0x78] sm:$0xff]  ;;  %v25728_v61 = vld [vmem:[#allocation89_spill] sm:$0xff] }
 0x372   : > { %17224 = vmatmul.mubr.msk.f32.gmra.mrb[50].mxu1 %vm500_vm12, %v11740_v55  ;;  %v11752_v21 = vsel %vm25721_vm13, %v11720_v25, 0.0  ;;  %v12140_v14 = vsel %vm25723_vm0, %v12108_v20, 0.0  ;;  %v25726_v55 = vld [vmem:[#allocation90_spill] sm:$0xff]  ;;  %vm25729_vm8 = vcmp.eq.s32.totalorder %v25728_v61, 1  ;;  %v12117_v27 = vld [vmem:[%s18592_s30 + $0xa8] sm:$0xff]  ;;  %v12118_v31 = vld [vmem:[%s18592_s30 + $0xb0] sm:$0xff] }
 0x373   : > { %17226 = vmatprep.mubr.msk.f32.mxu1 %vm500_vm12, %v11741_v53  ;;  %vm25727_vm3 = vcmp.eq.s32.totalorder %v25726_v55, 1  ;;  %v23538_v53 = vld [vmem:[%s18592_s30 + $0xf3] sm:$0xff]  ;;  %v23588_v25 = vld [vmem:[%s18592_s30 + $0x11b] sm:$0xff]  ;;  %v23606_v46 = vld [vmem:[%s18592_s30 + $0x12b] sm:$0xff] }
 0x374   : > { %16853 = vmatmul.mubr.msk.f32.gmra.mrb[68].mxu0 %vm500_vm12, %v23400_v8  ;;  %v12142_v23 = vsel %vm25727_vm3, %v12110_v52, 0.0  ;;  %v25744_v61 = vld [vmem:[#allocation59_spill] sm:$0xff]  ;;  %v25750_v40 = vld [vmem:[#allocation72_spill] sm:$0xff] }
 0x375   : > { %16855 = vmatprep.mubr.msk.f32.mxu0 %vm500_vm12, %v23407_v11  ;;  %vm25745_vm3 = vcmp.eq.s32.totalorder %v25744_v61, 1  ;;  %v12125_v61 = vld [vmem:[%s18592_s30 + $0xe8] sm:$0xff] }
 0x376   : > { %17227 = vmatmul.mubr.msk.f32.gmra.mrb[52].mxu1 %vm500_vm12, %v11742_v18  ;;  %v12112_v18 = vld [vmem:[%s18592_s30 + $0x80] sm:$0xff] }
 0x377   : > { %17229 = vmatprep.mubr.msk.f32.mxu1 %vm500_vm12, %v11743_v44  ;;  %v12143_v44 = vsel %vm25729_vm8, %v12111_v58, 0.0  ;;  %v12119_v58 = vld [vmem:[%s18592_s30 + $0xb8] sm:$0xff] }
 0x378   : > { %16856 = vmatmul.mubr.msk.f32.gmra.mrb[70].mxu0 %vm500_vm12, %v23418_v19 }
 0x379   : > { %16858 = vmatprep.mubr.msk.f32.mxu0 %vm500_vm12, %v23425_v45 }
 0x37a   : > { %17230 = vmatmul.mubr.msk.f32.gmra.mrb[54].mxu1 %vm500_vm12, %v11744_v4 }
 0x37b   : > { %17232 = vmatprep.mubr.msk.f32.mxu1 %vm500_vm12, %v11745_v60  ;;  %v12113_v60 = vld [vmem:[%s18592_s30 + $0x88] sm:$0xff] }
 0x37c   : > { %16859 = vmatmul.mubr.msk.f32.gmra.mrb[72].mxu0 %vm500_vm12, %v23436_v36 }
 0x37d   : > { %16861 = vmatprep.mubr.msk.f32.mxu0 %vm500_vm12, %v23443_v48 }
 0x37e   : > { %17233 = vmatmul.mubr.msk.f32.gmra.mrb[56].mxu1 %vm500_vm12, %v11746_v13  ;;  %v25732_v13 = vld [vmem:[#allocation97_spill] sm:$0xff] }
 0x37f   : > { %17235 = vmatprep.mubr.msk.f32.mxu1 %vm500_vm12, %v11747_v63  ;;  %vm25733_vm15 = vcmp.eq.s32.totalorder %v25732_v13, 1  ;;  %v23570_v63 = vld [vmem:[%s18592_s30 + $0x10b] sm:$0xff] }
 0x380   : > { %16862 = vmatmul.mubr.msk.f32.gmra.mrb[74].mxu0 %vm500_vm12, %v23454_v33  ;;  %v12145_v2 = vsel %vm25733_vm15, %v12113_v60, 0.0  ;;  %v12121_v13 = vld [vmem:[%s18592_s30 + $0xc8] sm:$0xff]  ;;  %vm25751_vm15 = vcmp.eq.s32.totalorder %v25750_v40, 1  ;;  %v8692_v40 = vld [vmem:[%s18592_s30 + $0x75] sm:$0xff] }
 0x381   : > { %16864 = vmatprep.mubr.msk.f32.mxu0 %vm500_vm12, %v23461_v62 }
 0x382   : > { %17236 = vmatmul.mubr.msk.f32.gmra.mrb[58].mxu1 %vm500_vm12, %v11748_v28  ;;  %v12146_v28 = vsel %vm25735_vm9, %v12114_v3, 0.0  ;;  %v23630_v3 = vld [vmem:[%s18592_s30 + $0x143] sm:$0xff] }
 0x383   : > { %17238 = vmatprep.mubr.msk.f32.mxu1 %vm500_vm12, %v11749_v9  ;;  %v12115_v9 = vld [vmem:[%s18592_s30 + $0x98] sm:$0xff] }
 0x384   : > { %16865 = vmatmul.mubr.msk.f32.gmra.mrb[76].mxu0 %vm500_vm12, %v23472_v43 }
 0x385   : > { %16867 = vmatprep.mubr.msk.f32.mxu0 %vm500_vm12, %v23479_v22 }
 0x386   : > { %17239 = vmatmul.mubr.msk.f32.gmra.mrb[60].mxu1 %vm500_vm12, %v11750_v49  ;;  %v12147_v49 = vsel %vm25737_vm11, %v12115_v9, 0.0  ;;  %v23642_v9 = vld [vmem:[%s18592_s30 + $0x14b] sm:$0xff] }
 0x387   : > { %17241 = vmatprep.mubr.msk.f32.mxu1 %vm500_vm12, %v11751_v41  ;;  %v25738_v41 = vld [vmem:[#allocation116_spill] sm:$0xff] }
 0x388   : > { %16868 = vmatmul.mubr.msk.f32.gmra.mrb[78].mxu0 %vm500_vm12, %v23491_v0  ;;  %vm25739_vm13 = vcmp.eq.s32.totalorder %v25738_v41, 1  ;;  %v12123_v41 = vld [vmem:[%s18592_s30 + $0xd8] sm:$0xff] }
 0x389   : > { %16870 = vmatprep.mubr.msk.f32.mxu0 %vm500_vm12, %v23498_v17  ;;  %v12148_v20 = vsel %vm25739_vm13, %v12116_v1, 0.0  ;;  %v8688_v1 = vld [vmem:[%s18592_s30 + $0x55] sm:$0xff] }
 0x38a   : > { %17242 = vmatmul.mubr.msk.f32.gmra.mrb[62].mxu1 %vm500_vm12, %v11752_v21  ;;  %v23594_v21 = vld [vmem:[%s18592_s30 + $0x123] sm:$0xff] }
 0x38b   : > { %17246 = vmatprep.mubr.msk.f32.mxu1 %vm500_vm12, %v12140_v14  ;;  %v25740_v14 = vld [vmem:[#allocation115_spill] sm:$0xff] }
 0x38c   : > { %16871 = vmatmul.mubr.msk.f32.gmra.mrb[80].mxu0 %vm500_vm12, %v23509_v24  ;;  %vm25741_vm0 = vcmp.eq.s32.totalorder %v25740_v14, 1 }
 0x38d   : > { %16873 = vmatprep.mubr.msk.f32.mxu0 %vm500_vm12, %v23516_v38  ;;  %v12149_v52 = vsel %vm25741_vm0, %v12117_v27, 0.0  ;;  %v8689_v27 = vld [vmem:[%s18592_s30 + $0x5d] sm:$0xff] }
 0x38e   : > { %17247 = vmatmul.mubr.msk.f32.vlgmr.msra.gmra.mrb[32].mxu1 %vm500_vm12, %v12141_v54  ;;  %v25742_v54 = vld [vmem:[#allocation21_spill] sm:$0xff] }
 0x38f   : > { %17295 = vmatpush3.msra.mxu1 %v23257_v15  ;;  %17249 = vmatprep.mubr.msk.f32.mxu1 %vm500_vm12, %v12142_v23  ;;  %v25730_v15 = vld [vmem:[#allocation98_spill] sm:$0xff]  ;;  %vm25743_vm7 = vcmp.eq.s32.totalorder %v25742_v54, 1 }
 0x390   : > { %16874 = vmatmul.mubr.msk.f32.gmra.mrb[82].mxu0 %vm500_vm12, %v23527_v35  ;;  %17344 = vmatprep.subr.mxu1 %v23532_v30  ;;  %vm25731_vm4 = vcmp.eq.s32.totalorder %v25730_v15, 1  ;;  %v12150_v55 = vsel %vm25743_vm7, %v12118_v31, 0.0  ;;  %v23612_v23 = vld [vmem:[%s18592_s30 + $0x133] sm:$0xff]  ;;  %v23624_v15 = vld [vmem:[%s18592_s30 + $0x13b] sm:$0xff]  ;;  %v25752_v31 = vld [vmem:[#allocation136_spill] sm:$0xff] }
 0x391   : > { %16876 = vmatprep.mubr.msk.f32.mxu0 %vm500_vm12, %v23538_v53  ;;  %v12144_v4 = vsel %vm25731_vm4, %v12112_v18, 0.0  ;;  %v12120_v18 = vld [vmem:[%s18592_s30 + $0xc0] sm:$0xff]  ;;  %vm25749_vm4 = vcmp.eq.s32.totalorder %v25748_v50, 1  ;;  %vm25753_vm9 = vcmp.eq.s32.totalorder %v25752_v31, 1  ;;  %v8691_v50 = vld [vmem:[%s18592_s30 + $0x6d] sm:$0xff] }
 0x392   : > { %17250 = vmatmul.mubr.msk.f32.gmra.mrb[34].mxu1 %vm500_vm12, %v12143_v44  ;;  %v12151_v44 = vsel %vm25745_vm3, %v12119_v58, 0.0  ;;  %v8720_v14 = vsel %vm25753_vm9, %v8688_v1, 0.0  ;;  %v25756_v58 = vld [vmem:[#allocation4_spill] sm:$0xff] }
 0x393   : > { %17252 = vmatprep.mubr.msk.f32.mxu1 %vm500_vm12, %v12144_v4  ;;  %v25746_v4 = vld [vmem:[#allocation64_spill] sm:$0xff]  ;;  %vm25757_vm13 = vcmp.eq.s32.totalorder %v25756_v58, 1  ;;  %v25770_v58 = vld [vmem:[#allocation5_spill] sm:$0xff] }
 0x394   : > { %16877 = vmatmul.mubr.msk.f32.gmra.mrb[84].mxu0 %vm500_vm12, %v23552_v7  ;;  %vm25747_vm8 = vcmp.eq.s32.totalorder %v25746_v4, 1  ;;  %vm25771_vm9 = vcmp.eq.s32.totalorder %v25770_v58, 1  ;;  %v25784_v58 = vld [vmem:[#allocation161_spill] sm:$0xff] }
 0x395   : > { %16879 = vmatprep.mubr.msk.f32.mxu0 %vm500_vm12, %v23558_v34  ;;  %v12152_v60 = vsel %vm25747_vm8, %v12120_v18, 0.0 }
 0x396   : > { %17253 = vmatmul.mubr.msk.f32.gmra.mrb[36].mxu1 %vm500_vm12, %v12145_v2  ;;  %v12122_v2 = vld [vmem:[%s18592_s30 + $0xd0] sm:$0xff] }
 0x397   : > { %17255 = vmatprep.mubr.msk.f32.mxu1 %vm500_vm12, %v12146_v28  ;;  %v12153_v28 = vsel %vm25749_vm4, %v12121_v13, 0.0  ;;  %v25760_v13 = vld [vmem:[#allocation142_spill] sm:$0xff] }
 0x398   : > { %16880 = vmatmul.mubr.msk.f32.gmra.mrb[86].mxu0 %vm500_vm12, %v23570_v63  ;;  %vm25761_vm7 = vcmp.eq.s32.totalorder %v25760_v13, 1  ;;  %v25774_v13 = vld [vmem:[#allocation148_spill] sm:$0xff] }
 0x399   : > { %16882 = vmatprep.mubr.msk.f32.mxu0 %vm500_vm12, %v23576_v59 }
 0x39a   : > { %17256 = vmatmul.mubr.msk.f32.gmra.mrb[38].mxu1 %vm500_vm12, %v12147_v49  ;;  %v12154_v49 = vsel %vm25751_vm15, %v12122_v2, 0.0 }
 0x39b   : > { %17258 = vmatprep.mubr.msk.f32.mxu1 %vm500_vm12, %v12148_v20  ;;  %v12124_v20 = vld [vmem:[%s18592_s30 + $0xe0] sm:$0xff] }
 0x39c   : > { %16883 = vmatmul.mubr.msk.f32.gmra.mrb[88].mxu0 %vm500_vm12, %v23588_v25  ;;  %v12156_v18 = vsel %vm25757_vm13, %v12124_v20, 0.0  ;;  %v12127_v20 = vld [vmem:[%s18592_s30 + $0xf8] sm:$0xff]  ;;  %vm25775_vm13 = vcmp.eq.s32.totalorder %v25774_v13, 1  ;;  %v25788_v13 = vld [vmem:[#allocation15_spill] sm:$0xff] }
 0x39d   : > { %16885 = vmatprep.mubr.msk.f32.mxu0 %vm500_vm12, %v23594_v21 }
 0x39e   : > { %17259 = vmatmul.mubr.msk.f32.gmra.mrb[40].mxu1 %vm500_vm12, %v12149_v52  ;;  %v25754_v52 = vld [vmem:[#allocation68_spill] sm:$0xff] }
 0x39f   : > { %17261 = vmatprep.mubr.msk.f32.mxu1 %vm500_vm12, %v12150_v55  ;;  %vm25755_vm11 = vcmp.eq.s32.totalorder %v25754_v52, 1  ;;  %v8690_v55 = vld [vmem:[%s18592_s30 + $0x65] sm:$0xff]  ;;  %v25768_v52 = vld [vmem:[#allocation149_spill] sm:$0xff] }
 0x3a0   : > { %16886 = vmatmul.mubr.msk.f32.gmra.mrb[90].mxu0 %vm500_vm12, %v23606_v46  ;;  %v12155_v54 = vsel %vm25755_vm11, %v12123_v41, 0.0  ;;  %v8722_v2 = vsel %vm25761_vm7, %v8690_v55, 0.0  ;;  %vm25769_vm15 = vcmp.eq.s32.totalorder %v25768_v52, 1  ;;  %v8693_v55 = vld [vmem:[%s18592_s30 + $0x7d] sm:$0xff] }
 0x3a1   : > { %16888 = vmatprep.mubr.msk.f32.mxu0 %vm500_vm12, %v23612_v23  ;;  %v25782_v52 = vld [vmem:[#allocation154_spill] sm:$0xff] }
 0x3a2   : > { %17262 = vmatmul.mubr.msk.f32.gmra.mrb[42].mxu1 %vm500_vm12, %v12151_v44  ;;  %v25758_v44 = vld [vmem:[#allocation135_spill] sm:$0xff] }
 0x3a3   : > { %17264 = vmatprep.mubr.msk.f32.mxu1 %vm500_vm12, %v12152_v60  ;;  %vm25759_vm0 = vcmp.eq.s32.totalorder %v25758_v44, 1  ;;  %v12126_v60 = vld [vmem:[%s18592_s30 + $0xf0] sm:$0xff]  ;;  %v25772_v44 = vld [vmem:[#allocation120_spill] sm:$0xff] }
 0x3a4   : > { %16889 = vmatmul.mubr.msk.f32.gmra.mrb[92].mxu0 %vm500_vm12, %v23624_v15  ;;  %v8721_v4 = vsel %vm25759_vm0, %v8689_v27, 0.0  ;;  %v25766_v27 = vld [vmem:[#allocation141_spill] sm:$0xff]  ;;  %vm25773_vm11 = vcmp.eq.s32.totalorder %v25772_v44, 1  ;;  %v25786_v44 = vld [vmem:[#allocation14_spill] sm:$0xff] }
 0x3a5   : > { %16891 = vmatprep.mubr.msk.f32.mxu0 %vm500_vm12, %v23630_v3  ;;  %vm25767_vm4 = vcmp.eq.s32.totalorder %v25766_v27, 1  ;;  %v25780_v27 = vld [vmem:[#allocation48_spill] sm:$0xff] }
 0x3a6   : > { %17265 = vmatmul.mubr.msk.f32.gmra.mrb[44].mxu1 %vm500_vm12, %v12153_v28  ;;  %v25762_v28 = vld [vmem:[#allocation75_spill] sm:$0xff]  ;;  %v8723_v31 = vsel %vm25767_vm4, %v8691_v50, 0.0  ;;  %v12130_v50 = vld [vmem:[%s18592_s30 + $0x110] sm:$0xff]  ;;  %vm25785_vm4 = vcmp.eq.s32.totalorder %v25784_v58, 1 }
 0x3a7   : > { %17267 = vmatprep.mubr.msk.f32.mxu1 %vm500_vm12, %v12154_v49  ;;  %vm25763_vm3 = vcmp.eq.s32.totalorder %v25762_v28, 1  ;;  %v25764_v49 = vld [vmem:[#allocation8_spill] sm:$0xff]  ;;  %v25776_v28 = vld [vmem:[#allocation155_spill] sm:$0xff]  ;;  %v25797_v58 = vld [vmem:[#allocation165_spill] sm:$0xff] }
 0x3a8   : > { %16892 = vmatmul.mubr.msk.f32.gmra.mrb[94].mxu0 %vm500_vm12, %v23642_v9  ;;  %v12157_v1 = vsel %vm25763_vm3, %v12125_v61, 0.0  ;;  %vm25765_vm8 = vcmp.eq.s32.totalorder %v25764_v49, 1  ;;  %v8694_v61 = vld [vmem:[%s18592_s30 + $0x85] sm:$0xff]  ;;  %vm25777_vm0 = vcmp.eq.s32.totalorder %v25776_v28, 1  ;;  %vm25781_vm3 = vcmp.eq.s32.totalorder %v25780_v27, 1  ;;  %v25794_v27 = vld [vmem:[#allocation105_spill] sm:$0xff] }
 0x3a9   : > { %16896 = vmatprep.mubr.msk.f32.mxu0 %vm500_vm12, %v8720_v14  ;;  %v12158_v41 = vsel %vm25765_vm8, %v12126_v60, 0.0  ;;  %v12128_v14 = vld [vmem:[%s18592_s30 + $0x100] sm:$0xff]  ;;  %v12129_v60 = vld [vmem:[%s18592_s30 + $0x108] sm:$0xff]  ;;  %vm25783_vm8 = vcmp.eq.s32.totalorder %v25782_v52, 1  ;;  %v8704_v52 = vld [vmem:[%s18592_s30 + $0xd5] sm:$0xff] }
 0x3aa   : > { %17268 = vmatmul.mubr.msk.f32.gmra.mrb[46].mxu1 %vm500_vm12, %v12155_v54  ;;  %v8724_v54 = vsel %vm25769_vm15, %v8692_v40, 0.0  ;;  %v8695_v40 = vld [vmem:[%s18592_s30 + $0x8d] sm:$0xff]  ;;  %v25778_v49 = vld [vmem:[#allocation119_spill] sm:$0xff]  ;;  %vm25787_vm15 = vcmp.eq.s32.totalorder %v25786_v44, 1 }
 0x3ab   : > { %17270 = vmatprep.mubr.msk.f32.mxu1 %vm500_vm12, %v12156_v18  ;;  %v12159_v18 = vsel %vm25771_vm9, %v12127_v20, 0.0  ;;  %vm25779_vm7 = vcmp.eq.s32.totalorder %v25778_v49, 1  ;;  %v8696_v20 = vld [vmem:[%s18592_s30 + $0x95] sm:$0xff]  ;;  %vm25789_vm9 = vcmp.eq.s32.totalorder %v25788_v13, 1  ;;  %v25790_v28 = vld [vmem:[#allocation160_spill] sm:$0xff] }
 0x3ac   : > { %16897 = vmatmul.mubr.msk.f32.vlgmr.msra.gmra.mrb[64].mxu0 %vm500_vm12, %v8721_v4  ;;  %v12160_v4 = vsel %vm25773_vm11, %v12128_v14, 0.0  ;;  %v12131_v14 = vld [vmem:[%s18592_s30 + $0x118] sm:$0xff]  ;;  %vm25791_vm11 = vcmp.eq.s32.totalorder %v25790_v28, 1 }
 0x3ad   : > { %16899 = vmatprep.mubr.msk.f32.mxu0 %vm500_vm12, %v8722_v2  ;;  %v8725_v2 = vsel %vm25775_vm13, %v8693_v55, 0.0  ;;  %v12132_v55 = vld [vmem:[%s18592_s30 + $0x120] sm:$0xff]  ;;  %v25792_v49 = vld [vmem:[#allocation166_spill] sm:$0xff] }
 0x3ae   : > { %17271 = vmatmul.mubr.msk.f32.gmra.mrb[48].mxu1 %vm500_vm12, %v12157_v1  ;;  %v8726_v1 = vsel %vm25777_vm0, %v8694_v61, 0.0  ;;  %v8697_v61 = vld [vmem:[%s18592_s30 + $0x9d] sm:$0xff]  ;;  %vm25793_vm13 = vcmp.eq.s32.totalorder %v25792_v49, 1  ;;  %vm25795_vm0 = vcmp.eq.s32.totalorder %v25794_v27, 1  ;;  %v8703_v27 = vld [vmem:[%s18592_s30 + $0xcd] sm:$0xff] }
 0x3af   : > { %17273 = vmatprep.mubr.msk.f32.mxu1 %vm500_vm12, %v12158_v41  ;;  %v12161_v41 = vsel %vm25779_vm7, %v12129_v60, 0.0  ;;  %v8698_v60 = vld [vmem:[%s18592_s30 + $0xa5] sm:$0xff]  ;;  %vm25798_vm7 = vcmp.eq.s32.totalorder %v25797_v58, 1  ;;  %v12139_v58 = vld [vmem:[%s18592_s30 + $0x158] sm:$0xff] }
 0x3b0   : > { %16900 = vmatmul.mubr.msk.f32.gmra.mrb[66].mxu0 %vm500_vm12, %v8723_v31  ;;  %v12162_v31 = vsel %vm25781_vm3, %v12130_v50, 0.0  ;;  %v12133_v50 = vld [vmem:[%s18592_s30 + $0x128] sm:$0xff]  ;;  %vm25799_vm3 = vcmp.eq.s32.totalorder %v25578_v39, 1  ;;  %v12138_v39 = vld [vmem:[%s18592_s30 + $0x150] sm:$0xff] }
 0x3b1   : > { %16902 = vmatprep.mubr.msk.f32.mxu0 %vm500_vm12, %v8724_v54  ;;  %v8727_v54 = vsel %vm25783_vm8, %v8695_v40, 0.0  ;;  %v12134_v40 = vld [vmem:[%s18592_s30 + $0x130] sm:$0xff] }
 0x3b2   : > { %17274 = vmatmul.mubr.msk.f32.gmra.mrb[50].mxu1 %vm500_vm12, %v12159_v18  ;;  %v8728_v18 = vsel %vm25785_vm4, %v8696_v20, 0.0  ;;  %v8699_v20 = vld [vmem:[%s18592_s30 + $0xad] sm:$0xff] }
 0x3b3   : > { %17276 = vmatprep.mubr.msk.f32.mxu1 %vm500_vm12, %v12160_v4  ;;  %v12163_v4 = vsel %vm25787_vm15, %v12131_v14, 0.0  ;;  %v8700_v14 = vld [vmem:[%s18592_s30 + $0xb5] sm:$0xff] }
 0x3b4   : > { %16903 = vmatmul.mubr.msk.f32.gmra.mrb[68].mxu0 %vm500_vm12, %v8725_v2  ;;  %v12164_v2 = vsel %vm25789_vm9, %v12132_v55, 0.0  ;;  %v12135_v55 = vld [vmem:[%s18592_s30 + $0x138] sm:$0xff]  ;;  %v8732_v44 = vsel %vm25799_vm3, %v8700_v14, 0.0 }
 0x3b5   : > { %16905 = vmatprep.mubr.msk.f32.mxu0 %vm500_vm12, %v8726_v1  ;;  %v8729_v1 = vsel %vm25791_vm11, %v8697_v61, 0.0  ;;  %v12136_v61 = vld [vmem:[%s18592_s30 + $0x140] sm:$0xff]  ;;  %v12167_v13 = vsel %vm9558_vm6, %v12135_v55, 0.0  ;;  %v12170_v55 = vsel %vm9561_vm5, %v12138_v39, 0.0 }
 0x3b6   : > { %17277 = vmatmul.mubr.msk.f32.gmra.mrb[52].mxu1 %vm500_vm12, %v12161_v41  ;;  %v8730_v41 = vsel %vm25793_vm13, %v8698_v60, 0.0  ;;  %v12168_v28 = vsel %vm9559_vm1, %v12136_v61, 0.0  ;;  %v8705_v60 = vld [vmem:[%s18592_s30 + $0xdd] sm:$0xff] }
 0x3b7   : > { %17279 = vmatprep.mubr.msk.f32.mxu1 %vm500_vm12, %v12162_v31  ;;  %v12165_v31 = vsel %vm25795_vm0, %v12133_v50, 0.0  ;;  %v12171_v50 = vsel %vm9562_vm14, %v12139_v58, 0.0  ;;  %v25816_v39 = vld [vmem:[#allocation179_spill] sm:$0xff] }
 0x3b8   : > { %16906 = vmatmul.mubr.msk.f32.gmra.mrb[70].mxu0 %vm500_vm12, %v8727_v54  ;;  %v12166_v54 = vsel %vm9557_vm2, %v12134_v40, 0.0  ;;  %v25802_v40 = vld [vmem:[#allocation171_spill] sm:$0xff]  ;;  %vm25817_vm15 = vcmp.eq.s32.totalorder %v25816_v39, 1  ;;  %v8716_v39 = vld [vmem:[%s18592_s30 + $0x135] sm:$0xff] }
 0x3b9   : > { %16908 = vmatprep.mubr.msk.f32.mxu0 %vm500_vm12, %v8728_v18  ;;  %v8731_v18 = vsel %vm25798_vm7, %v8699_v20, 0.0  ;;  %vm25803_vm2 = vcmp.eq.s32.totalorder %v25802_v40, 1  ;;  %v8709_v58 = vld [vmem:[%s18592_s30 + $0xfd] sm:$0xff] }
 0x3ba   : > { %17280 = vmatmul.mubr.msk.f32.gmra.mrb[54].mxu1 %vm500_vm12, %v12163_v4  ;;  %v8701_v4 = vld [vmem:[%s18592_s30 + $0xbd] sm:$0xff] }
 0x3bb   : > { %17282 = vmatprep.mubr.msk.f32.mxu1 %vm500_vm12, %v12164_v2  ;;  %v8702_v2 = vld [vmem:[%s18592_s30 + $0xc5] sm:$0xff]  ;;  %v8733_v49 = vsel %vm25803_vm2, %v8701_v4, 0.0  ;;  %vm25832_vm2 = vcmp.eq.s32.totalorder %v25612_v10, 1 }
 0x3bc   : > { %16909 = vmatmul.mubr.msk.f32.gmra.mrb[72].mxu0 %vm500_vm12, %v8729_v1  ;;  %v12137_v1 = vld [vmem:[%s18592_s30 + $0x148] sm:$0xff] }
 0x3bd   : > { %16911 = vmatprep.mubr.msk.f32.mxu0 %vm500_vm12, %v8730_v41  ;;  %v25804_v41 = vld [vmem:[#allocation175_spill] sm:$0xff] }
 0x3be   : > { %17283 = vmatmul.mubr.msk.f32.gmra.mrb[56].mxu1 %vm500_vm12, %v12165_v31  ;;  %vm25805_vm6 = vcmp.eq.s32.totalorder %v25804_v41, 1  ;;  %v25806_v31 = vld [vmem:[#allocation129_spill] sm:$0xff] }
 0x3bf   : > { %17285 = vmatprep.mubr.msk.f32.mxu1 %vm500_vm12, %v12166_v54  ;;  %v8734_v20 = vsel %vm25805_vm6, %v8702_v2, 0.0  ;;  %vm25807_vm1 = vcmp.eq.s32.totalorder %v25806_v31, 1  ;;  %v8708_v31 = vld [vmem:[%s18592_s30 + $0xf5] sm:$0xff]  ;;  %vm25833_vm6 = vcmp.eq.s32.totalorder %v25614_v51, 1 }
 0x3c0   : > { %16912 = vmatmul.mubr.msk.f32.gmra.mrb[74].mxu0 %vm500_vm12, %v8731_v18  ;;  %v12169_v14 = vsel %vm25807_vm1, %v12137_v1, 0.0  ;;  %v25809_v18 = vld [vmem:[#allocation174_spill] sm:$0xff]  ;;  %v25814_v1 = vld [vmem:[#allocation176_spill] sm:$0xff]  ;;  %v25820_v54 = vld [vmem:[#allocation181_spill] sm:$0xff]  ;;  %vm25834_vm1 = vcmp.eq.s32.totalorder %v25616_v26, 1 }
 0x3c1   : > { %16914 = vmatprep.mubr.msk.f32.mxu0 %vm500_vm12, %v8732_v44  ;;  %vm25810_vm8 = vcmp.eq.s32.totalorder %v25809_v18, 1  ;;  %v25811_v44 = vld [vmem:[#allocation177_spill] sm:$0xff]  ;;  %vm25815_vm5 = vcmp.eq.s32.totalorder %v25814_v1, 1  ;;  %vm25821_vm9 = vcmp.eq.s32.totalorder %v25820_v54, 1  ;;  %v8710_v18 = vld [vmem:[%s18592_s30 + $0x105] sm:$0xff]  ;;  %v8748_v10 = vsel %vm25834_vm1, %v8716_v39, 0.0 }
 0x3c2   : > { %17286 = vmatmul.mubr.msk.f32.gmra.mrb[58].mxu1 %vm500_vm12, %v12167_v13  ;;  %v8735_v61 = vsel %vm25810_vm8, %v8703_v27, 0.0  ;;  %vm25812_vm4 = vcmp.eq.s32.totalorder %v25811_v44, 1  ;;  %v12527_v13 = vld [vmem:[%s18592_s30 + $0x63] sm:$0xff]  ;;  %v8737_v40 = vsel %vm25815_vm5, %v8705_v60, 0.0  ;;  %v12529_v27 = vld [vmem:[%s18592_s30 + $0x73] sm:$0xff]  ;;  %vm25835_vm8 = vcmp.eq.s32.totalorder %v25618_v57, 1 }
 0x3c3   : > { %17288 = vmatprep.mubr.msk.f32.mxu1 %vm500_vm12, %v12168_v28  ;;  %v8736_v4 = vsel %vm25812_vm4, %v8704_v52, 0.0  ;;  %v8706_v28 = vld [vmem:[%s18592_s30 + $0xe5] sm:$0xff]  ;;  %v8711_v60 = vld [vmem:[%s18592_s30 + $0x10d] sm:$0xff]  ;;  %vm25836_vm4 = vcmp.eq.s32.totalorder %v25620_v16, 1  ;;  %v12558_v16 = vld [vmem:[%s18592_s30 + $0x15b] sm:$0xff] }
 0x3c4   : > { %16915 = vmatmul.mubr.msk.f32.gmra.mrb[76].mxu0 %vm500_vm12, %v8733_v49  ;;  %v12528_v49 = vld [vmem:[%s18592_s30 + $0x6b] sm:$0xff]  ;;  %v8738_v41 = vsel %vm25817_vm15, %v8706_v28, 0.0  ;;  %v25824_v44 = vld [vmem:[#allocation183_spill] sm:$0xff]  ;;  %v12557_v57 = vld [vmem:[%s18592_s30 + $0x153] sm:$0xff]  ;;  %vm25840_vm15 = vcmp.eq.s32.totalorder %v25663_v56, 1 }
 0x3c5   : > { %16917 = vmatprep.mubr.msk.f32.mxu0 %vm500_vm12, %v8734_v20  ;;  %v8707_v20 = vld [vmem:[%s18592_s30 + $0xed] sm:$0xff]  ;;  %vm25825_vm13 = vcmp.eq.s32.totalorder %v25824_v44, 1  ;;  %v8713_v28 = vld [vmem:[%s18592_s30 + $0x11d] sm:$0xff]  ;;  %v8714_v1 = vld [vmem:[%s18592_s30 + $0x125] sm:$0xff] }
 0x3c6   : > { %17289 = vmatmul.mubr.msk.f32.gmra.mrb[60].mxu1 %vm500_vm12, %v12169_v14  ;;  %v25818_v14 = vld [vmem:[#allocation178_spill] sm:$0xff]  ;;  %v8719_v26 = vld [vmem:[%s18592_s30 + $0x14d] sm:$0xff]  ;;  %v25847_v56 = vld [vmem:[#allocation19_spill] sm:$0xff] }
 0x3c7   : > { %17291 = vmatprep.mubr.msk.f32.mxu1 %vm500_vm12, %v12170_v55  ;;  %vm25819_vm14 = vcmp.eq.s32.totalorder %v25818_v14, 1  ;;  %v8740_v55 = vsel %vm25821_vm9, %v8708_v31, 0.0  ;;  %v25859_v31 = vld [vmem:[#allocation44_spill] sm:$0xff]  ;;  %v25860_v14 = vld [vmem:[#allocation42_spill] sm:$0xff]  ;;  %vm25864_vm9 = vcmp.eq.s32.totalorder %v22086_v37, 1 }
 0x3c8   : > { %16918 = vmatmul.mubr.msk.f32.gmra.mrb[78].mxu0 %vm500_vm12, %v8735_v61  ;;  %v8739_v52 = vsel %vm25819_vm14, %v8707_v20, 0.0  ;;  %v25857_v20 = vld [vmem:[#allocation40_spill] sm:$0xff]  ;;  %vm25863_vm14 = vcmp.eq.s32.totalorder %v22020_v47, 1 }
 0x3c9   : > { %16920 = vmatprep.mubr.msk.f32.mxu0 %vm500_vm12, %v8736_v4  ;;  %v8742_v4 = vsel %vm25825_vm13, %v8710_v18, 0.0  ;;  %v12938_v54 = vld [vmem:[%s18592_s30 + $0x126] sm:$0xff]  ;;  %v12939_v18 = vld [vmem:[%s18592_s30 + $0x12e] sm:$0xff]  ;;  %vm25866_vm13 = vcmp.eq.s32.totalorder %v22166_v6, 1  ;;  %v23996_v6 = vld [vmem:[%s24369_s7] ss:$0 sm:$0xff] }
 0x3ca   : > { %17292 = vmatmul.mubr.msk.f32.gmra.mrb[62].mxu1 %vm500_vm12, %v12171_v50 }
 0x3cb   : > { %17296 = vmatprep.mubr.msk.f32.mxu1 %vm500_vm12, %v12527_v13  ;;  %v8712_v13 = vld [vmem:[%s18592_s30 + $0x115] sm:$0xff] }
 0x3cc   : > { %16921 = vmatmul.mubr.msk.f32.gmra.mrb[80].mxu0 %vm500_vm12, %v8737_v40 }
 0x3cd   : > { %16923 = vmatprep.mubr.msk.f32.mxu0 %vm500_vm12, %v8738_v41  ;;  %v8718_v41 = vld [vmem:[%s18592_s30 + $0x145] sm:$0xff] }
 0x3ce   : > { %17297 = vmatmul.mubr.msk.f32.vlgmr.msra.gmra.mrb[32].mxu1 %vm500_vm12, %v12528_v49  ;;  %v8715_v49 = vld [vmem:[%s18592_s30 + $0x12d] sm:$0xff]  ;;  %v8750_v51 = vsel %vm25836_vm4, %v8718_v41, 0.0 }
 0x3cf   : > { %17345 = vmatpush3.msra.mxu1 %v23532_v30  ;;  %17299 = vmatprep.mubr.msk.f32.mxu1 %vm500_vm12, %v12529_v27  ;;  %v25822_v30 = vld [vmem:[#allocation180_spill] sm:$0xff]  ;;  %v25858_v27 = vld [vmem:[#allocation38_spill] sm:$0xff] }
 0x3d0   : > { %16924 = vmatmul.mubr.msk.f32.gmra.mrb[82].mxu0 %vm500_vm12, %v8739_v52  ;;  %vm25823_vm11 = vcmp.eq.s32.totalorder %v25822_v30, 1  ;;  %v25861_v52 = vld [vmem:[#allocation49_spill] sm:$0xff] }
 0x3d1   : > { %16926 = vmatprep.mubr.msk.f32.mxu0 %vm500_vm12, %v8740_v55  ;;  %v8741_v61 = vsel %vm25823_vm11, %v8709_v58, 0.0  ;;  %v25862_v55 = vld [vmem:[#allocation46_spill] sm:$0xff]  ;;  %v12970_v58 = vsel %vm25863_vm14, %v12938_v54, 0.0  ;;  %vm25865_vm11 = vcmp.eq.s32.totalorder %v22108_v42, 1 }
 0x3d2   : > { %17300 = vmatmul.mubr.msk.f32.gmra.mrb[34].mxu1 %vm500_vm12, %v23400_v8  ;;  %v25826_v8 = vld [vmem:[#allocation182_spill] sm:$0xff] }
 0x3d3   : > { %17302 = vmatprep.mubr.msk.f32.mxu1 %vm500_vm12, %v23407_v11  ;;  %vm25827_vm0 = vcmp.eq.s32.totalorder %v25826_v8, 1  ;;  %v25828_v11 = vld [vmem:[#allocation53_spill] sm:$0xff] }
 0x3d4   : > { %16927 = vmatmul.mubr.msk.f32.gmra.mrb[84].mxu0 %vm500_vm12, %v8741_v61  ;;  %v8743_v2 = vsel %vm25827_vm0, %v8711_v60, 0.0  ;;  %vm25829_vm7 = vcmp.eq.s32.totalorder %v25828_v11, 1  ;;  %v12940_v30 = vld [vmem:[%s18592_s30 + $0x136] sm:$0xff]  ;;  %v12971_v61 = vsel %vm10489_vm10, %v12939_v18, 0.0  ;;  %v12942_v60 = vld [vmem:[%s18592_s30 + $0x146] sm:$0xff]  ;;  %v12943_v8 = vld [vmem:[%s18592_s30 + $0x14e] sm:$0xff] }
 0x3d5   : > { %16929 = vmatprep.mubr.msk.f32.mxu0 %vm500_vm12, %v8742_v4  ;;  %v8744_v50 = vsel %vm25829_vm7, %v8712_v13, 0.0  ;;  %v12972_v44 = vsel %vm25864_vm9, %v12940_v30, 0.0  ;;  %v12941_v4 = vld [vmem:[%s18592_s30 + $0x13e] sm:$0xff]  ;;  %v12974_v13 = vsel %vm25866_vm13, %v12942_v60, 0.0  ;;  %vm25867_vm10 = vcmp.eq.s32.totalorder %v22183_v32, 1 }
 0x3d6   : > { %17303 = vmatmul.mubr.msk.f32.gmra.mrb[36].mxu1 %vm500_vm12, %v23418_v19  ;;  %v25830_v19 = vld [vmem:[#allocation139_spill] sm:$0xff]  ;;  %v12973_v47 = vsel %vm25865_vm11, %v12941_v4, 0.0  ;;  %v12975_v37 = vsel %vm25867_vm10, %v12943_v8, 0.0  ;;  %vm25868_vm0 = vcmp.eq.s32.totalorder %v25718_v5, 1  ;;  %vm25869_vm7 = vcmp.eq.s32.totalorder %v25720_v29, 1 }
 0x3d7   : > { %17305 = vmatprep.mubr.msk.f32.mxu1 %vm500_vm12, %v23425_v45  ;;  %vm25831_vm3 = vcmp.eq.s32.totalorder %v25830_v19, 1  ;;  %v8746_v45 = vsel %vm25832_vm2, %v8714_v1, 0.0  ;;  %v12976_v11 = vsel %vm25868_vm0, %v12944_v12, 0.0  ;;  %vm13612_vm2 = vcmask 523264  }
 0x3d8   : > { %16930 = vmatmul.mubr.msk.f32.gmra.mrb[86].mxu0 %vm500_vm12, %v8743_v2  ;;  %v8745_v40 = vsel %vm25831_vm3, %v8713_v28, 0.0  ;;  %v12945_v2 = vld [vmem:[%s18592_s30 + $0x15e] sm:$0xff]  ;;  %vm13532_vm3 = vcmask 523648  }
 0x3d9   : > { %16932 = vmatprep.mubr.msk.f32.mxu0 %vm500_vm12, %v8744_v50  ;;  %v12977_v42 = vsel %vm25869_vm7, %v12945_v2, 0.0 }
 0x3da   : > { %17306 = vmatmul.mubr.msk.f32.gmra.mrb[38].mxu1 %vm500_vm12, %v23436_v36  ;;  %v8747_v36 = vsel %vm25833_vm6, %v8715_v49, 0.0  ;;  %vm25870_vm6 = vcmask 130048  }
 0x3db   : > { %17308 = vmatprep.mubr.msk.f32.mxu1 %vm500_vm12, %v23443_v48  ;;  %v8717_v48 = vld [vmem:[%s18592_s30 + $0x13d] sm:$0xff]  ;;  %vm25871_vm1 = vmmov %vm25870_vm6 }
 0x3dc   : > { %16933 = vmatmul.mubr.msk.f32.gmra.mrb[88].mxu0 %vm500_vm12, %v8745_v40  ;;  %vm25873_vm4 = vmmov %vm25871_vm1 }
 0x3dd   : > { %16935 = vmatprep.mubr.msk.f32.mxu0 %vm500_vm12, %v8746_v45  ;;  %vm25876_vm14 = vmmov %vm25871_vm1 }
 0x3de   : > { %17309 = vmatmul.mubr.msk.f32.gmra.mrb[40].mxu1 %vm500_vm12, %v23454_v33  ;;  %v8749_v33 = vsel %vm25835_vm8, %v8717_v48, 0.0  ;;  %vm25872_vm8 = vmmov %vm25871_vm1 }
 0x3df   : > { %17311 = vmatprep.mubr.msk.f32.mxu1 %vm500_vm12, %v23461_v62  ;;  %v25837_v62 = vld [vmem:[#allocation198_spill] sm:$0xff]  ;;  %vm25877_vm9 = vmmov %vm25871_vm1 }
 0x3e0   : > { %16936 = vmatmul.mubr.msk.f32.gmra.mrb[90].mxu0 %vm500_vm12, %v8747_v36  ;;  %vm25838_vm5 = vcmp.eq.s32.totalorder %v25837_v62, 1  ;;  %vm25878_vm11 = vmmov %vm25871_vm1 }
 0x3e1   : > { %16938 = vmatprep.mubr.msk.f32.mxu0 %vm500_vm12, %v8748_v10  ;;  %vm25879_vm13 = vmmov %vm25871_vm1 }
 0x3e2   : > { %17312 = vmatmul.mubr.msk.f32.gmra.mrb[42].mxu1 %vm500_vm12, %v23472_v43  ;;  %v8751_v43 = vsel %vm25838_vm5, %v8719_v26, 0.0  ;;  %vm25874_vm5 = vmmov %vm25871_vm1 }
 0x3e3   : > { %17314 = vmatprep.mubr.msk.f32.mxu1 %vm500_vm12, %v23479_v22  ;;  %v12915_v22 = vld [vmem:[%s18592_s30 + $0x6e] sm:$0xff]  ;;  %s18399_s30 = smov 32   ;;  %vm25880_vm10 = vmmov %vm25871_vm1 }
 0x3e4   : > { %16939 = vmatmul.mubr.msk.f32.gmra.mrb[92].mxu0 %vm500_vm12, %v8749_v33  ;;  %vm25881_vm0 = vmmov %vm25871_vm1 }
 0x3e5   : > { %16941 = vmatprep.mubr.msk.f32.mxu0 %vm500_vm12, %v8750_v51  ;;  %vm25882_vm7 = vmmov %vm25881_vm0 }
 0x3e6   : > { %17315 = vmatmul.mubr.msk.f32.gmra.mrb[44].mxu1 %vm500_vm12, %v23491_v0  ;;  %v25839_v0 = vld [vmem:[#allocation140_spill] sm:$0xff] }
 0x3e7   : > { %17317 = vmatprep.mubr.msk.f32.mxu1 %vm500_vm12, %v23498_v17  ;;  %v12947_v17 = vsel %vm25840_vm15, %v12915_v22, 0.0  ;;  %vm25875_vm15 = vmmov %vm25871_vm1 }
 0x3e8   : > { %16942 = vmatmul.mubr.msk.f32.gmra.mrb[94].mxu0 %vm500_vm12, %v8751_v43 }
 0x3ea   : > { %17318 = vmatmul.mubr.msk.f32.gmra.mrb[46].mxu1 %vm500_vm12, %v23509_v24  ;;  %v25841_v24 = vld [vmem:[#allocation147_spill] sm:$0xff] }
 0x3eb   : > { %17320 = vmatprep.mubr.msk.f32.mxu1 %vm500_vm12, %v23516_v38  ;;  %v25842_v38 = vld [vmem:[#allocation146_spill] sm:$0xff] }
 0x3ee   : > { %17321 = vmatmul.mubr.msk.f32.gmra.mrb[48].mxu1 %vm500_vm12, %v23527_v35  ;;  %v25843_v35 = vld [vmem:[#allocation153_spill] sm:$0xff] }
 0x3ef   : > { %17323 = vmatprep.mubr.msk.f32.mxu1 %vm500_vm12, %v23538_v53  ;;  %v25844_v53 = vld [vmem:[#allocation152_spill] sm:$0xff] }
 0x3f2   : > { %17324 = vmatmul.mubr.msk.f32.gmra.mrb[50].mxu1 %vm500_vm12, %v23552_v7  ;;  %v25845_v7 = vld [vmem:[#allocation159_spill] sm:$0xff] }
 0x3f3   : > { %17326 = vmatprep.mubr.msk.f32.mxu1 %vm500_vm12, %v23558_v34  ;;  %v25846_v34 = vld [vmem:[#allocation158_spill] sm:$0xff] }
 0x3f6   : > { %17327 = vmatmul.mubr.msk.f32.gmra.mrb[52].mxu1 %vm500_vm12, %v23570_v63  ;;  %v25848_v63 = vld [vmem:[#allocation164_spill] sm:$0xff] }
 0x3f7   : > { %17329 = vmatprep.mubr.msk.f32.mxu1 %vm500_vm12, %v23576_v59  ;;  %v25849_v59 = vld [vmem:[#allocation170_spill] sm:$0xff] }
 0x3fa   : > { %17330 = vmatmul.mubr.msk.f32.gmra.mrb[54].mxu1 %vm500_vm12, %v23588_v25  ;;  %v25850_v25 = vld [vmem:[#allocation169_spill] sm:$0xff] }
 0x3fb   : > { %17332 = vmatprep.mubr.msk.f32.mxu1 %vm500_vm12, %v23594_v21  ;;  %v25851_v21 = vld [vmem:[#allocation173_spill] sm:$0xff] }
 0x3fe   : > { %17333 = vmatmul.mubr.msk.f32.gmra.mrb[56].mxu1 %vm500_vm12, %v23606_v46  ;;  %v25852_v46 = vld [vmem:[#allocation26_spill] sm:$0xff] }
 0x3ff   : > { %17335 = vmatprep.mubr.msk.f32.mxu1 %vm500_vm12, %v23612_v23  ;;  %v25853_v23 = vld [vmem:[#allocation32_spill] sm:$0xff] }
 0x402   : > { %17336 = vmatmul.mubr.msk.f32.gmra.mrb[58].mxu1 %vm500_vm12, %v23624_v15  ;;  %v25854_v15 = vld [vmem:[#allocation29_spill] sm:$0xff] }
 0x403   : > { %17338 = vmatprep.mubr.msk.f32.mxu1 %vm500_vm12, %v23630_v3  ;;  %v25855_v3 = vld [vmem:[#allocation36_spill] sm:$0xff] }
 0x406   : > { %17339 = vmatmul.mubr.msk.f32.gmra.mrb[60].mxu1 %vm500_vm12, %v23642_v9  ;;  %v25856_v9 = vld [vmem:[#allocation34_spill] sm:$0xff] }
 0x407   : > { %17341 = vmatprep.mubr.msk.f32.mxu1 %vm500_vm12, %v12557_v57 }
 0x40a   : > { %17342 = vmatmul.mubr.msk.f32.gmra.mrb[62].mxu1 %vm500_vm12, %v12558_v16 }
 0x40b   : > { %17346 = vmatprep.mubr.msk.f32.mxu1 %vm500_vm12, %v25839_v0 }
 0x40e   : > { %17347 = vmatmul.mubr.msk.f32.vlgmr.msra.gmra.mrb[32].mxu1 %vm500_vm12, %v12947_v17 }
 0x40f   : > { %17349 = vmatprep.mubr.msk.f32.mxu1 %vm500_vm12, %v25841_v24 }
 0x412   : > { %17350 = vmatmul.mubr.msk.f32.gmra.mrb[34].mxu1 %vm500_vm12, %v25842_v38 }
 0x413   : > { %17352 = vmatprep.mubr.msk.f32.mxu1 %vm500_vm12, %v25843_v35 }
 0x416   : > { %17353 = vmatmul.mubr.msk.f32.gmra.mrb[36].mxu1 %vm500_vm12, %v25844_v53 }
 0x417   : > { %17355 = vmatprep.mubr.msk.f32.mxu1 %vm500_vm12, %v25845_v7 }
 0x41a   : > { %17356 = vmatmul.mubr.msk.f32.gmra.mrb[38].mxu1 %vm500_vm12, %v25846_v34 }
 0x41b   : > { %17358 = vmatprep.mubr.msk.f32.mxu1 %vm500_vm12, %v25847_v56 }
 0x41e   : > { %17359 = vmatmul.mubr.msk.f32.gmra.mrb[40].mxu1 %vm500_vm12, %v25848_v63 }
 0x41f   : > { %17361 = vmatprep.mubr.msk.f32.mxu1 %vm500_vm12, %v25849_v59 }
 0x422   : > { %17362 = vmatmul.mubr.msk.f32.gmra.mrb[42].mxu1 %vm500_vm12, %v25850_v25 }
 0x423   : > { %17364 = vmatprep.mubr.msk.f32.mxu1 %vm500_vm12, %v25851_v21 }
 0x426   : > { %17365 = vmatmul.mubr.msk.f32.gmra.mrb[44].mxu1 %vm500_vm12, %v25852_v46 }
 0x427   : > { %17367 = vmatprep.mubr.msk.f32.mxu1 %vm500_vm12, %v25853_v23 }
 0x42a   : > { %17368 = vmatmul.mubr.msk.f32.gmra.mrb[46].mxu1 %vm500_vm12, %v25854_v15 }
 0x42b   : > { %17370 = vmatprep.mubr.msk.f32.mxu1 %vm500_vm12, %v25855_v3 }
 0x42e   : > { %17371 = vmatmul.mubr.msk.f32.gmra.mrb[48].mxu1 %vm500_vm12, %v25856_v9 }
 0x42f   : > { %17373 = vmatprep.mubr.msk.f32.mxu1 %vm500_vm12, %v25857_v20 }
 0x432   : > { %17374 = vmatmul.mubr.msk.f32.gmra.mrb[50].mxu1 %vm500_vm12, %v25858_v27 }
 0x433   : > { %17376 = vmatprep.mubr.msk.f32.mxu1 %vm500_vm12, %v25859_v31 }
 0x436   : > { %17377 = vmatmul.mubr.msk.f32.gmra.mrb[52].mxu1 %vm500_vm12, %v25860_v14 }
 0x437   : > { %17379 = vmatprep.mubr.msk.f32.mxu1 %vm500_vm12, %v25861_v52 }
 0x43a   : > { %17380 = vmatmul.mubr.msk.f32.gmra.mrb[54].mxu1 %vm500_vm12, %v25862_v55 }
 0x43b   : > { %17382 = vmatprep.mubr.msk.f32.mxu1 %vm500_vm12, %v12970_v58 }
 0x43e   : > { %17383 = vmatmul.mubr.msk.f32.gmra.mrb[56].mxu1 %vm500_vm12, %v12971_v61 }
 0x43f   : > { %17385 = vmatprep.mubr.msk.f32.mxu1 %vm500_vm12, %v12972_v44 }
 0x442   : > { %17386 = vmatmul.mubr.msk.f32.gmra.mrb[58].mxu1 %vm500_vm12, %v12973_v47  ;;  %v13597_v47 = vld [vmem:[%s24372_s10] sm:$0xff] }
 0x443   : > { %17388 = vmatprep.mubr.msk.f32.mxu1 %vm500_vm12, %v12974_v13  ;;  %v13598_v13 = vld [vmem:[%s24372_s10 + $0x8] sm:$0xff] }
 0x446   : > { %17389 = vmatmul.mubr.msk.f32.gmra.mrb[60].mxu1 %vm500_vm12, %v12975_v37  ;;  %v17458_v37 = vpack.c.bf16 %v13598_v13, %v13597_v47 }
 0x447   : > { %17391 = vmatprep.mubr.msk.f32.mxu1 %vm500_vm12, %v12976_v11 }
 0x448   : > { %17459 = vmatprep.subr.bf16.mxu0 %v17458_v37 }
 0x449   : > { %17461 = vmatpush3.bf16.msra.mxu0 %v17458_v37 }
 0x44a   : > { %17392 = vmatmul.mubr.msk.f32.gmra.mrb[62].mxu1 %vm500_vm12, %v12977_v42  ;;  %vm9306_vm12 = vcmask 392448  }
 0x47f   : > { %v16898_v32 = vpop.f32.mrb[64].mxu0 }
 0x480   : > { %v9115_v50 = vadd.f32 %v16898_v32, %v23996_v6  ;;  %v8916_v28 = vpop.f32.mrb[65].mxu0 }
 0x481   : > { %v9114_v5 = vadd.f32 %v23996_v6, %v8916_v28 }
 0x482   : > { %v9147_v1 = vmax.f32 %v9115_v50, 0.0 }
 0x483   : > { %v9146_v19 = vmax.f32 %v9114_v5, 0.0  ;;  %v16901_v40 = vpop.f32.mrb[66].mxu0 }
 0x484   : > { %v9117_v45 = vadd.f32 %v16901_v40, %v23996_v6  ;;  %9212 = vrot.lane.b32.xlu1 %v9147_v1, %s18399_s30  ;;  %v8926_v29 = vpop.f32.mrb[67].mxu0 }
 0x485   : > { %v9116_v49 = vadd.f32 %v23996_v6, %v8926_v29  ;;  %9210 = vrot.lane.b32.xlu0 %v9146_v19, %s18399_s30 }
 0x486   : > { %v9149_v39 = vmax.f32 %v9117_v45, 0.0 }
 0x487   : > { %v9148_v36 = vmax.f32 %v9116_v49, 0.0  ;;  %v16904_v10 = vpop.f32.mrb[68].mxu0 }
 0x488   : > { %v9119_v48 = vadd.f32 %v16904_v10, %v23996_v6  ;;  %9216 = vrot.lane.b32.xlu1 %v9149_v39, %s18399_s30  ;;  %v8936_v41 = vpop.f32.mrb[69].mxu0 }
 0x489   : > { %v9118_v33 = vadd.f32 %v23996_v6, %v8936_v41  ;;  %9214 = vrot.lane.b32.xlu0 %v9148_v36, %s18399_s30 }
 0x48a   : > { %v9151_v51 = vmax.f32 %v9119_v48, 0.0 }
 0x48b   : > { %v9150_v26 = vmax.f32 %v9118_v33, 0.0  ;;  %v16907_v62 = vpop.f32.mrb[70].mxu0 }
 0x48c   : > { %v9121_v43 = vadd.f32 %v16907_v62, %v23996_v6  ;;  %9220 = vrot.lane.b32.xlu1 %v9151_v51, %s18399_s30  ;;  %v8946_v57 = vpop.f32.mrb[71].mxu0 }
 0x48d   : > { %v9120_v16 = vadd.f32 %v23996_v6, %v8946_v57  ;;  %9218 = vrot.lane.b32.xlu0 %v9150_v26, %s18399_s30  ;;  %v13600_v57 = vld [vmem:[%s24372_s10 + $0x18] sm:$0xff] }
 0x48e   : > { %v9153_v22 = vmax.f32 %v9121_v43, 0.0  ;;  %v13599_v43 = vld [vmem:[%s24372_s10 + $0x10] sm:$0xff] }
 0x48f   : > { %v9152_v0 = vmax.f32 %v9120_v16, 0.0  ;;  %v16910_v17 = vpop.f32.mrb[72].mxu0 }
 0x490   : > { %v9123_v24 = vadd.f32 %v16910_v17, %v23996_v6  ;;  %9224 = vrot.lane.b32.xlu1 %v9153_v22, %s18399_s30  ;;  %v8956_v38 = vpop.f32.mrb[73].mxu0  ;;  %v13601_v17 = vld [vmem:[%s24372_s10 + $0x20] sm:$0xff] }
 0x491   : > { %v9122_v35 = vadd.f32 %v23996_v6, %v8956_v38  ;;  %9222 = vrot.lane.b32.xlu0 %v9152_v0, %s18399_s30  ;;  %v17462_v0 = vpack.c.bf16 %v13600_v57, %v13599_v43 }
 0x492   : > { %v9155_v53 = vmax.f32 %v9123_v24, 0.0  ;;  %v13602_v24 = vld [vmem:[%s24372_s10 + $0x28] sm:$0xff] }
 0x493   : > { %v9154_v7 = vmax.f32 %v9122_v35, 0.0  ;;  %v16913_v34 = vpop.f32.mrb[74].mxu0  ;;  %v17466_v35 = vpack.c.bf16 %v13602_v24, %v13601_v17  ;;  %17463 = vmatprep.subr.bf16.mxu0 %v17462_v0 }
 0x494   : > { %v9125_v56 = vadd.f32 %v16913_v34, %v23996_v6  ;;  %9228 = vrot.lane.b32.xlu1 %v9155_v53, %s18399_s30  ;;  %v8966_v63 = vpop.f32.mrb[75].mxu0  ;;  %v13603_v53 = vld [vmem:[%s24372_s10 + $0x30] sm:$0xff]  ;;  %17465 = vmatpush3.bf16.msra.mxu0 %v17462_v0 }
 0x495   : > { %v9124_v59 = vadd.f32 %v23996_v6, %v8966_v63  ;;  %9226 = vrot.lane.b32.xlu0 %v9154_v7, %s18399_s30  ;;  %v13604_v7 = vld [vmem:[%s24372_s10 + $0x38] sm:$0xff]  ;;  %17467 = vmatprep.subr.bf16.mxu0 %v17466_v35 }
 0x496   : > { %v9157_v25 = vmax.f32 %v9125_v56, 0.0 }
 0x497   : > { %v9156_v21 = vmax.f32 %v9124_v59, 0.0  ;;  %v16916_v46 = vpop.f32.mrb[76].mxu0 }
 0x498   : > { %v9127_v23 = vadd.f32 %v16916_v46, %v23996_v6  ;;  %9232 = vrot.lane.b32.xlu1 %v9157_v25, %s18399_s30  ;;  %v8976_v15 = vpop.f32.mrb[77].mxu0  ;;  %17469 = vmatpush3.bf16.msra.mxu0 %v17466_v35 }
 0x499   : > { %v9126_v3 = vadd.f32 %v23996_v6, %v8976_v15  ;;  %9230 = vrot.lane.b32.xlu0 %v9156_v21, %s18399_s30  ;;  %v17470_v21 = vpack.c.bf16 %v13604_v7, %v13603_v53 }
 0x49a   : > { %v9159_v9 = vmax.f32 %v9127_v23, 0.0 }
 0x49b   : > { %v9158_v20 = vmax.f32 %v9126_v3, 0.0  ;;  %v16919_v27 = vpop.f32.mrb[78].mxu0  ;;  %17471 = vmatprep.subr.bf16.mxu0 %v17470_v21 }
 0x49c   : > { %v9129_v31 = vadd.f32 %v16919_v27, %v23996_v6  ;;  %9236 = vrot.lane.b32.xlu1 %v9159_v9, %s18399_s30  ;;  %v8986_v14 = vpop.f32.mrb[79].mxu0  ;;  %17473 = vmatpush3.bf16.msra.mxu0 %v17470_v21 }
 0x49d   : > { %v9128_v52 = vadd.f32 %v23996_v6, %v8986_v14  ;;  %9234 = vrot.lane.b32.xlu0 %v9158_v20, %s18399_s30 }
 0x49e   : > { %v9161_v54 = vmax.f32 %v9129_v31, 0.0 }
 0x49f   : > { %v9160_v55 = vmax.f32 %v9128_v52, 0.0  ;;  %v16922_v58 = vpop.f32.mrb[80].mxu0  ;;  %v24089_v52 = vld [vmem:[%s24371_s9] ss:$0 sm:$0xff] }
 0x4a0   : > { %v9131_v18 = vadd.f32 %v16922_v58, %v23996_v6  ;;  %9240 = vrot.lane.b32.xlu1 %v9161_v54, %s18399_s30  ;;  %v8996_v30 = vpop.f32.mrb[81].mxu0 }
 0x4a1   : > { %v9130_v61 = vadd.f32 %v23996_v6, %v8996_v30  ;;  %9238 = vrot.lane.b32.xlu0 %v9160_v55, %s18399_s30 }
 0x4a2   : > { %v9163_v44 = vmax.f32 %v9131_v18, 0.0 }
 0x4a3   : > { %v9162_v4 = vmax.f32 %v9130_v61, 0.0  ;;  %v16925_v60 = vpop.f32.mrb[82].mxu0 }
 0x4a4   : > { %v9133_v8 = vadd.f32 %v16925_v60, %v23996_v6  ;;  %9244 = vrot.lane.b32.xlu1 %v9163_v44, %s18399_s30  ;;  %v9006_v12 = vpop.f32.mrb[83].mxu0 }
 0x4a5   : > { %v9132_v2 = vadd.f32 %v23996_v6, %v9006_v12  ;;  %9242 = vrot.lane.b32.xlu0 %v9162_v4, %s18399_s30 }
 0x4a6   : > { %v9165_v11 = vmax.f32 %v9133_v8, 0.0 }
 0x4a7   : > { %v9164_v42 = vmax.f32 %v9132_v2, 0.0  ;;  %v16928_v32 = vpop.f32.mrb[84].mxu0 }
 0x4a8   : > { %v9135_v50 = vadd.f32 %v16928_v32, %v23996_v6  ;;  %9248 = vrot.lane.b32.xlu1 %v9165_v11, %s18399_s30  ;;  %v9016_v28 = vpop.f32.mrb[85].mxu0 }
 0x4a9   : > { %v9134_v5 = vadd.f32 %v23996_v6, %v9016_v28  ;;  %9246 = vrot.lane.b32.xlu0 %v9164_v42, %s18399_s30 }
 0x4aa   : > { %v9167_v1 = vmax.f32 %v9135_v50, 0.0 }
 0x4ab   : > { %v9166_v19 = vmax.f32 %v9134_v5, 0.0  ;;  %v16931_v40 = vpop.f32.mrb[86].mxu0 }
 0x4ac   : > { %v9137_v45 = vadd.f32 %v16931_v40, %v23996_v6  ;;  %9252 = vrot.lane.b32.xlu1 %v9167_v1, %s18399_s30  ;;  %v9026_v29 = vpop.f32.mrb[87].mxu0 }
 0x4ad   : > { %v9136_v49 = vadd.f32 %v23996_v6, %v9026_v29  ;;  %9250 = vrot.lane.b32.xlu0 %v9166_v19, %s18399_s30 }
 0x4ae   : > { %v9169_v39 = vmax.f32 %v9137_v45, 0.0 }
 0x4af   : > { %v9168_v36 = vmax.f32 %v9136_v49, 0.0  ;;  %v16934_v10 = vpop.f32.mrb[88].mxu0 }
 0x4b0   : > { %v9139_v48 = vadd.f32 %v16934_v10, %v23996_v6  ;;  %9256 = vrot.lane.b32.xlu1 %v9169_v39, %s18399_s30  ;;  %v9036_v41 = vpop.f32.mrb[89].mxu0 }
 0x4b1   : > { %v9138_v33 = vadd.f32 %v23996_v6, %v9036_v41  ;;  %9254 = vrot.lane.b32.xlu0 %v9168_v36, %s18399_s30 }
 0x4b2   : > { %v9171_v51 = vmax.f32 %v9139_v48, 0.0 }
 0x4b3   : > { %v9170_v26 = vmax.f32 %v9138_v33, 0.0  ;;  %v16937_v62 = vpop.f32.mrb[90].mxu0 }
 0x4b4   : > { %v9141_v16 = vadd.f32 %v16937_v62, %v23996_v6  ;;  %9260 = vrot.lane.b32.xlu1 %v9171_v51, %s18399_s30  ;;  %v9046_v22 = vpop.f32.mrb[91].mxu0 }
 0x4b5   : > { %v9140_v38 = vadd.f32 %v23996_v6, %v9046_v22  ;;  %9258 = vrot.lane.b32.xlu0 %v9170_v26, %s18399_s30 }
 0x4b6   : > { %v9173_v34 = vmax.f32 %v9141_v16, 0.0 }
 0x4b7   : > { %v9172_v56 = vmax.f32 %v9140_v38, 0.0  ;;  %v16940_v63 = vpop.f32.mrb[92].mxu0 }
 0x4b8   : > { %v9143_v59 = vadd.f32 %v16940_v63, %v23996_v6  ;;  %9264 = vrot.lane.b32.xlu1 %v9173_v34, %s18399_s30  ;;  %v9056_v25 = vpop.f32.mrb[93].mxu0 }
 0x4b9   : > { %v9142_v46 = vadd.f32 %v23996_v6, %v9056_v25  ;;  %9262 = vrot.lane.b32.xlu0 %v9172_v56, %s18399_s30 }
 0x4ba   : > { %v9175_v23 = vmax.f32 %v9143_v59, 0.0 }
 0x4bb   : > { %v9174_v15 = vmax.f32 %v9142_v46, 0.0  ;;  %v16943_v3 = vpop.f32.mrb[94].mxu0 }
 0x4bc   : > { %v9145_v9 = vadd.f32 %v16943_v3, %v23996_v6  ;;  %9268 = vrot.lane.b32.xlu1 %v9175_v23, %s18399_s30  ;;  %v9066_v20 = vpop.f32.mrb[95].mxu0 }
 0x4bd   : > { %v9144_v27 = vadd.f32 %v23996_v6, %v9066_v20  ;;  %9266 = vrot.lane.b32.xlu0 %v9174_v15, %s18399_s30 }
 0x4be   : > { %v9177_v31 = vmax.f32 %v9145_v9, 0.0 }
 0x4bf   : > { %v9176_v14 = vmax.f32 %v9144_v27, 0.0 }
 0x4c0   : > { %9272 = vrot.lane.b32.xlu1 %v9177_v31, %s18399_s30 }
 0x4c1   : > { %9270 = vrot.lane.b32.xlu0 %v9176_v14, %s18399_s30 }
 0x4e1   : > { %v17348_v54 = vpop.f32.mrb[32].mxu1 }
 0x4e2   : > { %v13341_v55 = vadd.f32 %v17348_v54, %v24089_v52  ;;  %v13142_v58 = vpop.f32.mrb[33].mxu1 }
 0x4e3   : > { %v13340_v6 = vadd.f32 %v24089_v52, %v13142_v58 }
 0x4e4   : > { %v13373_v18 = vmax.f32 %v13341_v55, 0.0 }
 0x4e5   : > { %v13372_v30 = vmax.f32 %v13340_v6, 0.0  ;;  %v17351_v61 = vpop.f32.mrb[34].mxu1 }
 0x4e6   : > { %v13343_v44 = vadd.f32 %v17351_v61, %v24089_v52  ;;  %v13152_v4 = vpop.f32.mrb[35].mxu1  ;;  %13438 = vrot.lane.b32.xlu1 %v13373_v18, %s18400_s14 }
 0x4e7   : > { %v13342_v60 = vadd.f32 %v24089_v52, %v13152_v4  ;;  %13436 = vrot.lane.b32.xlu0 %v13372_v30, %s18400_s14 }
 0x4e8   : > { %v13375_v47 = vmax.f32 %v13343_v44, 0.0 }
 0x4e9   : > { %v13374_v13 = vmax.f32 %v13342_v60, 0.0  ;;  %v17354_v8 = vpop.f32.mrb[36].mxu1 }
 0x4ea   : > { %v13345_v12 = vadd.f32 %v17354_v8, %v24089_v52  ;;  %v13162_v37 = vpop.f32.mrb[37].mxu1  ;;  %13442 = vrot.lane.b32.xlu1 %v13375_v47, %s18400_s14 }
 0x4eb   : > { %v13344_v2 = vadd.f32 %v24089_v52, %v13162_v37  ;;  %13440 = vrot.lane.b32.xlu0 %v13374_v13, %s18400_s14 }
 0x4ec   : > { %v13377_v11 = vmax.f32 %v13345_v12, 0.0 }
 0x4ed   : > { %v13376_v42 = vmax.f32 %v13344_v2, 0.0  ;;  %v17357_v32 = vpop.f32.mrb[38].mxu1 }
 0x4ee   : > { %v13347_v50 = vadd.f32 %v17357_v32, %v24089_v52  ;;  %v13172_v28 = vpop.f32.mrb[39].mxu1  ;;  %13446 = vrot.lane.b32.xlu1 %v13377_v11, %s18400_s14 }
 0x4ef   : > { %v13346_v5 = vadd.f32 %v24089_v52, %v13172_v28  ;;  %13444 = vrot.lane.b32.xlu0 %v13376_v42, %s18400_s14 }
 0x4f0   : > { %v13379_v1 = vmax.f32 %v13347_v50, 0.0 }
 0x4f1   : > { %v13378_v19 = vmax.f32 %v13346_v5, 0.0  ;;  %v17360_v40 = vpop.f32.mrb[40].mxu1 }
 0x4f2   : > { %v13349_v45 = vadd.f32 %v17360_v40, %v24089_v52  ;;  %v13182_v29 = vpop.f32.mrb[41].mxu1  ;;  %13450 = vrot.lane.b32.xlu1 %v13379_v1, %s18400_s14 }
 0x4f3   : > { %v13348_v49 = vadd.f32 %v24089_v52, %v13182_v29  ;;  %13448 = vrot.lane.b32.xlu0 %v13378_v19, %s18400_s14 }
 0x4f4   : > { %v13381_v39 = vmax.f32 %v13349_v45, 0.0 }
 0x4f5   : > { %v13380_v36 = vmax.f32 %v13348_v49, 0.0  ;;  %v17363_v10 = vpop.f32.mrb[42].mxu1 }
 0x4f6   : > { %v13351_v48 = vadd.f32 %v17363_v10, %v24089_v52  ;;  %v9213_v41 = vpop.permute.xlu1 %9212  ;;  %v13192_v33 = vpop.f32.mrb[43].mxu1  ;;  %13454 = vrot.lane.b32.xlu1 %v13381_v39, %s18400_s14 }
 0x4f7   : > { %9308 = vst.msk [vmem:[#allocation2 + $0x8] sm:$0xff] %vm9306_vm12, %v9213_v41  ;;  %v13350_v51 = vadd.f32 %v24089_v52, %v13192_v33  ;;  %v9211_v26 = vpop.permute.xlu0 %9210  ;;  %13452 = vrot.lane.b32.xlu0 %v13380_v36, %s18400_s14 }
 0x4f8   : > { %v13383_v62 = vmax.f32 %v13351_v48, 0.0  ;;  %9307 = vst.msk [vmem:[#allocation2] sm:$0xff] %vm9306_vm12, %v9211_v26 }
 0x4f9   : > { %v13382_v43 = vmax.f32 %v13350_v51, 0.0  ;;  %v17366_v57 = vpop.f32.mrb[44].mxu1 }
 0x4fa   : > { %v13353_v16 = vadd.f32 %v17366_v57, %v24089_v52  ;;  %v9217_v22 = vpop.permute.xlu1 %9216  ;;  %v13202_v0 = vpop.f32.mrb[45].mxu1  ;;  %13458 = vrot.lane.b32.xlu1 %v13383_v62, %s18400_s14 }
 0x4fb   : > { %9310 = vst.msk [vmem:[#allocation2 + $0x18] sm:$0xff] %vm9306_vm12, %v9217_v22  ;;  %v13352_v17 = vadd.f32 %v24089_v52, %v13202_v0  ;;  %v9215_v24 = vpop.permute.xlu0 %9214  ;;  %13456 = vrot.lane.b32.xlu0 %v13382_v43, %s18400_s14 }
 0x4fc   : > { %v13385_v38 = vmax.f32 %v13353_v16, 0.0  ;;  %9309 = vst.msk [vmem:[#allocation2 + $0x10] sm:$0xff] %vm9306_vm12, %v9215_v24 }
 0x4fd   : > { %v13384_v35 = vmax.f32 %v13352_v17, 0.0  ;;  %v17369_v53 = vpop.f32.mrb[46].mxu1 }
 0x4fe   : > { %v13355_v7 = vadd.f32 %v17369_v53, %v24089_v52  ;;  %v9221_v34 = vpop.permute.xlu1 %9220  ;;  %v13212_v56 = vpop.f32.mrb[47].mxu1  ;;  %13462 = vrot.lane.b32.xlu1 %v13385_v38, %s18400_s14 }
 0x4ff   : > { %9312 = vst.msk [vmem:[#allocation2 + $0x28] sm:$0xff] %vm9306_vm12, %v9221_v34  ;;  %v13354_v63 = vadd.f32 %v24089_v52, %v13212_v56  ;;  %v9219_v59 = vpop.permute.xlu0 %9218  ;;  %13460 = vrot.lane.b32.xlu0 %v13384_v35, %s18400_s14 }
 0x500   : > { %v13387_v25 = vmax.f32 %v13355_v7, 0.0  ;;  %9311 = vst.msk [vmem:[#allocation2 + $0x20] sm:$0xff] %vm9306_vm12, %v9219_v59 }
 0x501   : > { %v13386_v21 = vmax.f32 %v13354_v63, 0.0  ;;  %v17372_v46 = vpop.f32.mrb[48].mxu1 }
 0x502   : > { %v13357_v23 = vadd.f32 %v17372_v46, %v24089_v52  ;;  %v9225_v15 = vpop.permute.xlu1 %9224  ;;  %v13222_v3 = vpop.f32.mrb[49].mxu1  ;;  %13466 = vrot.lane.b32.xlu1 %v13387_v25, %s18400_s14 }
 0x503   : > { %9314 = vst.msk [vmem:[#allocation2 + $0x38] sm:$0xff] %vm9306_vm12, %v9225_v15  ;;  %v13356_v9 = vadd.f32 %v24089_v52, %v13222_v3  ;;  %v9223_v20 = vpop.permute.xlu0 %9222  ;;  %13464 = vrot.lane.b32.xlu0 %v13386_v21, %s18400_s14 }
 0x504   : > { %v13389_v27 = vmax.f32 %v13357_v23, 0.0  ;;  %9313 = vst.msk [vmem:[#allocation2 + $0x30] sm:$0xff] %vm9306_vm12, %v9223_v20 }
 0x505   : > { %v13388_v31 = vmax.f32 %v13356_v9, 0.0  ;;  %v17375_v14 = vpop.f32.mrb[50].mxu1 }
 0x506   : > { %v13359_v54 = vadd.f32 %v17375_v14, %v24089_v52  ;;  %v9229_v55 = vpop.permute.xlu1 %9228  ;;  %v13232_v58 = vpop.f32.mrb[51].mxu1  ;;  %13470 = vrot.lane.b32.xlu1 %v13389_v27, %s18400_s14 }
 0x507   : > { %9316 = vst.msk [vmem:[#allocation2 + $0x48] sm:$0xff] %vm9306_vm12, %v9229_v55  ;;  %v13358_v6 = vadd.f32 %v24089_v52, %v13232_v58  ;;  %v9227_v18 = vpop.permute.xlu0 %9226  ;;  %13468 = vrot.lane.b32.xlu0 %v13388_v31, %s18400_s14 }
 0x508   : > { %v13391_v30 = vmax.f32 %v13359_v54, 0.0  ;;  %9315 = vst.msk [vmem:[#allocation2 + $0x40] sm:$0xff] %vm9306_vm12, %v9227_v18 }
 0x509   : > { %v13390_v61 = vmax.f32 %v13358_v6, 0.0  ;;  %v17378_v44 = vpop.f32.mrb[52].mxu1 }
 0x50a   : > { %v13361_v4 = vadd.f32 %v17378_v44, %v24089_v52  ;;  %v9233_v60 = vpop.permute.xlu1 %9232  ;;  %v13242_v47 = vpop.f32.mrb[53].mxu1  ;;  %13474 = vrot.lane.b32.xlu1 %v13391_v30, %s18400_s14 }
 0x50b   : > { %9318 = vst.msk [vmem:[#allocation2 + $0x58] sm:$0xff] %vm9306_vm12, %v9233_v60  ;;  %v13360_v13 = vadd.f32 %v24089_v52, %v13242_v47  ;;  %v9231_v8 = vpop.permute.xlu0 %9230  ;;  %13472 = vrot.lane.b32.xlu0 %v13390_v61, %s18400_s14 }
 0x50c   : > { %v13393_v12 = vmax.f32 %v13361_v4, 0.0  ;;  %9317 = vst.msk [vmem:[#allocation2 + $0x50] sm:$0xff] %vm9306_vm12, %v9231_v8 }
 0x50d   : > { %v13392_v37 = vmax.f32 %v13360_v13, 0.0  ;;  %v17381_v2 = vpop.f32.mrb[54].mxu1 }
 0x50e   : > { %v13363_v11 = vadd.f32 %v17381_v2, %v24089_v52  ;;  %v9237_v42 = vpop.permute.xlu1 %9236  ;;  %v13252_v32 = vpop.f32.mrb[55].mxu1  ;;  %13478 = vrot.lane.b32.xlu1 %v13393_v12, %s18400_s14 }
 0x50f   : > { %9320 = vst.msk [vmem:[#allocation2 + $0x68] sm:$0xff] %vm9306_vm12, %v9237_v42  ;;  %v13362_v50 = vadd.f32 %v24089_v52, %v13252_v32  ;;  %v9235_v28 = vpop.permute.xlu0 %9234  ;;  %13476 = vrot.lane.b32.xlu0 %v13392_v37, %s18400_s14 }
 0x510   : > { %v13395_v5 = vmax.f32 %v13363_v11, 0.0  ;;  %9319 = vst.msk [vmem:[#allocation2 + $0x60] sm:$0xff] %vm9306_vm12, %v9235_v28 }
 0x511   : > { %v13394_v1 = vmax.f32 %v13362_v50, 0.0  ;;  %v17384_v19 = vpop.f32.mrb[56].mxu1 }
 0x512   : > { %v13365_v40 = vadd.f32 %v17384_v19, %v24089_v52  ;;  %v9241_v45 = vpop.permute.xlu1 %9240  ;;  %v13262_v29 = vpop.f32.mrb[57].mxu1  ;;  %13482 = vrot.lane.b32.xlu1 %v13395_v5, %s18400_s14 }
 0x513   : > { %9322 = vst.msk [vmem:[#allocation2 + $0x78] sm:$0xff] %vm9306_vm12, %v9241_v45  ;;  %v13364_v49 = vadd.f32 %v24089_v52, %v13262_v29  ;;  %v9239_v39 = vpop.permute.xlu0 %9238  ;;  %13480 = vrot.lane.b32.xlu0 %v13394_v1, %s18400_s14 }
 0x514   : > { %v13397_v36 = vmax.f32 %v13365_v40, 0.0  ;;  %9321 = vst.msk [vmem:[#allocation2 + $0x70] sm:$0xff] %vm9306_vm12, %v9239_v39 }
 0x515   : > { %v13396_v10 = vmax.f32 %v13364_v49, 0.0  ;;  %v17387_v48 = vpop.f32.mrb[58].mxu1 }
 0x516   : > { %v13367_v41 = vadd.f32 %v17387_v48, %v24089_v52  ;;  %v9245_v33 = vpop.permute.xlu1 %9244  ;;  %v13272_v51 = vpop.f32.mrb[59].mxu1  ;;  %13486 = vrot.lane.b32.xlu1 %v13397_v36, %s18400_s14 }
 0x517   : > { %9324 = vst.msk [vmem:[#allocation2 + $0x88] sm:$0xff] %vm9306_vm12, %v9245_v33  ;;  %v13366_v26 = vadd.f32 %v24089_v52, %v13272_v51  ;;  %v9243_v62 = vpop.permute.xlu0 %9242  ;;  %13484 = vrot.lane.b32.xlu0 %v13396_v10, %s18400_s14 }
 0x518   : > { %v13399_v43 = vmax.f32 %v13367_v41, 0.0  ;;  %9323 = vst.msk [vmem:[#allocation2 + $0x80] sm:$0xff] %vm9306_vm12, %v9243_v62 }
 0x519   : > { %v13398_v57 = vmax.f32 %v13366_v26, 0.0  ;;  %v17390_v16 = vpop.f32.mrb[60].mxu1 }
 0x51a   : > { %v13369_v22 = vadd.f32 %v17390_v16, %v24089_v52  ;;  %v9249_v0 = vpop.permute.xlu1 %9248  ;;  %v13282_v17 = vpop.f32.mrb[61].mxu1  ;;  %13490 = vrot.lane.b32.xlu1 %v13399_v43, %s18400_s14 }
 0x51b   : > { %9326 = vst.msk [vmem:[#allocation2 + $0x98] sm:$0xff] %vm9306_vm12, %v9249_v0  ;;  %v13368_v24 = vadd.f32 %v24089_v52, %v13282_v17  ;;  %v9247_v38 = vpop.permute.xlu0 %9246  ;;  %13488 = vrot.lane.b32.xlu0 %v13398_v57, %s18400_s14 }
 0x51c   : > { %v13401_v35 = vmax.f32 %v13369_v22, 0.0  ;;  %9325 = vst.msk [vmem:[#allocation2 + $0x90] sm:$0xff] %vm9306_vm12, %v9247_v38 }
 0x51d   : > { %v13400_v53 = vmax.f32 %v13368_v24, 0.0  ;;  %v17393_v7 = vpop.f32.mrb[62].mxu1 }
 0x51e   : > { %v13371_v34 = vadd.f32 %v17393_v7, %v24089_v52  ;;  %v9253_v56 = vpop.permute.xlu1 %9252  ;;  %v13292_v63 = vpop.f32.mrb[63].mxu1  ;;  %13494 = vrot.lane.b32.xlu1 %v13401_v35, %s18400_s14 }
 0x51f   : > { %9328 = vst.msk [vmem:[#allocation2 + $0xa8] sm:$0xff] %vm9306_vm12, %v9253_v56  ;;  %v13370_v59 = vadd.f32 %v24089_v52, %v13292_v63  ;;  %v9251_v25 = vpop.permute.xlu0 %9250  ;;  %13492 = vrot.lane.b32.xlu0 %v13400_v53, %s18400_s14 }
 0x520   : > { %v13403_v21 = vmax.f32 %v13371_v34, 0.0  ;;  %9327 = vst.msk [vmem:[#allocation2 + $0xa0] sm:$0xff] %vm9306_vm12, %v9251_v25 }
 0x521   : > { %v13402_v46 = vmax.f32 %v13370_v59, 0.0 }
 0x522   : > { %v9257_v23 = vpop.permute.xlu1 %9256  ;;  %13498 = vrot.lane.b32.xlu1 %v13403_v21, %s18400_s14 }
 0x523   : > { %9330 = vst.msk [vmem:[#allocation2 + $0xb8] sm:$0xff] %vm9306_vm12, %v9257_v23  ;;  %v9255_v15 = vpop.permute.xlu0 %9254  ;;  %13496 = vrot.lane.b32.xlu0 %v13402_v46, %s18400_s14 }
 0x524   : > { %9329 = vst.msk [vmem:[#allocation2 + $0xb0] sm:$0xff] %vm9306_vm12, %v9255_v15 }
 0x526   : > { %v9261_v3 = vpop.permute.xlu1 %9260 }
 0x527   : > { %9332 = vst.msk [vmem:[#allocation2 + $0xc8] sm:$0xff] %vm9306_vm12, %v9261_v3  ;;  %v9259_v52 = vpop.permute.xlu0 %9258 }
 0x528   : > { %9331 = vst.msk [vmem:[#allocation2 + $0xc0] sm:$0xff] %vm9306_vm12, %v9259_v52 }
 0x52a   : > { %v9265_v9 = vpop.permute.xlu1 %9264 }
 0x52b   : > { %9334 = vst.msk [vmem:[#allocation2 + $0xd8] sm:$0xff] %vm9306_vm12, %v9265_v9  ;;  %v9263_v20 = vpop.permute.xlu0 %9262 }
 0x52c   : > { %9333 = vst.msk [vmem:[#allocation2 + $0xd0] sm:$0xff] %vm9306_vm12, %v9263_v20 }
 0x52e   : > { %v9269_v27 = vpop.permute.xlu1 %9268 }
 0x52f   : > { %9336 = vst.msk [vmem:[#allocation2 + $0xe8] sm:$0xff] %vm9306_vm12, %v9269_v27  ;;  %v9267_v31 = vpop.permute.xlu0 %9266 }
 0x530   : > { %9335 = vst.msk [vmem:[#allocation2 + $0xe0] sm:$0xff] %vm9306_vm12, %v9267_v31 }
 0x532   : > { %v9273_v14 = vpop.permute.xlu1 %9272 }
 0x533   : > { %9338 = vst.msk [vmem:[#allocation2 + $0xf8] sm:$0xff] %vm9306_vm12, %v9273_v14  ;;  %v9271_v54 = vpop.permute.xlu0 %9270 }
 0x534   : > { %9337 = vst.msk [vmem:[#allocation2 + $0xf0] sm:$0xff] %vm9306_vm12, %v9271_v54  ;;  %vm25883_vm12 = vmmov %vm25881_vm0 }
 0x558   : > { %v13439_v55 = vpop.permute.xlu1 %13438 }
 0x559   : > { %13534 = vst.msk [vmem:[#allocation2 + $0x8] sm:$0xff] %vm13532_vm3, %v13439_v55  ;;  %v13437_v58 = vpop.permute.xlu0 %13436  ;;  %v24255_v55 = vld [vmem:[%s422_s16] ss:$0 sm:$0xff] }
 0x55a   : > { %13533 = vst.msk [vmem:[#allocation2] sm:$0xff] %vm13532_vm3, %v13437_v58 }
 0x55c   : > { %v13443_v6 = vpop.permute.xlu1 %13442 }
 0x55d   : > { %13536 = vst.msk [vmem:[#allocation2 + $0x18] sm:$0xff] %vm13532_vm3, %v13443_v6  ;;  %v13441_v18 = vpop.permute.xlu0 %13440 }
 0x55e   : > { %13535 = vst.msk [vmem:[#allocation2 + $0x10] sm:$0xff] %vm13532_vm3, %v13441_v18 }
 0x560   : > { %v13447_v30 = vpop.permute.xlu1 %13446  ;;  %v13566_v4 = vld [vmem:[#allocation2 + $0x8] sm:$0xff] }
 0x561   : > { %13538 = vst.msk [vmem:[#allocation2 + $0x28] sm:$0xff] %vm13532_vm3, %v13447_v30  ;;  %v13445_v61 = vpop.permute.xlu0 %13444  ;;  %v13565_v44 = vld [vmem:[#allocation2] sm:$0xff] }
 0x562   : > { %13537 = vst.msk [vmem:[#allocation2 + $0x20] sm:$0xff] %vm13532_vm3, %v13445_v61  ;;  %17410 = vmatprep.mubr.msk.f32.mxu0 %vm13612_vm2, %v13565_v44 }
 0x563   : > { %17411 = vmatmul.mubr.msk.f32.vlgmr.msra.gmra.mrb[96].mxu0 %vm13612_vm2, %v13566_v4 }
 0x564   : > { %v13451_v60 = vpop.permute.xlu1 %13450  ;;  %v13568_v8 = vld [vmem:[#allocation2 + $0x18] sm:$0xff] }
 0x565   : > { %13540 = vst.msk [vmem:[#allocation2 + $0x38] sm:$0xff] %vm13532_vm3, %v13451_v60  ;;  %v13449_v47 = vpop.permute.xlu0 %13448  ;;  %v13567_v13 = vld [vmem:[#allocation2 + $0x10] sm:$0xff] }
 0x566   : > { %13539 = vst.msk [vmem:[#allocation2 + $0x30] sm:$0xff] %vm13532_vm3, %v13449_v47  ;;  %17413 = vmatprep.mubr.msk.f32.mxu0 %vm13612_vm2, %v13567_v13 }
 0x567   : > { %17414 = vmatmul.mubr.msk.f32.gmra.mrb[98].mxu0 %vm13612_vm2, %v13568_v8 }
 0x568   : > { %v13455_v12 = vpop.permute.xlu1 %13454  ;;  %v13570_v11 = vld [vmem:[#allocation2 + $0x28] sm:$0xff] }
 0x569   : > { %13542 = vst.msk [vmem:[#allocation2 + $0x48] sm:$0xff] %vm13532_vm3, %v13455_v12  ;;  %v13453_v37 = vpop.permute.xlu0 %13452  ;;  %v13569_v2 = vld [vmem:[#allocation2 + $0x20] sm:$0xff] }
 0x56a   : > { %13541 = vst.msk [vmem:[#allocation2 + $0x40] sm:$0xff] %vm13532_vm3, %v13453_v37  ;;  %17416 = vmatprep.mubr.msk.f32.mxu0 %vm13612_vm2, %v13569_v2 }
 0x56b   : > { %17417 = vmatmul.mubr.msk.f32.gmra.mrb[100].mxu0 %vm13612_vm2, %v13570_v11 }
 0x56c   : > { %v13459_v42 = vpop.permute.xlu1 %13458  ;;  %v13572_v28 = vld [vmem:[#allocation2 + $0x38] sm:$0xff] }
 0x56d   : > { %13544 = vst.msk [vmem:[#allocation2 + $0x58] sm:$0xff] %vm13532_vm3, %v13459_v42  ;;  %v13457_v32 = vpop.permute.xlu0 %13456  ;;  %v13571_v50 = vld [vmem:[#allocation2 + $0x30] sm:$0xff] }
 0x56e   : > { %13543 = vst.msk [vmem:[#allocation2 + $0x50] sm:$0xff] %vm13532_vm3, %v13457_v32  ;;  %17419 = vmatprep.mubr.msk.f32.mxu0 %vm13612_vm2, %v13571_v50 }
 0x56f   : > { %17420 = vmatmul.mubr.msk.f32.gmra.mrb[102].mxu0 %vm13612_vm2, %v13572_v28 }
 0x570   : > { %v13463_v5 = vpop.permute.xlu1 %13462  ;;  %v13574_v40 = vld [vmem:[#allocation2 + $0x48] sm:$0xff] }
 0x571   : > { %13546 = vst.msk [vmem:[#allocation2 + $0x68] sm:$0xff] %vm13532_vm3, %v13463_v5  ;;  %v13461_v1 = vpop.permute.xlu0 %13460  ;;  %v13573_v19 = vld [vmem:[#allocation2 + $0x40] sm:$0xff] }
 0x572   : > { %13545 = vst.msk [vmem:[#allocation2 + $0x60] sm:$0xff] %vm13532_vm3, %v13461_v1  ;;  %17422 = vmatprep.mubr.msk.f32.mxu0 %vm13612_vm2, %v13573_v19 }
 0x573   : > { %17423 = vmatmul.mubr.msk.f32.gmra.mrb[104].mxu0 %vm13612_vm2, %v13574_v40 }
 0x574   : > { %v13467_v45 = vpop.permute.xlu1 %13466  ;;  %v13576_v39 = vld [vmem:[#allocation2 + $0x58] sm:$0xff] }
 0x575   : > { %13548 = vst.msk [vmem:[#allocation2 + $0x78] sm:$0xff] %vm13532_vm3, %v13467_v45  ;;  %v13465_v29 = vpop.permute.xlu0 %13464  ;;  %v13575_v49 = vld [vmem:[#allocation2 + $0x50] sm:$0xff] }
 0x576   : > { %13547 = vst.msk [vmem:[#allocation2 + $0x70] sm:$0xff] %vm13532_vm3, %v13465_v29  ;;  %17425 = vmatprep.mubr.msk.f32.mxu0 %vm13612_vm2, %v13575_v49 }
 0x577   : > { %17426 = vmatmul.mubr.msk.f32.gmra.mrb[106].mxu0 %vm13612_vm2, %v13576_v39 }
 0x578   : > { %v13471_v36 = vpop.permute.xlu1 %13470  ;;  %v13578_v41 = vld [vmem:[#allocation2 + $0x68] sm:$0xff] }
 0x579   : > { %13550 = vst.msk [vmem:[#allocation2 + $0x88] sm:$0xff] %vm13532_vm3, %v13471_v36  ;;  %v13469_v10 = vpop.permute.xlu0 %13468  ;;  %v13577_v48 = vld [vmem:[#allocation2 + $0x60] sm:$0xff] }
 0x57a   : > { %13549 = vst.msk [vmem:[#allocation2 + $0x80] sm:$0xff] %vm13532_vm3, %v13469_v10  ;;  %17428 = vmatprep.mubr.msk.f32.mxu0 %vm13612_vm2, %v13577_v48 }
 0x57b   : > { %17429 = vmatmul.mubr.msk.f32.gmra.mrb[108].mxu0 %vm13612_vm2, %v13578_v41 }
 0x57c   : > { %v13475_v33 = vpop.permute.xlu1 %13474  ;;  %v13580_v62 = vld [vmem:[#allocation2 + $0x78] sm:$0xff] }
 0x57d   : > { %13552 = vst.msk [vmem:[#allocation2 + $0x98] sm:$0xff] %vm13532_vm3, %v13475_v33  ;;  %v13473_v51 = vpop.permute.xlu0 %13472  ;;  %v13579_v26 = vld [vmem:[#allocation2 + $0x70] sm:$0xff] }
 0x57e   : > { %13551 = vst.msk [vmem:[#allocation2 + $0x90] sm:$0xff] %vm13532_vm3, %v13473_v51  ;;  %17431 = vmatprep.mubr.msk.f32.mxu0 %vm13612_vm2, %v13579_v26 }
 0x57f   : > { %17432 = vmatmul.mubr.msk.f32.gmra.mrb[110].mxu0 %vm13612_vm2, %v13580_v62 }
 0x580   : > { %v13479_v43 = vpop.permute.xlu1 %13478  ;;  %v13582_v22 = vld [vmem:[#allocation2 + $0x88] sm:$0xff] }
 0x581   : > { %13554 = vst.msk [vmem:[#allocation2 + $0xa8] sm:$0xff] %vm13532_vm3, %v13479_v43  ;;  %v13477_v57 = vpop.permute.xlu0 %13476  ;;  %v13581_v16 = vld [vmem:[#allocation2 + $0x80] sm:$0xff] }
 0x582   : > { %13553 = vst.msk [vmem:[#allocation2 + $0xa0] sm:$0xff] %vm13532_vm3, %v13477_v57  ;;  %17434 = vmatprep.mubr.msk.f32.mxu0 %vm13612_vm2, %v13581_v16 }
 0x583   : > { %17435 = vmatmul.mubr.msk.f32.gmra.mrb[112].mxu0 %vm13612_vm2, %v13582_v22 }
 0x584   : > { %v13483_v0 = vpop.permute.xlu1 %13482  ;;  %v13584_v38 = vld [vmem:[#allocation2 + $0x98] sm:$0xff] }
 0x585   : > { %13556 = vst.msk [vmem:[#allocation2 + $0xb8] sm:$0xff] %vm13532_vm3, %v13483_v0  ;;  %v13481_v17 = vpop.permute.xlu0 %13480  ;;  %v13583_v24 = vld [vmem:[#allocation2 + $0x90] sm:$0xff] }
 0x586   : > { %13555 = vst.msk [vmem:[#allocation2 + $0xb0] sm:$0xff] %vm13532_vm3, %v13481_v17  ;;  %17437 = vmatprep.mubr.msk.f32.mxu0 %vm13612_vm2, %v13583_v24 }
 0x587   : > { %17438 = vmatmul.mubr.msk.f32.gmra.mrb[114].mxu0 %vm13612_vm2, %v13584_v38 }
 0x588   : > { %v13487_v35 = vpop.permute.xlu1 %13486  ;;  %v13586_v34 = vld [vmem:[#allocation2 + $0xa8] sm:$0xff] }
 0x589   : > { %13558 = vst.msk [vmem:[#allocation2 + $0xc8] sm:$0xff] %vm13532_vm3, %v13487_v35  ;;  %v13485_v53 = vpop.permute.xlu0 %13484  ;;  %v13585_v7 = vld [vmem:[#allocation2 + $0xa0] sm:$0xff] }
 0x58a   : > { %13557 = vst.msk [vmem:[#allocation2 + $0xc0] sm:$0xff] %vm13532_vm3, %v13485_v53  ;;  %17440 = vmatprep.mubr.msk.f32.mxu0 %vm13612_vm2, %v13585_v7 }
 0x58b   : > { %17441 = vmatmul.mubr.msk.f32.gmra.mrb[116].mxu0 %vm13612_vm2, %v13586_v34 }
 0x58c   : > { %v13491_v56 = vpop.permute.xlu1 %13490  ;;  %v13588_v25 = vld [vmem:[#allocation2 + $0xb8] sm:$0xff] }
 0x58d   : > { %13560 = vst.msk [vmem:[#allocation2 + $0xd8] sm:$0xff] %vm13532_vm3, %v13491_v56  ;;  %v13489_v63 = vpop.permute.xlu0 %13488  ;;  %v13587_v59 = vld [vmem:[#allocation2 + $0xb0] sm:$0xff] }
 0x58e   : > { %13559 = vst.msk [vmem:[#allocation2 + $0xd0] sm:$0xff] %vm13532_vm3, %v13489_v63  ;;  %17443 = vmatprep.mubr.msk.f32.mxu0 %vm13612_vm2, %v13587_v59 }
 0x58f   : > { %17444 = vmatmul.mubr.msk.f32.gmra.mrb[118].mxu0 %vm13612_vm2, %v13588_v25 }
 0x590   : > { %v13495_v21 = vpop.permute.xlu1 %13494  ;;  %v13590_v15 = vld [vmem:[#allocation2 + $0xc8] sm:$0xff] }
 0x591   : > { %13562 = vst.msk [vmem:[#allocation2 + $0xe8] sm:$0xff] %vm13532_vm3, %v13495_v21  ;;  %v13493_v46 = vpop.permute.xlu0 %13492  ;;  %v13589_v23 = vld [vmem:[#allocation2 + $0xc0] sm:$0xff] }
 0x592   : > { %13561 = vst.msk [vmem:[#allocation2 + $0xe0] sm:$0xff] %vm13532_vm3, %v13493_v46  ;;  %17446 = vmatprep.mubr.msk.f32.mxu0 %vm13612_vm2, %v13589_v23 }
 0x593   : > { %17447 = vmatmul.mubr.msk.f32.gmra.mrb[120].mxu0 %vm13612_vm2, %v13590_v15 }
 0x594   : > { %v13499_v3 = vpop.permute.xlu1 %13498  ;;  %v13592_v20 = vld [vmem:[#allocation2 + $0xd8] sm:$0xff] }
 0x595   : > { %13564 = vst.msk [vmem:[#allocation2 + $0xf8] sm:$0xff] %vm13532_vm3, %v13499_v3  ;;  %v13497_v52 = vpop.permute.xlu0 %13496  ;;  %v13591_v9 = vld [vmem:[#allocation2 + $0xd0] sm:$0xff] }
 0x596   : > { %13563 = vst.msk [vmem:[#allocation2 + $0xf0] sm:$0xff] %vm13532_vm3, %v13497_v52  ;;  %17449 = vmatprep.mubr.msk.f32.mxu0 %vm13612_vm2, %v13591_v9  ;;  %vm25884_vm3 = vmmov %vm25881_vm0 }
 0x597   : > { %17450 = vmatmul.mubr.msk.f32.gmra.mrb[122].mxu0 %vm13612_vm2, %v13592_v20 }
 0x598   : > { %v13594_v31 = vld [vmem:[#allocation2 + $0xe8] sm:$0xff] }
 0x599   : > { %v13593_v27 = vld [vmem:[#allocation2 + $0xe0] sm:$0xff] }
 0x59a   : > { %17452 = vmatprep.mubr.msk.f32.mxu0 %vm13612_vm2, %v13593_v27 }
 0x59b   : > { %17453 = vmatmul.mubr.msk.f32.gmra.mrb[124].mxu0 %vm13612_vm2, %v13594_v31 }
 0x59c   : > { %v13596_v54 = vld [vmem:[#allocation2 + $0xf8] sm:$0xff] }
 0x59d   : > { %v13595_v14 = vld [vmem:[#allocation2 + $0xf0] sm:$0xff] }
 0x59e   : > { %17455 = vmatprep.mubr.msk.f32.mxu0 %vm13612_vm2, %v13595_v14 }
 0x59f   : > { %17456 = vmatmul.mubr.msk.f32.gmra.mrb[126].mxu0 %vm13612_vm2, %v13596_v54  ;;  %vm25885_vm2 = vmmov %vm25881_vm0 }
 0x636   : > { %v17412_v58 = vpop.f32.mrb[96].mxu0 }
 0x637   : > { %v13781_v6 = vadd.f32 %v17412_v58, %v24255_v55  ;;  %v13775_v18 = vpop.f32.mrb[97].mxu0 }
 0x638   : > { %v13776_v30 = vadd.f32 %v24255_v55, %v13775_v18 }
 0x639   : > { %v13935_v61 = vmax.f32 %v13781_v6, 0.0 }
 0x63a   : > { %v13934_v44 = vmax.f32 %v13776_v30, 0.0  ;;  %v17415_v4 = vpop.f32.mrb[98].mxu0 }
 0x63b   : > { %13967 = vst.msk [vmem:[%s24262_s20 + $0x8] sm:$0xff] %vm25870_vm6, %v13935_v61  ;;  %v13791_v60 = vadd.f32 %v17415_v4, %v24255_v55  ;;  %v13785_v47 = vpop.f32.mrb[99].mxu0  ;;  %vm25886_vm6 = vmmov %vm25881_vm0 }
 0x63c   : > { %13966 = vst.msk [vmem:[%s24262_s20] sm:$0xff] %vm25871_vm1, %v13934_v44  ;;  %v13786_v13 = vadd.f32 %v24255_v55, %v13785_v47  ;;  %vm25887_vm1 = vmmov %vm25881_vm0 }
 0x63d   : > { %v13937_v8 = vmax.f32 %v13791_v60, 0.0 }
 0x63e   : > { %v13936_v12 = vmax.f32 %v13786_v13, 0.0  ;;  %v17418_v37 = vpop.f32.mrb[100].mxu0 }
 0x63f   : > { %13969 = vst.msk [vmem:[%s24262_s20 + $0x18] sm:$0xff] %vm25872_vm8, %v13937_v8  ;;  %v13801_v2 = vadd.f32 %v17418_v37, %v24255_v55  ;;  %v13795_v11 = vpop.f32.mrb[101].mxu0  ;;  %vm25888_vm8 = vmmov %vm25881_vm0 }
 0x640   : > { %13968 = vst.msk [vmem:[%s24262_s20 + $0x10] sm:$0xff] %vm25873_vm4, %v13936_v12  ;;  %v13796_v42 = vadd.f32 %v24255_v55, %v13795_v11  ;;  %vm25889_vm4 = vmmov %vm25881_vm0 }
 0x641   : > { %v13939_v32 = vmax.f32 %v13801_v2, 0.0 }
 0x642   : > { %v13938_v50 = vmax.f32 %v13796_v42, 0.0  ;;  %v17421_v28 = vpop.f32.mrb[102].mxu0 }
 0x643   : > { %13971 = vst.msk [vmem:[%s24262_s20 + $0x28] sm:$0xff] %vm25874_vm5, %v13939_v32  ;;  %v13811_v5 = vadd.f32 %v17421_v28, %v24255_v55  ;;  %v13805_v1 = vpop.f32.mrb[103].mxu0  ;;  %vm25890_vm5 = vmmov %vm25881_vm0 }
 0x644   : > { %13970 = vst.msk [vmem:[%s24262_s20 + $0x20] sm:$0xff] %vm25875_vm15, %v13938_v50  ;;  %v13806_v19 = vadd.f32 %v24255_v55, %v13805_v1  ;;  %vm25891_vm15 = vmmov %vm25881_vm0 }
 0x645   : > { %v13941_v40 = vmax.f32 %v13811_v5, 0.0 }
 0x646   : > { %v13940_v45 = vmax.f32 %v13806_v19, 0.0  ;;  %v17424_v29 = vpop.f32.mrb[104].mxu0 }
 0x647   : > { %13973 = vst.msk [vmem:[%s24262_s20 + $0x38] sm:$0xff] %vm25876_vm14, %v13941_v40  ;;  %v13821_v49 = vadd.f32 %v17424_v29, %v24255_v55  ;;  %v13815_v39 = vpop.f32.mrb[105].mxu0  ;;  %vm25892_vm14 = vmmov %vm25881_vm0 }
 0x648   : > { %13972 = vst.msk [vmem:[%s24262_s20 + $0x30] sm:$0xff] %vm25877_vm9, %v13940_v45  ;;  %v13816_v36 = vadd.f32 %v24255_v55, %v13815_v39  ;;  %vm25893_vm9 = vmmov %vm25881_vm0 }
 0x649   : > { %v13943_v10 = vmax.f32 %v13821_v49, 0.0 }
 0x64a   : > { %v13942_v48 = vmax.f32 %v13816_v36, 0.0  ;;  %v17427_v41 = vpop.f32.mrb[106].mxu0 }
 0x64b   : > { %13975 = vst.msk [vmem:[%s24262_s20 + $0x48] sm:$0xff] %vm25878_vm11, %v13943_v10  ;;  %v13831_v33 = vadd.f32 %v17427_v41, %v24255_v55  ;;  %v13825_v51 = vpop.f32.mrb[107].mxu0  ;;  %vm25894_vm11 = vmmov %vm25881_vm0 }
 0x64c   : > { %13974 = vst.msk [vmem:[%s24262_s20 + $0x40] sm:$0xff] %vm25879_vm13, %v13942_v48  ;;  %v13826_v26 = vadd.f32 %v24255_v55, %v13825_v51  ;;  %vm25895_vm13 = vmmov %vm25881_vm0 }
 0x64d   : > { %v13945_v62 = vmax.f32 %v13831_v33, 0.0 }
 0x64e   : > { %v13944_v43 = vmax.f32 %v13826_v26, 0.0  ;;  %v17430_v57 = vpop.f32.mrb[108].mxu0 }
 0x64f   : > { %13977 = vst.msk [vmem:[%s24262_s20 + $0x58] sm:$0xff] %vm25880_vm10, %v13945_v62  ;;  %v13841_v16 = vadd.f32 %v17430_v57, %v24255_v55  ;;  %v13835_v22 = vpop.f32.mrb[109].mxu0  ;;  %vm25896_vm10 = vmmov %vm25881_vm0 }
 0x650   : > { %13976 = vst.msk [vmem:[%s24262_s20 + $0x50] sm:$0xff] %vm25881_vm0, %v13944_v43  ;;  %v13836_v0 = vadd.f32 %v24255_v55, %v13835_v22 }
 0x651   : > { %v13947_v17 = vmax.f32 %v13841_v16, 0.0 }
 0x652   : > { %v13946_v24 = vmax.f32 %v13836_v0, 0.0  ;;  %v17433_v38 = vpop.f32.mrb[110].mxu0 }
 0x653   : > { %13979 = vst.msk [vmem:[%s24262_s20 + $0x68] sm:$0xff] %vm25882_vm7, %v13947_v17  ;;  %v13851_v35 = vadd.f32 %v17433_v38, %v24255_v55  ;;  %v13845_v53 = vpop.f32.mrb[111].mxu0  ;;  %vm25897_vm7 = vmmov %vm25881_vm0 }
 0x654   : > { %13978 = vst.msk [vmem:[%s24262_s20 + $0x60] sm:$0xff] %vm25883_vm12, %v13946_v24  ;;  %v13846_v7 = vadd.f32 %v24255_v55, %v13845_v53  ;;  %vm25898_vm12 = vmmov %vm25881_vm0 }
 0x655   : > { %v13949_v34 = vmax.f32 %v13851_v35, 0.0 }
 0x656   : > { %v13948_v56 = vmax.f32 %v13846_v7, 0.0  ;;  %v17436_v63 = vpop.f32.mrb[112].mxu0 }
 0x657   : > { %13981 = vst.msk [vmem:[%s24262_s20 + $0x78] sm:$0xff] %vm25884_vm3, %v13949_v34  ;;  %v13861_v59 = vadd.f32 %v17436_v63, %v24255_v55  ;;  %v13855_v25 = vpop.f32.mrb[113].mxu0  ;;  %vm25899_vm3 = vmmov %vm25881_vm0 }
 0x658   : > { %13980 = vst.msk [vmem:[%s24262_s20 + $0x70] sm:$0xff] %vm25885_vm2, %v13948_v56  ;;  %v13856_v21 = vadd.f32 %v24255_v55, %v13855_v25  ;;  %vm25900_vm2 = vmmov %vm25881_vm0 }
 0x659   : > { %v13951_v46 = vmax.f32 %v13861_v59, 0.0 }
 0x65a   : > { %v13950_v23 = vmax.f32 %v13856_v21, 0.0  ;;  %v17439_v15 = vpop.f32.mrb[114].mxu0 }
 0x65b   : > { %13983 = vst.msk [vmem:[%s24262_s20 + $0x88] sm:$0xff] %vm25886_vm6, %v13951_v46  ;;  %v13871_v3 = vadd.f32 %v17439_v15, %v24255_v55  ;;  %v13865_v52 = vpop.f32.mrb[115].mxu0 }
 0x65c   : > { %13982 = vst.msk [vmem:[%s24262_s20 + $0x80] sm:$0xff] %vm25887_vm1, %v13950_v23  ;;  %v13866_v9 = vadd.f32 %v24255_v55, %v13865_v52 }
 0x65d   : > { %v13953_v20 = vmax.f32 %v13871_v3, 0.0 }
 0x65e   : > { %v13952_v27 = vmax.f32 %v13866_v9, 0.0  ;;  %v17442_v31 = vpop.f32.mrb[116].mxu0 }
 0x65f   : > { %13985 = vst.msk [vmem:[%s24262_s20 + $0x98] sm:$0xff] %vm25888_vm8, %v13953_v20  ;;  %v13881_v14 = vadd.f32 %v17442_v31, %v24255_v55  ;;  %v13875_v54 = vpop.f32.mrb[117].mxu0 }
 0x660   : > { %13984 = vst.msk [vmem:[%s24262_s20 + $0x90] sm:$0xff] %vm25889_vm4, %v13952_v27  ;;  %v13876_v58 = vadd.f32 %v24255_v55, %v13875_v54 }
 0x661   : > { %v13955_v6 = vmax.f32 %v13881_v14, 0.0 }
 0x662   : > { %v13954_v18 = vmax.f32 %v13876_v58, 0.0  ;;  %v17445_v30 = vpop.f32.mrb[118].mxu0 }
 0x663   : > { %13987 = vst.msk [vmem:[%s24262_s20 + $0xa8] sm:$0xff] %vm25890_vm5, %v13955_v6  ;;  %v13891_v61 = vadd.f32 %v17445_v30, %v24255_v55  ;;  %v13885_v44 = vpop.f32.mrb[119].mxu0 }
 0x664   : > { %13986 = vst.msk [vmem:[%s24262_s20 + $0xa0] sm:$0xff] %vm25891_vm15, %v13954_v18  ;;  %v13886_v4 = vadd.f32 %v24255_v55, %v13885_v44 }
 0x665   : > { %v13957_v60 = vmax.f32 %v13891_v61, 0.0 }
 0x666   : > { %v13956_v47 = vmax.f32 %v13886_v4, 0.0  ;;  %v17448_v13 = vpop.f32.mrb[120].mxu0 }
 0x667   : > { %13989 = vst.msk [vmem:[%s24262_s20 + $0xb8] sm:$0xff] %vm25892_vm14, %v13957_v60  ;;  %v13901_v8 = vadd.f32 %v17448_v13, %v24255_v55  ;;  %v13895_v12 = vpop.f32.mrb[121].mxu0 }
 0x668   : > { %13988 = vst.msk [vmem:[%s24262_s20 + $0xb0] sm:$0xff] %vm25893_vm9, %v13956_v47  ;;  %v13896_v37 = vadd.f32 %v24255_v55, %v13895_v12 }
 0x669   : > { %v13959_v2 = vmax.f32 %v13901_v8, 0.0 }
 0x66a   : > { %v13958_v11 = vmax.f32 %v13896_v37, 0.0  ;;  %v17451_v42 = vpop.f32.mrb[122].mxu0 }
 0x66b   : > { %13991 = vst.msk [vmem:[%s24262_s20 + $0xc8] sm:$0xff] %vm25894_vm11, %v13959_v2  ;;  %v13911_v32 = vadd.f32 %v17451_v42, %v24255_v55  ;;  %v13905_v50 = vpop.f32.mrb[123].mxu0 }
 0x66c   : > { %13990 = vst.msk [vmem:[%s24262_s20 + $0xc0] sm:$0xff] %vm25895_vm13, %v13958_v11  ;;  %v13906_v28 = vadd.f32 %v24255_v55, %v13905_v50 }
 0x66d   : > { %v13961_v5 = vmax.f32 %v13911_v32, 0.0 }
 0x66e   : > { %v13960_v1 = vmax.f32 %v13906_v28, 0.0  ;;  %v17454_v19 = vpop.f32.mrb[124].mxu0 }
 0x66f   : > { %13993 = vst.msk [vmem:[%s24262_s20 + $0xd8] sm:$0xff] %vm25896_vm10, %v13961_v5  ;;  %v13921_v40 = vadd.f32 %v17454_v19, %v24255_v55  ;;  %v13915_v45 = vpop.f32.mrb[125].mxu0 }
 0x670   : > { %13992 = vst.msk [vmem:[%s24262_s20 + $0xd0] sm:$0xff] %vm25881_vm0, %v13960_v1  ;;  %v13916_v29 = vadd.f32 %v24255_v55, %v13915_v45 }
 0x671   : > { %v13963_v49 = vmax.f32 %v13921_v40, 0.0 }
 0x672   : > { %v13962_v39 = vmax.f32 %v13916_v29, 0.0  ;;  %v17457_v36 = vpop.f32.mrb[126].mxu0 }
 0x673   : > { %13995 = vst.msk [vmem:[%s24262_s20 + $0xe8] sm:$0xff] %vm25897_vm7, %v13963_v49  ;;  %v13931_v10 = vadd.f32 %v17457_v36, %v24255_v55  ;;  %v13925_v48 = vpop.f32.mrb[127].mxu0 }
 0x674   : > { %13994 = vst.msk [vmem:[%s24262_s20 + $0xe0] sm:$0xff] %vm25898_vm12, %v13962_v39  ;;  %v13926_v41 = vadd.f32 %v24255_v55, %v13925_v48 }
 0x675   : > { %v13965_v33 = vmax.f32 %v13931_v10, 0.0 }
 0x676   : > { %v13964_v51 = vmax.f32 %v13926_v41, 0.0 }
 0x677   : > { %13997 = vst.msk [vmem:[%s24262_s20 + $0xf8] sm:$0xff] %vm25899_vm3, %v13965_v33 }
 0x678   : > { %13996 = vst.msk [vmem:[%s24262_s20 + $0xf0] sm:$0xff] %vm25900_vm2, %v13964_v51 }
 0x679 PF: > { %s22_s21 = sadd.s32 1, %s18395_s21  }
 0x67a   : > { %p19_p4 = scmp.ge.s32.totalorder %s22_s21, 4  }
 0x67c   :  { %21 = sbr.rel (!%p19_p4) target bundleno = 1 (0x1), region = 125 }

</bundles_post_ra>
